<compile_context>
chip_gen: v6e
topology: v6e:2x2x1
jax: 0.10.0
libtpu: 0.0.40
codegen_flags: <defaults>
</compile_context>

<pallas_src>
import jax
import jax.numpy as jnp
from jax.experimental import pallas as pl
from jax.experimental.pallas import tpu as pltpu


# ---------------------------------------------------------------------------
# Fused 3x3 conv (stride 1 or 2, pad 1) + folded BN bias + optional residual
# + ReLU + optional fused global average pool.
# ---------------------------------------------------------------------------
def _make_conv_kernel(Hout, Wout, Cin, Cout, *, stride, relu, has_residual,
                      final_pool):
    n_out = Hout * Wout
    inv = 1.0 / float(n_out)
    n_x = 1 if stride == 1 else 4            # 1 padded plane, or 4 phase planes

    def kernel(*refs):
        x_refs = refs[:n_x]
        w_ref = refs[n_x]
        b_ref = refs[n_x + 1]
        r_ref = refs[n_x + 2] if has_residual else None
        o_ref = refs[-1]

        acc = jnp.zeros((n_out, Cout), jnp.float32)
        if stride == 1:
            # x block: (1, Hout+2, Wout+2, Cin) -- spatially padded input.
            xp = x_refs[0][...].reshape(Hout + 2, Wout + 2, Cin)
            xp = xp.astype(jnp.float32)
            for t in range(9):
                ky, kx = divmod(t, 3)
                patch = xp[ky:ky + Hout, kx:kx + Wout, :].reshape(n_out, Cin)
                acc = acc + jnp.dot(patch, w_ref[t].astype(jnp.float32),
                                    preferred_element_type=jnp.float32)
        else:
            # x blocks: 4 stride-2 phase planes of the padded input, each
            # (1, Hout+1, Wout+1, Cin); tap (ky,kx) reads plane (ky%2, kx%2)
            # at offset (ky//2, kx//2) -> only strided-output work is done.
            planes = [r[...].reshape(Hout + 1, Wout + 1, Cin).astype(jnp.float32)
                      for r in x_refs]
            for t in range(9):
                ky, kx = divmod(t, 3)
                ph = (ky % 2) * 2 + (kx % 2)
                patch = planes[ph][ky // 2:ky // 2 + Hout,
                                   kx // 2:kx // 2 + Wout, :].reshape(n_out, Cin)
                acc = acc + jnp.dot(patch, w_ref[t].astype(jnp.float32),
                                    preferred_element_type=jnp.float32)

        out = acc + b_ref[...]                       # folded BatchNorm bias
        if has_residual:
            out = out + r_ref[...].reshape(n_out, Cout).astype(jnp.float32)
        if relu:
            out = jnp.maximum(out, 0.0)

        if final_pool:
            m = jnp.sum(out, axis=0, keepdims=True) * inv
            o_ref[...] = m.reshape(1, 1, Cout).astype(o_ref.dtype)
        else:
            o_ref[...] = out.reshape(1, Hout, Wout, Cout).astype(o_ref.dtype)

    return kernel


def conv3x3_bn_act(x, w, scale, bias, *, stride=1, residual=None, relu=True,
                   final_pool=False):
    """x: (N, H, W, Cin) NHWC; w: (3, 3, Cin, Cout) HWIO.

    Returns (N, Hout, Wout, Cout), or (N, Cout) if final_pool (fused GAP).
    """
    N, H, W, Cin = x.shape
    Cout = w.shape[-1]
    assert stride in (1, 2)
    Hout, Wout = H // stride, W // stride
    if residual is not None:
        assert residual.shape == (N, Hout, Wout, Cout), residual.shape

    # Fold BN scale into the conv weights; bias stays separate.
    w = w.astype(jnp.float32) * scale.astype(jnp.float32)[None, None, None, :]
    b2 = bias.reshape(1, Cout).astype(jnp.float32)

    # Pad Cin to a multiple of 8 (sublane alignment of the weight tiles);
    # zero channels / zero weights do not change the result.
    if Cin % 8 != 0:
        pc = 8 - Cin % 8
        x = jnp.pad(x, ((0, 0), (0, 0), (0, 0), (0, pc)))
        w = jnp.pad(w, ((0, 0), (0, 0), (0, pc), (0, 0)))
        Cin += pc

    xp = jnp.pad(x, ((0, 0), (1, 1), (1, 1), (0, 0)))            # spatial pad=1
    w9 = w.reshape(9, Cin, Cout)

    if stride == 1:
        x_args = [xp]
        x_specs = [pl.BlockSpec((1, H + 2, W + 2, Cin),
                                lambda i: (i, 0, 0, 0))]
    else:
        assert H % 2 == 0 and W % 2 == 0
        # Phase decomposition of the padded input: each plane has shape
        # (N, Hout+1, Wout+1, Cin) and contains xp[:, p::2, q::2, :].
        x_args = [xp[:, 0::2, 0::2, :], xp[:, 0::2, 1::2, :],
                  xp[:, 1::2, 0::2, :], xp[:, 1::2, 1::2, :]]
        x_specs = [pl.BlockSpec((1, Hout + 1, Wout + 1, Cin),
                                lambda i: (i, 0, 0, 0)) for _ in range(4)]

    kernel = _make_conv_kernel(Hout, Wout, Cin, Cout, stride=stride,
                               relu=relu, has_residual=residual is not None,
                               final_pool=final_pool)

    in_specs = x_specs + [
        pl.BlockSpec((9, Cin, Cout), lambda i: (0, 0, 0)),   # resident weights
        pl.BlockSpec((1, Cout), lambda i: (0, 0)),           # resident bias
    ]
    args = x_args + [w9, b2]
    if residual is not None:
        in_specs.append(pl.BlockSpec((1, Hout, Wout, Cout),
                                     lambda i: (i, 0, 0, 0)))
        args.append(residual)

    if final_pool:
        out_shape = jax.ShapeDtypeStruct((N, 1, Cout), x.dtype)
        out_spec = pl.BlockSpec((1, 1, Cout), lambda i: (i, 0, 0))
    else:
        out_shape = jax.ShapeDtypeStruct((N, Hout, Wout, Cout), x.dtype)
        out_spec = pl.BlockSpec((1, Hout, Wout, Cout), lambda i: (i, 0, 0, 0))

    out = pl.pallas_call(
        kernel,
        out_shape=out_shape,
        grid=(N,),
        in_specs=in_specs,
        out_specs=out_spec,
        compiler_params=pltpu.CompilerParams(
            dimension_semantics=("parallel",)),
    )(*args)

    if final_pool:
        out = out.reshape(N, Cout)
    return out


# ---------------------------------------------------------------------------
# Parameters (kaiming-normal conv weights, BN folded to per-channel scale/bias)
# ---------------------------------------------------------------------------
def _fold_bn(gamma, beta, mean, var, eps=1e-5):
    scale = gamma * jax.lax.rsqrt(var + eps)
    return scale, beta - mean * scale


def make_params(key, in_chans=16, num_blocks=(1, 1, 1)):
    keys = iter(jax.random.split(key, 5 + 10 * sum(num_blocks)))

    def conv_w(cin, cout):
        std = (2.0 / (cin * 9)) ** 0.5                    # kaiming_normal_
        return std * jax.random.normal(next(keys), (3, 3, cin, cout),
                                       jnp.float32)

    def bn(c):
        gamma = 1.0 + 0.1 * jax.random.normal(next(keys), (c,), jnp.float32)
        beta = 0.1 * jax.random.normal(next(keys), (c,), jnp.float32)
        mean = 0.1 * jax.random.normal(next(keys), (c,), jnp.float32)
        var = 0.5 + jax.random.uniform(next(keys), (c,), jnp.float32)
        return _fold_bn(gamma, beta, mean, var)

    s, b = bn(in_chans)
    params = {"stem": {"w": conv_w(3, in_chans), "scale": s, "bias": b},
              "blocks": []}
    in_planes = in_chans
    for planes, nb, first_stride in [(in_chans, num_blocks[0], 1),
                                     (in_chans * 2, num_blocks[1], 2),
                                     (in_chans * 4, num_blocks[2], 2)]:
        for stride in [first_stride] + [1] * (nb - 1):
            s1, b1 = bn(planes)
            s2, b2 = bn(planes)
            params["blocks"].append({
                "stride": stride, "planes": planes,
                "w1": conv_w(in_planes, planes), "scale1": s1, "bias1": b1,
                "w2": conv_w(planes, planes), "scale2": s2, "bias2": b2,
            })
            in_planes = planes
    return params


# ---------------------------------------------------------------------------
# ResNet_fe forward (stem -> layer1/2/3 of BasicBlocks -> global avg pool)
# ---------------------------------------------------------------------------
def resnet_fe_forward(x_nchw, params):
    x = jnp.transpose(x_nchw, (0, 2, 3, 1))               # NCHW -> NHWC
    blocks = params["blocks"]
    st = params["stem"]
    x = conv3x3_bn_act(x, st["w"], st["scale"], st["bias"], stride=1,
                       final_pool=(len(blocks) == 0))
    for bi, blk in enumerate(blocks):
        stride = blk["stride"]
        out = conv3x3_bn_act(x, blk["w1"], blk["scale1"], blk["bias1"],
                             stride=stride)
        if stride != 1 or x.shape[-1] != blk["planes"]:
            # Option-A shortcut: spatial subsample + zero-pad channels.
            sc = x[:, ::stride, ::stride, :]
            pad_c = blk["planes"] - sc.shape[-1]
            sc = jnp.pad(sc, ((0, 0), (0, 0), (0, 0),
                              (pad_c // 2, pad_c - pad_c // 2)))
        else:
            sc = x
        is_last = bi == len(blocks) - 1
        # conv2 fuses BN + residual add + ReLU (+ global-avg-pool on the last
        # block) into a single kernel.
        x = conv3x3_bn_act(out, blk["w2"], blk["scale2"], blk["bias2"],
                           stride=1, residual=sc, final_pool=is_last)
    return x


# ---------------------------------------------------------------------------
# Pure-JAX reference (lax.conv) for correctness checking
# ---------------------------------------------------------------------------
def _ref_conv(x, w, stride):
    return jax.lax.conv_general_dilated(
        x, w, window_strides=(stride, stride), padding=((1, 1), (1, 1)),
        dimension_numbers=("NHWC", "HWIO", "NHWC"),
        precision=jax.lax.Precision.HIGHEST)


def resnet_fe_reference(x_nchw, params):
    x = jnp.transpose(x_nchw, (0, 2, 3, 1))
    st = params["stem"]
    x = jnp.maximum(_ref_conv(x, st["w"], 1) * st["scale"] + st["bias"], 0.0)
    for blk in params["blocks"]:
        stride = blk["stride"]
        out = jnp.maximum(
            _ref_conv(x, blk["w1"], stride) * blk["scale1"] + blk["bias1"],
            0.0)
        if stride != 1 or x.shape[-1] != blk["planes"]:
            sc = x[:, ::stride, ::stride, :]
            pad_c = blk["planes"] - sc.shape[-1]
            sc = jnp.pad(sc, ((0, 0), (0, 0), (0, 0),
                              (pad_c // 2, pad_c - pad_c // 2)))
        else:
            sc = x
        x = jnp.maximum(
            _ref_conv(out, blk["w2"], 1) * blk["scale2"] + blk["bias2"] + sc,
            0.0)
    return jnp.mean(x, axis=(1, 2))


if __name__ == "__main__":
    key = jax.random.PRNGKey(0)
    k_params, k_x = jax.random.split(key)

    in_chans, num_blocks = 16, (1, 1, 1)
    params = make_params(k_params, in_chans=in_chans, num_blocks=num_blocks)
    x = jax.random.normal(k_x, (2, 3, 16, 16), dtype=jnp.float32)

    fwd = jax.jit(lambda a: resnet_fe_forward(a, params))
    out = jax.block_until_ready(fwd(x))

    ref = resnet_fe_reference(x, params)
    assert out.shape == (2, in_chans * 4), out.shape
    assert jnp.allclose(out, ref, atol=2e-3, rtol=2e-3), float(
        jnp.max(jnp.abs(out - ref)))

    print("KERNEL_OK")
</pallas_src>

<mosaic_0001>
module attributes {stable_mosaic.version = 11 : i64} {
  func.func @kernel(%arg0: i32, %arg1: memref<1x18x18x8xf32, #tpu.memory_space<vmem>>, %arg2: memref<9x8x16xf32, #tpu.memory_space<vmem>>, %arg3: memref<1x16xf32, #tpu.memory_space<vmem>>, %arg4: memref<1x16x16x16xf32, #tpu.memory_space<vmem>>) attributes {dimension_semantics = [#tpu.dimension_semantics<parallel>], iteration_bounds = array<i64: 2>, scalar_prefetch = 0 : i64, scratch_operands = 0 : i64, tpu.core_type = #tpu.core_type<tc>, window_params = [{transform_indices = @transform_0, window_bounds = array<i64: 1, 18, 18, 8>}, {pipeline_mode = #tpu.pipeline_mode<synchronous>, transform_indices = @transform_1, window_bounds = array<i64: 9, 8, 16>}, {pipeline_mode = #tpu.pipeline_mode<synchronous>, transform_indices = @transform_2, window_bounds = array<i64: 1, 16>}, {transform_indices = @transform_3, window_bounds = array<i64: 1, 16, 16, 16>}]} {
    %cst = arith.constant 0.000000e+00 : f32
    %0 = vector.broadcast %cst : f32 to vector<256x16xf32>
    %c0 = arith.constant 0 : index
    %c0_0 = arith.constant 0 : index
    %c0_1 = arith.constant 0 : index
    %c0_2 = arith.constant 0 : index
    %1 = vector.load %arg1[%c0, %c0_0, %c0_1, %c0_2] : memref<1x18x18x8xf32, #tpu.memory_space<vmem>>, vector<1x18x18x8xf32>
    %2 = vector.shape_cast %1 : vector<1x18x18x8xf32> to vector<18x18x8xf32>
    %3 = vector.extract_strided_slice %2 {offsets = [0, 0, 0], sizes = [16, 16, 8], strides = [1, 1, 1]} : vector<18x18x8xf32> to vector<16x16x8xf32>
    %4 = vector.shape_cast %3 : vector<16x16x8xf32> to vector<256x8xf32>
    %c0_3 = arith.constant 0 : index
    %c0_4 = arith.constant 0 : index
    %c0_5 = arith.constant 0 : index
    %5 = vector.load %arg2[%c0_3, %c0_4, %c0_5] : memref<9x8x16xf32, #tpu.memory_space<vmem>>, vector<1x8x16xf32>
    %6 = vector.shape_cast %5 : vector<1x8x16xf32> to vector<8x16xf32>
    %cst_6 = arith.constant dense<0.000000e+00> : vector<256x16xf32>
    %7 = tpu.matmul %4, %6, %cst_6 {dimension_numbers = #tpu.dot_dimension_numbers<[1], [0], [0], [1], [0, 0, 1, 1], [], []>} : vector<256x8xf32>, vector<8x16xf32>, vector<256x16xf32> -> vector<256x16xf32>
    %8 = arith.addf %0, %7 : vector<256x16xf32>
    %9 = vector.extract_strided_slice %2 {offsets = [0, 1, 0], sizes = [16, 16, 8], strides = [1, 1, 1]} : vector<18x18x8xf32> to vector<16x16x8xf32>
    %10 = vector.shape_cast %9 : vector<16x16x8xf32> to vector<256x8xf32>
    %c1 = arith.constant 1 : index
    %c0_7 = arith.constant 0 : index
    %c0_8 = arith.constant 0 : index
    %11 = vector.load %arg2[%c1, %c0_7, %c0_8] : memref<9x8x16xf32, #tpu.memory_space<vmem>>, vector<1x8x16xf32>
    %12 = vector.shape_cast %11 : vector<1x8x16xf32> to vector<8x16xf32>
    %cst_9 = arith.constant dense<0.000000e+00> : vector<256x16xf32>
    %13 = tpu.matmul %10, %12, %cst_9 {dimension_numbers = #tpu.dot_dimension_numbers<[1], [0], [0], [1], [0, 0, 1, 1], [], []>} : vector<256x8xf32>, vector<8x16xf32>, vector<256x16xf32> -> vector<256x16xf32>
    %14 = arith.addf %8, %13 : vector<256x16xf32>
    %15 = vector.extract_strided_slice %2 {offsets = [0, 2, 0], sizes = [16, 16, 8], strides = [1, 1, 1]} : vector<18x18x8xf32> to vector<16x16x8xf32>
    %16 = vector.shape_cast %15 : vector<16x16x8xf32> to vector<256x8xf32>
    %c2 = arith.constant 2 : index
    %c0_10 = arith.constant 0 : index
    %c0_11 = arith.constant 0 : index
    %17 = vector.load %arg2[%c2, %c0_10, %c0_11] : memref<9x8x16xf32, #tpu.memory_space<vmem>>, vector<1x8x16xf32>
    %18 = vector.shape_cast %17 : vector<1x8x16xf32> to vector<8x16xf32>
    %cst_12 = arith.constant dense<0.000000e+00> : vector<256x16xf32>
    %19 = tpu.matmul %16, %18, %cst_12 {dimension_numbers = #tpu.dot_dimension_numbers<[1], [0], [0], [1], [0, 0, 1, 1], [], []>} : vector<256x8xf32>, vector<8x16xf32>, vector<256x16xf32> -> vector<256x16xf32>
    %20 = arith.addf %14, %19 : vector<256x16xf32>
    %21 = vector.extract_strided_slice %2 {offsets = [1, 0, 0], sizes = [16, 16, 8], strides = [1, 1, 1]} : vector<18x18x8xf32> to vector<16x16x8xf32>
    %22 = vector.shape_cast %21 : vector<16x16x8xf32> to vector<256x8xf32>
    %c3 = arith.constant 3 : index
    %c0_13 = arith.constant 0 : index
    %c0_14 = arith.constant 0 : index
    %23 = vector.load %arg2[%c3, %c0_13, %c0_14] : memref<9x8x16xf32, #tpu.memory_space<vmem>>, vector<1x8x16xf32>
    %24 = vector.shape_cast %23 : vector<1x8x16xf32> to vector<8x16xf32>
    %cst_15 = arith.constant dense<0.000000e+00> : vector<256x16xf32>
    %25 = tpu.matmul %22, %24, %cst_15 {dimension_numbers = #tpu.dot_dimension_numbers<[1], [0], [0], [1], [0, 0, 1, 1], [], []>} : vector<256x8xf32>, vector<8x16xf32>, vector<256x16xf32> -> vector<256x16xf32>
    %26 = arith.addf %20, %25 : vector<256x16xf32>
    %27 = vector.extract_strided_slice %2 {offsets = [1, 1, 0], sizes = [16, 16, 8], strides = [1, 1, 1]} : vector<18x18x8xf32> to vector<16x16x8xf32>
    %28 = vector.shape_cast %27 : vector<16x16x8xf32> to vector<256x8xf32>
    %c4 = arith.constant 4 : index
    %c0_16 = arith.constant 0 : index
    %c0_17 = arith.constant 0 : index
    %29 = vector.load %arg2[%c4, %c0_16, %c0_17] : memref<9x8x16xf32, #tpu.memory_space<vmem>>, vector<1x8x16xf32>
    %30 = vector.shape_cast %29 : vector<1x8x16xf32> to vector<8x16xf32>
    %cst_18 = arith.constant dense<0.000000e+00> : vector<256x16xf32>
    %31 = tpu.matmul %28, %30, %cst_18 {dimension_numbers = #tpu.dot_dimension_numbers<[1], [0], [0], [1], [0, 0, 1, 1], [], []>} : vector<256x8xf32>, vector<8x16xf32>, vector<256x16xf32> -> vector<256x16xf32>
    %32 = arith.addf %26, %31 : vector<256x16xf32>
    %33 = vector.extract_strided_slice %2 {offsets = [1, 2, 0], sizes = [16, 16, 8], strides = [1, 1, 1]} : vector<18x18x8xf32> to vector<16x16x8xf32>
    %34 = vector.shape_cast %33 : vector<16x16x8xf32> to vector<256x8xf32>
    %c5 = arith.constant 5 : index
    %c0_19 = arith.constant 0 : index
    %c0_20 = arith.constant 0 : index
    %35 = vector.load %arg2[%c5, %c0_19, %c0_20] : memref<9x8x16xf32, #tpu.memory_space<vmem>>, vector<1x8x16xf32>
    %36 = vector.shape_cast %35 : vector<1x8x16xf32> to vector<8x16xf32>
    %cst_21 = arith.constant dense<0.000000e+00> : vector<256x16xf32>
    %37 = tpu.matmul %34, %36, %cst_21 {dimension_numbers = #tpu.dot_dimension_numbers<[1], [0], [0], [1], [0, 0, 1, 1], [], []>} : vector<256x8xf32>, vector<8x16xf32>, vector<256x16xf32> -> vector<256x16xf32>
    %38 = arith.addf %32, %37 : vector<256x16xf32>
    %39 = vector.extract_strided_slice %2 {offsets = [2, 0, 0], sizes = [16, 16, 8], strides = [1, 1, 1]} : vector<18x18x8xf32> to vector<16x16x8xf32>
    %40 = vector.shape_cast %39 : vector<16x16x8xf32> to vector<256x8xf32>
    %c6 = arith.constant 6 : index
    %c0_22 = arith.constant 0 : index
    %c0_23 = arith.constant 0 : index
    %41 = vector.load %arg2[%c6, %c0_22, %c0_23] : memref<9x8x16xf32, #tpu.memory_space<vmem>>, vector<1x8x16xf32>
    %42 = vector.shape_cast %41 : vector<1x8x16xf32> to vector<8x16xf32>
    %cst_24 = arith.constant dense<0.000000e+00> : vector<256x16xf32>
    %43 = tpu.matmul %40, %42, %cst_24 {dimension_numbers = #tpu.dot_dimension_numbers<[1], [0], [0], [1], [0, 0, 1, 1], [], []>} : vector<256x8xf32>, vector<8x16xf32>, vector<256x16xf32> -> vector<256x16xf32>
    %44 = arith.addf %38, %43 : vector<256x16xf32>
    %45 = vector.extract_strided_slice %2 {offsets = [2, 1, 0], sizes = [16, 16, 8], strides = [1, 1, 1]} : vector<18x18x8xf32> to vector<16x16x8xf32>
    %46 = vector.shape_cast %45 : vector<16x16x8xf32> to vector<256x8xf32>
    %c7 = arith.constant 7 : index
    %c0_25 = arith.constant 0 : index
    %c0_26 = arith.constant 0 : index
    %47 = vector.load %arg2[%c7, %c0_25, %c0_26] : memref<9x8x16xf32, #tpu.memory_space<vmem>>, vector<1x8x16xf32>
    %48 = vector.shape_cast %47 : vector<1x8x16xf32> to vector<8x16xf32>
    %cst_27 = arith.constant dense<0.000000e+00> : vector<256x16xf32>
    %49 = tpu.matmul %46, %48, %cst_27 {dimension_numbers = #tpu.dot_dimension_numbers<[1], [0], [0], [1], [0, 0, 1, 1], [], []>} : vector<256x8xf32>, vector<8x16xf32>, vector<256x16xf32> -> vector<256x16xf32>
    %50 = arith.addf %44, %49 : vector<256x16xf32>
    %51 = vector.extract_strided_slice %2 {offsets = [2, 2, 0], sizes = [16, 16, 8], strides = [1, 1, 1]} : vector<18x18x8xf32> to vector<16x16x8xf32>
    %52 = vector.shape_cast %51 : vector<16x16x8xf32> to vector<256x8xf32>
    %c8 = arith.constant 8 : index
    %c0_28 = arith.constant 0 : index
    %c0_29 = arith.constant 0 : index
    %53 = vector.load %arg2[%c8, %c0_28, %c0_29] : memref<9x8x16xf32, #tpu.memory_space<vmem>>, vector<1x8x16xf32>
    %54 = vector.shape_cast %53 : vector<1x8x16xf32> to vector<8x16xf32>
    %cst_30 = arith.constant dense<0.000000e+00> : vector<256x16xf32>
    %55 = tpu.matmul %52, %54, %cst_30 {dimension_numbers = #tpu.dot_dimension_numbers<[1], [0], [0], [1], [0, 0, 1, 1], [], []>} : vector<256x8xf32>, vector<8x16xf32>, vector<256x16xf32> -> vector<256x16xf32>
    %56 = arith.addf %50, %55 : vector<256x16xf32>
    %c0_31 = arith.constant 0 : index
    %c0_32 = arith.constant 0 : index
    %57 = vector.load %arg3[%c0_31, %c0_32] : memref<1x16xf32, #tpu.memory_space<vmem>>, vector<1x16xf32>
    %58 = vector.broadcast %57 : vector<1x16xf32> to vector<256x16xf32>
    %59 = arith.addf %56, %58 : vector<256x16xf32>
    %cst_33 = arith.constant 0.000000e+00 : f32
    %60 = vector.broadcast %cst_33 : f32 to vector<256x16xf32>
    %61 = arith.maximumf %59, %60 : vector<256x16xf32>
    %62 = vector.shape_cast %61 : vector<256x16xf32> to vector<1x16x16x16xf32>
    %c0_34 = arith.constant 0 : index
    %c0_35 = arith.constant 0 : index
    %c0_36 = arith.constant 0 : index
    %c0_37 = arith.constant 0 : index
    %63 = vector.load %arg4[%c0_34, %c0_35, %c0_36, %c0_37] : memref<1x16x16x16xf32, #tpu.memory_space<vmem>>, vector<1x16x16x16xf32>
    tpu.vector_store %arg4[%c0_34, %c0_35, %c0_36, %c0_37], %62 {strides = array<i32>} : memref<1x16x16x16xf32, #tpu.memory_space<vmem>>, vector<1x16x16x16xf32>,
    return
  }
  func.func @transform_0(%arg0: i32) -> (i32, i32, i32, i32) {
    %c0_i32 = arith.constant 0 : i32
    %c0_i32_0 = arith.constant 0 : i32
    %c0_i32_1 = arith.constant 0 : i32
    %c0_i32_2 = arith.constant 0 : i32
    return %arg0, %c0_i32, %c0_i32_0, %c0_i32_1 : i32, i32, i32, i32
  }
  func.func @transform_1(%arg0: i32) -> (i32, i32, i32) {
    %c0_i32 = arith.constant 0 : i32
    %c0_i32_0 = arith.constant 0 : i32
    %c0_i32_1 = arith.constant 0 : i32
    %c0_i32_2 = arith.constant 0 : i32
    return %c0_i32, %c0_i32_0, %c0_i32_1 : i32, i32, i32
  }
  func.func @transform_2(%arg0: i32) -> (i32, i32) {
    %c0_i32 = arith.constant 0 : i32
    %c0_i32_0 = arith.constant 0 : i32
    %c0_i32_1 = arith.constant 0 : i32
    return %c0_i32, %c0_i32_0 : i32, i32
  }
  func.func @transform_3(%arg0: i32) -> (i32, i32, i32, i32) {
    %c0_i32 = arith.constant 0 : i32
    %c0_i32_0 = arith.constant 0 : i32
    %c0_i32_1 = arith.constant 0 : i32
    %c0_i32_2 = arith.constant 0 : i32
    return %arg0, %c0_i32, %c0_i32_0, %c0_i32_1 : i32, i32, i32, i32
  }
}

module attributes {stable_mosaic.version = 11 : i64} {
  func.func @kernel(%arg0: i32, %arg1: memref<1x18x18x16xf32, #tpu.memory_space<vmem>>, %arg2: memref<9x16x16xf32, #tpu.memory_space<vmem>>, %arg3: memref<1x16xf32, #tpu.memory_space<vmem>>, %arg4: memref<1x16x16x16xf32, #tpu.memory_space<vmem>>) attributes {dimension_semantics = [#tpu.dimension_semantics<parallel>], iteration_bounds = array<i64: 2>, scalar_prefetch = 0 : i64, scratch_operands = 0 : i64, tpu.core_type = #tpu.core_type<tc>, window_params = [{transform_indices = @transform_0, window_bounds = array<i64: 1, 18, 18, 16>}, {pipeline_mode = #tpu.pipeline_mode<synchronous>, transform_indices = @transform_1, window_bounds = array<i64: 9, 16, 16>}, {pipeline_mode = #tpu.pipeline_mode<synchronous>, transform_indices = @transform_2, window_bounds = array<i64: 1, 16>}, {transform_indices = @transform_3, window_bounds = array<i64: 1, 16, 16, 16>}]} {
    %cst = arith.constant 0.000000e+00 : f32
    %0 = vector.broadcast %cst : f32 to vector<256x16xf32>
    %c0 = arith.constant 0 : index
    %c0_0 = arith.constant 0 : index
    %c0_1 = arith.constant 0 : index
    %c0_2 = arith.constant 0 : index
    %1 = vector.load %arg1[%c0, %c0_0, %c0_1, %c0_2] : memref<1x18x18x16xf32, #tpu.memory_space<vmem>>, vector<1x18x18x16xf32>
    %2 = vector.shape_cast %1 : vector<1x18x18x16xf32> to vector<18x18x16xf32>
    %3 = vector.extract_strided_slice %2 {offsets = [0, 0, 0], sizes = [16, 16, 16], strides = [1, 1, 1]} : vector<18x18x16xf32> to vector<16x16x16xf32>
    %4 = vector.shape_cast %3 : vector<16x16x16xf32> to vector<256x16xf32>
    %c0_3 = arith.constant 0 : index
    %c0_4 = arith.constant 0 : index
    %c0_5 = arith.constant 0 : index
    %5 = vector.load %arg2[%c0_3, %c0_4, %c0_5] : memref<9x16x16xf32, #tpu.memory_space<vmem>>, vector<1x16x16xf32>
    %6 = vector.shape_cast %5 : vector<1x16x16xf32> to vector<16x16xf32>
    %cst_6 = arith.constant dense<0.000000e+00> : vector<256x16xf32>
    %7 = tpu.matmul %4, %6, %cst_6 {dimension_numbers = #tpu.dot_dimension_numbers<[1], [0], [0], [1], [0, 0, 1, 1], [], []>} : vector<256x16xf32>, vector<16x16xf32>, vector<256x16xf32> -> vector<256x16xf32>
    %8 = arith.addf %0, %7 : vector<256x16xf32>
    %9 = vector.extract_strided_slice %2 {offsets = [0, 1, 0], sizes = [16, 16, 16], strides = [1, 1, 1]} : vector<18x18x16xf32> to vector<16x16x16xf32>
    %10 = vector.shape_cast %9 : vector<16x16x16xf32> to vector<256x16xf32>
    %c1 = arith.constant 1 : index
    %c0_7 = arith.constant 0 : index
    %c0_8 = arith.constant 0 : index
    %11 = vector.load %arg2[%c1, %c0_7, %c0_8] : memref<9x16x16xf32, #tpu.memory_space<vmem>>, vector<1x16x16xf32>
    %12 = vector.shape_cast %11 : vector<1x16x16xf32> to vector<16x16xf32>
    %cst_9 = arith.constant dense<0.000000e+00> : vector<256x16xf32>
    %13 = tpu.matmul %10, %12, %cst_9 {dimension_numbers = #tpu.dot_dimension_numbers<[1], [0], [0], [1], [0, 0, 1, 1], [], []>} : vector<256x16xf32>, vector<16x16xf32>, vector<256x16xf32> -> vector<256x16xf32>
    %14 = arith.addf %8, %13 : vector<256x16xf32>
    %15 = vector.extract_strided_slice %2 {offsets = [0, 2, 0], sizes = [16, 16, 16], strides = [1, 1, 1]} : vector<18x18x16xf32> to vector<16x16x16xf32>
    %16 = vector.shape_cast %15 : vector<16x16x16xf32> to vector<256x16xf32>
    %c2 = arith.constant 2 : index
    %c0_10 = arith.constant 0 : index
    %c0_11 = arith.constant 0 : index
    %17 = vector.load %arg2[%c2, %c0_10, %c0_11] : memref<9x16x16xf32, #tpu.memory_space<vmem>>, vector<1x16x16xf32>
    %18 = vector.shape_cast %17 : vector<1x16x16xf32> to vector<16x16xf32>
    %cst_12 = arith.constant dense<0.000000e+00> : vector<256x16xf32>
    %19 = tpu.matmul %16, %18, %cst_12 {dimension_numbers = #tpu.dot_dimension_numbers<[1], [0], [0], [1], [0, 0, 1, 1], [], []>} : vector<256x16xf32>, vector<16x16xf32>, vector<256x16xf32> -> vector<256x16xf32>
    %20 = arith.addf %14, %19 : vector<256x16xf32>
    %21 = vector.extract_strided_slice %2 {offsets = [1, 0, 0], sizes = [16, 16, 16], strides = [1, 1, 1]} : vector<18x18x16xf32> to vector<16x16x16xf32>
    %22 = vector.shape_cast %21 : vector<16x16x16xf32> to vector<256x16xf32>
    %c3 = arith.constant 3 : index
    %c0_13 = arith.constant 0 : index
    %c0_14 = arith.constant 0 : index
    %23 = vector.load %arg2[%c3, %c0_13, %c0_14] : memref<9x16x16xf32, #tpu.memory_space<vmem>>, vector<1x16x16xf32>
    %24 = vector.shape_cast %23 : vector<1x16x16xf32> to vector<16x16xf32>
    %cst_15 = arith.constant dense<0.000000e+00> : vector<256x16xf32>
    %25 = tpu.matmul %22, %24, %cst_15 {dimension_numbers = #tpu.dot_dimension_numbers<[1], [0], [0], [1], [0, 0, 1, 1], [], []>} : vector<256x16xf32>, vector<16x16xf32>, vector<256x16xf32> -> vector<256x16xf32>
    %26 = arith.addf %20, %25 : vector<256x16xf32>
    %27 = vector.extract_strided_slice %2 {offsets = [1, 1, 0], sizes = [16, 16, 16], strides = [1, 1, 1]} : vector<18x18x16xf32> to vector<16x16x16xf32>
    %28 = vector.shape_cast %27 : vector<16x16x16xf32> to vector<256x16xf32>
    %c4 = arith.constant 4 : index
    %c0_16 = arith.constant 0 : index
    %c0_17 = arith.constant 0 : index
    %29 = vector.load %arg2[%c4, %c0_16, %c0_17] : memref<9x16x16xf32, #tpu.memory_space<vmem>>, vector<1x16x16xf32>
    %30 = vector.shape_cast %29 : vector<1x16x16xf32> to vector<16x16xf32>
    %cst_18 = arith.constant dense<0.000000e+00> : vector<256x16xf32>
    %31 = tpu.matmul %28, %30, %cst_18 {dimension_numbers = #tpu.dot_dimension_numbers<[1], [0], [0], [1], [0, 0, 1, 1], [], []>} : vector<256x16xf32>, vector<16x16xf32>, vector<256x16xf32> -> vector<256x16xf32>
    %32 = arith.addf %26, %31 : vector<256x16xf32>
    %33 = vector.extract_strided_slice %2 {offsets = [1, 2, 0], sizes = [16, 16, 16], strides = [1, 1, 1]} : vector<18x18x16xf32> to vector<16x16x16xf32>
    %34 = vector.shape_cast %33 : vector<16x16x16xf32> to vector<256x16xf32>
    %c5 = arith.constant 5 : index
    %c0_19 = arith.constant 0 : index
    %c0_20 = arith.constant 0 : index
    %35 = vector.load %arg2[%c5, %c0_19, %c0_20] : memref<9x16x16xf32, #tpu.memory_space<vmem>>, vector<1x16x16xf32>
    %36 = vector.shape_cast %35 : vector<1x16x16xf32> to vector<16x16xf32>
    %cst_21 = arith.constant dense<0.000000e+00> : vector<256x16xf32>
    %37 = tpu.matmul %34, %36, %cst_21 {dimension_numbers = #tpu.dot_dimension_numbers<[1], [0], [0], [1], [0, 0, 1, 1], [], []>} : vector<256x16xf32>, vector<16x16xf32>, vector<256x16xf32> -> vector<256x16xf32>
    %38 = arith.addf %32, %37 : vector<256x16xf32>
    %39 = vector.extract_strided_slice %2 {offsets = [2, 0, 0], sizes = [16, 16, 16], strides = [1, 1, 1]} : vector<18x18x16xf32> to vector<16x16x16xf32>
    %40 = vector.shape_cast %39 : vector<16x16x16xf32> to vector<256x16xf32>
    %c6 = arith.constant 6 : index
    %c0_22 = arith.constant 0 : index
    %c0_23 = arith.constant 0 : index
    %41 = vector.load %arg2[%c6, %c0_22, %c0_23] : memref<9x16x16xf32, #tpu.memory_space<vmem>>, vector<1x16x16xf32>
    %42 = vector.shape_cast %41 : vector<1x16x16xf32> to vector<16x16xf32>
    %cst_24 = arith.constant dense<0.000000e+00> : vector<256x16xf32>
    %43 = tpu.matmul %40, %42, %cst_24 {dimension_numbers = #tpu.dot_dimension_numbers<[1], [0], [0], [1], [0, 0, 1, 1], [], []>} : vector<256x16xf32>, vector<16x16xf32>, vector<256x16xf32> -> vector<256x16xf32>
    %44 = arith.addf %38, %43 : vector<256x16xf32>
    %45 = vector.extract_strided_slice %2 {offsets = [2, 1, 0], sizes = [16, 16, 16], strides = [1, 1, 1]} : vector<18x18x16xf32> to vector<16x16x16xf32>
    %46 = vector.shape_cast %45 : vector<16x16x16xf32> to vector<256x16xf32>
    %c7 = arith.constant 7 : index
    %c0_25 = arith.constant 0 : index
    %c0_26 = arith.constant 0 : index
    %47 = vector.load %arg2[%c7, %c0_25, %c0_26] : memref<9x16x16xf32, #tpu.memory_space<vmem>>, vector<1x16x16xf32>
    %48 = vector.shape_cast %47 : vector<1x16x16xf32> to vector<16x16xf32>
    %cst_27 = arith.constant dense<0.000000e+00> : vector<256x16xf32>
    %49 = tpu.matmul %46, %48, %cst_27 {dimension_numbers = #tpu.dot_dimension_numbers<[1], [0], [0], [1], [0, 0, 1, 1], [], []>} : vector<256x16xf32>, vector<16x16xf32>, vector<256x16xf32> -> vector<256x16xf32>
    %50 = arith.addf %44, %49 : vector<256x16xf32>
    %51 = vector.extract_strided_slice %2 {offsets = [2, 2, 0], sizes = [16, 16, 16], strides = [1, 1, 1]} : vector<18x18x16xf32> to vector<16x16x16xf32>
    %52 = vector.shape_cast %51 : vector<16x16x16xf32> to vector<256x16xf32>
    %c8 = arith.constant 8 : index
    %c0_28 = arith.constant 0 : index
    %c0_29 = arith.constant 0 : index
    %53 = vector.load %arg2[%c8, %c0_28, %c0_29] : memref<9x16x16xf32, #tpu.memory_space<vmem>>, vector<1x16x16xf32>
    %54 = vector.shape_cast %53 : vector<1x16x16xf32> to vector<16x16xf32>
    %cst_30 = arith.constant dense<0.000000e+00> : vector<256x16xf32>
    %55 = tpu.matmul %52, %54, %cst_30 {dimension_numbers = #tpu.dot_dimension_numbers<[1], [0], [0], [1], [0, 0, 1, 1], [], []>} : vector<256x16xf32>, vector<16x16xf32>, vector<256x16xf32> -> vector<256x16xf32>
    %56 = arith.addf %50, %55 : vector<256x16xf32>
    %c0_31 = arith.constant 0 : index
    %c0_32 = arith.constant 0 : index
    %57 = vector.load %arg3[%c0_31, %c0_32] : memref<1x16xf32, #tpu.memory_space<vmem>>, vector<1x16xf32>
    %58 = vector.broadcast %57 : vector<1x16xf32> to vector<256x16xf32>
    %59 = arith.addf %56, %58 : vector<256x16xf32>
    %cst_33 = arith.constant 0.000000e+00 : f32
    %60 = vector.broadcast %cst_33 : f32 to vector<256x16xf32>
    %61 = arith.maximumf %59, %60 : vector<256x16xf32>
    %62 = vector.shape_cast %61 : vector<256x16xf32> to vector<1x16x16x16xf32>
    %c0_34 = arith.constant 0 : index
    %c0_35 = arith.constant 0 : index
    %c0_36 = arith.constant 0 : index
    %c0_37 = arith.constant 0 : index
    %63 = vector.load %arg4[%c0_34, %c0_35, %c0_36, %c0_37] : memref<1x16x16x16xf32, #tpu.memory_space<vmem>>, vector<1x16x16x16xf32>
    tpu.vector_store %arg4[%c0_34, %c0_35, %c0_36, %c0_37], %62 {strides = array<i32>} : memref<1x16x16x16xf32, #tpu.memory_space<vmem>>, vector<1x16x16x16xf32>,
    return
  }
  func.func @transform_0(%arg0: i32) -> (i32, i32, i32, i32) {
    %c0_i32 = arith.constant 0 : i32
    %c0_i32_0 = arith.constant 0 : i32
    %c0_i32_1 = arith.constant 0 : i32
    %c0_i32_2 = arith.constant 0 : i32
    return %arg0, %c0_i32, %c0_i32_0, %c0_i32_1 : i32, i32, i32, i32
  }
  func.func @transform_1(%arg0: i32) -> (i32, i32, i32) {
    %c0_i32 = arith.constant 0 : i32
    %c0_i32_0 = arith.constant 0 : i32
    %c0_i32_1 = arith.constant 0 : i32
    %c0_i32_2 = arith.constant 0 : i32
    return %c0_i32, %c0_i32_0, %c0_i32_1 : i32, i32, i32
  }
  func.func @transform_2(%arg0: i32) -> (i32, i32) {
    %c0_i32 = arith.constant 0 : i32
    %c0_i32_0 = arith.constant 0 : i32
    %c0_i32_1 = arith.constant 0 : i32
    return %c0_i32, %c0_i32_0 : i32, i32
  }
  func.func @transform_3(%arg0: i32) -> (i32, i32, i32, i32) {
    %c0_i32 = arith.constant 0 : i32
    %c0_i32_0 = arith.constant 0 : i32
    %c0_i32_1 = arith.constant 0 : i32
    %c0_i32_2 = arith.constant 0 : i32
    return %arg0, %c0_i32, %c0_i32_0, %c0_i32_1 : i32, i32, i32, i32
  }
}

module attributes {stable_mosaic.version = 11 : i64} {
  func.func @kernel(%arg0: i32, %arg1: memref<1x18x18x16xf32, #tpu.memory_space<vmem>>, %arg2: memref<9x16x16xf32, #tpu.memory_space<vmem>>, %arg3: memref<1x16xf32, #tpu.memory_space<vmem>>, %arg4: memref<1x16x16x16xf32, #tpu.memory_space<vmem>>, %arg5: memref<1x16x16x16xf32, #tpu.memory_space<vmem>>) attributes {dimension_semantics = [#tpu.dimension_semantics<parallel>], iteration_bounds = array<i64: 2>, scalar_prefetch = 0 : i64, scratch_operands = 0 : i64, tpu.core_type = #tpu.core_type<tc>, window_params = [{transform_indices = @transform_0, window_bounds = array<i64: 1, 18, 18, 16>}, {pipeline_mode = #tpu.pipeline_mode<synchronous>, transform_indices = @transform_1, window_bounds = array<i64: 9, 16, 16>}, {pipeline_mode = #tpu.pipeline_mode<synchronous>, transform_indices = @transform_2, window_bounds = array<i64: 1, 16>}, {transform_indices = @transform_3, window_bounds = array<i64: 1, 16, 16, 16>}, {transform_indices = @transform_4, window_bounds = array<i64: 1, 16, 16, 16>}]} {
    %cst = arith.constant 0.000000e+00 : f32
    %0 = vector.broadcast %cst : f32 to vector<256x16xf32>
    %c0 = arith.constant 0 : index
    %c0_0 = arith.constant 0 : index
    %c0_1 = arith.constant 0 : index
    %c0_2 = arith.constant 0 : index
    %1 = vector.load %arg1[%c0, %c0_0, %c0_1, %c0_2] : memref<1x18x18x16xf32, #tpu.memory_space<vmem>>, vector<1x18x18x16xf32>
    %2 = vector.shape_cast %1 : vector<1x18x18x16xf32> to vector<18x18x16xf32>
    %3 = vector.extract_strided_slice %2 {offsets = [0, 0, 0], sizes = [16, 16, 16], strides = [1, 1, 1]} : vector<18x18x16xf32> to vector<16x16x16xf32>
    %4 = vector.shape_cast %3 : vector<16x16x16xf32> to vector<256x16xf32>
    %c0_3 = arith.constant 0 : index
    %c0_4 = arith.constant 0 : index
    %c0_5 = arith.constant 0 : index
    %5 = vector.load %arg2[%c0_3, %c0_4, %c0_5] : memref<9x16x16xf32, #tpu.memory_space<vmem>>, vector<1x16x16xf32>
    %6 = vector.shape_cast %5 : vector<1x16x16xf32> to vector<16x16xf32>
    %cst_6 = arith.constant dense<0.000000e+00> : vector<256x16xf32>
    %7 = tpu.matmul %4, %6, %cst_6 {dimension_numbers = #tpu.dot_dimension_numbers<[1], [0], [0], [1], [0, 0, 1, 1], [], []>} : vector<256x16xf32>, vector<16x16xf32>, vector<256x16xf32> -> vector<256x16xf32>
    %8 = arith.addf %0, %7 : vector<256x16xf32>
    %9 = vector.extract_strided_slice %2 {offsets = [0, 1, 0], sizes = [16, 16, 16], strides = [1, 1, 1]} : vector<18x18x16xf32> to vector<16x16x16xf32>
    %10 = vector.shape_cast %9 : vector<16x16x16xf32> to vector<256x16xf32>
    %c1 = arith.constant 1 : index
    %c0_7 = arith.constant 0 : index
    %c0_8 = arith.constant 0 : index
    %11 = vector.load %arg2[%c1, %c0_7, %c0_8] : memref<9x16x16xf32, #tpu.memory_space<vmem>>, vector<1x16x16xf32>
    %12 = vector.shape_cast %11 : vector<1x16x16xf32> to vector<16x16xf32>
    %cst_9 = arith.constant dense<0.000000e+00> : vector<256x16xf32>
    %13 = tpu.matmul %10, %12, %cst_9 {dimension_numbers = #tpu.dot_dimension_numbers<[1], [0], [0], [1], [0, 0, 1, 1], [], []>} : vector<256x16xf32>, vector<16x16xf32>, vector<256x16xf32> -> vector<256x16xf32>
    %14 = arith.addf %8, %13 : vector<256x16xf32>
    %15 = vector.extract_strided_slice %2 {offsets = [0, 2, 0], sizes = [16, 16, 16], strides = [1, 1, 1]} : vector<18x18x16xf32> to vector<16x16x16xf32>
    %16 = vector.shape_cast %15 : vector<16x16x16xf32> to vector<256x16xf32>
    %c2 = arith.constant 2 : index
    %c0_10 = arith.constant 0 : index
    %c0_11 = arith.constant 0 : index
    %17 = vector.load %arg2[%c2, %c0_10, %c0_11] : memref<9x16x16xf32, #tpu.memory_space<vmem>>, vector<1x16x16xf32>
    %18 = vector.shape_cast %17 : vector<1x16x16xf32> to vector<16x16xf32>
    %cst_12 = arith.constant dense<0.000000e+00> : vector<256x16xf32>
    %19 = tpu.matmul %16, %18, %cst_12 {dimension_numbers = #tpu.dot_dimension_numbers<[1], [0], [0], [1], [0, 0, 1, 1], [], []>} : vector<256x16xf32>, vector<16x16xf32>, vector<256x16xf32> -> vector<256x16xf32>
    %20 = arith.addf %14, %19 : vector<256x16xf32>
    %21 = vector.extract_strided_slice %2 {offsets = [1, 0, 0], sizes = [16, 16, 16], strides = [1, 1, 1]} : vector<18x18x16xf32> to vector<16x16x16xf32>
    %22 = vector.shape_cast %21 : vector<16x16x16xf32> to vector<256x16xf32>
    %c3 = arith.constant 3 : index
    %c0_13 = arith.constant 0 : index
    %c0_14 = arith.constant 0 : index
    %23 = vector.load %arg2[%c3, %c0_13, %c0_14] : memref<9x16x16xf32, #tpu.memory_space<vmem>>, vector<1x16x16xf32>
    %24 = vector.shape_cast %23 : vector<1x16x16xf32> to vector<16x16xf32>
    %cst_15 = arith.constant dense<0.000000e+00> : vector<256x16xf32>
    %25 = tpu.matmul %22, %24, %cst_15 {dimension_numbers = #tpu.dot_dimension_numbers<[1], [0], [0], [1], [0, 0, 1, 1], [], []>} : vector<256x16xf32>, vector<16x16xf32>, vector<256x16xf32> -> vector<256x16xf32>
    %26 = arith.addf %20, %25 : vector<256x16xf32>
    %27 = vector.extract_strided_slice %2 {offsets = [1, 1, 0], sizes = [16, 16, 16], strides = [1, 1, 1]} : vector<18x18x16xf32> to vector<16x16x16xf32>
    %28 = vector.shape_cast %27 : vector<16x16x16xf32> to vector<256x16xf32>
    %c4 = arith.constant 4 : index
    %c0_16 = arith.constant 0 : index
    %c0_17 = arith.constant 0 : index
    %29 = vector.load %arg2[%c4, %c0_16, %c0_17] : memref<9x16x16xf32, #tpu.memory_space<vmem>>, vector<1x16x16xf32>
    %30 = vector.shape_cast %29 : vector<1x16x16xf32> to vector<16x16xf32>
    %cst_18 = arith.constant dense<0.000000e+00> : vector<256x16xf32>
    %31 = tpu.matmul %28, %30, %cst_18 {dimension_numbers = #tpu.dot_dimension_numbers<[1], [0], [0], [1], [0, 0, 1, 1], [], []>} : vector<256x16xf32>, vector<16x16xf32>, vector<256x16xf32> -> vector<256x16xf32>
    %32 = arith.addf %26, %31 : vector<256x16xf32>
    %33 = vector.extract_strided_slice %2 {offsets = [1, 2, 0], sizes = [16, 16, 16], strides = [1, 1, 1]} : vector<18x18x16xf32> to vector<16x16x16xf32>
    %34 = vector.shape_cast %33 : vector<16x16x16xf32> to vector<256x16xf32>
    %c5 = arith.constant 5 : index
    %c0_19 = arith.constant 0 : index
    %c0_20 = arith.constant 0 : index
    %35 = vector.load %arg2[%c5, %c0_19, %c0_20] : memref<9x16x16xf32, #tpu.memory_space<vmem>>, vector<1x16x16xf32>
    %36 = vector.shape_cast %35 : vector<1x16x16xf32> to vector<16x16xf32>
    %cst_21 = arith.constant dense<0.000000e+00> : vector<256x16xf32>
    %37 = tpu.matmul %34, %36, %cst_21 {dimension_numbers = #tpu.dot_dimension_numbers<[1], [0], [0], [1], [0, 0, 1, 1], [], []>} : vector<256x16xf32>, vector<16x16xf32>, vector<256x16xf32> -> vector<256x16xf32>
    %38 = arith.addf %32, %37 : vector<256x16xf32>
    %39 = vector.extract_strided_slice %2 {offsets = [2, 0, 0], sizes = [16, 16, 16], strides = [1, 1, 1]} : vector<18x18x16xf32> to vector<16x16x16xf32>
    %40 = vector.shape_cast %39 : vector<16x16x16xf32> to vector<256x16xf32>
    %c6 = arith.constant 6 : index
    %c0_22 = arith.constant 0 : index
    %c0_23 = arith.constant 0 : index
    %41 = vector.load %arg2[%c6, %c0_22, %c0_23] : memref<9x16x16xf32, #tpu.memory_space<vmem>>, vector<1x16x16xf32>
    %42 = vector.shape_cast %41 : vector<1x16x16xf32> to vector<16x16xf32>
    %cst_24 = arith.constant dense<0.000000e+00> : vector<256x16xf32>
    %43 = tpu.matmul %40, %42, %cst_24 {dimension_numbers = #tpu.dot_dimension_numbers<[1], [0], [0], [1], [0, 0, 1, 1], [], []>} : vector<256x16xf32>, vector<16x16xf32>, vector<256x16xf32> -> vector<256x16xf32>
    %44 = arith.addf %38, %43 : vector<256x16xf32>
    %45 = vector.extract_strided_slice %2 {offsets = [2, 1, 0], sizes = [16, 16, 16], strides = [1, 1, 1]} : vector<18x18x16xf32> to vector<16x16x16xf32>
    %46 = vector.shape_cast %45 : vector<16x16x16xf32> to vector<256x16xf32>
    %c7 = arith.constant 7 : index
    %c0_25 = arith.constant 0 : index
    %c0_26 = arith.constant 0 : index
    %47 = vector.load %arg2[%c7, %c0_25, %c0_26] : memref<9x16x16xf32, #tpu.memory_space<vmem>>, vector<1x16x16xf32>
    %48 = vector.shape_cast %47 : vector<1x16x16xf32> to vector<16x16xf32>
    %cst_27 = arith.constant dense<0.000000e+00> : vector<256x16xf32>
    %49 = tpu.matmul %46, %48, %cst_27 {dimension_numbers = #tpu.dot_dimension_numbers<[1], [0], [0], [1], [0, 0, 1, 1], [], []>} : vector<256x16xf32>, vector<16x16xf32>, vector<256x16xf32> -> vector<256x16xf32>
    %50 = arith.addf %44, %49 : vector<256x16xf32>
    %51 = vector.extract_strided_slice %2 {offsets = [2, 2, 0], sizes = [16, 16, 16], strides = [1, 1, 1]} : vector<18x18x16xf32> to vector<16x16x16xf32>
    %52 = vector.shape_cast %51 : vector<16x16x16xf32> to vector<256x16xf32>
    %c8 = arith.constant 8 : index
    %c0_28 = arith.constant 0 : index
    %c0_29 = arith.constant 0 : index
    %53 = vector.load %arg2[%c8, %c0_28, %c0_29] : memref<9x16x16xf32, #tpu.memory_space<vmem>>, vector<1x16x16xf32>
    %54 = vector.shape_cast %53 : vector<1x16x16xf32> to vector<16x16xf32>
    %cst_30 = arith.constant dense<0.000000e+00> : vector<256x16xf32>
    %55 = tpu.matmul %52, %54, %cst_30 {dimension_numbers = #tpu.dot_dimension_numbers<[1], [0], [0], [1], [0, 0, 1, 1], [], []>} : vector<256x16xf32>, vector<16x16xf32>, vector<256x16xf32> -> vector<256x16xf32>
    %56 = arith.addf %50, %55 : vector<256x16xf32>
    %c0_31 = arith.constant 0 : index
    %c0_32 = arith.constant 0 : index
    %57 = vector.load %arg3[%c0_31, %c0_32] : memref<1x16xf32, #tpu.memory_space<vmem>>, vector<1x16xf32>
    %58 = vector.broadcast %57 : vector<1x16xf32> to vector<256x16xf32>
    %59 = arith.addf %56, %58 : vector<256x16xf32>
    %c0_33 = arith.constant 0 : index
    %c0_34 = arith.constant 0 : index
    %c0_35 = arith.constant 0 : index
    %c0_36 = arith.constant 0 : index
    %60 = vector.load %arg4[%c0_33, %c0_34, %c0_35, %c0_36] : memref<1x16x16x16xf32, #tpu.memory_space<vmem>>, vector<1x16x16x16xf32>
    %61 = vector.shape_cast %60 : vector<1x16x16x16xf32> to vector<256x16xf32>
    %62 = arith.addf %59, %61 : vector<256x16xf32>
    %cst_37 = arith.constant 0.000000e+00 : f32
    %63 = vector.broadcast %cst_37 : f32 to vector<256x16xf32>
    %64 = arith.maximumf %62, %63 : vector<256x16xf32>
    %65 = vector.shape_cast %64 : vector<256x16xf32> to vector<1x16x16x16xf32>
    %c0_38 = arith.constant 0 : index
    %c0_39 = arith.constant 0 : index
    %c0_40 = arith.constant 0 : index
    %c0_41 = arith.constant 0 : index
    %66 = vector.load %arg5[%c0_38, %c0_39, %c0_40, %c0_41] : memref<1x16x16x16xf32, #tpu.memory_space<vmem>>, vector<1x16x16x16xf32>
    tpu.vector_store %arg5[%c0_38, %c0_39, %c0_40, %c0_41], %65 {strides = array<i32>} : memref<1x16x16x16xf32, #tpu.memory_space<vmem>>, vector<1x16x16x16xf32>,
    return
  }
  func.func @transform_0(%arg0: i32) -> (i32, i32, i32, i32) {
    %c0_i32 = arith.constant 0 : i32
    %c0_i32_0 = arith.constant 0 : i32
    %c0_i32_1 = arith.constant 0 : i32
    %c0_i32_2 = arith.constant 0 : i32
    return %arg0, %c0_i32, %c0_i32_0, %c0_i32_1 : i32, i32, i32, i32
  }
  func.func @transform_1(%arg0: i32) -> (i32, i32, i32) {
    %c0_i32 = arith.constant 0 : i32
    %c0_i32_0 = arith.constant 0 : i32
    %c0_i32_1 = arith.constant 0 : i32
    %c0_i32_2 = arith.constant 0 : i32
    return %c0_i32, %c0_i32_0, %c0_i32_1 : i32, i32, i32
  }
  func.func @transform_2(%arg0: i32) -> (i32, i32) {
    %c0_i32 = arith.constant 0 : i32
    %c0_i32_0 = arith.constant 0 : i32
    %c0_i32_1 = arith.constant 0 : i32
    return %c0_i32, %c0_i32_0 : i32, i32
  }
  func.func @transform_3(%arg0: i32) -> (i32, i32, i32, i32) {
    %c0_i32 = arith.constant 0 : i32
    %c0_i32_0 = arith.constant 0 : i32
    %c0_i32_1 = arith.constant 0 : i32
    %c0_i32_2 = arith.constant 0 : i32
    return %arg0, %c0_i32, %c0_i32_0, %c0_i32_1 : i32, i32, i32, i32
  }
  func.func @transform_4(%arg0: i32) -> (i32, i32, i32, i32) {
    %c0_i32 = arith.constant 0 : i32
    %c0_i32_0 = arith.constant 0 : i32
    %c0_i32_1 = arith.constant 0 : i32
    %c0_i32_2 = arith.constant 0 : i32
    return %arg0, %c0_i32, %c0_i32_0, %c0_i32_1 : i32, i32, i32, i32
  }
}

module attributes {stable_mosaic.version = 11 : i64} {
  func.func @kernel(%arg0: i32, %arg1: memref<1x9x9x16xf32, #tpu.memory_space<vmem>>, %arg2: memref<1x9x9x16xf32, #tpu.memory_space<vmem>>, %arg3: memref<1x9x9x16xf32, #tpu.memory_space<vmem>>, %arg4: memref<1x9x9x16xf32, #tpu.memory_space<vmem>>, %arg5: memref<9x16x32xf32, #tpu.memory_space<vmem>>, %arg6: memref<1x32xf32, #tpu.memory_space<vmem>>, %arg7: memref<1x8x8x32xf32, #tpu.memory_space<vmem>>) attributes {dimension_semantics = [#tpu.dimension_semantics<parallel>], iteration_bounds = array<i64: 2>, scalar_prefetch = 0 : i64, scratch_operands = 0 : i64, tpu.core_type = #tpu.core_type<tc>, window_params = [{transform_indices = @transform_0, window_bounds = array<i64: 1, 9, 9, 16>}, {transform_indices = @transform_1, window_bounds = array<i64: 1, 9, 9, 16>}, {transform_indices = @transform_2, window_bounds = array<i64: 1, 9, 9, 16>}, {transform_indices = @transform_3, window_bounds = array<i64: 1, 9, 9, 16>}, {pipeline_mode = #tpu.pipeline_mode<synchronous>, transform_indices = @transform_4, window_bounds = array<i64: 9, 16, 32>}, {pipeline_mode = #tpu.pipeline_mode<synchronous>, transform_indices = @transform_5, window_bounds = array<i64: 1, 32>}, {transform_indices = @transform_6, window_bounds = array<i64: 1, 8, 8, 32>}]} {
    %cst = arith.constant 0.000000e+00 : f32
    %0 = vector.broadcast %cst : f32 to vector<64x32xf32>
    %c0 = arith.constant 0 : index
    %c0_0 = arith.constant 0 : index
    %c0_1 = arith.constant 0 : index
    %c0_2 = arith.constant 0 : index
    %1 = vector.load %arg1[%c0, %c0_0, %c0_1, %c0_2] : memref<1x9x9x16xf32, #tpu.memory_space<vmem>>, vector<1x9x9x16xf32>
    %2 = vector.shape_cast %1 : vector<1x9x9x16xf32> to vector<9x9x16xf32>
    %c0_3 = arith.constant 0 : index
    %c0_4 = arith.constant 0 : index
    %c0_5 = arith.constant 0 : index
    %c0_6 = arith.constant 0 : index
    %3 = vector.load %arg2[%c0_3, %c0_4, %c0_5, %c0_6] : memref<1x9x9x16xf32, #tpu.memory_space<vmem>>, vector<1x9x9x16xf32>
    %4 = vector.shape_cast %3 : vector<1x9x9x16xf32> to vector<9x9x16xf32>
    %c0_7 = arith.constant 0 : index
    %c0_8 = arith.constant 0 : index
    %c0_9 = arith.constant 0 : index
    %c0_10 = arith.constant 0 : index
    %5 = vector.load %arg3[%c0_7, %c0_8, %c0_9, %c0_10] : memref<1x9x9x16xf32, #tpu.memory_space<vmem>>, vector<1x9x9x16xf32>
    %6 = vector.shape_cast %5 : vector<1x9x9x16xf32> to vector<9x9x16xf32>
    %c0_11 = arith.constant 0 : index
    %c0_12 = arith.constant 0 : index
    %c0_13 = arith.constant 0 : index
    %c0_14 = arith.constant 0 : index
    %7 = vector.load %arg4[%c0_11, %c0_12, %c0_13, %c0_14] : memref<1x9x9x16xf32, #tpu.memory_space<vmem>>, vector<1x9x9x16xf32>
    %8 = vector.shape_cast %7 : vector<1x9x9x16xf32> to vector<9x9x16xf32>
    %9 = vector.extract_strided_slice %2 {offsets = [0, 0, 0], sizes = [8, 8, 16], strides = [1, 1, 1]} : vector<9x9x16xf32> to vector<8x8x16xf32>
    %10 = vector.shape_cast %9 : vector<8x8x16xf32> to vector<64x16xf32>
    %c0_15 = arith.constant 0 : index
    %c0_16 = arith.constant 0 : index
    %c0_17 = arith.constant 0 : index
    %11 = vector.load %arg5[%c0_15, %c0_16, %c0_17] : memref<9x16x32xf32, #tpu.memory_space<vmem>>, vector<1x16x32xf32>
    %12 = vector.shape_cast %11 : vector<1x16x32xf32> to vector<16x32xf32>
    %cst_18 = arith.constant dense<0.000000e+00> : vector<64x32xf32>
    %13 = tpu.matmul %10, %12, %cst_18 {dimension_numbers = #tpu.dot_dimension_numbers<[1], [0], [0], [1], [0, 0, 1, 1], [], []>} : vector<64x16xf32>, vector<16x32xf32>, vector<64x32xf32> -> vector<64x32xf32>
    %14 = arith.addf %0, %13 : vector<64x32xf32>
    %15 = vector.extract_strided_slice %4 {offsets = [0, 0, 0], sizes = [8, 8, 16], strides = [1, 1, 1]} : vector<9x9x16xf32> to vector<8x8x16xf32>
    %16 = vector.shape_cast %15 : vector<8x8x16xf32> to vector<64x16xf32>
    %c1 = arith.constant 1 : index
    %c0_19 = arith.constant 0 : index
    %c0_20 = arith.constant 0 : index
    %17 = vector.load %arg5[%c1, %c0_19, %c0_20] : memref<9x16x32xf32, #tpu.memory_space<vmem>>, vector<1x16x32xf32>
    %18 = vector.shape_cast %17 : vector<1x16x32xf32> to vector<16x32xf32>
    %cst_21 = arith.constant dense<0.000000e+00> : vector<64x32xf32>
    %19 = tpu.matmul %16, %18, %cst_21 {dimension_numbers = #tpu.dot_dimension_numbers<[1], [0], [0], [1], [0, 0, 1, 1], [], []>} : vector<64x16xf32>, vector<16x32xf32>, vector<64x32xf32> -> vector<64x32xf32>
    %20 = arith.addf %14, %19 : vector<64x32xf32>
    %21 = vector.extract_strided_slice %2 {offsets = [0, 1, 0], sizes = [8, 8, 16], strides = [1, 1, 1]} : vector<9x9x16xf32> to vector<8x8x16xf32>
    %22 = vector.shape_cast %21 : vector<8x8x16xf32> to vector<64x16xf32>
    %c2 = arith.constant 2 : index
    %c0_22 = arith.constant 0 : index
    %c0_23 = arith.constant 0 : index
    %23 = vector.load %arg5[%c2, %c0_22, %c0_23] : memref<9x16x32xf32, #tpu.memory_space<vmem>>, vector<1x16x32xf32>
    %24 = vector.shape_cast %23 : vector<1x16x32xf32> to vector<16x32xf32>
    %cst_24 = arith.constant dense<0.000000e+00> : vector<64x32xf32>
    %25 = tpu.matmul %22, %24, %cst_24 {dimension_numbers = #tpu.dot_dimension_numbers<[1], [0], [0], [1], [0, 0, 1, 1], [], []>} : vector<64x16xf32>, vector<16x32xf32>, vector<64x32xf32> -> vector<64x32xf32>
    %26 = arith.addf %20, %25 : vector<64x32xf32>
    %27 = vector.extract_strided_slice %6 {offsets = [0, 0, 0], sizes = [8, 8, 16], strides = [1, 1, 1]} : vector<9x9x16xf32> to vector<8x8x16xf32>
    %28 = vector.shape_cast %27 : vector<8x8x16xf32> to vector<64x16xf32>
    %c3 = arith.constant 3 : index
    %c0_25 = arith.constant 0 : index
    %c0_26 = arith.constant 0 : index
    %29 = vector.load %arg5[%c3, %c0_25, %c0_26] : memref<9x16x32xf32, #tpu.memory_space<vmem>>, vector<1x16x32xf32>
    %30 = vector.shape_cast %29 : vector<1x16x32xf32> to vector<16x32xf32>
    %cst_27 = arith.constant dense<0.000000e+00> : vector<64x32xf32>
    %31 = tpu.matmul %28, %30, %cst_27 {dimension_numbers = #tpu.dot_dimension_numbers<[1], [0], [0], [1], [0, 0, 1, 1], [], []>} : vector<64x16xf32>, vector<16x32xf32>, vector<64x32xf32> -> vector<64x32xf32>
    %32 = arith.addf %26, %31 : vector<64x32xf32>
    %33 = vector.extract_strided_slice %8 {offsets = [0, 0, 0], sizes = [8, 8, 16], strides = [1, 1, 1]} : vector<9x9x16xf32> to vector<8x8x16xf32>
    %34 = vector.shape_cast %33 : vector<8x8x16xf32> to vector<64x16xf32>
    %c4 = arith.constant 4 : index
    %c0_28 = arith.constant 0 : index
    %c0_29 = arith.constant 0 : index
    %35 = vector.load %arg5[%c4, %c0_28, %c0_29] : memref<9x16x32xf32, #tpu.memory_space<vmem>>, vector<1x16x32xf32>
    %36 = vector.shape_cast %35 : vector<1x16x32xf32> to vector<16x32xf32>
    %cst_30 = arith.constant dense<0.000000e+00> : vector<64x32xf32>
    %37 = tpu.matmul %34, %36, %cst_30 {dimension_numbers = #tpu.dot_dimension_numbers<[1], [0], [0], [1], [0, 0, 1, 1], [], []>} : vector<64x16xf32>, vector<16x32xf32>, vector<64x32xf32> -> vector<64x32xf32>
    %38 = arith.addf %32, %37 : vector<64x32xf32>
    %39 = vector.extract_strided_slice %6 {offsets = [0, 1, 0], sizes = [8, 8, 16], strides = [1, 1, 1]} : vector<9x9x16xf32> to vector<8x8x16xf32>
    %40 = vector.shape_cast %39 : vector<8x8x16xf32> to vector<64x16xf32>
    %c5 = arith.constant 5 : index
    %c0_31 = arith.constant 0 : index
    %c0_32 = arith.constant 0 : index
    %41 = vector.load %arg5[%c5, %c0_31, %c0_32] : memref<9x16x32xf32, #tpu.memory_space<vmem>>, vector<1x16x32xf32>
    %42 = vector.shape_cast %41 : vector<1x16x32xf32> to vector<16x32xf32>
    %cst_33 = arith.constant dense<0.000000e+00> : vector<64x32xf32>
    %43 = tpu.matmul %40, %42, %cst_33 {dimension_numbers = #tpu.dot_dimension_numbers<[1], [0], [0], [1], [0, 0, 1, 1], [], []>} : vector<64x16xf32>, vector<16x32xf32>, vector<64x32xf32> -> vector<64x32xf32>
    %44 = arith.addf %38, %43 : vector<64x32xf32>
    %45 = vector.extract_strided_slice %2 {offsets = [1, 0, 0], sizes = [8, 8, 16], strides = [1, 1, 1]} : vector<9x9x16xf32> to vector<8x8x16xf32>
    %46 = vector.shape_cast %45 : vector<8x8x16xf32> to vector<64x16xf32>
    %c6 = arith.constant 6 : index
    %c0_34 = arith.constant 0 : index
    %c0_35 = arith.constant 0 : index
    %47 = vector.load %arg5[%c6, %c0_34, %c0_35] : memref<9x16x32xf32, #tpu.memory_space<vmem>>, vector<1x16x32xf32>
    %48 = vector.shape_cast %47 : vector<1x16x32xf32> to vector<16x32xf32>
    %cst_36 = arith.constant dense<0.000000e+00> : vector<64x32xf32>
    %49 = tpu.matmul %46, %48, %cst_36 {dimension_numbers = #tpu.dot_dimension_numbers<[1], [0], [0], [1], [0, 0, 1, 1], [], []>} : vector<64x16xf32>, vector<16x32xf32>, vector<64x32xf32> -> vector<64x32xf32>
    %50 = arith.addf %44, %49 : vector<64x32xf32>
    %51 = vector.extract_strided_slice %4 {offsets = [1, 0, 0], sizes = [8, 8, 16], strides = [1, 1, 1]} : vector<9x9x16xf32> to vector<8x8x16xf32>
    %52 = vector.shape_cast %51 : vector<8x8x16xf32> to vector<64x16xf32>
    %c7 = arith.constant 7 : index
    %c0_37 = arith.constant 0 : index
    %c0_38 = arith.constant 0 : index
    %53 = vector.load %arg5[%c7, %c0_37, %c0_38] : memref<9x16x32xf32, #tpu.memory_space<vmem>>, vector<1x16x32xf32>
    %54 = vector.shape_cast %53 : vector<1x16x32xf32> to vector<16x32xf32>
    %cst_39 = arith.constant dense<0.000000e+00> : vector<64x32xf32>
    %55 = tpu.matmul %52, %54, %cst_39 {dimension_numbers = #tpu.dot_dimension_numbers<[1], [0], [0], [1], [0, 0, 1, 1], [], []>} : vector<64x16xf32>, vector<16x32xf32>, vector<64x32xf32> -> vector<64x32xf32>
    %56 = arith.addf %50, %55 : vector<64x32xf32>
    %57 = vector.extract_strided_slice %2 {offsets = [1, 1, 0], sizes = [8, 8, 16], strides = [1, 1, 1]} : vector<9x9x16xf32> to vector<8x8x16xf32>
    %58 = vector.shape_cast %57 : vector<8x8x16xf32> to vector<64x16xf32>
    %c8 = arith.constant 8 : index
    %c0_40 = arith.constant 0 : index
    %c0_41 = arith.constant 0 : index
    %59 = vector.load %arg5[%c8, %c0_40, %c0_41] : memref<9x16x32xf32, #tpu.memory_space<vmem>>, vector<1x16x32xf32>
    %60 = vector.shape_cast %59 : vector<1x16x32xf32> to vector<16x32xf32>
    %cst_42 = arith.constant dense<0.000000e+00> : vector<64x32xf32>
    %61 = tpu.matmul %58, %60, %cst_42 {dimension_numbers = #tpu.dot_dimension_numbers<[1], [0], [0], [1], [0, 0, 1, 1], [], []>} : vector<64x16xf32>, vector<16x32xf32>, vector<64x32xf32> -> vector<64x32xf32>
    %62 = arith.addf %56, %61 : vector<64x32xf32>
    %c0_43 = arith.constant 0 : index
    %c0_44 = arith.constant 0 : index
    %63 = vector.load %arg6[%c0_43, %c0_44] : memref<1x32xf32, #tpu.memory_space<vmem>>, vector<1x32xf32>
    %64 = vector.broadcast %63 : vector<1x32xf32> to vector<64x32xf32>
    %65 = arith.addf %62, %64 : vector<64x32xf32>
    %cst_45 = arith.constant 0.000000e+00 : f32
    %66 = vector.broadcast %cst_45 : f32 to vector<64x32xf32>
    %67 = arith.maximumf %65, %66 : vector<64x32xf32>
    %68 = vector.shape_cast %67 : vector<64x32xf32> to vector<1x8x8x32xf32>
    %c0_46 = arith.constant 0 : index
    %c0_47 = arith.constant 0 : index
    %c0_48 = arith.constant 0 : index
    %c0_49 = arith.constant 0 : index
    %69 = vector.load %arg7[%c0_46, %c0_47, %c0_48, %c0_49] : memref<1x8x8x32xf32, #tpu.memory_space<vmem>>, vector<1x8x8x32xf32>
    tpu.vector_store %arg7[%c0_46, %c0_47, %c0_48, %c0_49], %68 {strides = array<i32>} : memref<1x8x8x32xf32, #tpu.memory_space<vmem>>, vector<1x8x8x32xf32>,
    return
  }
  func.func @transform_0(%arg0: i32) -> (i32, i32, i32, i32) {
    %c0_i32 = arith.constant 0 : i32
    %c0_i32_0 = arith.constant 0 : i32
    %c0_i32_1 = arith.constant 0 : i32
    %c0_i32_2 = arith.constant 0 : i32
    return %arg0, %c0_i32, %c0_i32_0, %c0_i32_1 : i32, i32, i32, i32
  }
  func.func @transform_1(%arg0: i32) -> (i32, i32, i32, i32) {
    %c0_i32 = arith.constant 0 : i32
    %c0_i32_0 = arith.constant 0 : i32
    %c0_i32_1 = arith.constant 0 : i32
    %c0_i32_2 = arith.constant 0 : i32
    return %arg0, %c0_i32, %c0_i32_0, %c0_i32_1 : i32, i32, i32, i32
  }
  func.func @transform_2(%arg0: i32) -> (i32, i32, i32, i32) {
    %c0_i32 = arith.constant 0 : i32
    %c0_i32_0 = arith.constant 0 : i32
    %c0_i32_1 = arith.constant 0 : i32
    %c0_i32_2 = arith.constant 0 : i32
    return %arg0, %c0_i32, %c0_i32_0, %c0_i32_1 : i32, i32, i32, i32
  }
  func.func @transform_3(%arg0: i32) -> (i32, i32, i32, i32) {
    %c0_i32 = arith.constant 0 : i32
    %c0_i32_0 = arith.constant 0 : i32
    %c0_i32_1 = arith.constant 0 : i32
    %c0_i32_2 = arith.constant 0 : i32
    return %arg0, %c0_i32, %c0_i32_0, %c0_i32_1 : i32, i32, i32, i32
  }
  func.func @transform_4(%arg0: i32) -> (i32, i32, i32) {
    %c0_i32 = arith.constant 0 : i32
    %c0_i32_0 = arith.constant 0 : i32
    %c0_i32_1 = arith.constant 0 : i32
    %c0_i32_2 = arith.constant 0 : i32
    return %c0_i32, %c0_i32_0, %c0_i32_1 : i32, i32, i32
  }
  func.func @transform_5(%arg0: i32) -> (i32, i32) {
    %c0_i32 = arith.constant 0 : i32
    %c0_i32_0 = arith.constant 0 : i32
    %c0_i32_1 = arith.constant 0 : i32
    return %c0_i32, %c0_i32_0 : i32, i32
  }
  func.func @transform_6(%arg0: i32) -> (i32, i32, i32, i32) {
    %c0_i32 = arith.constant 0 : i32
    %c0_i32_0 = arith.constant 0 : i32
    %c0_i32_1 = arith.constant 0 : i32
    %c0_i32_2 = arith.constant 0 : i32
    return %arg0, %c0_i32, %c0_i32_0, %c0_i32_1 : i32, i32, i32, i32
  }
}

module attributes {stable_mosaic.version = 11 : i64} {
  func.func @kernel(%arg0: i32, %arg1: memref<1x5x5x32xf32, #tpu.memory_space<vmem>>, %arg2: memref<1x5x5x32xf32, #tpu.memory_space<vmem>>, %arg3: memref<1x5x5x32xf32, #tpu.memory_space<vmem>>, %arg4: memref<1x5x5x32xf32, #tpu.memory_space<vmem>>, %arg5: memref<9x32x64xf32, #tpu.memory_space<vmem>>, %arg6: memref<1x64xf32, #tpu.memory_space<vmem>>, %arg7: memref<1x4x4x64xf32, #tpu.memory_space<vmem>>) attributes {dimension_semantics = [#tpu.dimension_semantics<parallel>], iteration_bounds = array<i64: 2>, scalar_prefetch = 0 : i64, scratch_operands = 0 : i64, tpu.core_type = #tpu.core_type<tc>, window_params = [{transform_indices = @transform_0, window_bounds = array<i64: 1, 5, 5, 32>}, {transform_indices = @transform_1, window_bounds = array<i64: 1, 5, 5, 32>}, {transform_indices = @transform_2, window_bounds = array<i64: 1, 5, 5, 32>}, {transform_indices = @transform_3, window_bounds = array<i64: 1, 5, 5, 32>}, {pipeline_mode = #tpu.pipeline_mode<synchronous>, transform_indices = @transform_4, window_bounds = array<i64: 9, 32, 64>}, {pipeline_mode = #tpu.pipeline_mode<synchronous>, transform_indices = @transform_5, window_bounds = array<i64: 1, 64>}, {transform_indices = @transform_6, window_bounds = array<i64: 1, 4, 4, 64>}]} {
    %cst = arith.constant 0.000000e+00 : f32
    %0 = vector.broadcast %cst : f32 to vector<16x64xf32>
    %c0 = arith.constant 0 : index
    %c0_0 = arith.constant 0 : index
    %c0_1 = arith.constant 0 : index
    %c0_2 = arith.constant 0 : index
    %1 = vector.load %arg1[%c0, %c0_0, %c0_1, %c0_2] : memref<1x5x5x32xf32, #tpu.memory_space<vmem>>, vector<1x5x5x32xf32>
    %2 = vector.shape_cast %1 : vector<1x5x5x32xf32> to vector<5x5x32xf32>
    %c0_3 = arith.constant 0 : index
    %c0_4 = arith.constant 0 : index
    %c0_5 = arith.constant 0 : index
    %c0_6 = arith.constant 0 : index
    %3 = vector.load %arg2[%c0_3, %c0_4, %c0_5, %c0_6] : memref<1x5x5x32xf32, #tpu.memory_space<vmem>>, vector<1x5x5x32xf32>
    %4 = vector.shape_cast %3 : vector<1x5x5x32xf32> to vector<5x5x32xf32>
    %c0_7 = arith.constant 0 : index
    %c0_8 = arith.constant 0 : index
    %c0_9 = arith.constant 0 : index
    %c0_10 = arith.constant 0 : index
    %5 = vector.load %arg3[%c0_7, %c0_8, %c0_9, %c0_10] : memref<1x5x5x32xf32, #tpu.memory_space<vmem>>, vector<1x5x5x32xf32>
    %6 = vector.shape_cast %5 : vector<1x5x5x32xf32> to vector<5x5x32xf32>
    %c0_11 = arith.constant 0 : index
    %c0_12 = arith.constant 0 : index
    %c0_13 = arith.constant 0 : index
    %c0_14 = arith.constant 0 : index
    %7 = vector.load %arg4[%c0_11, %c0_12, %c0_13, %c0_14] : memref<1x5x5x32xf32, #tpu.memory_space<vmem>>, vector<1x5x5x32xf32>
    %8 = vector.shape_cast %7 : vector<1x5x5x32xf32> to vector<5x5x32xf32>
    %9 = vector.extract_strided_slice %2 {offsets = [0, 0, 0], sizes = [4, 4, 32], strides = [1, 1, 1]} : vector<5x5x32xf32> to vector<4x4x32xf32>
    %10 = vector.shape_cast %9 : vector<4x4x32xf32> to vector<16x32xf32>
    %c0_15 = arith.constant 0 : index
    %c0_16 = arith.constant 0 : index
    %c0_17 = arith.constant 0 : index
    %11 = vector.load %arg5[%c0_15, %c0_16, %c0_17] : memref<9x32x64xf32, #tpu.memory_space<vmem>>, vector<1x32x64xf32>
    %12 = vector.shape_cast %11 : vector<1x32x64xf32> to vector<32x64xf32>
    %cst_18 = arith.constant dense<0.000000e+00> : vector<16x64xf32>
    %13 = tpu.matmul %10, %12, %cst_18 {dimension_numbers = #tpu.dot_dimension_numbers<[1], [0], [0], [1], [0, 0, 1, 1], [], []>} : vector<16x32xf32>, vector<32x64xf32>, vector<16x64xf32> -> vector<16x64xf32>
    %14 = arith.addf %0, %13 : vector<16x64xf32>
    %15 = vector.extract_strided_slice %4 {offsets = [0, 0, 0], sizes = [4, 4, 32], strides = [1, 1, 1]} : vector<5x5x32xf32> to vector<4x4x32xf32>
    %16 = vector.shape_cast %15 : vector<4x4x32xf32> to vector<16x32xf32>
    %c1 = arith.constant 1 : index
    %c0_19 = arith.constant 0 : index
    %c0_20 = arith.constant 0 : index
    %17 = vector.load %arg5[%c1, %c0_19, %c0_20] : memref<9x32x64xf32, #tpu.memory_space<vmem>>, vector<1x32x64xf32>
    %18 = vector.shape_cast %17 : vector<1x32x64xf32> to vector<32x64xf32>
    %cst_21 = arith.constant dense<0.000000e+00> : vector<16x64xf32>
    %19 = tpu.matmul %16, %18, %cst_21 {dimension_numbers = #tpu.dot_dimension_numbers<[1], [0], [0], [1], [0, 0, 1, 1], [], []>} : vector<16x32xf32>, vector<32x64xf32>, vector<16x64xf32> -> vector<16x64xf32>
    %20 = arith.addf %14, %19 : vector<16x64xf32>
    %21 = vector.extract_strided_slice %2 {offsets = [0, 1, 0], sizes = [4, 4, 32], strides = [1, 1, 1]} : vector<5x5x32xf32> to vector<4x4x32xf32>
    %22 = vector.shape_cast %21 : vector<4x4x32xf32> to vector<16x32xf32>
    %c2 = arith.constant 2 : index
    %c0_22 = arith.constant 0 : index
    %c0_23 = arith.constant 0 : index
    %23 = vector.load %arg5[%c2, %c0_22, %c0_23] : memref<9x32x64xf32, #tpu.memory_space<vmem>>, vector<1x32x64xf32>
    %24 = vector.shape_cast %23 : vector<1x32x64xf32> to vector<32x64xf32>
    %cst_24 = arith.constant dense<0.000000e+00> : vector<16x64xf32>
    %25 = tpu.matmul %22, %24, %cst_24 {dimension_numbers = #tpu.dot_dimension_numbers<[1], [0], [0], [1], [0, 0, 1, 1], [], []>} : vector<16x32xf32>, vector<32x64xf32>, vector<16x64xf32> -> vector<16x64xf32>
    %26 = arith.addf %20, %25 : vector<16x64xf32>
    %27 = vector.extract_strided_slice %6 {offsets = [0, 0, 0], sizes = [4, 4, 32], strides = [1, 1, 1]} : vector<5x5x32xf32> to vector<4x4x32xf32>
    %28 = vector.shape_cast %27 : vector<4x4x32xf32> to vector<16x32xf32>
    %c3 = arith.constant 3 : index
    %c0_25 = arith.constant 0 : index
    %c0_26 = arith.constant 0 : index
    %29 = vector.load %arg5[%c3, %c0_25, %c0_26] : memref<9x32x64xf32, #tpu.memory_space<vmem>>, vector<1x32x64xf32>
    %30 = vector.shape_cast %29 : vector<1x32x64xf32> to vector<32x64xf32>
    %cst_27 = arith.constant dense<0.000000e+00> : vector<16x64xf32>
    %31 = tpu.matmul %28, %30, %cst_27 {dimension_numbers = #tpu.dot_dimension_numbers<[1], [0], [0], [1], [0, 0, 1, 1], [], []>} : vector<16x32xf32>, vector<32x64xf32>, vector<16x64xf32> -> vector<16x64xf32>
    %32 = arith.addf %26, %31 : vector<16x64xf32>
    %33 = vector.extract_strided_slice %8 {offsets = [0, 0, 0], sizes = [4, 4, 32], strides = [1, 1, 1]} : vector<5x5x32xf32> to vector<4x4x32xf32>
    %34 = vector.shape_cast %33 : vector<4x4x32xf32> to vector<16x32xf32>
    %c4 = arith.constant 4 : index
    %c0_28 = arith.constant 0 : index
    %c0_29 = arith.constant 0 : index
    %35 = vector.load %arg5[%c4, %c0_28, %c0_29] : memref<9x32x64xf32, #tpu.memory_space<vmem>>, vector<1x32x64xf32>
    %36 = vector.shape_cast %35 : vector<1x32x64xf32> to vector<32x64xf32>
    %cst_30 = arith.constant dense<0.000000e+00> : vector<16x64xf32>
    %37 = tpu.matmul %34, %36, %cst_30 {dimension_numbers = #tpu.dot_dimension_numbers<[1], [0], [0], [1], [0, 0, 1, 1], [], []>} : vector<16x32xf32>, vector<32x64xf32>, vector<16x64xf32> -> vector<16x64xf32>
    %38 = arith.addf %32, %37 : vector<16x64xf32>
    %39 = vector.extract_strided_slice %6 {offsets = [0, 1, 0], sizes = [4, 4, 32], strides = [1, 1, 1]} : vector<5x5x32xf32> to vector<4x4x32xf32>
    %40 = vector.shape_cast %39 : vector<4x4x32xf32> to vector<16x32xf32>
    %c5 = arith.constant 5 : index
    %c0_31 = arith.constant 0 : index
    %c0_32 = arith.constant 0 : index
    %41 = vector.load %arg5[%c5, %c0_31, %c0_32] : memref<9x32x64xf32, #tpu.memory_space<vmem>>, vector<1x32x64xf32>
    %42 = vector.shape_cast %41 : vector<1x32x64xf32> to vector<32x64xf32>
    %cst_33 = arith.constant dense<0.000000e+00> : vector<16x64xf32>
    %43 = tpu.matmul %40, %42, %cst_33 {dimension_numbers = #tpu.dot_dimension_numbers<[1], [0], [0], [1], [0, 0, 1, 1], [], []>} : vector<16x32xf32>, vector<32x64xf32>, vector<16x64xf32> -> vector<16x64xf32>
    %44 = arith.addf %38, %43 : vector<16x64xf32>
    %45 = vector.extract_strided_slice %2 {offsets = [1, 0, 0], sizes = [4, 4, 32], strides = [1, 1, 1]} : vector<5x5x32xf32> to vector<4x4x32xf32>
    %46 = vector.shape_cast %45 : vector<4x4x32xf32> to vector<16x32xf32>
    %c6 = arith.constant 6 : index
    %c0_34 = arith.constant 0 : index
    %c0_35 = arith.constant 0 : index
    %47 = vector.load %arg5[%c6, %c0_34, %c0_35] : memref<9x32x64xf32, #tpu.memory_space<vmem>>, vector<1x32x64xf32>
    %48 = vector.shape_cast %47 : vector<1x32x64xf32> to vector<32x64xf32>
    %cst_36 = arith.constant dense<0.000000e+00> : vector<16x64xf32>
    %49 = tpu.matmul %46, %48, %cst_36 {dimension_numbers = #tpu.dot_dimension_numbers<[1], [0], [0], [1], [0, 0, 1, 1], [], []>} : vector<16x32xf32>, vector<32x64xf32>, vector<16x64xf32> -> vector<16x64xf32>
    %50 = arith.addf %44, %49 : vector<16x64xf32>
    %51 = vector.extract_strided_slice %4 {offsets = [1, 0, 0], sizes = [4, 4, 32], strides = [1, 1, 1]} : vector<5x5x32xf32> to vector<4x4x32xf32>
    %52 = vector.shape_cast %51 : vector<4x4x32xf32> to vector<16x32xf32>
    %c7 = arith.constant 7 : index
    %c0_37 = arith.constant 0 : index
    %c0_38 = arith.constant 0 : index
    %53 = vector.load %arg5[%c7, %c0_37, %c0_38] : memref<9x32x64xf32, #tpu.memory_space<vmem>>, vector<1x32x64xf32>
    %54 = vector.shape_cast %53 : vector<1x32x64xf32> to vector<32x64xf32>
    %cst_39 = arith.constant dense<0.000000e+00> : vector<16x64xf32>
    %55 = tpu.matmul %52, %54, %cst_39 {dimension_numbers = #tpu.dot_dimension_numbers<[1], [0], [0], [1], [0, 0, 1, 1], [], []>} : vector<16x32xf32>, vector<32x64xf32>, vector<16x64xf32> -> vector<16x64xf32>
    %56 = arith.addf %50, %55 : vector<16x64xf32>
    %57 = vector.extract_strided_slice %2 {offsets = [1, 1, 0], sizes = [4, 4, 32], strides = [1, 1, 1]} : vector<5x5x32xf32> to vector<4x4x32xf32>
    %58 = vector.shape_cast %57 : vector<4x4x32xf32> to vector<16x32xf32>
    %c8 = arith.constant 8 : index
    %c0_40 = arith.constant 0 : index
    %c0_41 = arith.constant 0 : index
    %59 = vector.load %arg5[%c8, %c0_40, %c0_41] : memref<9x32x64xf32, #tpu.memory_space<vmem>>, vector<1x32x64xf32>
    %60 = vector.shape_cast %59 : vector<1x32x64xf32> to vector<32x64xf32>
    %cst_42 = arith.constant dense<0.000000e+00> : vector<16x64xf32>
    %61 = tpu.matmul %58, %60, %cst_42 {dimension_numbers = #tpu.dot_dimension_numbers<[1], [0], [0], [1], [0, 0, 1, 1], [], []>} : vector<16x32xf32>, vector<32x64xf32>, vector<16x64xf32> -> vector<16x64xf32>
    %62 = arith.addf %56, %61 : vector<16x64xf32>
    %c0_43 = arith.constant 0 : index
    %c0_44 = arith.constant 0 : index
    %63 = vector.load %arg6[%c0_43, %c0_44] : memref<1x64xf32, #tpu.memory_space<vmem>>, vector<1x64xf32>
    %64 = vector.broadcast %63 : vector<1x64xf32> to vector<16x64xf32>
    %65 = arith.addf %62, %64 : vector<16x64xf32>
    %cst_45 = arith.constant 0.000000e+00 : f32
    %66 = vector.broadcast %cst_45 : f32 to vector<16x64xf32>
    %67 = arith.maximumf %65, %66 : vector<16x64xf32>
    %68 = vector.shape_cast %67 : vector<16x64xf32> to vector<1x4x4x64xf32>
    %c0_46 = arith.constant 0 : index
    %c0_47 = arith.constant 0 : index
    %c0_48 = arith.constant 0 : index
    %c0_49 = arith.constant 0 : index
    %69 = vector.load %arg7[%c0_46, %c0_47, %c0_48, %c0_49] : memref<1x4x4x64xf32, #tpu.memory_space<vmem>>, vector<1x4x4x64xf32>
    tpu.vector_store %arg7[%c0_46, %c0_47, %c0_48, %c0_49], %68 {strides = array<i32>} : memref<1x4x4x64xf32, #tpu.memory_space<vmem>>, vector<1x4x4x64xf32>,
    return
  }
  func.func @transform_0(%arg0: i32) -> (i32, i32, i32, i32) {
    %c0_i32 = arith.constant 0 : i32
    %c0_i32_0 = arith.constant 0 : i32
    %c0_i32_1 = arith.constant 0 : i32
    %c0_i32_2 = arith.constant 0 : i32
    return %arg0, %c0_i32, %c0_i32_0, %c0_i32_1 : i32, i32, i32, i32
  }
  func.func @transform_1(%arg0: i32) -> (i32, i32, i32, i32) {
    %c0_i32 = arith.constant 0 : i32
    %c0_i32_0 = arith.constant 0 : i32
    %c0_i32_1 = arith.constant 0 : i32
    %c0_i32_2 = arith.constant 0 : i32
    return %arg0, %c0_i32, %c0_i32_0, %c0_i32_1 : i32, i32, i32, i32
  }
  func.func @transform_2(%arg0: i32) -> (i32, i32, i32, i32) {
    %c0_i32 = arith.constant 0 : i32
    %c0_i32_0 = arith.constant 0 : i32
    %c0_i32_1 = arith.constant 0 : i32
    %c0_i32_2 = arith.constant 0 : i32
    return %arg0, %c0_i32, %c0_i32_0, %c0_i32_1 : i32, i32, i32, i32
  }
  func.func @transform_3(%arg0: i32) -> (i32, i32, i32, i32) {
    %c0_i32 = arith.constant 0 : i32
    %c0_i32_0 = arith.constant 0 : i32
    %c0_i32_1 = arith.constant 0 : i32
    %c0_i32_2 = arith.constant 0 : i32
    return %arg0, %c0_i32, %c0_i32_0, %c0_i32_1 : i32, i32, i32, i32
  }
  func.func @transform_4(%arg0: i32) -> (i32, i32, i32) {
    %c0_i32 = arith.constant 0 : i32
    %c0_i32_0 = arith.constant 0 : i32
    %c0_i32_1 = arith.constant 0 : i32
    %c0_i32_2 = arith.constant 0 : i32
    return %c0_i32, %c0_i32_0, %c0_i32_1 : i32, i32, i32
  }
  func.func @transform_5(%arg0: i32) -> (i32, i32) {
    %c0_i32 = arith.constant 0 : i32
    %c0_i32_0 = arith.constant 0 : i32
    %c0_i32_1 = arith.constant 0 : i32
    return %c0_i32, %c0_i32_0 : i32, i32
  }
  func.func @transform_6(%arg0: i32) -> (i32, i32, i32, i32) {
    %c0_i32 = arith.constant 0 : i32
    %c0_i32_0 = arith.constant 0 : i32
    %c0_i32_1 = arith.constant 0 : i32
    %c0_i32_2 = arith.constant 0 : i32
    return %arg0, %c0_i32, %c0_i32_0, %c0_i32_1 : i32, i32, i32, i32
  }
}

module attributes {stable_mosaic.version = 11 : i64} {
  func.func @kernel(%arg0: i32, %arg1: memref<1x10x10x32xf32, #tpu.memory_space<vmem>>, %arg2: memref<9x32x32xf32, #tpu.memory_space<vmem>>, %arg3: memref<1x32xf32, #tpu.memory_space<vmem>>, %arg4: memref<1x8x8x32xf32, #tpu.memory_space<vmem>>, %arg5: memref<1x8x8x32xf32, #tpu.memory_space<vmem>>) attributes {dimension_semantics = [#tpu.dimension_semantics<parallel>], iteration_bounds = array<i64: 2>, scalar_prefetch = 0 : i64, scratch_operands = 0 : i64, tpu.core_type = #tpu.core_type<tc>, window_params = [{transform_indices = @transform_0, window_bounds = array<i64: 1, 10, 10, 32>}, {pipeline_mode = #tpu.pipeline_mode<synchronous>, transform_indices = @transform_1, window_bounds = array<i64: 9, 32, 32>}, {pipeline_mode = #tpu.pipeline_mode<synchronous>, transform_indices = @transform_2, window_bounds = array<i64: 1, 32>}, {transform_indices = @transform_3, window_bounds = array<i64: 1, 8, 8, 32>}, {transform_indices = @transform_4, window_bounds = array<i64: 1, 8, 8, 32>}]} {
    %cst = arith.constant 0.000000e+00 : f32
    %0 = vector.broadcast %cst : f32 to vector<64x32xf32>
    %c0 = arith.constant 0 : index
    %c0_0 = arith.constant 0 : index
    %c0_1 = arith.constant 0 : index
    %c0_2 = arith.constant 0 : index
    %1 = vector.load %arg1[%c0, %c0_0, %c0_1, %c0_2] : memref<1x10x10x32xf32, #tpu.memory_space<vmem>>, vector<1x10x10x32xf32>
    %2 = vector.shape_cast %1 : vector<1x10x10x32xf32> to vector<10x10x32xf32>
    %3 = vector.extract_strided_slice %2 {offsets = [0, 0, 0], sizes = [8, 8, 32], strides = [1, 1, 1]} : vector<10x10x32xf32> to vector<8x8x32xf32>
    %4 = vector.shape_cast %3 : vector<8x8x32xf32> to vector<64x32xf32>
    %c0_3 = arith.constant 0 : index
    %c0_4 = arith.constant 0 : index
    %c0_5 = arith.constant 0 : index
    %5 = vector.load %arg2[%c0_3, %c0_4, %c0_5] : memref<9x32x32xf32, #tpu.memory_space<vmem>>, vector<1x32x32xf32>
    %6 = vector.shape_cast %5 : vector<1x32x32xf32> to vector<32x32xf32>
    %cst_6 = arith.constant dense<0.000000e+00> : vector<64x32xf32>
    %7 = tpu.matmul %4, %6, %cst_6 {dimension_numbers = #tpu.dot_dimension_numbers<[1], [0], [0], [1], [0, 0, 1, 1], [], []>} : vector<64x32xf32>, vector<32x32xf32>, vector<64x32xf32> -> vector<64x32xf32>
    %8 = arith.addf %0, %7 : vector<64x32xf32>
    %9 = vector.extract_strided_slice %2 {offsets = [0, 1, 0], sizes = [8, 8, 32], strides = [1, 1, 1]} : vector<10x10x32xf32> to vector<8x8x32xf32>
    %10 = vector.shape_cast %9 : vector<8x8x32xf32> to vector<64x32xf32>
    %c1 = arith.constant 1 : index
    %c0_7 = arith.constant 0 : index
    %c0_8 = arith.constant 0 : index
    %11 = vector.load %arg2[%c1, %c0_7, %c0_8] : memref<9x32x32xf32, #tpu.memory_space<vmem>>, vector<1x32x32xf32>
    %12 = vector.shape_cast %11 : vector<1x32x32xf32> to vector<32x32xf32>
    %cst_9 = arith.constant dense<0.000000e+00> : vector<64x32xf32>
    %13 = tpu.matmul %10, %12, %cst_9 {dimension_numbers = #tpu.dot_dimension_numbers<[1], [0], [0], [1], [0, 0, 1, 1], [], []>} : vector<64x32xf32>, vector<32x32xf32>, vector<64x32xf32> -> vector<64x32xf32>
    %14 = arith.addf %8, %13 : vector<64x32xf32>
    %15 = vector.extract_strided_slice %2 {offsets = [0, 2, 0], sizes = [8, 8, 32], strides = [1, 1, 1]} : vector<10x10x32xf32> to vector<8x8x32xf32>
    %16 = vector.shape_cast %15 : vector<8x8x32xf32> to vector<64x32xf32>
    %c2 = arith.constant 2 : index
    %c0_10 = arith.constant 0 : index
    %c0_11 = arith.constant 0 : index
    %17 = vector.load %arg2[%c2, %c0_10, %c0_11] : memref<9x32x32xf32, #tpu.memory_space<vmem>>, vector<1x32x32xf32>
    %18 = vector.shape_cast %17 : vector<1x32x32xf32> to vector<32x32xf32>
    %cst_12 = arith.constant dense<0.000000e+00> : vector<64x32xf32>
    %19 = tpu.matmul %16, %18, %cst_12 {dimension_numbers = #tpu.dot_dimension_numbers<[1], [0], [0], [1], [0, 0, 1, 1], [], []>} : vector<64x32xf32>, vector<32x32xf32>, vector<64x32xf32> -> vector<64x32xf32>
    %20 = arith.addf %14, %19 : vector<64x32xf32>
    %21 = vector.extract_strided_slice %2 {offsets = [1, 0, 0], sizes = [8, 8, 32], strides = [1, 1, 1]} : vector<10x10x32xf32> to vector<8x8x32xf32>
    %22 = vector.shape_cast %21 : vector<8x8x32xf32> to vector<64x32xf32>
    %c3 = arith.constant 3 : index
    %c0_13 = arith.constant 0 : index
    %c0_14 = arith.constant 0 : index
    %23 = vector.load %arg2[%c3, %c0_13, %c0_14] : memref<9x32x32xf32, #tpu.memory_space<vmem>>, vector<1x32x32xf32>
    %24 = vector.shape_cast %23 : vector<1x32x32xf32> to vector<32x32xf32>
    %cst_15 = arith.constant dense<0.000000e+00> : vector<64x32xf32>
    %25 = tpu.matmul %22, %24, %cst_15 {dimension_numbers = #tpu.dot_dimension_numbers<[1], [0], [0], [1], [0, 0, 1, 1], [], []>} : vector<64x32xf32>, vector<32x32xf32>, vector<64x32xf32> -> vector<64x32xf32>
    %26 = arith.addf %20, %25 : vector<64x32xf32>
    %27 = vector.extract_strided_slice %2 {offsets = [1, 1, 0], sizes = [8, 8, 32], strides = [1, 1, 1]} : vector<10x10x32xf32> to vector<8x8x32xf32>
    %28 = vector.shape_cast %27 : vector<8x8x32xf32> to vector<64x32xf32>
    %c4 = arith.constant 4 : index
    %c0_16 = arith.constant 0 : index
    %c0_17 = arith.constant 0 : index
    %29 = vector.load %arg2[%c4, %c0_16, %c0_17] : memref<9x32x32xf32, #tpu.memory_space<vmem>>, vector<1x32x32xf32>
    %30 = vector.shape_cast %29 : vector<1x32x32xf32> to vector<32x32xf32>
    %cst_18 = arith.constant dense<0.000000e+00> : vector<64x32xf32>
    %31 = tpu.matmul %28, %30, %cst_18 {dimension_numbers = #tpu.dot_dimension_numbers<[1], [0], [0], [1], [0, 0, 1, 1], [], []>} : vector<64x32xf32>, vector<32x32xf32>, vector<64x32xf32> -> vector<64x32xf32>
    %32 = arith.addf %26, %31 : vector<64x32xf32>
    %33 = vector.extract_strided_slice %2 {offsets = [1, 2, 0], sizes = [8, 8, 32], strides = [1, 1, 1]} : vector<10x10x32xf32> to vector<8x8x32xf32>
    %34 = vector.shape_cast %33 : vector<8x8x32xf32> to vector<64x32xf32>
    %c5 = arith.constant 5 : index
    %c0_19 = arith.constant 0 : index
    %c0_20 = arith.constant 0 : index
    %35 = vector.load %arg2[%c5, %c0_19, %c0_20] : memref<9x32x32xf32, #tpu.memory_space<vmem>>, vector<1x32x32xf32>
    %36 = vector.shape_cast %35 : vector<1x32x32xf32> to vector<32x32xf32>
    %cst_21 = arith.constant dense<0.000000e+00> : vector<64x32xf32>
    %37 = tpu.matmul %34, %36, %cst_21 {dimension_numbers = #tpu.dot_dimension_numbers<[1], [0], [0], [1], [0, 0, 1, 1], [], []>} : vector<64x32xf32>, vector<32x32xf32>, vector<64x32xf32> -> vector<64x32xf32>
    %38 = arith.addf %32, %37 : vector<64x32xf32>
    %39 = vector.extract_strided_slice %2 {offsets = [2, 0, 0], sizes = [8, 8, 32], strides = [1, 1, 1]} : vector<10x10x32xf32> to vector<8x8x32xf32>
    %40 = vector.shape_cast %39 : vector<8x8x32xf32> to vector<64x32xf32>
    %c6 = arith.constant 6 : index
    %c0_22 = arith.constant 0 : index
    %c0_23 = arith.constant 0 : index
    %41 = vector.load %arg2[%c6, %c0_22, %c0_23] : memref<9x32x32xf32, #tpu.memory_space<vmem>>, vector<1x32x32xf32>
    %42 = vector.shape_cast %41 : vector<1x32x32xf32> to vector<32x32xf32>
    %cst_24 = arith.constant dense<0.000000e+00> : vector<64x32xf32>
    %43 = tpu.matmul %40, %42, %cst_24 {dimension_numbers = #tpu.dot_dimension_numbers<[1], [0], [0], [1], [0, 0, 1, 1], [], []>} : vector<64x32xf32>, vector<32x32xf32>, vector<64x32xf32> -> vector<64x32xf32>
    %44 = arith.addf %38, %43 : vector<64x32xf32>
    %45 = vector.extract_strided_slice %2 {offsets = [2, 1, 0], sizes = [8, 8, 32], strides = [1, 1, 1]} : vector<10x10x32xf32> to vector<8x8x32xf32>
    %46 = vector.shape_cast %45 : vector<8x8x32xf32> to vector<64x32xf32>
    %c7 = arith.constant 7 : index
    %c0_25 = arith.constant 0 : index
    %c0_26 = arith.constant 0 : index
    %47 = vector.load %arg2[%c7, %c0_25, %c0_26] : memref<9x32x32xf32, #tpu.memory_space<vmem>>, vector<1x32x32xf32>
    %48 = vector.shape_cast %47 : vector<1x32x32xf32> to vector<32x32xf32>
    %cst_27 = arith.constant dense<0.000000e+00> : vector<64x32xf32>
    %49 = tpu.matmul %46, %48, %cst_27 {dimension_numbers = #tpu.dot_dimension_numbers<[1], [0], [0], [1], [0, 0, 1, 1], [], []>} : vector<64x32xf32>, vector<32x32xf32>, vector<64x32xf32> -> vector<64x32xf32>
    %50 = arith.addf %44, %49 : vector<64x32xf32>
    %51 = vector.extract_strided_slice %2 {offsets = [2, 2, 0], sizes = [8, 8, 32], strides = [1, 1, 1]} : vector<10x10x32xf32> to vector<8x8x32xf32>
    %52 = vector.shape_cast %51 : vector<8x8x32xf32> to vector<64x32xf32>
    %c8 = arith.constant 8 : index
    %c0_28 = arith.constant 0 : index
    %c0_29 = arith.constant 0 : index
    %53 = vector.load %arg2[%c8, %c0_28, %c0_29] : memref<9x32x32xf32, #tpu.memory_space<vmem>>, vector<1x32x32xf32>
    %54 = vector.shape_cast %53 : vector<1x32x32xf32> to vector<32x32xf32>
    %cst_30 = arith.constant dense<0.000000e+00> : vector<64x32xf32>
    %55 = tpu.matmul %52, %54, %cst_30 {dimension_numbers = #tpu.dot_dimension_numbers<[1], [0], [0], [1], [0, 0, 1, 1], [], []>} : vector<64x32xf32>, vector<32x32xf32>, vector<64x32xf32> -> vector<64x32xf32>
    %56 = arith.addf %50, %55 : vector<64x32xf32>
    %c0_31 = arith.constant 0 : index
    %c0_32 = arith.constant 0 : index
    %57 = vector.load %arg3[%c0_31, %c0_32] : memref<1x32xf32, #tpu.memory_space<vmem>>, vector<1x32xf32>
    %58 = vector.broadcast %57 : vector<1x32xf32> to vector<64x32xf32>
    %59 = arith.addf %56, %58 : vector<64x32xf32>
    %c0_33 = arith.constant 0 : index
    %c0_34 = arith.constant 0 : index
    %c0_35 = arith.constant 0 : index
    %c0_36 = arith.constant 0 : index
    %60 = vector.load %arg4[%c0_33, %c0_34, %c0_35, %c0_36] : memref<1x8x8x32xf32, #tpu.memory_space<vmem>>, vector<1x8x8x32xf32>
    %61 = vector.shape_cast %60 : vector<1x8x8x32xf32> to vector<64x32xf32>
    %62 = arith.addf %59, %61 : vector<64x32xf32>
    %cst_37 = arith.constant 0.000000e+00 : f32
    %63 = vector.broadcast %cst_37 : f32 to vector<64x32xf32>
    %64 = arith.maximumf %62, %63 : vector<64x32xf32>
    %65 = vector.shape_cast %64 : vector<64x32xf32> to vector<1x8x8x32xf32>
    %c0_38 = arith.constant 0 : index
    %c0_39 = arith.constant 0 : index
    %c0_40 = arith.constant 0 : index
    %c0_41 = arith.constant 0 : index
    %66 = vector.load %arg5[%c0_38, %c0_39, %c0_40, %c0_41] : memref<1x8x8x32xf32, #tpu.memory_space<vmem>>, vector<1x8x8x32xf32>
    tpu.vector_store %arg5[%c0_38, %c0_39, %c0_40, %c0_41], %65 {strides = array<i32>} : memref<1x8x8x32xf32, #tpu.memory_space<vmem>>, vector<1x8x8x32xf32>,
    return
  }
  func.func @transform_0(%arg0: i32) -> (i32, i32, i32, i32) {
    %c0_i32 = arith.constant 0 : i32
    %c0_i32_0 = arith.constant 0 : i32
    %c0_i32_1 = arith.constant 0 : i32
    %c0_i32_2 = arith.constant 0 : i32
    return %arg0, %c0_i32, %c0_i32_0, %c0_i32_1 : i32, i32, i32, i32
  }
  func.func @transform_1(%arg0: i32) -> (i32, i32, i32) {
    %c0_i32 = arith.constant 0 : i32
    %c0_i32_0 = arith.constant 0 : i32
    %c0_i32_1 = arith.constant 0 : i32
    %c0_i32_2 = arith.constant 0 : i32
    return %c0_i32, %c0_i32_0, %c0_i32_1 : i32, i32, i32
  }
  func.func @transform_2(%arg0: i32) -> (i32, i32) {
    %c0_i32 = arith.constant 0 : i32
    %c0_i32_0 = arith.constant 0 : i32
    %c0_i32_1 = arith.constant 0 : i32
    return %c0_i32, %c0_i32_0 : i32, i32
  }
  func.func @transform_3(%arg0: i32) -> (i32, i32, i32, i32) {
    %c0_i32 = arith.constant 0 : i32
    %c0_i32_0 = arith.constant 0 : i32
    %c0_i32_1 = arith.constant 0 : i32
    %c0_i32_2 = arith.constant 0 : i32
    return %arg0, %c0_i32, %c0_i32_0, %c0_i32_1 : i32, i32, i32, i32
  }
  func.func @transform_4(%arg0: i32) -> (i32, i32, i32, i32) {
    %c0_i32 = arith.constant 0 : i32
    %c0_i32_0 = arith.constant 0 : i32
    %c0_i32_1 = arith.constant 0 : i32
    %c0_i32_2 = arith.constant 0 : i32
    return %arg0, %c0_i32, %c0_i32_0, %c0_i32_1 : i32, i32, i32, i32
  }
}

module attributes {stable_mosaic.version = 11 : i64} {
  func.func @kernel(%arg0: i32, %arg1: memref<1x6x6x64xf32, #tpu.memory_space<vmem>>, %arg2: memref<9x64x64xf32, #tpu.memory_space<vmem>>, %arg3: memref<1x64xf32, #tpu.memory_space<vmem>>, %arg4: memref<1x4x4x64xf32, #tpu.memory_space<vmem>>, %arg5: memref<1x1x64xf32, #tpu.memory_space<vmem>>) attributes {dimension_semantics = [#tpu.dimension_semantics<parallel>], iteration_bounds = array<i64: 2>, scalar_prefetch = 0 : i64, scratch_operands = 0 : i64, tpu.core_type = #tpu.core_type<tc>, window_params = [{transform_indices = @transform_0, window_bounds = array<i64: 1, 6, 6, 64>}, {pipeline_mode = #tpu.pipeline_mode<synchronous>, transform_indices = @transform_1, window_bounds = array<i64: 9, 64, 64>}, {pipeline_mode = #tpu.pipeline_mode<synchronous>, transform_indices = @transform_2, window_bounds = array<i64: 1, 64>}, {transform_indices = @transform_3, window_bounds = array<i64: 1, 4, 4, 64>}, {transform_indices = @transform_4, window_bounds = array<i64: 1, 1, 64>}]} {
    %cst = arith.constant 0.000000e+00 : f32
    %0 = vector.broadcast %cst : f32 to vector<16x64xf32>
    %c0 = arith.constant 0 : index
    %c0_0 = arith.constant 0 : index
    %c0_1 = arith.constant 0 : index
    %c0_2 = arith.constant 0 : index
    %1 = vector.load %arg1[%c0, %c0_0, %c0_1, %c0_2] : memref<1x6x6x64xf32, #tpu.memory_space<vmem>>, vector<1x6x6x64xf32>
    %2 = vector.shape_cast %1 : vector<1x6x6x64xf32> to vector<6x6x64xf32>
    %3 = vector.extract_strided_slice %2 {offsets = [0, 0, 0], sizes = [4, 4, 64], strides = [1, 1, 1]} : vector<6x6x64xf32> to vector<4x4x64xf32>
    %4 = vector.shape_cast %3 : vector<4x4x64xf32> to vector<16x64xf32>
    %c0_3 = arith.constant 0 : index
    %c0_4 = arith.constant 0 : index
    %c0_5 = arith.constant 0 : index
    %5 = vector.load %arg2[%c0_3, %c0_4, %c0_5] : memref<9x64x64xf32, #tpu.memory_space<vmem>>, vector<1x64x64xf32>
    %6 = vector.shape_cast %5 : vector<1x64x64xf32> to vector<64x64xf32>
    %cst_6 = arith.constant dense<0.000000e+00> : vector<16x64xf32>
    %7 = tpu.matmul %4, %6, %cst_6 {dimension_numbers = #tpu.dot_dimension_numbers<[1], [0], [0], [1], [0, 0, 1, 1], [], []>} : vector<16x64xf32>, vector<64x64xf32>, vector<16x64xf32> -> vector<16x64xf32>
    %8 = arith.addf %0, %7 : vector<16x64xf32>
    %9 = vector.extract_strided_slice %2 {offsets = [0, 1, 0], sizes = [4, 4, 64], strides = [1, 1, 1]} : vector<6x6x64xf32> to vector<4x4x64xf32>
    %10 = vector.shape_cast %9 : vector<4x4x64xf32> to vector<16x64xf32>
    %c1 = arith.constant 1 : index
    %c0_7 = arith.constant 0 : index
    %c0_8 = arith.constant 0 : index
    %11 = vector.load %arg2[%c1, %c0_7, %c0_8] : memref<9x64x64xf32, #tpu.memory_space<vmem>>, vector<1x64x64xf32>
    %12 = vector.shape_cast %11 : vector<1x64x64xf32> to vector<64x64xf32>
    %cst_9 = arith.constant dense<0.000000e+00> : vector<16x64xf32>
    %13 = tpu.matmul %10, %12, %cst_9 {dimension_numbers = #tpu.dot_dimension_numbers<[1], [0], [0], [1], [0, 0, 1, 1], [], []>} : vector<16x64xf32>, vector<64x64xf32>, vector<16x64xf32> -> vector<16x64xf32>
    %14 = arith.addf %8, %13 : vector<16x64xf32>
    %15 = vector.extract_strided_slice %2 {offsets = [0, 2, 0], sizes = [4, 4, 64], strides = [1, 1, 1]} : vector<6x6x64xf32> to vector<4x4x64xf32>
    %16 = vector.shape_cast %15 : vector<4x4x64xf32> to vector<16x64xf32>
    %c2 = arith.constant 2 : index
    %c0_10 = arith.constant 0 : index
    %c0_11 = arith.constant 0 : index
    %17 = vector.load %arg2[%c2, %c0_10, %c0_11] : memref<9x64x64xf32, #tpu.memory_space<vmem>>, vector<1x64x64xf32>
    %18 = vector.shape_cast %17 : vector<1x64x64xf32> to vector<64x64xf32>
    %cst_12 = arith.constant dense<0.000000e+00> : vector<16x64xf32>
    %19 = tpu.matmul %16, %18, %cst_12 {dimension_numbers = #tpu.dot_dimension_numbers<[1], [0], [0], [1], [0, 0, 1, 1], [], []>} : vector<16x64xf32>, vector<64x64xf32>, vector<16x64xf32> -> vector<16x64xf32>
    %20 = arith.addf %14, %19 : vector<16x64xf32>
    %21 = vector.extract_strided_slice %2 {offsets = [1, 0, 0], sizes = [4, 4, 64], strides = [1, 1, 1]} : vector<6x6x64xf32> to vector<4x4x64xf32>
    %22 = vector.shape_cast %21 : vector<4x4x64xf32> to vector<16x64xf32>
    %c3 = arith.constant 3 : index
    %c0_13 = arith.constant 0 : index
    %c0_14 = arith.constant 0 : index
    %23 = vector.load %arg2[%c3, %c0_13, %c0_14] : memref<9x64x64xf32, #tpu.memory_space<vmem>>, vector<1x64x64xf32>
    %24 = vector.shape_cast %23 : vector<1x64x64xf32> to vector<64x64xf32>
    %cst_15 = arith.constant dense<0.000000e+00> : vector<16x64xf32>
    %25 = tpu.matmul %22, %24, %cst_15 {dimension_numbers = #tpu.dot_dimension_numbers<[1], [0], [0], [1], [0, 0, 1, 1], [], []>} : vector<16x64xf32>, vector<64x64xf32>, vector<16x64xf32> -> vector<16x64xf32>
    %26 = arith.addf %20, %25 : vector<16x64xf32>
    %27 = vector.extract_strided_slice %2 {offsets = [1, 1, 0], sizes = [4, 4, 64], strides = [1, 1, 1]} : vector<6x6x64xf32> to vector<4x4x64xf32>
    %28 = vector.shape_cast %27 : vector<4x4x64xf32> to vector<16x64xf32>
    %c4 = arith.constant 4 : index
    %c0_16 = arith.constant 0 : index
    %c0_17 = arith.constant 0 : index
    %29 = vector.load %arg2[%c4, %c0_16, %c0_17] : memref<9x64x64xf32, #tpu.memory_space<vmem>>, vector<1x64x64xf32>
    %30 = vector.shape_cast %29 : vector<1x64x64xf32> to vector<64x64xf32>
    %cst_18 = arith.constant dense<0.000000e+00> : vector<16x64xf32>
    %31 = tpu.matmul %28, %30, %cst_18 {dimension_numbers = #tpu.dot_dimension_numbers<[1], [0], [0], [1], [0, 0, 1, 1], [], []>} : vector<16x64xf32>, vector<64x64xf32>, vector<16x64xf32> -> vector<16x64xf32>
    %32 = arith.addf %26, %31 : vector<16x64xf32>
    %33 = vector.extract_strided_slice %2 {offsets = [1, 2, 0], sizes = [4, 4, 64], strides = [1, 1, 1]} : vector<6x6x64xf32> to vector<4x4x64xf32>
    %34 = vector.shape_cast %33 : vector<4x4x64xf32> to vector<16x64xf32>
    %c5 = arith.constant 5 : index
    %c0_19 = arith.constant 0 : index
    %c0_20 = arith.constant 0 : index
    %35 = vector.load %arg2[%c5, %c0_19, %c0_20] : memref<9x64x64xf32, #tpu.memory_space<vmem>>, vector<1x64x64xf32>
    %36 = vector.shape_cast %35 : vector<1x64x64xf32> to vector<64x64xf32>
    %cst_21 = arith.constant dense<0.000000e+00> : vector<16x64xf32>
    %37 = tpu.matmul %34, %36, %cst_21 {dimension_numbers = #tpu.dot_dimension_numbers<[1], [0], [0], [1], [0, 0, 1, 1], [], []>} : vector<16x64xf32>, vector<64x64xf32>, vector<16x64xf32> -> vector<16x64xf32>
    %38 = arith.addf %32, %37 : vector<16x64xf32>
    %39 = vector.extract_strided_slice %2 {offsets = [2, 0, 0], sizes = [4, 4, 64], strides = [1, 1, 1]} : vector<6x6x64xf32> to vector<4x4x64xf32>
    %40 = vector.shape_cast %39 : vector<4x4x64xf32> to vector<16x64xf32>
    %c6 = arith.constant 6 : index
    %c0_22 = arith.constant 0 : index
    %c0_23 = arith.constant 0 : index
    %41 = vector.load %arg2[%c6, %c0_22, %c0_23] : memref<9x64x64xf32, #tpu.memory_space<vmem>>, vector<1x64x64xf32>
    %42 = vector.shape_cast %41 : vector<1x64x64xf32> to vector<64x64xf32>
    %cst_24 = arith.constant dense<0.000000e+00> : vector<16x64xf32>
    %43 = tpu.matmul %40, %42, %cst_24 {dimension_numbers = #tpu.dot_dimension_numbers<[1], [0], [0], [1], [0, 0, 1, 1], [], []>} : vector<16x64xf32>, vector<64x64xf32>, vector<16x64xf32> -> vector<16x64xf32>
    %44 = arith.addf %38, %43 : vector<16x64xf32>
    %45 = vector.extract_strided_slice %2 {offsets = [2, 1, 0], sizes = [4, 4, 64], strides = [1, 1, 1]} : vector<6x6x64xf32> to vector<4x4x64xf32>
    %46 = vector.shape_cast %45 : vector<4x4x64xf32> to vector<16x64xf32>
    %c7 = arith.constant 7 : index
    %c0_25 = arith.constant 0 : index
    %c0_26 = arith.constant 0 : index
    %47 = vector.load %arg2[%c7, %c0_25, %c0_26] : memref<9x64x64xf32, #tpu.memory_space<vmem>>, vector<1x64x64xf32>
    %48 = vector.shape_cast %47 : vector<1x64x64xf32> to vector<64x64xf32>
    %cst_27 = arith.constant dense<0.000000e+00> : vector<16x64xf32>
    %49 = tpu.matmul %46, %48, %cst_27 {dimension_numbers = #tpu.dot_dimension_numbers<[1], [0], [0], [1], [0, 0, 1, 1], [], []>} : vector<16x64xf32>, vector<64x64xf32>, vector<16x64xf32> -> vector<16x64xf32>
    %50 = arith.addf %44, %49 : vector<16x64xf32>
    %51 = vector.extract_strided_slice %2 {offsets = [2, 2, 0], sizes = [4, 4, 64], strides = [1, 1, 1]} : vector<6x6x64xf32> to vector<4x4x64xf32>
    %52 = vector.shape_cast %51 : vector<4x4x64xf32> to vector<16x64xf32>
    %c8 = arith.constant 8 : index
    %c0_28 = arith.constant 0 : index
    %c0_29 = arith.constant 0 : index
    %53 = vector.load %arg2[%c8, %c0_28, %c0_29] : memref<9x64x64xf32, #tpu.memory_space<vmem>>, vector<1x64x64xf32>
    %54 = vector.shape_cast %53 : vector<1x64x64xf32> to vector<64x64xf32>
    %cst_30 = arith.constant dense<0.000000e+00> : vector<16x64xf32>
    %55 = tpu.matmul %52, %54, %cst_30 {dimension_numbers = #tpu.dot_dimension_numbers<[1], [0], [0], [1], [0, 0, 1, 1], [], []>} : vector<16x64xf32>, vector<64x64xf32>, vector<16x64xf32> -> vector<16x64xf32>
    %56 = arith.addf %50, %55 : vector<16x64xf32>
    %c0_31 = arith.constant 0 : index
    %c0_32 = arith.constant 0 : index
    %57 = vector.load %arg3[%c0_31, %c0_32] : memref<1x64xf32, #tpu.memory_space<vmem>>, vector<1x64xf32>
    %58 = vector.broadcast %57 : vector<1x64xf32> to vector<16x64xf32>
    %59 = arith.addf %56, %58 : vector<16x64xf32>
    %c0_33 = arith.constant 0 : index
    %c0_34 = arith.constant 0 : index
    %c0_35 = arith.constant 0 : index
    %c0_36 = arith.constant 0 : index
    %60 = vector.load %arg4[%c0_33, %c0_34, %c0_35, %c0_36] : memref<1x4x4x64xf32, #tpu.memory_space<vmem>>, vector<1x4x4x64xf32>
    %61 = vector.shape_cast %60 : vector<1x4x4x64xf32> to vector<16x64xf32>
    %62 = arith.addf %59, %61 : vector<16x64xf32>
    %cst_37 = arith.constant 0.000000e+00 : f32
    %63 = vector.broadcast %cst_37 : f32 to vector<16x64xf32>
    %64 = arith.maximumf %62, %63 : vector<16x64xf32>
    %cst_38 = arith.constant dense<0.000000e+00> : vector<64xf32>
    %65 = vector.multi_reduction <add>, %64, %cst_38 [0] : vector<16x64xf32> to vector<64xf32>
    %66 = vector.shape_cast %65 : vector<64xf32> to vector<1x64xf32>
    %cst_39 = arith.constant 6.250000e-02 : f32
    %67 = vector.broadcast %cst_39 : f32 to vector<1x64xf32>
    %68 = arith.mulf %66, %67 : vector<1x64xf32>
    %69 = vector.shape_cast %68 : vector<1x64xf32> to vector<1x1x64xf32>
    %c0_40 = arith.constant 0 : index
    %c0_41 = arith.constant 0 : index
    %c0_42 = arith.constant 0 : index
    %70 = vector.load %arg5[%c0_40, %c0_41, %c0_42] : memref<1x1x64xf32, #tpu.memory_space<vmem>>, vector<1x1x64xf32>
    tpu.vector_store %arg5[%c0_40, %c0_41, %c0_42], %69 {strides = array<i32>} : memref<1x1x64xf32, #tpu.memory_space<vmem>>, vector<1x1x64xf32>,
    return
  }
  func.func @transform_0(%arg0: i32) -> (i32, i32, i32, i32) {
    %c0_i32 = arith.constant 0 : i32
    %c0_i32_0 = arith.constant 0 : i32
    %c0_i32_1 = arith.constant 0 : i32
    %c0_i32_2 = arith.constant 0 : i32
    return %arg0, %c0_i32, %c0_i32_0, %c0_i32_1 : i32, i32, i32, i32
  }
  func.func @transform_1(%arg0: i32) -> (i32, i32, i32) {
    %c0_i32 = arith.constant 0 : i32
    %c0_i32_0 = arith.constant 0 : i32
    %c0_i32_1 = arith.constant 0 : i32
    %c0_i32_2 = arith.constant 0 : i32
    return %c0_i32, %c0_i32_0, %c0_i32_1 : i32, i32, i32
  }
  func.func @transform_2(%arg0: i32) -> (i32, i32) {
    %c0_i32 = arith.constant 0 : i32
    %c0_i32_0 = arith.constant 0 : i32
    %c0_i32_1 = arith.constant 0 : i32
    return %c0_i32, %c0_i32_0 : i32, i32
  }
  func.func @transform_3(%arg0: i32) -> (i32, i32, i32, i32) {
    %c0_i32 = arith.constant 0 : i32
    %c0_i32_0 = arith.constant 0 : i32
    %c0_i32_1 = arith.constant 0 : i32
    %c0_i32_2 = arith.constant 0 : i32
    return %arg0, %c0_i32, %c0_i32_0, %c0_i32_1 : i32, i32, i32, i32
  }
  func.func @transform_4(%arg0: i32) -> (i32, i32, i32) {
    %c0_i32 = arith.constant 0 : i32
    %c0_i32_0 = arith.constant 0 : i32
    %c0_i32_1 = arith.constant 0 : i32
    return %arg0, %c0_i32, %c0_i32_0 : i32, i32, i32
  }
}

</mosaic_0001>

<bundles_post_ra>
// kernel: _lambda_.7
= control target key start
LH: loop header
LB: loop body
LE: loop exit
PB: predicated region body
PF: predicated region fallthrough
CT: control target
= control target key end

     0   :  { %s4197_s12 = smov 0   ;;  %s5879_s0 = inlined_call_operand.vmem [shape: f32[2,18,18,8], index: 0, kind: input, shape index: {}]   ;;  %s5880_s1 = inlined_call_operand.vmem [shape: f32[9,8,16], index: 1, kind: input, shape index: {}]   ;;  %s5881_s2 = inlined_call_operand.vmem [shape: f32[1,16], index: 2, kind: input, shape index: {}]   ;;  %s5882_s3 = inlined_call_operand.vmem [shape: f32[2,16,16,16], index: 3, kind: output, shape index: {}]  }
   0x1 LB: > { %s3103_s13 = sadd.s32 4294967295, %s4175_s12   ;;  %p3107_p0 = scmp.ge.s32.totalorder %s4175_s12, 1  ;;  %s4175_s12 = sphi %s4197_s12, %s13_s12  }
   0x2   : > { %p137_p1 = scmp.lt.s32.totalorder %s4175_s12, 3 }
   0x4   : > { %p138_p2 = pnand %p3107_p0, %p137_p1 }
   0x6   : > { %141 = sbr.rel (%p138_p2) target bundleno = 511 (0x1ff), region = 32 }
   0xb   : > { %v3111_v0 = vld [vmem:[%s5880_s1 + $0x8] sm:$0xff]  ;;  %p161_p3 = scmp.lt.s32.totalorder %s3103_s13, 1  ;;  %v225_v1 = vld [vmem:[%s5880_s1] sm:$0xff]  ;;  %v3176_v2 = vld [vmem:[%s5880_s1 + $0x10] sm:$0xff]  ;;  %vm274_vm0 = vcmask 1046528   ;;  %vm357_vm1 = vcmask 64512  }
   0xc   : > { %4158 = vmatprep.subr.mxu1 %v3111_v0  ;;  %3708 = vmatprep.subr.mxu0 %v3111_v0  ;;  %v4263_v21 = vld [vmem:[%s5880_s1 + $0x18] sm:$0xff]  ;;  %v4281_v28 = vld [vmem:[%s5880_s1 + $0x20] sm:$0xff]  ;;  %vm936_vm2 = vcmask 1045504   ;;  %vm3015_vm3 = vcmask 130048  }
   0xd   : > { %4159 = vmatpush3.msra.mxu1 %v3111_v0  ;;  %3709 = vmatpush3.msra.mxu0 %v3111_v0  ;;  %s6176_s13 = smov (!%p161_p3, %s3103_s13), 1 }
   0xe   : > { %3758 = vmatprep.subr.mxu1 %v225_v1  ;;  %3808 = vmatprep.subr.mxu0 %v3176_v2  ;;  %s4160_s20 = smul.u32 432, %s6176_s13  ;;  %s3410_s11 = sshll.u32 %s6176_s13, 8 }
   0xf   : > { %s5702_s15 = scalar_lea.vmem %s5882_s3, %s3410_s11 }
  0x10   : > { %s4220_s23 = scalar_lea.vmem %s5879_s0, %s4160_s20 }
  0x11   : > { %v4223_v3 = vld [vmem:[%s4220_s23] sm:$0xff]  ;;  %v4226_v4 = vld [vmem:[%s4220_s23 + $0x8] sm:$0xff]  ;;  %v4238_v10 = vld [vmem:[%s4220_s23 + $0x10] sm:$0x3] }
  0x12   : > { %v4229_v5 = vld [vmem:[%s4220_s23 + $0xc0] sm:$0xff]  ;;  %v275_v6 = vrot.slane %v4223_v3, 1  ;;  %v276_v7 = vrot.slane %v4226_v4, 1  ;;  %v4234_v8 = vld [vmem:[%s4220_s23 + $0xc8] sm:$0xff]  ;;  %v278_v12 = vrot.slane %v4238_v10, 1  ;;  %v4246_v14 = vld [vmem:[%s4220_s23 + $0x18] sm:$0xff] }
  0x13   : > { %v315_v9 = vrot.slane %v4229_v5, 1  ;;  %v316_v11 = vrot.slane %v4234_v8, 1  ;;  %v4243_v13 = vld [vmem:[%s4220_s23 + $0xd0] sm:$0x3]  ;;  %v4251_v17 = vld [vmem:[%s4220_s23 + $0x20] sm:$0xff]  ;;  %v280_v18 = vrot.slane %v4246_v14, 1 }
  0x14   : > { %v277_v15 = vsel %vm274_vm0, %v275_v6, %v276_v7  ;;  %v318_v16 = vrot.slane %v4243_v13, 1  ;;  %v4255_v19 = vld [vmem:[%s4220_s23 + $0xd8] sm:$0xff]  ;;  %v4258_v20 = vld [vmem:[%s4220_s23 + $0xe0] sm:$0xff]  ;;  %v279_v23 = vsel %vm274_vm0, %v276_v7, %v278_v12  ;;  %v281_v24 = vrot.slane %v4251_v17, 1  ;;  %v4273_v26 = vld [vmem:[%s4220_s23 + $0x28] sm:$0x3] }
  0x15   : > { %3710 = vmatprep.mubr.msk.f32.mxu0 %vm357_vm1, %v277_v15  ;;  %v4267_v22 = vsel %vm274_vm0, %v315_v9, %v316_v11  ;;  %v320_v25 = vrot.slane %v4255_v19, 1  ;;  %v4276_v27 = vld [vmem:[%s4220_s23 + $0xe8] sm:$0x3]  ;;  %v321_v30 = vrot.slane %v4258_v20, 1  ;;  %v283_v31 = vrot.slane %v4273_v26, 1  ;;  %v4293_v33 = vld [vmem:[%s4220_s23 + $0x30] sm:$0xff] }
  0x16   : > { %5965 = vst [vmem:[#allocation2_spill] sm:$0xff] %v4267_v22  ;;  %3734 = vmatprep.mubr.msk.f32.mxu1 %vm357_vm1, %v4267_v22  ;;  %3711 = vmatmul.mubr.msk.f32.vlgmr.msra.gmra.mxu0 %vm357_vm1, %v279_v23  ;;  %v4287_v29 = vsel %vm274_vm0, %v316_v11, %v318_v16  ;;  %v323_v32 = vrot.slane %v4276_v27, 1  ;;  %v4296_v34 = vld [vmem:[%s4220_s23 + $0x38] sm:$0xff]  ;;  %v4299_v35 = vld [vmem:[%s4220_s23 + $0xf0] sm:$0xff]  ;;  %v4304_v36 = vsel %vm274_vm0, %v280_v18, %v281_v24  ;;  %v285_v37 = vrot.slane %v4293_v33, 1  ;;  %v4331_v47 = vld [vmem:[%s4220_s23 + $0x48] sm:$0xff] }
  0x17   : > { %5966 = vst [vmem:[#allocation3_spill] sm:$0xff] %v4287_v29  ;;  %3735 = vmatmul.mubr.msk.f32.vlgmr.msra.gmra.mxu1 %vm357_vm1, %v4287_v29  ;;  %3809 = vmatpush3.msra.mxu0 %v3176_v2  ;;  %5967 = vst [vmem:[#allocation4_spill] sm:$0xff] %v4304_v36  ;;  %v286_v38 = vrot.slane %v4296_v34, 1  ;;  %v4309_v39 = vld [vmem:[%s4220_s23 + $0xf8] sm:$0xff]  ;;  %v325_v40 = vrot.slane %v4299_v35, 1  ;;  %v4318_v42 = vsel %vm274_vm0, %v320_v25, %v321_v30  ;;  %v4334_v48 = vld [vmem:[%s4220_s23 + $0x50] sm:$0xff] }
  0x18   : > { %v4313_v41 = vld [vmem:[%s4220_s23 + $0x40] sm:$0x3]  ;;  %3759 = vmatpush3.msra.mxu1 %v225_v1  ;;  %3713 = vmatprep.mubr.msk.f32.mxu0 %vm357_vm1, %v4304_v36  ;;  %5968 = vst [vmem:[#allocation5_spill] sm:$0xff] %v4318_v42  ;;  %v4321_v43 = vsel %vm274_vm0, %v281_v24, %v283_v31  ;;  %v4324_v44 = vsel %vm274_vm0, %v321_v30, %v323_v32  ;;  %v326_v45 = vrot.slane %v4309_v39, 1  ;;  %v290_v52 = vrot.slane %v4331_v47, 1  ;;  %v4345_v53 = vld [vmem:[%s4220_s23 + $0x108] sm:$0xff] }
  0x19   : > { %5969 = vst [vmem:[#allocation6_spill] sm:$0xff] %v4321_v43  ;;  %5970 = vst [vmem:[#allocation7_spill] sm:$0xff] %v4324_v44  ;;  %v4328_v46 = vld [vmem:[%s4220_s23 + $0x100] sm:$0x3]  ;;  %3737 = vmatprep.mubr.msk.f32.mxu1 %vm357_vm1, %v4318_v42  ;;  %v4339_v49 = vsel %vm274_vm0, %v285_v37, %v286_v38  ;;  %v288_v50 = vrot.slane %v4313_v41, 1  ;;  %v4348_v54 = vld [vmem:[%s4220_s23 + $0x110] sm:$0xff]  ;;  %3858 = vmatprep.subr.mxu1 %v4263_v21 }
  0x1a   : > { %5971 = vst [vmem:[#allocation8_spill] sm:$0xff] %v4339_v49  ;;  %v328_v51 = vrot.slane %v4328_v46, 1  ;;  %v4351_v55 = vld [vmem:[%s4220_s23 + $0x60] sm:$0xff]  ;;  %3714 = vmatmul.mubr.msk.f32.gmra.mxu0 %vm357_vm1, %v4321_v43  ;;  %v4357_v56 = vsel %vm274_vm0, %v325_v40, %v326_v45  ;;  %v291_v57 = vrot.slane %v4334_v48, 1  ;;  %v330_v58 = vrot.slane %v4345_v53, 1  ;;  %v4366_v61 = vld [vmem:[%s4220_s23 + $0x68] sm:$0xff]  ;;  %3908 = vmatprep.subr.mxu0 %v4281_v28 }
  0x1b   : > { %5972 = vst [vmem:[#allocation9_spill] sm:$0xff] %v4357_v56  ;;  %v331_v59 = vrot.slane %v4348_v54, 1  ;;  %v4363_v60 = vld [vmem:[%s4220_s23 + $0x58] sm:$0x3]  ;;  %3738 = vmatmul.mubr.msk.f32.gmra.mxu1 %vm357_vm1, %v4324_v44  ;;  %3716 = vmatprep.mubr.msk.f32.mxu0 %vm357_vm1, %v4339_v49  ;;  %v4374_v62 = vsel %vm274_vm0, %v286_v38, %v288_v50  ;;  %v295_v1 = vrot.slane %v4351_v55, 1  ;;  %v4382_v2 = vld [vmem:[%s4220_s23 + $0x120] sm:$0xff] }
  0x1c   : > { %5973 = vst [vmem:[#allocation10_spill] sm:$0xff] %v4374_v62  ;;  %v293_v63 = vrot.slane %v4363_v60, 1  ;;  %v4378_v0 = vld [vmem:[%s4220_s23 + $0x118] sm:$0x3]  ;;  %v4385_v6 = vld [vmem:[%s4220_s23 + $0x128] sm:$0xff]  ;;  %3740 = vmatprep.mubr.msk.f32.mxu1 %vm357_vm1, %v4357_v56  ;;  %v4390_v7 = vsel %vm274_vm0, %v326_v45, %v328_v51  ;;  %v4393_v9 = vsel %vm274_vm0, %v290_v52, %v291_v57  ;;  %v296_v12 = vrot.slane %v4366_v61, 1 }
  0x1d   : > { %5974 = vst [vmem:[#allocation11_spill] sm:$0xff] %v4390_v7  ;;  %5975 = vst [vmem:[#allocation12_spill] sm:$0xff] %v4393_v9  ;;  %v333_v11 = vrot.slane %v4378_v0, 1  ;;  %v4398_v15 = vld [vmem:[%s4220_s23 + $0x70] sm:$0x3]  ;;  %v4404_v18 = vsel %vm274_vm0, %v330_v58, %v331_v59  ;;  %v335_v23 = vrot.slane %v4382_v2, 1 }
  0x1e   : > { %v4401_v16 = vld [vmem:[%s4220_s23 + $0x130] sm:$0x3]  ;;  %5976 = vst [vmem:[#allocation13_spill] sm:$0xff] %v4404_v18  ;;  %v336_v24 = vrot.slane %v4385_v6, 1  ;;  %v4409_v25 = vld [vmem:[%s4220_s23 + $0x78] sm:$0xff]  ;;  %v4412_v30 = vld [vmem:[%s4220_s23 + $0x80] sm:$0xff]  ;;  %3717 = vmatmul.mubr.msk.f32.gmra.mxu0 %vm357_vm1, %v4374_v62  ;;  %v4427_v37 = vsel %vm274_vm0, %v291_v57, %v293_v63  ;;  %v4437_v50 = vsel %vm274_vm0, %v295_v1, %v296_v12 }
  0x1f   : > { %v4417_v31 = vld [vmem:[%s4220_s23 + $0x138] sm:$0xff]  ;;  %v4420_v32 = vld [vmem:[%s4220_s23 + $0x140] sm:$0xff]  ;;  %3741 = vmatmul.mubr.msk.f32.gmra.mxu1 %vm357_vm1, %v4390_v7  ;;  %3719 = vmatprep.mubr.msk.f32.mxu0 %vm357_vm1, %v4393_v9  ;;  %5977 = vst [vmem:[#allocation14_spill] sm:$0xff] %v4427_v37  ;;  %v298_v38 = vrot.slane %v4398_v15, 1  ;;  %v338_v40 = vrot.slane %v4401_v16, 1  ;;  %v4434_v45 = vsel %vm274_vm0, %v331_v59, %v333_v11  ;;  %5979 = vst [vmem:[#allocation16_spill] sm:$0xff] %v4437_v50 }
  0x20   : > { %3743 = vmatprep.mubr.msk.f32.mxu1 %vm357_vm1, %v4404_v18  ;;  %5978 = vst [vmem:[#allocation15_spill] sm:$0xff] %v4434_v45  ;;  %v300_v51 = vrot.slane %v4409_v25, 1  ;;  %v301_v52 = vrot.slane %v4412_v30, 1  ;;  %v4442_v57 = vld [vmem:[%s4220_s23 + $0x88] sm:$0x3]  ;;  %v4448_v63 = vsel %vm274_vm0, %v335_v23, %v336_v24  ;;  %v340_v7 = vrot.slane %v4417_v31, 1 }
  0x21   : > { %v4445_v58 = vld [vmem:[%s4220_s23 + $0x148] sm:$0x3]  ;;  %5980 = vst [vmem:[#allocation17_spill] sm:$0xff] %v4448_v63  ;;  %v341_v18 = vrot.slane %v4420_v32, 1  ;;  %v4453_v59 = vld [vmem:[%s4220_s23 + $0x90] sm:$0xff]  ;;  %v4456_v1 = vld [vmem:[%s4220_s23 + $0x98] sm:$0xff]  ;;  %v4471_v23 = vsel %vm274_vm0, %v296_v12, %v298_v38  ;;  %v4478_v29 = vsel %vm274_vm0, %v336_v24, %v338_v40 }
  0x22   : > { %3720 = vmatmul.mubr.msk.f32.gmra.mxu0 %vm357_vm1, %v4427_v37  ;;  %v4461_v11 = vld [vmem:[%s4220_s23 + $0x150] sm:$0xff]  ;;  %v4464_v56 = vld [vmem:[%s4220_s23 + $0x158] sm:$0xff]  ;;  %5982 = vst [vmem:[#allocation19_spill] sm:$0xff] %v4471_v23  ;;  %v303_v44 = vrot.slane %v4442_v57, 1  ;;  %v343_v42 = vrot.slane %v4445_v58, 1  ;;  %5983 = vst [vmem:[#allocation20_spill] sm:$0xff] %v4478_v29 }
  0x23   : > { %5981 = vst [vmem:[#allocation18_spill] sm:$0xff] %v4464_v56  ;;  %3744 = vmatmul.mubr.msk.f32.gmra.mxu1 %vm357_vm1, %v4434_v45  ;;  %3722 = vmatprep.mubr.msk.f32.mxu0 %vm357_vm1, %v4437_v50  ;;  %v4481_v45 = vsel %vm274_vm0, %v300_v51, %v301_v52  ;;  %v305_v22 = vrot.slane %v4453_v59, 1  ;;  %v306_v12 = vrot.slane %v4456_v1, 1  ;;  %v4486_v38 = vld [vmem:[%s4220_s23 + $0xa0] sm:$0x3]  ;;  %v4489_v50 = vsel %vm274_vm0, %v340_v7, %v341_v18  ;;  %v4497_v24 = vld [vmem:[%s4220_s23 + $0xa8] sm:$0xff] }
  0x24   : > { %3746 = vmatprep.mubr.msk.f32.mxu1 %vm357_vm1, %v4448_v63  ;;  %5984 = vst [vmem:[#allocation21_spill] sm:$0xff] %v4481_v45  ;;  %5985 = vst [vmem:[#allocation22_spill] sm:$0xff] %v4489_v50  ;;  %v345_v37 = vrot.slane %v4461_v11, 1  ;;  %v346_v9 = vrot.slane %v4464_v56, 1  ;;  %v4494_v63 = vld [vmem:[%s4220_s23 + $0x160] sm:$0x3]  ;;  %v4515_v7 = vsel %vm274_vm0, %v301_v52, %v303_v44  ;;  %v4518_v49 = vsel %vm274_vm0, %v341_v18, %v343_v42 }
  0x25   : > { %v4500_v40 = vld [vmem:[%s4220_s23 + $0xb0] sm:$0xff]  ;;  %v4505_v51 = vld [vmem:[%s4220_s23 + $0x168] sm:$0xff]  ;;  %5987 = vst [vmem:[#allocation24_spill] sm:$0xff] %v4515_v7  ;;  %5988 = vst [vmem:[#allocation25_spill] sm:$0xff] %v4518_v49  ;;  %v308_v43 = vrot.slane %v4486_v38, 1  ;;  %v348_v36 = vrot.slane %v4494_v63, 1 }
  0x26   : > { %3723 = vmatmul.mubr.msk.f32.gmra.mxu0 %vm357_vm1, %v4471_v23  ;;  %v4508_v62 = vld [vmem:[%s4220_s23 + $0x170] sm:$0xff]  ;;  %v4524_v23 = vsel %vm274_vm0, %v305_v22, %v306_v12  ;;  %v4530_v56 = vld [vmem:[%s4220_s23 + $0xb8] sm:$0x3]  ;;  %v4533_v44 = vsel %vm274_vm0, %v345_v37, %v346_v9  ;;  %v350_v42 = vrot.slane %v4505_v51, 1 }
  0x27   : > { %5986 = vst [vmem:[#allocation23_spill] sm:$0xff] %v4508_v62  ;;  %3747 = vmatmul.mubr.msk.f32.gmra.mxu1 %vm357_vm1, %v4478_v29  ;;  %3725 = vmatprep.mubr.msk.f32.mxu0 %vm357_vm1, %v4481_v45  ;;  %5989 = vst [vmem:[#allocation26_spill] sm:$0xff] %v4524_v23  ;;  %v310_v29 = vrot.slane %v4497_v24, 1  ;;  %v311_v45 = vrot.slane %v4500_v40, 1  ;;  %v351_v18 = vrot.slane %v4508_v62, 1  ;;  %v4547_v22 = vsel %vm274_vm0, %v306_v12, %v308_v43 }
  0x28   : > { %3749 = vmatprep.mubr.msk.f32.mxu1 %vm357_vm1, %v4489_v50  ;;  %5990 = vst [vmem:[#allocation27_spill] sm:$0xff] %v4533_v44  ;;  %v4538_v52 = vld [vmem:[%s4220_s23 + $0x178] sm:$0x3]  ;;  %5991 = vst [vmem:[#allocation28_spill] sm:$0xff] %v4547_v22  ;;  %v313_v37 = vrot.slane %v4530_v56, 1  ;;  %v937_v50 = vrot.slane %v4223_v3, 2  ;;  %v4554_v62 = vsel %vm274_vm0, %v346_v9, %v348_v36 }
  0x29   : > { %5992 = vst [vmem:[#allocation29_spill] sm:$0xff] %v4554_v62  ;;  %v4562_v43 = vsel %vm274_vm0, %v350_v42, %v351_v18  ;;  %v940_v12 = vrot.slane %v4238_v10, 2  ;;  %v942_v10 = vrot.slane %v4246_v14, 2  ;;  %v943_v42 = vrot.slane %v4251_v17, 2 }
  0x2a   : > { %3726 = vmatmul.mubr.msk.f32.gmra.mxu0 %vm357_vm1, %v4515_v7  ;;  %v4557_v7 = vsel %vm274_vm0, %v310_v29, %v311_v45  ;;  %5994 = vst [vmem:[#allocation31_spill] sm:$0xff] %v4562_v43  ;;  %v4572_v29 = vsel %vm274_vm0, %v311_v45, %v313_v37  ;;  %v945_v37 = vrot.slane %v4273_v26, 2  ;;  %v950_v26 = vrot.slane %v4313_v41, 2 }
  0x2b   : > { %3750 = vmatmul.mubr.msk.f32.gmra.mxu1 %vm357_vm1, %v4518_v49  ;;  %3728 = vmatprep.mubr.msk.f32.mxu0 %vm357_vm1, %v4524_v23  ;;  %5993 = vst [vmem:[#allocation30_spill] sm:$0xff] %v4557_v7  ;;  %v353_v49 = vrot.slane %v4538_v52, 1  ;;  %v938_v23 = vrot.slane %v4226_v4, 2  ;;  %5995 = vst [vmem:[#allocation32_spill] sm:$0xff] %v4572_v29  ;;  %v955_v41 = vrot.slane %v4363_v60, 2 }
  0x2c   : > { %3752 = vmatprep.mubr.msk.f32.mxu1 %vm357_vm1, %v4533_v44 }
  0x2d   : > { %v4577_v36 = vsel %vm274_vm0, %v351_v18, %v353_v49  ;;  %v939_v9 = vsel %vm936_vm2, %v937_v50, %v938_v23  ;;  %v941_v45 = vsel %vm936_vm2, %v938_v23, %v940_v12  ;;  %v947_v49 = vrot.slane %v4293_v33, 2  ;;  %v4612_v23 = vld [vmem:[%s5880_s1 + $0x30] sm:$0xff] }
  0x2e   : > { %3729 = vmatmul.mubr.msk.f32.gmra.mxu0 %vm357_vm1, %v4547_v22  ;;  %5996 = vst [vmem:[#allocation33_spill] sm:$0xff] %v4577_v36  ;;  %v948_v50 = vrot.slane %v4296_v34, 2  ;;  %v4595_v18 = vsel %vm936_vm2, %v942_v10, %v943_v42 }
  0x2f   : > { %3753 = vmatmul.mubr.msk.f32.gmra.mxu1 %vm357_vm1, %v4554_v62  ;;  %3731 = vmatprep.mubr.msk.f32.mxu0 %vm357_vm1, %v4557_v7 }
  0x30   : > { %3755 = vmatprep.mubr.msk.f32.mxu1 %vm357_vm1, %v4562_v43  ;;  %v4618_v12 = vsel %vm936_vm2, %v947_v49, %v948_v50 }
  0x32   : > { %3732 = vmatmul.mubr.msk.f32.gmra.mxu0 %vm357_vm1, %v4572_v29 }
  0x33   : > { %3756 = vmatmul.mubr.msk.f32.gmra.mxu1 %vm357_vm1, %v4577_v36  ;;  %3810 = vmatprep.mubr.msk.f32.mxu0 %vm357_vm1, %v939_v9  ;;  %v4600_v9 = vld [vmem:[%s5880_s1 + $0x28] sm:$0xff] }
  0x34   : > { %3760 = vmatprep.mubr.msk.f32.mxu1 %vm357_vm1, %v4223_v3  ;;  %v4606_v3 = vsel %vm936_vm2, %v943_v42, %v945_v37  ;;  %v957_v42 = vrot.slane %v4351_v55, 2  ;;  %v960_v37 = vrot.slane %v4398_v15, 2 }
  0x36   : > { %3811 = vmatmul.mubr.msk.f32.vlgmr.msra.gmra.mxu0 %vm357_vm1, %v941_v45  ;;  %v958_v45 = vrot.slane %v4366_v61, 2 }
  0x37   : > { %3761 = vmatmul.mubr.msk.f32.vlgmr.msra.gmra.mxu1 %vm357_vm1, %v4226_v4  ;;  %3909 = vmatpush3.msra.mxu0 %v4281_v28  ;;  %v952_v4 = vrot.slane %v4331_v47, 2  ;;  %v953_v28 = vrot.slane %v4334_v48, 2 }
  0x38   : > { %3859 = vmatpush3.msra.mxu1 %v4263_v21  ;;  %3763 = vmatprep.mubr.msk.f32.mxu1 %vm357_vm1, %v4246_v14  ;;  %v4633_v21 = vsel %vm936_vm2, %v948_v50, %v950_v26  ;;  %v4656_v49 = vsel %vm936_vm2, %v957_v42, %v958_v45  ;;  %v962_v50 = vrot.slane %v4409_v25, 2  ;;  %v963_v26 = vrot.slane %v4412_v30, 2 }
  0x39   : > { %3813 = vmatprep.mubr.msk.f32.mxu0 %vm357_vm1, %v4595_v18  ;;  %3958 = vmatprep.subr.mxu1 %v4600_v9  ;;  %v4639_v10 = vsel %vm936_vm2, %v952_v4, %v953_v28  ;;  %v4650_v60 = vsel %vm936_vm2, %v953_v28, %v955_v41  ;;  %v4667_v15 = vsel %vm936_vm2, %v958_v45, %v960_v37  ;;  %v965_v4 = vrot.slane %v4442_v57, 2 }
  0x3a   : > { %3814 = vmatmul.mubr.msk.f32.gmra.mxu0 %vm357_vm1, %v4606_v3  ;;  %4008 = vmatprep.subr.mxu0 %v4612_v23  ;;  %5997 = vst [vmem:[#allocation34_spill] sm:$0xff] %v4667_v15  ;;  %v4673_v28 = vsel %vm936_vm2, %v962_v50, %v963_v26  ;;  %v967_v41 = vrot.slane %v4453_v59, 2  ;;  %v968_v42 = vrot.slane %v4456_v1, 2  ;;  %v970_v45 = vrot.slane %v4486_v38, 2 }
  0x3b   : > { %3764 = vmatmul.mubr.msk.f32.gmra.mxu1 %vm357_vm1, %v4251_v17  ;;  %3816 = vmatprep.mubr.msk.f32.mxu0 %vm357_vm1, %v4618_v12  ;;  %v4684_v57 = vsel %vm936_vm2, %v963_v26, %v965_v4  ;;  %v972_v50 = vrot.slane %v4497_v24, 2  ;;  %v975_v26 = vrot.slane %v4530_v56, 2 }
  0x3c   : > { %3766 = vmatprep.mubr.msk.f32.mxu1 %vm357_vm1, %v4293_v33  ;;  %5998 = vst [vmem:[#allocation35_spill] sm:$0xff] %v4684_v57  ;;  %v4690_v37 = vsel %vm936_vm2, %v967_v41, %v968_v42  ;;  %v4701_v38 = vsel %vm936_vm2, %v968_v42, %v970_v45  ;;  %v977_v41 = vrot.slane %v4229_v5, 2  ;;  %v980_v42 = vrot.slane %v4243_v13, 2 }
  0x3d   : > { %5999 = vst [vmem:[#allocation36_spill] sm:$0xff] %v4701_v38 }
  0x3e   : > { %3817 = vmatmul.mubr.msk.f32.gmra.mxu0 %vm357_vm1, %v4633_v21 }
  0x3f   : > { %3767 = vmatmul.mubr.msk.f32.gmra.mxu1 %vm357_vm1, %v4296_v34  ;;  %3819 = vmatprep.mubr.msk.f32.mxu0 %vm357_vm1, %v4639_v10 }
  0x40   : > { %3769 = vmatprep.mubr.msk.f32.mxu1 %vm357_vm1, %v4331_v47 }
  0x42   : > { %3820 = vmatmul.mubr.msk.f32.gmra.mxu0 %vm357_vm1, %v4650_v60 }
  0x43   : > { %3770 = vmatmul.mubr.msk.f32.gmra.mxu1 %vm357_vm1, %v4334_v48  ;;  %3822 = vmatprep.mubr.msk.f32.mxu0 %vm357_vm1, %v4656_v49 }
  0x44   : > { %3772 = vmatprep.mubr.msk.f32.mxu1 %vm357_vm1, %v4351_v55 }
  0x46   : > { %3823 = vmatmul.mubr.msk.f32.gmra.mxu0 %vm357_vm1, %v4667_v15  ;;  %v973_v15 = vrot.slane %v4500_v40, 2 }
  0x47   : > { %3773 = vmatmul.mubr.msk.f32.gmra.mxu1 %vm357_vm1, %v4366_v61  ;;  %3825 = vmatprep.mubr.msk.f32.mxu0 %vm357_vm1, %v4673_v28 }
  0x48   : > { %3775 = vmatprep.mubr.msk.f32.mxu1 %vm357_vm1, %v4409_v25  ;;  %v4707_v4 = vsel %vm936_vm2, %v972_v50, %v973_v15  ;;  %v4718_v56 = vsel %vm936_vm2, %v973_v15, %v975_v26  ;;  %v982_v50 = vrot.slane %v4255_v19, 2  ;;  %v985_v15 = vrot.slane %v4276_v27, 2 }
  0x49   : > { %6000 = vst [vmem:[#allocation37_spill] sm:$0xff] %v4718_v56 }
  0x4a   : > { %3826 = vmatmul.mubr.msk.f32.gmra.mxu0 %vm357_vm1, %v4684_v57  ;;  %v978_v57 = vrot.slane %v4234_v8, 2 }
  0x4b   : > { %3776 = vmatmul.mubr.msk.f32.gmra.mxu1 %vm357_vm1, %v4412_v30  ;;  %3828 = vmatprep.mubr.msk.f32.mxu0 %vm357_vm1, %v4690_v37 }
  0x4c   : > { %3778 = vmatprep.mubr.msk.f32.mxu1 %vm357_vm1, %v4453_v59  ;;  %v4724_v45 = vsel %vm936_vm2, %v977_v41, %v978_v57  ;;  %v4735_v13 = vsel %vm936_vm2, %v978_v57, %v980_v42  ;;  %v987_v41 = vrot.slane %v4299_v35, 2  ;;  %v990_v57 = vrot.slane %v4328_v46, 2 }
  0x4d   : > { %6001 = vst [vmem:[#allocation38_spill] sm:$0xff] %v4735_v13 }
  0x4e   : > { %3829 = vmatmul.mubr.msk.f32.gmra.mxu0 %vm357_vm1, %v4701_v38  ;;  %v983_v38 = vrot.slane %v4258_v20, 2 }
  0x4f   : > { %3779 = vmatmul.mubr.msk.f32.gmra.mxu1 %vm357_vm1, %v4456_v1  ;;  %3831 = vmatprep.mubr.msk.f32.mxu0 %vm357_vm1, %v4707_v4 }
  0x50   : > { %3781 = vmatprep.mubr.msk.f32.mxu1 %vm357_vm1, %v4497_v24  ;;  %v4741_v26 = vsel %vm936_vm2, %v982_v50, %v983_v38  ;;  %v4752_v27 = vsel %vm936_vm2, %v983_v38, %v985_v15  ;;  %v992_v50 = vrot.slane %v4345_v53, 2  ;;  %v995_v38 = vrot.slane %v4378_v0, 2 }
  0x51   : > { %6002 = vst [vmem:[#allocation39_spill] sm:$0xff] %v4752_v27 }
  0x52   : > { %3832 = vmatmul.mubr.msk.f32.gmra.mxu0 %vm357_vm1, %v4718_v56  ;;  %v988_v56 = vrot.slane %v4309_v39, 2 }
  0x53   : > { %3782 = vmatmul.mubr.msk.f32.gmra.mxu1 %vm357_vm1, %v4500_v40  ;;  %3834 = vmatprep.mubr.msk.f32.mxu0 %vm357_vm1, %v4724_v45 }
  0x54   : > { %3784 = vmatprep.mubr.msk.f32.mxu1 %vm357_vm1, %v4229_v5  ;;  %v4758_v42 = vsel %vm936_vm2, %v987_v41, %v988_v56  ;;  %v4769_v46 = vsel %vm936_vm2, %v988_v56, %v990_v57  ;;  %v997_v41 = vrot.slane %v4382_v2, 2  ;;  %v1000_v56 = vrot.slane %v4401_v16, 2 }
  0x55   : > { %6003 = vst [vmem:[#allocation40_spill] sm:$0xff] %v4769_v46 }
  0x56   : > { %3835 = vmatmul.mubr.msk.f32.gmra.mxu0 %vm357_vm1, %v4735_v13  ;;  %v993_v13 = vrot.slane %v4348_v54, 2 }
  0x57   : > { %3785 = vmatmul.mubr.msk.f32.gmra.mxu1 %vm357_vm1, %v4234_v8  ;;  %3837 = vmatprep.mubr.msk.f32.mxu0 %vm357_vm1, %v4741_v26 }
  0x58   : > { %3787 = vmatprep.mubr.msk.f32.mxu1 %vm357_vm1, %v4255_v19  ;;  %v4775_v15 = vsel %vm936_vm2, %v992_v50, %v993_v13  ;;  %v4786_v0 = vsel %vm936_vm2, %v993_v13, %v995_v38  ;;  %v1002_v50 = vrot.slane %v4417_v31, 2  ;;  %v1005_v13 = vrot.slane %v4445_v58, 2 }
  0x59   : > { %6004 = vst [vmem:[#allocation41_spill] sm:$0xff] %v4775_v15  ;;  %6005 = vst [vmem:[#allocation42_spill] sm:$0xff] %v4786_v0 }
  0x5a   : > { %3838 = vmatmul.mubr.msk.f32.gmra.mxu0 %vm357_vm1, %v4752_v27  ;;  %v998_v27 = vrot.slane %v4385_v6, 2 }
  0x5b   : > { %3788 = vmatmul.mubr.msk.f32.gmra.mxu1 %vm357_vm1, %v4258_v20  ;;  %3840 = vmatprep.mubr.msk.f32.mxu0 %vm357_vm1, %v4758_v42 }
  0x5c   : > { %3790 = vmatprep.mubr.msk.f32.mxu1 %vm357_vm1, %v4299_v35  ;;  %v4792_v57 = vsel %vm936_vm2, %v997_v41, %v998_v27  ;;  %v4803_v16 = vsel %vm936_vm2, %v998_v27, %v1000_v56  ;;  %v1007_v41 = vrot.slane %v4461_v11, 2  ;;  %v1010_v27 = vrot.slane %v4494_v63, 2 }
  0x5d   : > { %6006 = vst [vmem:[#allocation43_spill] sm:$0xff] %v4792_v57  ;;  %6007 = vst [vmem:[#allocation44_spill] sm:$0xff] %v4803_v16 }
  0x5e   : > { %3841 = vmatmul.mubr.msk.f32.gmra.mxu0 %vm357_vm1, %v4769_v46  ;;  %v1003_v46 = vrot.slane %v4420_v32, 2 }
  0x5f   : > { %3791 = vmatmul.mubr.msk.f32.gmra.mxu1 %vm357_vm1, %v4309_v39  ;;  %3843 = vmatprep.mubr.msk.f32.mxu0 %vm357_vm1, %v4775_v15 }
  0x60   : > { %3793 = vmatprep.mubr.msk.f32.mxu1 %vm357_vm1, %v4345_v53  ;;  %v4809_v38 = vsel %vm936_vm2, %v1002_v50, %v1003_v46  ;;  %v4820_v58 = vsel %vm936_vm2, %v1003_v46, %v1005_v13  ;;  %v1012_v50 = vrot.slane %v4505_v51, 2  ;;  %v1015_v46 = vrot.slane %v4538_v52, 2  ;;  %v6011_v52 = vld [vmem:[#allocation4_spill] sm:$0xff] }
  0x62   : > { %3844 = vmatmul.mubr.msk.f32.gmra.mxu0 %vm357_vm1, %v4786_v0  ;;  %v6008_v0 = vld [vmem:[#allocation18_spill] sm:$0xff] }
  0x63   : > { %3794 = vmatmul.mubr.msk.f32.gmra.mxu1 %vm357_vm1, %v4348_v54  ;;  %3846 = vmatprep.mubr.msk.f32.mxu0 %vm357_vm1, %v4792_v57  ;;  %v1008_v15 = vrot.slane %v6008_v0, 2 }
  0x64   : > { %3796 = vmatprep.mubr.msk.f32.mxu1 %vm357_vm1, %v4382_v2 }
  0x65   : > { %v4826_v56 = vsel %vm936_vm2, %v1007_v41, %v1008_v15  ;;  %v4837_v63 = vsel %vm936_vm2, %v1008_v15, %v1010_v27  ;;  %v6012_v41 = vld [vmem:[#allocation6_spill] sm:$0xff] }
  0x66   : > { %3847 = vmatmul.mubr.msk.f32.gmra.mxu0 %vm357_vm1, %v4803_v16  ;;  %v6009_v16 = vld [vmem:[#allocation23_spill] sm:$0xff]  ;;  %v4877_v27 = vld [vmem:[%s5880_s1 + $0x40] sm:$0xff] }
  0x67   : > { %3797 = vmatmul.mubr.msk.f32.gmra.mxu1 %vm357_vm1, %v4385_v6  ;;  %3849 = vmatprep.mubr.msk.f32.mxu0 %vm357_vm1, %v4809_v38  ;;  %v1013_v57 = vrot.slane %v6009_v16, 2 }
  0x68   : > { %3799 = vmatprep.mubr.msk.f32.mxu1 %vm357_vm1, %v4417_v31 }
  0x69   : > { %v4843_v13 = vsel %vm936_vm2, %v1012_v50, %v1013_v57  ;;  %v4852_v15 = vsel %vm936_vm2, %v1013_v57, %v1015_v46  ;;  %v4869_v57 = vld [vmem:[%s5880_s1 + $0x38] sm:$0xff]  ;;  %v6014_v50 = vld [vmem:[#allocation10_spill] sm:$0xff]  ;;  %v6018_v46 = vld [vmem:[#allocation19_spill] sm:$0xff] }
  0x6a   : > { %3850 = vmatmul.mubr.msk.f32.gmra.mxu0 %vm357_vm1, %v4820_v58  ;;  %6010 = vst [vmem:[#allocation18_spill] sm:$0xff] %v4852_v15 }
  0x6b   : > { %3800 = vmatmul.mubr.msk.f32.gmra.mxu1 %vm357_vm1, %v4420_v32  ;;  %3852 = vmatprep.mubr.msk.f32.mxu0 %vm357_vm1, %v4826_v56 }
  0x6c   : > { %3802 = vmatprep.mubr.msk.f32.mxu1 %vm357_vm1, %v4461_v11 }
  0x6e   : > { %3853 = vmatmul.mubr.msk.f32.gmra.mxu0 %vm357_vm1, %v4837_v63 }
  0x6f   : > { %3803 = vmatmul.mubr.msk.f32.gmra.mxu1 %vm357_vm1, %v6008_v0  ;;  %3855 = vmatprep.mubr.msk.f32.mxu0 %vm357_vm1, %v4843_v13 }
  0x70   : > { %3805 = vmatprep.mubr.msk.f32.mxu1 %vm357_vm1, %v4505_v51 }
  0x72   : > { %3856 = vmatmul.mubr.msk.f32.gmra.mxu0 %vm357_vm1, %v4852_v15 }
  0x73   : > { %3806 = vmatmul.mubr.msk.f32.gmra.mxu1 %vm357_vm1, %v6009_v16  ;;  %3910 = vmatprep.mubr.msk.f32.mxu0 %vm357_vm1, %v6011_v52  ;;  %v6019_v52 = vld [vmem:[#allocation21_spill] sm:$0xff] }
  0x74   : > { %3860 = vmatprep.mubr.msk.f32.mxu1 %vm357_vm1, %v4246_v14  ;;  %v6013_v14 = vld [vmem:[#allocation8_spill] sm:$0xff] }
  0x76   : > { %3911 = vmatmul.mubr.msk.f32.vlgmr.msra.gmra.mxu0 %vm357_vm1, %v6012_v41  ;;  %v6020_v41 = vld [vmem:[#allocation24_spill] sm:$0xff] }
  0x77   : > { %3861 = vmatmul.mubr.msk.f32.vlgmr.msra.gmra.mxu1 %vm357_vm1, %v4251_v17  ;;  %4009 = vmatpush3.msra.mxu0 %v4612_v23  ;;  %v6015_v17 = vld [vmem:[#allocation12_spill] sm:$0xff] }
  0x78   : > { %3959 = vmatpush3.msra.mxu1 %v4600_v9  ;;  %3863 = vmatprep.mubr.msk.f32.mxu1 %vm357_vm1, %v4293_v33  ;;  %v6016_v9 = vld [vmem:[#allocation14_spill] sm:$0xff]  ;;  %v6017_v23 = vld [vmem:[#allocation16_spill] sm:$0xff] }
  0x79   : > { %3913 = vmatprep.mubr.msk.f32.mxu0 %vm357_vm1, %v6013_v14  ;;  %4058 = vmatprep.subr.mxu1 %v4869_v57 }
  0x7a   : > { %3914 = vmatmul.mubr.msk.f32.gmra.mxu0 %vm357_vm1, %v6014_v50  ;;  %4108 = vmatprep.subr.mxu0 %v4877_v27 }
  0x7b   : > { %3864 = vmatmul.mubr.msk.f32.gmra.mxu1 %vm357_vm1, %v4296_v34  ;;  %3916 = vmatprep.mubr.msk.f32.mxu0 %vm357_vm1, %v6015_v17 }
  0x7c   : > { %3866 = vmatprep.mubr.msk.f32.mxu1 %vm357_vm1, %v4331_v47 }
  0x7e   : > { %3917 = vmatmul.mubr.msk.f32.gmra.mxu0 %vm357_vm1, %v6016_v9 }
  0x7f   : > { %3867 = vmatmul.mubr.msk.f32.gmra.mxu1 %vm357_vm1, %v4334_v48  ;;  %3919 = vmatprep.mubr.msk.f32.mxu0 %vm357_vm1, %v6017_v23  ;;  %v6021_v23 = vld [vmem:[#allocation26_spill] sm:$0xff] }
  0x80   : > { %3869 = vmatprep.mubr.msk.f32.mxu1 %vm357_vm1, %v4351_v55 }
  0x82   : > { %3920 = vmatmul.mubr.msk.f32.gmra.mxu0 %vm357_vm1, %v6018_v46 }
  0x83   : > { %3870 = vmatmul.mubr.msk.f32.gmra.mxu1 %vm357_vm1, %v4366_v61  ;;  %3922 = vmatprep.mubr.msk.f32.mxu0 %vm357_vm1, %v6019_v52  ;;  %v4991_v52 = vld [vmem:[%s4220_s23 + $0x190] sm:$0x3] }
  0x84   : > { %3872 = vmatprep.mubr.msk.f32.mxu1 %vm357_vm1, %v4409_v25 }
  0x86   : > { %3923 = vmatmul.mubr.msk.f32.gmra.mxu0 %vm357_vm1, %v6020_v41  ;;  %v4978_v41 = vld [vmem:[%s4220_s23 + $0x188] sm:$0xff] }
  0x87   : > { %3873 = vmatmul.mubr.msk.f32.gmra.mxu1 %vm357_vm1, %v4412_v30  ;;  %3925 = vmatprep.mubr.msk.f32.mxu0 %vm357_vm1, %v6021_v23  ;;  %v6022_v23 = vld [vmem:[#allocation2_spill] sm:$0xff] }
  0x88   : > { %3875 = vmatprep.mubr.msk.f32.mxu1 %vm357_vm1, %v4453_v59 }
  0x8a   : > { %3926 = vmatmul.mubr.msk.f32.gmra.mxu0 %vm357_vm1, %v4547_v22  ;;  %v6023_v22 = vld [vmem:[#allocation3_spill] sm:$0xff] }
  0x8b   : > { %3876 = vmatmul.mubr.msk.f32.gmra.mxu1 %vm357_vm1, %v4456_v1  ;;  %3928 = vmatprep.mubr.msk.f32.mxu0 %vm357_vm1, %v4557_v7  ;;  %v6024_v7 = vld [vmem:[#allocation5_spill] sm:$0xff] }
  0x8c   : > { %3878 = vmatprep.mubr.msk.f32.mxu1 %vm357_vm1, %v4497_v24 }
  0x8e   : > { %3929 = vmatmul.mubr.msk.f32.gmra.mxu0 %vm357_vm1, %v4572_v29  ;;  %v6025_v29 = vld [vmem:[#allocation7_spill] sm:$0xff] }
  0x8f   : > { %3879 = vmatmul.mubr.msk.f32.gmra.mxu1 %vm357_vm1, %v4500_v40  ;;  %3931 = vmatprep.mubr.msk.f32.mxu0 %vm357_vm1, %v6022_v23  ;;  %v6026_v23 = vld [vmem:[#allocation9_spill] sm:$0xff] }
  0x90   : > { %3881 = vmatprep.mubr.msk.f32.mxu1 %vm357_vm1, %v4229_v5 }
  0x92   : > { %3932 = vmatmul.mubr.msk.f32.gmra.mxu0 %vm357_vm1, %v6023_v22  ;;  %v6027_v22 = vld [vmem:[#allocation11_spill] sm:$0xff] }
  0x93   : > { %3882 = vmatmul.mubr.msk.f32.gmra.mxu1 %vm357_vm1, %v4234_v8  ;;  %3934 = vmatprep.mubr.msk.f32.mxu0 %vm357_vm1, %v6024_v7  ;;  %v6028_v7 = vld [vmem:[#allocation13_spill] sm:$0xff] }
  0x94   : > { %3884 = vmatprep.mubr.msk.f32.mxu1 %vm357_vm1, %v4255_v19 }
  0x96   : > { %3935 = vmatmul.mubr.msk.f32.gmra.mxu0 %vm357_vm1, %v6025_v29  ;;  %v6029_v29 = vld [vmem:[#allocation15_spill] sm:$0xff] }
  0x97   : > { %3885 = vmatmul.mubr.msk.f32.gmra.mxu1 %vm357_vm1, %v4258_v20  ;;  %3937 = vmatprep.mubr.msk.f32.mxu0 %vm357_vm1, %v6026_v23  ;;  %v6030_v23 = vld [vmem:[#allocation17_spill] sm:$0xff] }
  0x98   : > { %3887 = vmatprep.mubr.msk.f32.mxu1 %vm357_vm1, %v4299_v35 }
  0x9a   : > { %3938 = vmatmul.mubr.msk.f32.gmra.mxu0 %vm357_vm1, %v6027_v22  ;;  %v6031_v22 = vld [vmem:[#allocation20_spill] sm:$0xff] }
  0x9b   : > { %3888 = vmatmul.mubr.msk.f32.gmra.mxu1 %vm357_vm1, %v4309_v39  ;;  %3940 = vmatprep.mubr.msk.f32.mxu0 %vm357_vm1, %v6028_v7  ;;  %v6032_v7 = vld [vmem:[#allocation22_spill] sm:$0xff] }
  0x9c   : > { %3890 = vmatprep.mubr.msk.f32.mxu1 %vm357_vm1, %v4345_v53 }
  0x9e   : > { %3941 = vmatmul.mubr.msk.f32.gmra.mxu0 %vm357_vm1, %v6029_v29  ;;  %v4975_v29 = vld [vmem:[%s4220_s23 + $0x180] sm:$0xff] }
  0x9f   : > { %3891 = vmatmul.mubr.msk.f32.gmra.mxu1 %vm357_vm1, %v4348_v54  ;;  %3943 = vmatprep.mubr.msk.f32.mxu0 %vm357_vm1, %v6030_v23  ;;  %v6033_v23 = vld [vmem:[#allocation25_spill] sm:$0xff] }
  0xa0   : > { %3893 = vmatprep.mubr.msk.f32.mxu1 %vm357_vm1, %v4382_v2 }
  0xa2   : > { %3944 = vmatmul.mubr.msk.f32.gmra.mxu0 %vm357_vm1, %v6031_v22  ;;  %v1607_v22 = vrot.slane %v4978_v41, 1 }
  0xa3   : > { %3894 = vmatmul.mubr.msk.f32.gmra.mxu1 %vm357_vm1, %v4385_v6  ;;  %3946 = vmatprep.mubr.msk.f32.mxu0 %vm357_vm1, %v6032_v7  ;;  %v1606_v7 = vrot.slane %v4975_v29, 1 }
  0xa4   : > { %3896 = vmatprep.mubr.msk.f32.mxu1 %vm357_vm1, %v4417_v31 }
  0xa6   : > { %3947 = vmatmul.mubr.msk.f32.gmra.mxu0 %vm357_vm1, %v6033_v23  ;;  %v5003_v23 = vsel %vm274_vm0, %v1606_v7, %v1607_v22 }
  0xa7   : > { %3897 = vmatmul.mubr.msk.f32.gmra.mxu1 %vm357_vm1, %v4420_v32  ;;  %3949 = vmatprep.mubr.msk.f32.mxu0 %vm357_vm1, %v4533_v44  ;;  %v1609_v44 = vrot.slane %v4991_v52, 1  ;;  %6034 = vst [vmem:[#allocation23_spill] sm:$0xff] %v5003_v23 }
  0xa8   : > { %3899 = vmatprep.mubr.msk.f32.mxu1 %vm357_vm1, %v4461_v11 }
  0xaa   : > { %3950 = vmatmul.mubr.msk.f32.gmra.mxu0 %vm357_vm1, %v4554_v62  ;;  %v5012_v62 = vsel %vm274_vm0, %v1607_v22, %v1609_v44  ;;  %v6046_v22 = vld [vmem:[#allocation44_spill] sm:$0xff] }
  0xab   : > { %3900 = vmatmul.mubr.msk.f32.gmra.mxu1 %vm357_vm1, %v6008_v0  ;;  %3952 = vmatprep.mubr.msk.f32.mxu0 %vm357_vm1, %v4562_v43  ;;  %6035 = vst [vmem:[#allocation4_spill] sm:$0xff] %v5012_v62 }
  0xac   : > { %3902 = vmatprep.mubr.msk.f32.mxu1 %vm357_vm1, %v4505_v51 }
  0xae   : > { %3953 = vmatmul.mubr.msk.f32.gmra.mxu0 %vm357_vm1, %v4577_v36  ;;  %v5187_v36 = vld [vmem:[%s4220_s23 + $0x198] sm:$0xff] }
  0xaf   : > { %3903 = vmatmul.mubr.msk.f32.gmra.mxu1 %vm357_vm1, %v6009_v16  ;;  %3955 = vmatprep.mubr.msk.f32.mxu0 %vm357_vm1, %v5003_v23 }
  0xb0   : > { %3905 = vmatprep.mubr.msk.f32.mxu1 %vm357_vm1, %v4975_v29 }
  0xb2   : > { %3956 = vmatmul.mubr.msk.f32.gmra.mxu0 %vm357_vm1, %v5012_v62 }
  0xb3   : > { %3906 = vmatmul.mubr.msk.f32.gmra.mxu1 %vm357_vm1, %v4978_v41  ;;  %4010 = vmatprep.mubr.msk.f32.mxu0 %vm357_vm1, %v4293_v33  ;;  %v6036_v33 = vld [vmem:[#allocation34_spill] sm:$0xff] }
  0xb4   : > { %3960 = vmatprep.mubr.msk.f32.mxu1 %vm357_vm1, %v4595_v18 }
  0xb6   : > { %4011 = vmatmul.mubr.msk.f32.vlgmr.msra.gmra.mxu0 %vm357_vm1, %v4296_v34  ;;  %v6037_v34 = vld [vmem:[#allocation35_spill] sm:$0xff] }
  0xb7   : > { %3961 = vmatmul.mubr.msk.f32.vlgmr.msra.gmra.mxu1 %vm357_vm1, %v4606_v3  ;;  %4109 = vmatpush3.msra.mxu0 %v4877_v27 }
  0xb8   : > { %4059 = vmatpush3.msra.mxu1 %v4869_v57  ;;  %3963 = vmatprep.mubr.msk.f32.mxu1 %vm357_vm1, %v4618_v12  ;;  %v1874_v57 = vrot.slane %v4975_v29, 2 }
  0xb9   : > { %4013 = vmatprep.mubr.msk.f32.mxu0 %vm357_vm1, %v4331_v47  ;;  %v6038_v47 = vld [vmem:[#allocation36_spill] sm:$0xff] }
  0xba   : > { %4014 = vmatmul.mubr.msk.f32.gmra.mxu0 %vm357_vm1, %v4334_v48  ;;  %v6039_v48 = vld [vmem:[#allocation37_spill] sm:$0xff] }
  0xbb   : > { %3964 = vmatmul.mubr.msk.f32.gmra.mxu1 %vm357_vm1, %v4633_v21  ;;  %4016 = vmatprep.mubr.msk.f32.mxu0 %vm357_vm1, %v4351_v55  ;;  %v6040_v55 = vld [vmem:[#allocation38_spill] sm:$0xff] }
  0xbc   : > { %3966 = vmatprep.mubr.msk.f32.mxu1 %vm357_vm1, %v4639_v10 }
  0xbe   : > { %4017 = vmatmul.mubr.msk.f32.gmra.mxu0 %vm357_vm1, %v4366_v61 }
  0xbf   : > { %3967 = vmatmul.mubr.msk.f32.gmra.mxu1 %vm357_vm1, %v4650_v60  ;;  %4019 = vmatprep.mubr.msk.f32.mxu0 %vm357_vm1, %v4409_v25  ;;  %v6042_v25 = vld [vmem:[#allocation40_spill] sm:$0xff] }
  0xc0   : > { %3969 = vmatprep.mubr.msk.f32.mxu1 %vm357_vm1, %v4656_v49 }
  0xc2   : > { %4020 = vmatmul.mubr.msk.f32.gmra.mxu0 %vm357_vm1, %v4412_v30  ;;  %v6043_v30 = vld [vmem:[#allocation41_spill] sm:$0xff] }
  0xc3   : > { %3970 = vmatmul.mubr.msk.f32.gmra.mxu1 %vm357_vm1, %v6036_v33  ;;  %4022 = vmatprep.mubr.msk.f32.mxu0 %vm357_vm1, %v4453_v59 }
  0xc4   : > { %3972 = vmatprep.mubr.msk.f32.mxu1 %vm357_vm1, %v4673_v28 }
  0xc6   : > { %4023 = vmatmul.mubr.msk.f32.gmra.mxu0 %vm357_vm1, %v4456_v1 }
  0xc7   : > { %3973 = vmatmul.mubr.msk.f32.gmra.mxu1 %vm357_vm1, %v6037_v34  ;;  %4025 = vmatprep.mubr.msk.f32.mxu0 %vm357_vm1, %v4497_v24  ;;  %v6044_v24 = vld [vmem:[#allocation42_spill] sm:$0xff] }
  0xc8   : > { %3975 = vmatprep.mubr.msk.f32.mxu1 %vm357_vm1, %v4690_v37 }
  0xca   : > { %4026 = vmatmul.mubr.msk.f32.gmra.mxu0 %vm357_vm1, %v4500_v40  ;;  %v6045_v40 = vld [vmem:[#allocation43_spill] sm:$0xff] }
  0xcb   : > { %3976 = vmatmul.mubr.msk.f32.gmra.mxu1 %vm357_vm1, %v6038_v47  ;;  %4028 = vmatprep.mubr.msk.f32.mxu0 %vm357_vm1, %v4229_v5 }
  0xcc   : > { %3978 = vmatprep.mubr.msk.f32.mxu1 %vm357_vm1, %v4707_v4 }
  0xce   : > { %4029 = vmatmul.mubr.msk.f32.gmra.mxu0 %vm357_vm1, %v4234_v8 }
  0xcf   : > { %3979 = vmatmul.mubr.msk.f32.gmra.mxu1 %vm357_vm1, %v6039_v48  ;;  %4031 = vmatprep.mubr.msk.f32.mxu0 %vm357_vm1, %v4255_v19  ;;  %v6041_v19 = vld [vmem:[#allocation39_spill] sm:$0xff] }
  0xd0   : > { %3981 = vmatprep.mubr.msk.f32.mxu1 %vm357_vm1, %v4724_v45 }
  0xd2   : > { %4032 = vmatmul.mubr.msk.f32.gmra.mxu0 %vm357_vm1, %v4258_v20 }
  0xd3   : > { %3982 = vmatmul.mubr.msk.f32.gmra.mxu1 %vm357_vm1, %v6040_v55  ;;  %4034 = vmatprep.mubr.msk.f32.mxu0 %vm357_vm1, %v4299_v35 }
  0xd4   : > { %3984 = vmatprep.mubr.msk.f32.mxu1 %vm357_vm1, %v4741_v26 }
  0xd6   : > { %v5090_v5 = vpop.f32.mrf.mxu0  ;;  %4035 = vmatmul.mubr.msk.f32.gmra.mxu0 %vm357_vm1, %v4309_v39 }
  0xd7   : > { %v5094_v8 = vpop.f32.mrf.mxu1  ;;  %3985 = vmatmul.mubr.msk.f32.gmra.mxu1 %vm357_vm1, %v6041_v19  ;;  %4037 = vmatprep.mubr.msk.f32.mxu0 %vm357_vm1, %v4345_v53 }
  0xd8   : > { %v5100_v20 = vpop.f32.mrf.mxu0  ;;  %3987 = vmatprep.mubr.msk.f32.mxu1 %vm357_vm1, %v4758_v42 }
  0xd9   : > { %v5104_v35 = vpop.f32.mrf.mxu1 }
  0xda   : > { %v5106_v61 = vpop.f32.mrf.mxu0  ;;  %4038 = vmatmul.mubr.msk.f32.gmra.mxu0 %vm357_vm1, %v4348_v54 }
  0xdb   : > { %v5110_v39 = vpop.f32.mrf.mxu1  ;;  %3988 = vmatmul.mubr.msk.f32.gmra.mxu1 %vm357_vm1, %v6042_v25  ;;  %4040 = vmatprep.mubr.msk.f32.mxu0 %vm357_vm1, %v4382_v2 }
  0xdc   : > { %v5116_v53 = vpop.f32.mrf.mxu0  ;;  %3990 = vmatprep.mubr.msk.f32.mxu1 %vm357_vm1, %v6043_v30 }
  0xdd   : > { %v5120_v59 = vpop.f32.mrf.mxu1 }
  0xde   : > { %v5122_v1 = vpop.f32.mrf.mxu0  ;;  %4041 = vmatmul.mubr.msk.f32.gmra.mxu0 %vm357_vm1, %v4385_v6 }
  0xdf   : > { %v5126_v54 = vpop.f32.mrf.mxu1  ;;  %3991 = vmatmul.mubr.msk.f32.gmra.mxu1 %vm357_vm1, %v6044_v24  ;;  %4043 = vmatprep.mubr.msk.f32.mxu0 %vm357_vm1, %v4417_v31 }
  0xe0   : > { %v5132_v2 = vpop.f32.mrf.mxu0  ;;  %3993 = vmatprep.mubr.msk.f32.mxu1 %vm357_vm1, %v6045_v40 }
  0xe1   : > { %v5136_v7 = vpop.f32.mrf.mxu1 }
  0xe2   : > { %v5138_v44 = vpop.f32.mrf.mxu0  ;;  %4044 = vmatmul.mubr.msk.f32.gmra.mxu0 %vm357_vm1, %v4420_v32 }
  0xe3   : > { %v5142_v6 = vpop.f32.mrf.mxu1  ;;  %3994 = vmatmul.mubr.msk.f32.gmra.mxu1 %vm357_vm1, %v6046_v22  ;;  %4046 = vmatprep.mubr.msk.f32.mxu0 %vm357_vm1, %v4461_v11 }
  0xe4   : > { %v5148_v31 = vpop.f32.mrf.mxu0  ;;  %3996 = vmatprep.mubr.msk.f32.mxu1 %vm357_vm1, %v4809_v38 }
  0xe5   : > { %v5152_v18 = vpop.f32.mrf.mxu1 }
  0xe6   : > { %v5154_v3 = vpop.f32.mrf.mxu0  ;;  %4047 = vmatmul.mubr.msk.f32.gmra.mxu0 %vm357_vm1, %v6008_v0  ;;  %v1875_v0 = vrot.slane %v4978_v41, 2 }
  0xe7   : > { %v5158_v32 = vpop.f32.mrf.mxu1  ;;  %3997 = vmatmul.mubr.msk.f32.gmra.mxu1 %vm357_vm1, %v4820_v58  ;;  %4049 = vmatprep.mubr.msk.f32.mxu0 %vm357_vm1, %v4505_v51 }
  0xe8   : > { %6047 = vst [vmem:[#allocation6_spill] sm:$0xff] %v5158_v32  ;;  %v5164_v11 = vpop.f32.mrf.mxu0  ;;  %3999 = vmatprep.mubr.msk.f32.mxu1 %vm357_vm1, %v4826_v56  ;;  %v5206_v32 = vld [vmem:[%s4220_s23 + $0x1a0] sm:$0xff] }
  0xe9   : > { %v5169_v27 = vpop.f32.mrf.mxu1 }
  0xea   : > { %6048 = vst [vmem:[#allocation8_spill] sm:$0xff] %v5169_v27  ;;  %v5172_v62 = vpop.f32.mrf.mxu0  ;;  %4050 = vmatmul.mubr.msk.f32.gmra.mxu0 %vm357_vm1, %v6009_v16  ;;  %v1877_v27 = vrot.slane %v4991_v52, 2  ;;  %v5193_v16 = vsel %vm936_vm2, %v1874_v57, %v1875_v0 }
  0xeb   : > { %v5176_v23 = vpop.f32.mrf.mxu1  ;;  %4000 = vmatmul.mubr.msk.f32.gmra.mxu1 %vm357_vm1, %v4837_v63  ;;  %4052 = vmatprep.mubr.msk.f32.mxu0 %vm357_vm1, %v4975_v29  ;;  %6051 = vst [vmem:[#allocation14_spill] sm:$0xff] %v5193_v16 }
  0xec   : > { %6049 = vst [vmem:[#allocation10_spill] sm:$0xff] %v5176_v23  ;;  %v5182_v51 = vpop.f32.mrf.mxu0  ;;  %4002 = vmatprep.mubr.msk.f32.mxu1 %vm357_vm1, %v4843_v13  ;;  %v5213_v57 = vsel %vm936_vm2, %v1875_v0, %v1877_v27 }
  0xed   : > { %v5190_v43 = vpop.f32.mrf.mxu1  ;;  %6053 = vst [vmem:[#allocation34_spill] sm:$0xff] %v5213_v57 }
  0xee   : > { %6050 = vst [vmem:[#allocation12_spill] sm:$0xff] %v5190_v43  ;;  %v5195_v23 = vpop.f32.mrf.mxu0  ;;  %4053 = vmatmul.mubr.msk.f32.gmra.mxu0 %vm357_vm1, %v4978_v41 }
  0xef   : > { %v5199_v29 = vpop.f32.mrf.mxu1  ;;  %4003 = vmatmul.mubr.msk.f32.gmra.mxu1 %vm357_vm1, %v4852_v15  ;;  %4055 = vmatprep.mubr.msk.f32.mxu0 %vm357_vm1, %v5187_v36 }
  0xf0   : > { %6052 = vst [vmem:[#allocation19_spill] sm:$0xff] %v5199_v29  ;;  %v5208_v52 = vpop.f32.mrf.mxu0  ;;  %4005 = vmatprep.mubr.msk.f32.mxu1 %vm357_vm1, %v5193_v16 }
  0xf1   : > { %v5215_v43 = vpop.f32.mrf.mxu1 }
  0xf2   : > { %6054 = vst [vmem:[#allocation35_spill] sm:$0xff] %v5215_v43  ;;  %v5217_v41 = vpop.f32.mrf.mxu0  ;;  %4056 = vmatmul.mubr.msk.f32.gmra.mxu0 %vm357_vm1, %v5206_v32 }
  0xf3   : > { %v5221_v29 = vpop.f32.mrf.mxu1  ;;  %4006 = vmatmul.mubr.msk.f32.gmra.mxu1 %vm357_vm1, %v5213_v57  ;;  %4110 = vmatprep.mubr.msk.f32.mxu0 %vm357_vm1, %v4618_v12 }
  0xf4   : > { %6055 = vst [vmem:[#allocation36_spill] sm:$0xff] %v5221_v29  ;;  %v5227_v15 = vpop.f32.mrf.mxu0  ;;  %4060 = vmatprep.mubr.msk.f32.mxu1 %vm357_vm1, %v6013_v14 }
  0xf5   : > { %v5231_v27 = vpop.f32.mrf.mxu1 }
  0xf6   : > { %6056 = vst [vmem:[#allocation37_spill] sm:$0xff] %v5231_v27  ;;  %v3812_v0 = vpop.f32.mrf.mxu0  ;;  %4111 = vmatmul.mubr.msk.f32.vlgmr.msra.gmra.mxu0 %vm357_vm1, %v4633_v21 }
  0xf7   : > { %v3762_v43 = vpop.f32.mrf.mxu1  ;;  %4061 = vmatmul.mubr.msk.f32.vlgmr.msra.gmra.mxu1 %vm357_vm1, %v6014_v50  ;;  %4113 = vmatprep.mubr.msk.f32.mxu0 %vm357_vm1, %v4639_v10 }
  0xf8   : > { %v783_v12 = vadd.f32 %v3762_v43, %v5090_v5  ;;  %v1149_v29 = vpop.f32.mrf.mxu0  ;;  %4063 = vmatprep.mubr.msk.f32.mxu1 %vm357_vm1, %v6015_v17  ;;  %v6057_v17 = vld [vmem:[#allocation16_spill] sm:$0xff] }
  0xf9   : > { %v777_v14 = vpop.f32.mrf.mxu1 }
  0xfa   : > { %v5242_v57 = vadd.f32 %v3812_v0, %v783_v12  ;;  %v778_v27 = vadd.f32 %v777_v14, %v5100_v20  ;;  %v3815_v16 = vpop.f32.mrf.mxu0  ;;  %4114 = vmatmul.mubr.msk.f32.gmra.mxu0 %vm357_vm1, %v4650_v60  ;;  %v6059_v14 = vld [vmem:[#allocation24_spill] sm:$0xff] }
  0xfb   : > { %v3765_v21 = vpop.f32.mrf.mxu1  ;;  %4064 = vmatmul.mubr.msk.f32.gmra.mxu1 %vm357_vm1, %v6016_v9  ;;  %4116 = vmatprep.mubr.msk.f32.mxu0 %vm357_vm1, %v4656_v49 }
  0xfc   : > { %v5251_v43 = vadd.f32 %v1149_v29, %v778_v27  ;;  %v793_v10 = vadd.f32 %v3765_v21, %v5106_v61  ;;  %v1159_v50 = vpop.f32.mrf.mxu0  ;;  %4066 = vmatprep.mubr.msk.f32.mxu1 %vm357_vm1, %v6057_v17 }
  0xfd   : > { %v787_v5 = vpop.f32.mrf.mxu1 }
  0xfe   : > { %v5256_v20 = vadd.f32 %v3815_v16, %v793_v10  ;;  %v788_v60 = vadd.f32 %v787_v5, %v5116_v53  ;;  %v3818_v0 = vpop.f32.mrf.mxu0  ;;  %4117 = vmatmul.mubr.msk.f32.gmra.mxu0 %vm357_vm1, %v6036_v33  ;;  %v6058_v16 = vld [vmem:[#allocation21_spill] sm:$0xff]  ;;  %v6060_v10 = vld [vmem:[#allocation26_spill] sm:$0xff] }
  0xff   : > { %v3768_v9 = vpop.f32.mrf.mxu1  ;;  %4067 = vmatmul.mubr.msk.f32.gmra.mxu1 %vm357_vm1, %v6018_v46  ;;  %4119 = vmatprep.mubr.msk.f32.mxu0 %vm357_vm1, %v4673_v28 }
 0x100   : > { %v5265_v49 = vadd.f32 %v1159_v50, %v788_v60  ;;  %v803_v61 = vadd.f32 %v3768_v9, %v5122_v1  ;;  %v1169_v29 = vpop.f32.mrf.mxu0  ;;  %4069 = vmatprep.mubr.msk.f32.mxu1 %vm357_vm1, %v6058_v16  ;;  %v6061_v60 = vld [vmem:[#allocation28_spill] sm:$0xff]  ;;  %v6062_v9 = vld [vmem:[#allocation30_spill] sm:$0xff] }
 0x101   : > { %v797_v53 = vpop.f32.mrf.mxu1 }
 0x102   : > { %v5270_v27 = vadd.f32 %v3818_v0, %v803_v61  ;;  %v798_v33 = vadd.f32 %v797_v53, %v5132_v2  ;;  %v3821_v12 = vpop.f32.mrf.mxu0  ;;  %4120 = vmatmul.mubr.msk.f32.gmra.mxu0 %vm357_vm1, %v6037_v34  ;;  %v6063_v53 = vld [vmem:[#allocation32_spill] sm:$0xff] }
 0x103   : > { %v3771_v46 = vpop.f32.mrf.mxu1  ;;  %4070 = vmatmul.mubr.msk.f32.gmra.mxu1 %vm357_vm1, %v6059_v14  ;;  %4122 = vmatprep.mubr.msk.f32.mxu0 %vm357_vm1, %v4690_v37 }
 0x104   : > { %v5279_v28 = vadd.f32 %v1169_v29, %v798_v33  ;;  %v813_v1 = vadd.f32 %v3771_v46, %v5138_v44  ;;  %v1179_v21 = vpop.f32.mrf.mxu0  ;;  %4072 = vmatprep.mubr.msk.f32.mxu1 %vm357_vm1, %v6060_v10 }
 0x105   : > { %v807_v2 = vpop.f32.mrf.mxu1 }
 0x106   : > { %v5284_v50 = vadd.f32 %v3821_v12, %v813_v1  ;;  %v808_v34 = vadd.f32 %v807_v2, %v5148_v31  ;;  %v3824_v17 = vpop.f32.mrf.mxu0  ;;  %4123 = vmatmul.mubr.msk.f32.gmra.mxu0 %vm357_vm1, %v6038_v47  ;;  %v6064_v12 = vld [vmem:[#allocation2_spill] sm:$0xff]  ;;  %v6066_v2 = vld [vmem:[#allocation5_spill] sm:$0xff] }
 0x107   : > { %v3774_v5 = vpop.f32.mrf.mxu1  ;;  %4073 = vmatmul.mubr.msk.f32.gmra.mxu1 %vm357_vm1, %v6061_v60  ;;  %4125 = vmatprep.mubr.msk.f32.mxu0 %vm357_vm1, %v4707_v4  ;;  %v6067_v60 = vld [vmem:[#allocation7_spill] sm:$0xff] }
 0x108   : > { %v5293_v37 = vadd.f32 %v1179_v21, %v808_v34  ;;  %v823_v44 = vadd.f32 %v3774_v5, %v5154_v3  ;;  %v1189_v0 = vpop.f32.mrf.mxu0  ;;  %4075 = vmatprep.mubr.msk.f32.mxu1 %vm357_vm1, %v6062_v9  ;;  %v6065_v21 = vld [vmem:[#allocation3_spill] sm:$0xff] }
 0x109   : > { %v817_v31 = vpop.f32.mrf.mxu1 }
 0x10a   : > { %v5298_v61 = vadd.f32 %v3824_v17, %v823_v44  ;;  %v818_v47 = vadd.f32 %v817_v31, %v5164_v11  ;;  %v3827_v29 = vpop.f32.mrf.mxu0  ;;  %4126 = vmatmul.mubr.msk.f32.gmra.mxu0 %vm357_vm1, %v6039_v48 }
 0x10b   : > { %v3777_v16 = vpop.f32.mrf.mxu1  ;;  %4076 = vmatmul.mubr.msk.f32.gmra.mxu1 %vm357_vm1, %v6063_v53  ;;  %4128 = vmatprep.mubr.msk.f32.mxu0 %vm357_vm1, %v4724_v45  ;;  %v6070_v53 = vld [vmem:[#allocation13_spill] sm:$0xff] }
 0x10c   : > { %v5307_v4 = vadd.f32 %v1189_v0, %v818_v47  ;;  %v833_v3 = vadd.f32 %v3777_v16, %v5172_v62  ;;  %v1199_v33 = vpop.f32.mrf.mxu0  ;;  %4078 = vmatprep.mubr.msk.f32.mxu1 %vm357_vm1, %v6064_v12  ;;  %v6068_v0 = vld [vmem:[#allocation9_spill] sm:$0xff] }
 0x10d   : > { %v827_v11 = vpop.f32.mrf.mxu1 }
 0x10e   : > { %v5312_v46 = vadd.f32 %v3827_v29, %v833_v3  ;;  %v828_v48 = vadd.f32 %v827_v11, %v5182_v51  ;;  %v3830_v14 = vpop.f32.mrf.mxu0  ;;  %4129 = vmatmul.mubr.msk.f32.gmra.mxu0 %vm357_vm1, %v6040_v55  ;;  %v6069_v29 = vld [vmem:[#allocation11_spill] sm:$0xff] }
 0x10f   : > { %v3780_v1 = vpop.f32.mrf.mxu1  ;;  %4079 = vmatmul.mubr.msk.f32.gmra.mxu1 %vm357_vm1, %v6065_v21  ;;  %4131 = vmatprep.mubr.msk.f32.mxu0 %vm357_vm1, %v4741_v26  ;;  %v6071_v11 = vld [vmem:[#allocation15_spill] sm:$0xff] }
 0x110   : > { %v5321_v62 = vadd.f32 %v1199_v33, %v828_v48  ;;  %v843_v45 = vadd.f32 %v3780_v1, %v5195_v23  ;;  %v1209_v10 = vpop.f32.mrf.mxu0  ;;  %4081 = vmatprep.mubr.msk.f32.mxu1 %vm357_vm1, %v6066_v2 }
 0x111   : > { %v837_v51 = vpop.f32.mrf.mxu1 }
 0x112   : > { %v5326_v34 = vadd.f32 %v3830_v14, %v843_v45  ;;  %v838_v55 = vadd.f32 %v837_v51, %v5208_v52  ;;  %v3833_v17 = vpop.f32.mrf.mxu0  ;;  %4132 = vmatmul.mubr.msk.f32.gmra.mxu0 %vm357_vm1, %v6041_v19  ;;  %v6072_v14 = vld [vmem:[#allocation17_spill] sm:$0xff]  ;;  %v6074_v51 = vld [vmem:[#allocation22_spill] sm:$0xff] }
 0x113   : > { %v3783_v5 = vpop.f32.mrf.mxu1  ;;  %4082 = vmatmul.mubr.msk.f32.gmra.mxu1 %vm357_vm1, %v6067_v60  ;;  %4134 = vmatprep.mubr.msk.f32.mxu0 %vm357_vm1, %v4758_v42  ;;  %v6075_v60 = vld [vmem:[#allocation25_spill] sm:$0xff] }
 0x114   : > { %v5335_v26 = vadd.f32 %v1209_v10, %v838_v55  ;;  %v853_v23 = vadd.f32 %v3783_v5, %v5217_v41  ;;  %v1219_v44 = vpop.f32.mrf.mxu0  ;;  %4084 = vmatprep.mubr.msk.f32.mxu1 %vm357_vm1, %v6068_v0  ;;  %v6073_v10 = vld [vmem:[#allocation20_spill] sm:$0xff] }
 0x115   : > { %v847_v52 = vpop.f32.mrf.mxu1 }
 0x116   : > { %v5340_v9 = vadd.f32 %v3833_v17, %v853_v23  ;;  %v848_v19 = vadd.f32 %v847_v52, %v5227_v15  ;;  %v3836_v31 = vpop.f32.mrf.mxu0  ;;  %4135 = vmatmul.mubr.msk.f32.gmra.mxu0 %vm357_vm1, %v6042_v25 }
 0x117   : > { %v3786_v47 = vpop.f32.mrf.mxu1  ;;  %4085 = vmatmul.mubr.msk.f32.gmra.mxu1 %vm357_vm1, %v6069_v29  ;;  %4137 = vmatprep.mubr.msk.f32.mxu0 %vm357_vm1, %v6043_v30  ;;  %v6078_v29 = vld [vmem:[#allocation6_spill] sm:$0xff] }
 0x118   : > { %v5349_v42 = vadd.f32 %v1219_v44, %v848_v19  ;;  %v863_v41 = vadd.f32 %v3786_v47, %v5094_v8  ;;  %v1229_v16 = vpop.f32.mrf.mxu0  ;;  %4087 = vmatprep.mubr.msk.f32.mxu1 %vm357_vm1, %v6070_v53  ;;  %v6076_v44 = vld [vmem:[#allocation27_spill] sm:$0xff]  ;;  %v2408_v53 = vrot.slane %v5187_v36, 1 }
 0x119   : > { %v857_v15 = vpop.f32.mrf.mxu1 }
 0x11a   : > { %v5354_v3 = vadd.f32 %v3836_v31, %v863_v41  ;;  %v858_v25 = vadd.f32 %v857_v15, %v5104_v35  ;;  %v3839_v33 = vpop.f32.mrf.mxu0  ;;  %4138 = vmatmul.mubr.msk.f32.gmra.mxu0 %vm357_vm1, %v6044_v24  ;;  %v2677_v31 = vrot.slane %v5206_v32, 2  ;;  %v2409_v15 = vrot.slane %v5206_v32, 1  ;;  %v6084_v32 = vld [vmem:[#allocation10_spill] sm:$0xff] }
 0x11b   : > { %v3789_v12 = vpop.f32.mrf.mxu1  ;;  %4088 = vmatmul.mubr.msk.f32.gmra.mxu1 %vm357_vm1, %v6071_v11  ;;  %4140 = vmatprep.mubr.msk.f32.mxu0 %vm357_vm1, %v6045_v40 }
 0x11c   : > { %v5363_v8 = vadd.f32 %v1229_v16, %v858_v25  ;;  %v873_v30 = vadd.f32 %v3789_v12, %v5110_v39  ;;  %v1239_v48 = vpop.f32.mrf.mxu0  ;;  %4090 = vmatprep.mubr.msk.f32.mxu1 %vm357_vm1, %v6072_v14  ;;  %v6079_v16 = vld [vmem:[#allocation31_spill] sm:$0xff]  ;;  %v6082_v14 = vld [vmem:[#allocation33_spill] sm:$0xff] }
 0x11d   : > { %v867_v35 = vpop.f32.mrf.mxu1 }
 0x11e   : > { %v5368_v1 = vadd.f32 %v3839_v33, %v873_v30  ;;  %v868_v24 = vadd.f32 %v867_v35, %v5120_v59  ;;  %v3842_v21 = vpop.f32.mrf.mxu0  ;;  %4141 = vmatmul.mubr.msk.f32.gmra.mxu0 %vm357_vm1, %v6046_v22  ;;  %v6081_v30 = vld [vmem:[#allocation18_spill] sm:$0xff] }
 0x11f   : > { %v3792_v45 = vpop.f32.mrf.mxu1  ;;  %4091 = vmatmul.mubr.msk.f32.gmra.mxu1 %vm357_vm1, %v6073_v10  ;;  %4143 = vmatprep.mubr.msk.f32.mxu0 %vm357_vm1, %v4809_v38  ;;  %v6083_v35 = vld [vmem:[#allocation14_spill] sm:$0xff]  ;;  %v6085_v10 = vld [vmem:[#allocation23_spill] sm:$0xff] }
 0x120   : > { %v5377_v39 = vadd.f32 %v1239_v48, %v868_v24  ;;  %v883_v40 = vadd.f32 %v3792_v45, %v5126_v54  ;;  %v1249_v2 = vpop.f32.mrf.mxu0  ;;  %4093 = vmatprep.mubr.msk.f32.mxu1 %vm357_vm1, %v6074_v51 }
 0x121   : > { %v877_v59 = vpop.f32.mrf.mxu1 }
 0x122   : > { %v5382_v55 = vadd.f32 %v3842_v21, %v883_v40  ;;  %v878_v22 = vadd.f32 %v877_v59, %v5136_v7  ;;  %v3845_v17 = vpop.f32.mrf.mxu0  ;;  %4144 = vmatmul.mubr.msk.f32.gmra.mxu0 %vm357_vm1, %v4820_v58  ;;  %v2410_v59 = vsel %vm274_vm0, %v2408_v53, %v2409_v15 }
 0x123   : > { %v3795_v5 = vpop.f32.mrf.mxu1  ;;  %4094 = vmatmul.mubr.msk.f32.gmra.mxu1 %vm357_vm1, %v6075_v60  ;;  %4146 = vmatprep.mubr.msk.f32.mxu0 %vm357_vm1, %v4826_v56  ;;  %v6077_v56 = vld [vmem:[#allocation29_spill] sm:$0xff] }
 0x124   : > { %v5391_v38 = vadd.f32 %v1249_v2, %v878_v22  ;;  %v893_v54 = vadd.f32 %v3795_v5, %v5142_v6  ;;  %v1259_v23 = vpop.f32.mrf.mxu0  ;;  %4096 = vmatprep.mubr.msk.f32.mxu1 %vm357_vm1, %v6076_v44  ;;  %v2676_v6 = vrot.slane %v5187_v36, 2  ;;  %v6088_v44 = vld [vmem:[#allocation4_spill] sm:$0xff] }
 0x125   : > { %v887_v7 = vpop.f32.mrf.mxu1 }
 0x126   : > { %v5396_v0 = vadd.f32 %v3845_v17, %v893_v54  ;;  %v888_v58 = vadd.f32 %v887_v7, %v5152_v18  ;;  %v3848_v52 = vpop.f32.mrf.mxu0  ;;  %4147 = vmatmul.mubr.msk.f32.gmra.mxu0 %vm357_vm1, %v4837_v63  ;;  %v224_v63 = vld [vmem:[%s4220_s23 + $0x1a8] sm:$0x3]  ;;  %v2678_v40 = vsel %vm936_vm2, %v2676_v6, %v2677_v31  ;;  %v6086_v17 = vld [vmem:[#allocation12_spill] sm:$0xff]  ;;  %v6087_v54 = vld [vmem:[#allocation34_spill] sm:$0xff] }
 0x127   : > { %v3798_v19 = vpop.f32.mrf.mxu1  ;;  %4097 = vmatmul.mubr.msk.f32.gmra.mxu1 %vm357_vm1, %v6077_v56  ;;  %4149 = vmatprep.mubr.msk.f32.mxu0 %vm357_vm1, %v4843_v13  ;;  %v6080_v13 = vld [vmem:[#allocation8_spill] sm:$0xff]  ;;  %v2679_v24 = vrot.slane %v224_v63, 2  ;;  %v2411_v2 = vrot.slane %v224_v63, 1 }
 0x128   : > { %v5407_v47 = vadd.f32 %v1259_v23, %v888_v58  ;;  %v903_v41 = vadd.f32 %v3798_v19, %v6078_v29  ;;  %v1269_v18 = vpop.f32.mrf.mxu0  ;;  %4099 = vmatprep.mubr.msk.f32.mxu1 %vm357_vm1, %v6079_v16 }
 0x129   : > { %v897_v25 = vpop.f32.mrf.mxu1  ;;  %v2680_v7 = vsel %vm936_vm2, %v2677_v31, %v2679_v24  ;;  %v2412_v6 = vsel %vm274_vm0, %v2409_v15, %v2411_v2  ;;  %v6092_v15 = vld [vmem:[#allocation37_spill] sm:$0xff] }
 0x12a   : > { %v5415_v33 = vadd.f32 %v3848_v52, %v903_v41  ;;  %v898_v12 = vadd.f32 %v897_v25, %v6080_v13  ;;  %v3851_v11 = vpop.f32.mrf.mxu0  ;;  %4150 = vmatmul.mubr.msk.f32.gmra.mxu0 %vm357_vm1, %v6081_v30  ;;  %v6089_v52 = vld [vmem:[#allocation19_spill] sm:$0xff]  ;;  %v6091_v25 = vld [vmem:[#allocation36_spill] sm:$0xff] }
 0x12b   : > { %v3801_v48 = vpop.f32.mrf.mxu1  ;;  %4100 = vmatmul.mubr.msk.f32.gmra.mxu1 %vm357_vm1, %v6082_v14  ;;  %4152 = vmatprep.mubr.msk.f32.mxu0 %vm357_vm1, %v6083_v35 }
 0x12c   : > { %v5424_v36 = vadd.f32 %v1269_v18, %v898_v12  ;;  %v913_v21 = vadd.f32 %v3801_v48, %v6084_v32  ;;  %v1279_v45 = vpop.f32.mrf.mxu0  ;;  %4102 = vmatprep.mubr.msk.f32.mxu1 %vm357_vm1, %v6085_v10  ;;  %v6090_v18 = vld [vmem:[#allocation35_spill] sm:$0xff] }
 0x12d   : > { %v907_v51 = vpop.f32.mrf.mxu1 }
 0x12e   : > { %v5431_v22 = vadd.f32 %v3851_v11, %v913_v21  ;;  %v908_v5 = vadd.f32 %v907_v51, %v6086_v17  ;;  %v3854_v60 = vpop.f32.mrf.mxu0  ;;  %4153 = vmatmul.mubr.msk.f32.gmra.mxu0 %vm357_vm1, %v6087_v54 }
 0x12f   : > { %v3804_v23 = vpop.f32.mrf.mxu1  ;;  %4103 = vmatmul.mubr.msk.f32.gmra.mxu1 %vm357_vm1, %v6088_v44  ;;  %4155 = vmatprep.mubr.msk.f32.mxu0 %vm357_vm1, %v2678_v40 }
 0x130   : > { %v5440_v58 = vadd.f32 %v1279_v45, %v908_v5  ;;  %v923_v19 = vadd.f32 %v3804_v23, %v6089_v52  ;;  %v1289_v56 = vpop.f32.mrf.mxu0  ;;  %4105 = vmatprep.mubr.msk.f32.mxu1 %vm357_vm1, %v2410_v59 }
 0x131   : > { %v917_v29 = vpop.f32.mrf.mxu1 }
 0x132   : > { %v5445_v41 = vadd.f32 %v3854_v60, %v923_v19  ;;  %v918_v16 = vadd.f32 %v917_v29, %v6090_v18  ;;  %v3857_v63 = vpop.f32.mrf.mxu0  ;;  %4156 = vmatmul.mubr.msk.f32.gmra.mxu0 %vm357_vm1, %v2680_v7 }
 0x133   : > { %v3807_v53 = vpop.f32.mrf.mxu1  ;;  %4106 = vmatmul.mubr.msk.f32.gmra.mxu1 %vm357_vm1, %v2412_v6 }
 0x134   : > { %v5450_v31 = vadd.f32 %v1289_v56, %v918_v16  ;;  %v933_v13 = vadd.f32 %v3807_v53, %v6091_v25  ;;  %v1299_v12 = vpop.f32.mrf.mxu0 }
 0x135   : > { %v927_v11 = vpop.f32.mrf.mxu1 }
 0x136   : > { %v5453_v30 = vadd.f32 %v3857_v63, %v933_v13  ;;  %v928_v48 = vadd.f32 %v927_v11, %v6092_v15  ;;  %v3912_v14 = vpop.f32.mrf.mxu0 }
 0x137   : > { %v3862_v35 = vpop.f32.mrf.mxu1 }
 0x138   : > { %v5456_v24 = vadd.f32 %v1299_v12, %v928_v48  ;;  %v1574_v32 = vadd.f32 %v3862_v35, %v5242_v57  ;;  %v1683_v21 = vpop.f32.mrf.mxu0 }
 0x139   : > { %v1414_v45 = vpop.f32.mrf.mxu1 }
 0x13a   : > { %v5459_v10 = vadd.f32 %v3912_v14, %v1574_v32  ;;  %v1573_v40 = vadd.f32 %v1414_v45, %v5251_v43  ;;  %v3915_v2 = vpop.f32.mrf.mxu0 }
 0x13b   : > { %v3865_v51 = vpop.f32.mrf.mxu1 }
 0x13c   : > { %v5462_v59 = vadd.f32 %v1683_v21, %v1573_v40  ;;  %v1576_v17 = vadd.f32 %v3865_v51, %v5256_v20  ;;  %v1693_v5 = vpop.f32.mrf.mxu0 }
 0x13d   : > { %v1424_v60 = vpop.f32.mrf.mxu1 }
 0x13e   : > { %v5465_v54 = vadd.f32 %v3915_v2, %v1576_v17  ;;  %v1575_v23 = vadd.f32 %v1424_v60, %v5265_v49  ;;  %v3918_v44 = vpop.f32.mrf.mxu0 }
 0x13f   : > { %v3868_v57 = vpop.f32.mrf.mxu1 }
 0x140   : > { %v5468_v7 = vadd.f32 %v1693_v5, %v1575_v23  ;;  %v1578_v52 = vadd.f32 %v3868_v57, %v5270_v27  ;;  %v1703_v19 = vpop.f32.mrf.mxu0 }
 0x141   : > { %v1434_v43 = vpop.f32.mrf.mxu1 }
 0x142   : > { %v5471_v56 = vadd.f32 %v3918_v44, %v1578_v52  ;;  %v1577_v6 = vadd.f32 %v1434_v43, %v5279_v28  ;;  %v3921_v29 = vpop.f32.mrf.mxu0 }
 0x143   : > { %v3871_v20 = vpop.f32.mrf.mxu1 }
 0x144   : > { %v5474_v18 = vadd.f32 %v1703_v19, %v1577_v6  ;;  %v1580_v16 = vadd.f32 %v3871_v20, %v5284_v50  ;;  %v1713_v63 = vpop.f32.mrf.mxu0 }
 0x145   : > { %v1444_v49 = vpop.f32.mrf.mxu1 }
 0x146   : > { %v5477_v53 = vadd.f32 %v3921_v29, %v1580_v16  ;;  %v1579_v25 = vadd.f32 %v1444_v49, %v5293_v37  ;;  %v3924_v13 = vpop.f32.mrf.mxu0 }
 0x147   : > { %v3874_v27 = vpop.f32.mrf.mxu1 }
 0x148   : > { %v5480_v12 = vadd.f32 %v1713_v63, %v1579_v25  ;;  %v1582_v11 = vadd.f32 %v3874_v27, %v5298_v61  ;;  %v1723_v15 = vpop.f32.mrf.mxu0 }
 0x149   : > { %v1454_v28 = vpop.f32.mrf.mxu1 }
 0x14a   : > { %v5483_v48 = vadd.f32 %v3924_v13, %v1582_v11  ;;  %v1581_v14 = vadd.f32 %v1454_v28, %v5307_v4  ;;  %v3927_v35 = vpop.f32.mrf.mxu0 }
 0x14b   : > { %v3877_v50 = vpop.f32.mrf.mxu1 }
 0x14c   : > { %v5486_v32 = vadd.f32 %v1723_v15, %v1581_v14  ;;  %v1584_v21 = vadd.f32 %v3877_v50, %v5312_v46  ;;  %v1733_v45 = vpop.f32.mrf.mxu0 }
 0x14d   : > { %v1464_v37 = vpop.f32.mrf.mxu1 }
 0x14e   : > { %v5489_v40 = vadd.f32 %v3927_v35, %v1584_v21  ;;  %v1583_v2 = vadd.f32 %v1464_v37, %v5321_v62  ;;  %v3930_v51 = vpop.f32.mrf.mxu0 }
 0x14f   : > { %v3880_v61 = vpop.f32.mrf.mxu1 }
 0x150   : > { %v5492_v17 = vadd.f32 %v1733_v45, %v1583_v2  ;;  %v1586_v5 = vadd.f32 %v3880_v61, %v5326_v34  ;;  %v1743_v60 = vpop.f32.mrf.mxu0 }
 0x151   : > { %v1474_v4 = vpop.f32.mrf.mxu1 }
 0x152   : > { %v5495_v23 = vadd.f32 %v3930_v51, %v1586_v5  ;;  %v1585_v44 = vadd.f32 %v1474_v4, %v5335_v26  ;;  %v3933_v57 = vpop.f32.mrf.mxu0 }
 0x153   : > { %v3883_v46 = vpop.f32.mrf.mxu1 }
 0x154   : > { %v5498_v52 = vadd.f32 %v1743_v60, %v1585_v44  ;;  %v1588_v19 = vadd.f32 %v3883_v46, %v5340_v9  ;;  %v1753_v43 = vpop.f32.mrf.mxu0 }
 0x155   : > { %v1484_v62 = vpop.f32.mrf.mxu1 }
 0x156   : > { %v5501_v6 = vadd.f32 %v3933_v57, %v1588_v19  ;;  %v1587_v29 = vadd.f32 %v1484_v62, %v5349_v42  ;;  %v3936_v20 = vpop.f32.mrf.mxu0 }
 0x157   : > { %v3886_v34 = vpop.f32.mrf.mxu1 }
 0x158   : > { %v5504_v16 = vadd.f32 %v1753_v43, %v1587_v29  ;;  %v1590_v63 = vadd.f32 %v3886_v34, %v5354_v3  ;;  %v1763_v49 = vpop.f32.mrf.mxu0 }
 0x159   : > { %v1494_v26 = vpop.f32.mrf.mxu1 }
 0x15a   : > { %v5507_v25 = vadd.f32 %v3936_v20, %v1590_v63  ;;  %v1589_v13 = vadd.f32 %v1494_v26, %v5363_v8  ;;  %v3939_v27 = vpop.f32.mrf.mxu0 }
 0x15b   : > { %v3889_v9 = vpop.f32.mrf.mxu1 }
 0x15c   : > { %v5510_v11 = vadd.f32 %v1763_v49, %v1589_v13  ;;  %v1592_v15 = vadd.f32 %v3889_v9, %v5368_v1  ;;  %v1773_v28 = vpop.f32.mrf.mxu0 }
 0x15d   : > { %v1504_v42 = vpop.f32.mrf.mxu1 }
 0x15e   : > { %v5513_v14 = vadd.f32 %v3939_v27, %v1592_v15  ;;  %v1591_v35 = vadd.f32 %v1504_v42, %v5377_v39  ;;  %v3942_v50 = vpop.f32.mrf.mxu0 }
 0x15f   : > { %v3892_v3 = vpop.f32.mrf.mxu1 }
 0x160   : > { %6093 = vst [vmem:[#allocation38_spill] sm:$0xff] %v5513_v14  ;;  %v5516_v21 = vadd.f32 %v1773_v28, %v1591_v35  ;;  %v1594_v45 = vadd.f32 %v3892_v3, %v5382_v55  ;;  %v1783_v37 = vpop.f32.mrf.mxu0 }
 0x161   : > { %v1514_v8 = vpop.f32.mrf.mxu1 }
 0x162   : > { %6094 = vst [vmem:[#allocation39_spill] sm:$0xff] %v5516_v21  ;;  %v5519_v2 = vadd.f32 %v3942_v50, %v1594_v45  ;;  %v1593_v51 = vadd.f32 %v1514_v8, %v5391_v38  ;;  %v3945_v61 = vpop.f32.mrf.mxu0 }
 0x163   : > { %v3895_v1 = vpop.f32.mrf.mxu1 }
 0x164   : > { %6095 = vst [vmem:[#allocation40_spill] sm:$0xff] %v5519_v2  ;;  %v5522_v5 = vadd.f32 %v1783_v37, %v1593_v51  ;;  %v1596_v60 = vadd.f32 %v3895_v1, %v5396_v0  ;;  %v1793_v4 = vpop.f32.mrf.mxu0 }
 0x165   : > { %v1524_v39 = vpop.f32.mrf.mxu1 }
 0x166   : > { %6096 = vst [vmem:[#allocation41_spill] sm:$0xff] %v5522_v5  ;;  %v5525_v44 = vadd.f32 %v3945_v61, %v1596_v60  ;;  %v1595_v57 = vadd.f32 %v1524_v39, %v5407_v47  ;;  %v3948_v46 = vpop.f32.mrf.mxu0 }
 0x167   : > { %v3898_v55 = vpop.f32.mrf.mxu1 }
 0x168   : > { %6097 = vst [vmem:[#allocation42_spill] sm:$0xff] %v5525_v44  ;;  %v5528_v19 = vadd.f32 %v1793_v4, %v1595_v57  ;;  %v1598_v43 = vadd.f32 %v3898_v55, %v5415_v33  ;;  %v1803_v62 = vpop.f32.mrf.mxu0 }
 0x169   : > { %v1534_v38 = vpop.f32.mrf.mxu1 }
 0x16a   : > { %6098 = vst [vmem:[#allocation43_spill] sm:$0xff] %v5528_v19  ;;  %v5531_v29 = vadd.f32 %v3948_v46, %v1598_v43  ;;  %v1597_v20 = vadd.f32 %v1534_v38, %v5424_v36  ;;  %v3951_v34 = vpop.f32.mrf.mxu0 }
 0x16b   : > { %v3901_v0 = vpop.f32.mrf.mxu1 }
 0x16c   : > { %6099 = vst [vmem:[#allocation44_spill] sm:$0xff] %v5531_v29  ;;  %v5534_v63 = vadd.f32 %v1803_v62, %v1597_v20  ;;  %v1600_v49 = vadd.f32 %v3901_v0, %v5431_v22  ;;  %v1813_v26 = vpop.f32.mrf.mxu0 }
 0x16d   : > { %v1544_v47 = vpop.f32.mrf.mxu1 }
 0x16e   : > { %6100 = vst [vmem:[#allocation16_spill] sm:$0xff] %v5534_v63  ;;  %v5537_v13 = vadd.f32 %v3951_v34, %v1600_v49  ;;  %v1599_v27 = vadd.f32 %v1544_v47, %v5440_v58  ;;  %v3954_v9 = vpop.f32.mrf.mxu0 }
 0x16f   : > { %v3904_v33 = vpop.f32.mrf.mxu1 }
 0x170   : > { %6101 = vst [vmem:[#allocation21_spill] sm:$0xff] %v5537_v13  ;;  %v5540_v15 = vadd.f32 %v1813_v26, %v1599_v27  ;;  %v1602_v28 = vadd.f32 %v3904_v33, %v5445_v41  ;;  %v1823_v42 = vpop.f32.mrf.mxu0 }
 0x171   : > { %v1554_v36 = vpop.f32.mrf.mxu1 }
 0x172   : > { %6102 = vst [vmem:[#allocation24_spill] sm:$0xff] %v5540_v15  ;;  %v5543_v35 = vadd.f32 %v3954_v9, %v1602_v28  ;;  %v1601_v50 = vadd.f32 %v1554_v36, %v5450_v31  ;;  %v3957_v3 = vpop.f32.mrf.mxu0 }
 0x173   : > { %v3907_v22 = vpop.f32.mrf.mxu1 }
 0x174   : > { %6103 = vst [vmem:[#allocation26_spill] sm:$0xff] %v5543_v35  ;;  %v5546_v45 = vadd.f32 %v1823_v42, %v1601_v50  ;;  %v1604_v37 = vadd.f32 %v3907_v22, %v5453_v30  ;;  %v1833_v8 = vpop.f32.mrf.mxu0 }
 0x175   : > { %v1564_v58 = vpop.f32.mrf.mxu1 }
 0x176   : > { %6104 = vst [vmem:[#allocation28_spill] sm:$0xff] %v5546_v45  ;;  %v5549_v51 = vadd.f32 %v3957_v3, %v1604_v37  ;;  %v1603_v61 = vadd.f32 %v1564_v58, %v5456_v24  ;;  %v5552_v1 = vpop.f32.mrf.mxu0 }
 0x177   : > { %v3962_v41 = vpop.f32.mrf.mxu1 }
 0x178   : > { %6105 = vst [vmem:[#allocation30_spill] sm:$0xff] %v5549_v51  ;;  %v5554_v60 = vadd.f32 %v1833_v8, %v1603_v61  ;;  %v5556_v4 = vpop.f32.mrf.mxu0 }
 0x179   : > { %v1951_v31 = vpop.f32.mrf.mxu1 }
 0x17a   : > { %6106 = vst [vmem:[#allocation32_spill] sm:$0xff] %v5554_v60  ;;  %v5558_v39 = vpop.f32.mrf.mxu0 }
 0x17b   : > { %v3965_v57 = vpop.f32.mrf.mxu1 }
 0x17c   : > { %v5560_v46 = vpop.f32.mrf.mxu0 }
 0x17d   : > { %v5562_v30 = vpop.f32.mrf.mxu1 }
 0x17e   : > { %v5564_v55 = vpop.f32.mrf.mxu0 }
 0x17f   : > { %v5566_v43 = vpop.f32.mrf.mxu1 }
 0x180   : > { %v5568_v24 = vpop.f32.mrf.mxu0 }
 0x181   : > { %v5570_v62 = vpop.f32.mrf.mxu1 }
 0x182   : > { %v5572_v38 = vpop.f32.mrf.mxu0 }
 0x183   : > { %v5574_v20 = vpop.f32.mrf.mxu1 }
 0x184   : > { %v5576_v34 = vpop.f32.mrf.mxu0 }
 0x185   : > { %v5578_v0 = vpop.f32.mrf.mxu1 }
 0x186   : > { %v5580_v49 = vpop.f32.mrf.mxu0 }
 0x187   : > { %v5582_v26 = vpop.f32.mrf.mxu1 }
 0x188   : > { %v5584_v47 = vpop.f32.mrf.mxu0 }
 0x189   : > { %v5586_v27 = vpop.f32.mrf.mxu1 }
 0x18a   : > { %v5588_v9 = vpop.f32.mrf.mxu0 }
 0x18b   : > { %v5590_v33 = vpop.f32.mrf.mxu1 }
 0x18c   : > { %v5592_v28 = vpop.f32.mrf.mxu0 }
 0x18d   : > { %v5594_v42 = vpop.f32.mrf.mxu1 }
 0x18e   : > { %v5596_v36 = vpop.f32.mrf.mxu0 }
 0x18f   : > { %v5598_v50 = vpop.f32.mrf.mxu1 }
 0x190   : > { %v5600_v3 = vpop.f32.mrf.mxu0 }
 0x191   : > { %v5602_v22 = vpop.f32.mrf.mxu1 }
 0x192   : > { %v5604_v37 = vpop.f32.mrf.mxu0 }
 0x193   : > { %v5606_v8 = vpop.f32.mrf.mxu1 }
 0x194   : > { %v5608_v58 = vpop.f32.mrf.mxu0 }
 0x195   : > { %v5610_v61 = vpop.f32.mrf.mxu1 }
 0x196   : > { %v5612_v60 = vpop.f32.mrf.mxu0 }
 0x197   : > { %v5614_v51 = vpop.f32.mrf.mxu1 }
 0x198   : > { %v5616_v45 = vpop.f32.mrf.mxu0 }
 0x199   : > { %6107 = vst [vmem:[#allocation2_spill] sm:$0xff] %v5616_v45  ;;  %v5618_v35 = vpop.f32.mrf.mxu1 }
 0x19a   : > { %v5620_v15 = vpop.f32.mrf.mxu0 }
 0x19b   : > { %6108 = vst [vmem:[#allocation3_spill] sm:$0xff] %v5620_v15  ;;  %v5622_v13 = vpop.f32.mrf.mxu1 }
 0x19c   : > { %6109 = vst [vmem:[#allocation5_spill] sm:$0xff] %v5622_v13  ;;  %v5624_v63 = vpop.f32.mrf.mxu0 }
 0x19d   : > { %6110 = vst [vmem:[#allocation7_spill] sm:$0xff] %v5624_v63  ;;  %v5626_v29 = vpop.f32.mrf.mxu1 }
 0x19e   : > { %6111 = vst [vmem:[#allocation9_spill] sm:$0xff] %v5626_v29  ;;  %v5628_v19 = vpop.f32.mrf.mxu0 }
 0x19f   : > { %6112 = vst [vmem:[#allocation11_spill] sm:$0xff] %v5628_v19  ;;  %v5630_v44 = vpop.f32.mrf.mxu1 }
 0x1a0   : > { %6113 = vst [vmem:[#allocation13_spill] sm:$0xff] %v5630_v44  ;;  %v5632_v5 = vpop.f32.mrf.mxu0 }
 0x1a1   : > { %6114 = vst [vmem:[#allocation15_spill] sm:$0xff] %v5632_v5  ;;  %v5634_v2 = vpop.f32.mrf.mxu1 }
 0x1a2   : > { %6115 = vst [vmem:[#allocation17_spill] sm:$0xff] %v5634_v2  ;;  %v5636_v21 = vpop.f32.mrf.mxu0 }
 0x1a3   : > { %6116 = vst [vmem:[#allocation20_spill] sm:$0xff] %v5636_v21  ;;  %v5638_v45 = vpop.f32.mrf.mxu1 }
 0x1a4   : > { %6117 = vst [vmem:[#allocation22_spill] sm:$0xff] %v5638_v45  ;;  %v5640_v14 = vpop.f32.mrf.mxu0 }
 0x1a5   : > { %6118 = vst [vmem:[#allocation25_spill] sm:$0xff] %v5640_v14  ;;  %v5642_v15 = vpop.f32.mrf.mxu1 }
 0x1a6   : > { %6119 = vst [vmem:[#allocation27_spill] sm:$0xff] %v5642_v15  ;;  %v5644_v13 = vpop.f32.mrf.mxu0 }
 0x1a7   : > { %6120 = vst [vmem:[#allocation29_spill] sm:$0xff] %v5644_v13  ;;  %v5646_v63 = vpop.f32.mrf.mxu1 }
 0x1a8   : > { %6121 = vst [vmem:[#allocation6_spill] sm:$0xff] %v5646_v63  ;;  %v5648_v29 = vpop.f32.mrf.mxu0 }
 0x1a9   : > { %6122 = vst [vmem:[#allocation31_spill] sm:$0xff] %v5648_v29  ;;  %v5650_v19 = vpop.f32.mrf.mxu1  ;;  %v2111_v29 = vadd.f32 %v3962_v41, %v5459_v10  ;;  %v2112_v10 = vadd.f32 %v5562_v30, %v5468_v7  ;;  %v2114_v7 = vadd.f32 %v5570_v62, %v5474_v18 }
 0x1aa   : > { %6123 = vst [vmem:[#allocation8_spill] sm:$0xff] %v5650_v19  ;;  %v5652_v44 = vpop.f32.mrf.mxu0 }
 0x1ab   : > { %6124 = vst [vmem:[#allocation18_spill] sm:$0xff] %v5652_v44  ;;  %v5654_v5 = vpop.f32.mrf.mxu1  ;;  %v2110_v44 = vadd.f32 %v1951_v31, %v5462_v59  ;;  %v2115_v59 = vadd.f32 %v5566_v43, %v5471_v56  ;;  %v5688_v31 = vld [vmem:[%s5881_s2] ss:$0 sm:$0xff] }
 0x1ac   : > { %6125 = vst [vmem:[#allocation33_spill] sm:$0xff] %v5654_v5  ;;  %v5656_v2 = vpop.f32.mrf.mxu0 }
 0x1ad   : > { %6126 = vst [vmem:[#allocation14_spill] sm:$0xff] %v5656_v2  ;;  %v5658_v21 = vpop.f32.mrf.mxu1 }
 0x1ae   : > { %6127 = vst [vmem:[#allocation10_spill] sm:$0xff] %v5658_v21  ;;  %v5660_v45 = vpop.f32.mrf.mxu0 }
 0x1af   : > { %6128 = vst [vmem:[#allocation23_spill] sm:$0xff] %v5660_v45  ;;  %v5662_v14 = vpop.f32.mrf.mxu1  ;;  %v2376_v45 = vadd.f32 %v5552_v1, %v2111_v29 }
 0x1b0   : > { %6129 = vst [vmem:[#allocation12_spill] sm:$0xff] %v5662_v14  ;;  %v5664_v15 = vpop.f32.mrf.mxu0  ;;  %v2113_v14 = vadd.f32 %v3965_v57, %v5465_v54 }
 0x1b1   : > { %6130 = vst [vmem:[#allocation34_spill] sm:$0xff] %v5664_v15  ;;  %v5666_v13 = vpop.f32.mrf.mxu1 }
 0x1b2   : > { %6131 = vst [vmem:[#allocation4_spill] sm:$0xff] %v5666_v13  ;;  %v5669_v63 = vpop.f32.mrf.mxu0  ;;  %v2375_v13 = vadd.f32 %v5556_v4, %v2110_v44  ;;  %v2378_v54 = vadd.f32 %v5558_v39, %v2113_v14  ;;  %v2117_v14 = vadd.f32 %v5574_v20, %v5477_v53  ;;  %v2116_v53 = vadd.f32 %v5578_v0, %v5480_v12 }
 0x1b3   : > { %6132 = vst [vmem:[#allocation19_spill] sm:$0xff] %v5669_v63  ;;  %v5671_v19 = vpop.f32.mrf.mxu1 }
 0x1b4   : > { %v5674_v2 = vpop.f32.mrf.mxu0 }
 0x1b5   : > { %6133 = vst [vmem:[#allocation35_spill] sm:$0xff] %v5674_v2  ;;  %v5676_v21 = vpop.f32.mrf.mxu1  ;;  %v2380_v2 = vadd.f32 %v5564_v55, %v2115_v59  ;;  %v2379_v55 = vadd.f32 %v5568_v24, %v2114_v7 }
 0x1b6   : > { %v4112_v15 = vpop.f32.mrf.mxu0 }
 0x1b7   : > { %v4062_v5 = vpop.f32.mrf.mxu1 }
 0x1b8   : > { %v2645_v41 = vadd.f32 %v4062_v5, %v2376_v45  ;;  %v2753_v63 = vpop.f32.mrf.mxu0  ;;  %v2377_v45 = vadd.f32 %v5560_v46, %v2112_v10 }
 0x1b9   : > { %v2485_v29 = vpop.f32.mrf.mxu1 }
 0x1ba   : > { %v2913_v1 = vadd.f32 %v4112_v15, %v2645_v41  ;;  %v2644_v57 = vadd.f32 %v2485_v29, %v2375_v13  ;;  %v4115_v44 = vpop.f32.mrf.mxu0 }
 0x1bb   : > { %v4065_v5 = vpop.f32.mrf.mxu1 }
 0x1bc   : > { %v2952_v56 = vadd.f32 %v5688_v31, %v2913_v1  ;;  %v2912_v4 = vadd.f32 %v2753_v63, %v2644_v57  ;;  %v2647_v30 = vadd.f32 %v4065_v5, %v2378_v54  ;;  %v2763_v43 = vpop.f32.mrf.mxu0  ;;  %v2382_v54 = vadd.f32 %v5572_v38, %v2117_v14 }
 0x1bd   : > { %v2495_v18 = vpop.f32.mrf.mxu1  ;;  %v2119_v1 = vadd.f32 %v5582_v26, %v5483_v48  ;;  %v2381_v5 = vadd.f32 %v5576_v34, %v2116_v53 }
 0x1be   : > { %v2984_v13 = vmax.f32 %v2952_v56, 0.0  ;;  %v2951_v15 = vadd.f32 %v5688_v31, %v2912_v4  ;;  %v2915_v63 = vadd.f32 %v4115_v44, %v2647_v30  ;;  %v2646_v39 = vadd.f32 %v2495_v18, %v2377_v45  ;;  %v4118_v46 = vpop.f32.mrf.mxu0 }
 0x1bf   : > { %v4068_v62 = vpop.f32.mrf.mxu1  ;;  %v2384_v30 = vadd.f32 %v5580_v49, %v2119_v1 }
 0x1c0   : > { %3017 = vst.msk [vmem:[%s5702_s15 + $0x8] sm:$0xff] %vm3015_vm3, %v2984_v13  ;;  %v2983_v20 = vmax.f32 %v2951_v15, 0.0  ;;  %v2954_v10 = vadd.f32 %v5688_v31, %v2915_v63  ;;  %v2914_v41 = vadd.f32 %v2763_v43, %v2646_v39  ;;  %v2649_v59 = vadd.f32 %v4068_v62, %v2380_v2  ;;  %v2773_v29 = vpop.f32.mrf.mxu0 }
 0x1c1   : > { %v2505_v57 = vpop.f32.mrf.mxu1  ;;  %v2118_v2 = vadd.f32 %v5586_v27, %v5486_v32  ;;  %v2121_v43 = vadd.f32 %v5590_v33, %v5489_v40  ;;  %v2120_v63 = vadd.f32 %v5594_v42, %v5492_v17  ;;  %v2123_v62 = vadd.f32 %v5598_v50, %v5495_v23 }
 0x1c2   : > { %3016 = vst.msk [vmem:[%s5702_s15] sm:$0xff] %vm3015_vm3, %v2983_v20  ;;  %v2986_v24 = vmax.f32 %v2954_v10, 0.0  ;;  %v2953_v12 = vadd.f32 %v5688_v31, %v2914_v41  ;;  %v2917_v0 = vadd.f32 %v4118_v46, %v2649_v59  ;;  %v2648_v44 = vadd.f32 %v2505_v57, %v2379_v55  ;;  %v4121_v7 = vpop.f32.mrf.mxu0 }
 0x1c3   : > { %v4071_v45 = vpop.f32.mrf.mxu1  ;;  %v2383_v15 = vadd.f32 %v5584_v47, %v2118_v2  ;;  %v2386_v53 = vadd.f32 %v5588_v9, %v2121_v43  ;;  %v2385_v59 = vadd.f32 %v5592_v28, %v2120_v63  ;;  %v2124_v2 = vadd.f32 %v5610_v61, %v5504_v16  ;;  %v6135_v63 = vld [vmem:[#allocation5_spill] sm:$0xff] }
 0x1c4   : > { %3019 = vst.msk [vmem:[%s5702_s15 + $0x18] sm:$0xff] %vm3015_vm3, %v2986_v24  ;;  %v2985_v38 = vmax.f32 %v2953_v12, 0.0  ;;  %v2956_v48 = vadd.f32 %v5688_v31, %v2917_v0  ;;  %v2916_v26 = vadd.f32 %v2773_v29, %v2648_v44  ;;  %v2651_v56 = vadd.f32 %v4071_v45, %v2382_v54  ;;  %v2783_v4 = vpop.f32.mrf.mxu0 }
 0x1c5   : > { %v2515_v14 = vpop.f32.mrf.mxu1  ;;  %v2122_v29 = vadd.f32 %v5602_v22, %v5498_v52  ;;  %v2388_v24 = vadd.f32 %v5596_v36, %v2123_v62  ;;  %v2125_v12 = vadd.f32 %v5606_v8, %v5501_v6  ;;  %v6138_v62 = vld [vmem:[#allocation9_spill] sm:$0xff] }
 0x1c6   : > { %3018 = vst.msk [vmem:[%s5702_s15 + $0x10] sm:$0xff] %vm3015_vm3, %v2985_v38  ;;  %v2988_v34 = vmax.f32 %v2956_v48, 0.0  ;;  %v2955_v32 = vadd.f32 %v5688_v31, %v2916_v26  ;;  %v2919_v27 = vadd.f32 %v4121_v7, %v2651_v56  ;;  %v2650_v18 = vadd.f32 %v2515_v14, %v2381_v5  ;;  %v4124_v13 = vpop.f32.mrf.mxu0 }
 0x1c7   : > { %v4074_v39 = vpop.f32.mrf.mxu1  ;;  %v2387_v5 = vadd.f32 %v5600_v3, %v2122_v29  ;;  %v2390_v26 = vadd.f32 %v5604_v37, %v2125_v12  ;;  %v2127_v56 = vadd.f32 %v5614_v51, %v5507_v25  ;;  %v2389_v14 = vadd.f32 %v5608_v58, %v2124_v2 }
 0x1c8   : > { %3021 = vst.msk [vmem:[%s5702_s15 + $0x28] sm:$0xff] %vm3015_vm3, %v2988_v34  ;;  %v2987_v49 = vmax.f32 %v2955_v32, 0.0  ;;  %v2958_v40 = vadd.f32 %v5688_v31, %v2919_v27  ;;  %v2918_v33 = vadd.f32 %v2783_v4, %v2650_v18  ;;  %v2653_v46 = vadd.f32 %v4074_v39, %v2384_v30  ;;  %v2793_v55 = vpop.f32.mrf.mxu0 }
 0x1c9   : > { %v2525_v20 = vpop.f32.mrf.mxu1  ;;  %v2126_v34 = vadd.f32 %v5618_v35, %v5510_v11 }
 0x1ca   : > { %3020 = vst.msk [vmem:[%s5702_s15 + $0x20] sm:$0xff] %vm3015_vm3, %v2987_v49  ;;  %v2990_v47 = vmax.f32 %v2958_v40, 0.0  ;;  %v2957_v17 = vadd.f32 %v5688_v31, %v2918_v33  ;;  %v2921_v42 = vadd.f32 %v4124_v13, %v2653_v46  ;;  %v2652_v10 = vadd.f32 %v2525_v20, %v2383_v15  ;;  %v4127_v41 = vpop.f32.mrf.mxu0  ;;  %v6134_v15 = vld [vmem:[#allocation38_spill] sm:$0xff] }
 0x1cb   : > { %v4077_v54 = vpop.f32.mrf.mxu1  ;;  %v2392_v13 = vadd.f32 %v5612_v60, %v2127_v56  ;;  %v2129_v39 = vadd.f32 %v6135_v63, %v6134_v15  ;;  %v6136_v46 = vld [vmem:[#allocation2_spill] sm:$0xff] }
 0x1cc   : > { %3023 = vst.msk [vmem:[%s5702_s15 + $0x38] sm:$0xff] %vm3015_vm3, %v2990_v47  ;;  %v2989_v9 = vmax.f32 %v2957_v17, 0.0  ;;  %v2960_v23 = vadd.f32 %v5688_v31, %v2921_v42  ;;  %v2920_v50 = vadd.f32 %v2793_v55, %v2652_v10  ;;  %v2655_v1 = vadd.f32 %v4077_v54, %v2386_v53  ;;  %v2803_v57 = vpop.f32.mrf.mxu0  ;;  %v6137_v53 = vld [vmem:[#allocation39_spill] sm:$0xff]  ;;  %v6140_v54 = vld [vmem:[#allocation40_spill] sm:$0xff]  ;;  %v6147_v56 = vld [vmem:[#allocation22_spill] sm:$0xff] }
 0x1cd   : > { %v2535_v0 = vpop.f32.mrf.mxu1  ;;  %v2391_v55 = vadd.f32 %v6136_v46, %v2126_v34  ;;  %v2128_v20 = vadd.f32 %v6138_v62, %v6137_v53  ;;  %v6148_v34 = vld [vmem:[#allocation15_spill] sm:$0xff] }
 0x1ce   : > { %3022 = vst.msk [vmem:[%s5702_s15 + $0x30] sm:$0xff] %vm3015_vm3, %v2989_v9  ;;  %v2992_v28 = vmax.f32 %v2960_v23, 0.0  ;;  %v2959_v52 = vadd.f32 %v5688_v31, %v2920_v50  ;;  %v2923_v22 = vadd.f32 %v4127_v41, %v2655_v1  ;;  %v2654_v44 = vadd.f32 %v2535_v0, %v2385_v59  ;;  %v4130_v7 = vpop.f32.mrf.mxu0  ;;  %v6139_v59 = vld [vmem:[#allocation3_spill] sm:$0xff]  ;;  %v6141_v9 = vld [vmem:[#allocation13_spill] sm:$0xff] }
 0x1cf   : > { %v4080_v45 = vpop.f32.mrf.mxu1  ;;  %v2394_v29 = vadd.f32 %v6139_v59, %v2129_v39  ;;  %v2131_v23 = vadd.f32 %v6141_v9, %v6140_v54 }
 0x1d0   : > { %3025 = vst.msk [vmem:[%s5702_s15 + $0x48] sm:$0xff] %vm3015_vm3, %v2992_v28  ;;  %v2991_v36 = vmax.f32 %v2959_v52, 0.0  ;;  %v2962_v6 = vadd.f32 %v5688_v31, %v2923_v22  ;;  %v2922_v8 = vadd.f32 %v2803_v57, %v2654_v44  ;;  %v2657_v38 = vadd.f32 %v4080_v45, %v2388_v24  ;;  %v2813_v48 = vpop.f32.mrf.mxu0  ;;  %v6142_v28 = vld [vmem:[#allocation7_spill] sm:$0xff]  ;;  %v6143_v22 = vld [vmem:[#allocation41_spill] sm:$0xff] }
 0x1d1   : > { %v2545_v4 = vpop.f32.mrf.mxu1  ;;  %v2393_v52 = vadd.f32 %v6142_v28, %v2128_v20  ;;  %v6144_v44 = vld [vmem:[#allocation17_spill] sm:$0xff] }
 0x1d2   : > { %3024 = vst.msk [vmem:[%s5702_s15 + $0x40] sm:$0xff] %vm3015_vm3, %v2991_v36  ;;  %v2994_v3 = vmax.f32 %v2962_v6, 0.0  ;;  %v2961_v16 = vadd.f32 %v5688_v31, %v2922_v8  ;;  %v2925_v61 = vadd.f32 %v4130_v7, %v2657_v38  ;;  %v2656_v30 = vadd.f32 %v2545_v4, %v2387_v5  ;;  %v4133_v43 = vpop.f32.mrf.mxu0  ;;  %v6145_v38 = vld [vmem:[#allocation11_spill] sm:$0xff] }
 0x1d3   : > { %v4083_v32 = vpop.f32.mrf.mxu1  ;;  %v2130_v7 = vadd.f32 %v6144_v44, %v6143_v22 }
 0x1d4   : > { %3027 = vst.msk [vmem:[%s5702_s15 + $0x58] sm:$0xff] %vm3015_vm3, %v2994_v3  ;;  %v2993_v37 = vmax.f32 %v2961_v16, 0.0  ;;  %v2964_v25 = vadd.f32 %v5688_v31, %v2925_v61  ;;  %v2924_v51 = vadd.f32 %v2813_v48, %v2656_v30  ;;  %v2659_v27 = vadd.f32 %v4083_v32, %v2390_v26  ;;  %v2823_v18 = vpop.f32.mrf.mxu0  ;;  %v6146_v26 = vld [vmem:[#allocation42_spill] sm:$0xff] }
 0x1d5   : > { %v2555_v49 = vpop.f32.mrf.mxu1  ;;  %v2396_v48 = vadd.f32 %v6145_v38, %v2131_v23  ;;  %v2133_v4 = vadd.f32 %v6147_v56, %v6146_v26  ;;  %v2395_v32 = vadd.f32 %v6148_v34, %v2130_v7 }
 0x1d6   : > { %3026 = vst.msk [vmem:[%s5702_s15 + $0x50] sm:$0xff] %vm3015_vm3, %v2993_v37  ;;  %v2996_v58 = vmax.f32 %v2964_v25, 0.0  ;;  %v2963_v11 = vadd.f32 %v5688_v31, %v2924_v51  ;;  %v2927_v35 = vadd.f32 %v4133_v43, %v2659_v27  ;;  %v2658_v40 = vadd.f32 %v2555_v49, %v2389_v14  ;;  %v4136_v33 = vpop.f32.mrf.mxu0  ;;  %v6149_v37 = vld [vmem:[#allocation43_spill] sm:$0xff]  ;;  %v6151_v49 = vld [vmem:[#allocation20_spill] sm:$0xff] }
 0x1d7   : > { %v4086_v47 = vpop.f32.mrf.mxu1  ;;  %v6150_v25 = vld [vmem:[#allocation27_spill] sm:$0xff] }
 0x1d8   : > { %3029 = vst.msk [vmem:[%s5702_s15 + $0x68] sm:$0xff] %vm3015_vm3, %v2996_v58  ;;  %v2995_v60 = vmax.f32 %v2963_v11, 0.0  ;;  %v2966_v17 = vadd.f32 %v5688_v31, %v2927_v35  ;;  %v2926_v42 = vadd.f32 %v2823_v18, %v2658_v40  ;;  %v2661_v10 = vadd.f32 %v4086_v47, %v2392_v13  ;;  %v2833_v41 = vpop.f32.mrf.mxu0  ;;  %v6152_v11 = vld [vmem:[#allocation44_spill] sm:$0xff]  ;;  %v6153_v35 = vld [vmem:[#allocation6_spill] sm:$0xff]  ;;  %v6154_v47 = vld [vmem:[#allocation25_spill] sm:$0xff] }
 0x1d9   : > { %v2565_v50 = vpop.f32.mrf.mxu1  ;;  %v2132_v51 = vadd.f32 %v6150_v25, %v6149_v37  ;;  %v2398_v58 = vadd.f32 %v6151_v49, %v2133_v4  ;;  %v2135_v40 = vadd.f32 %v6153_v35, %v6152_v11 }
 0x1da   : > { %3028 = vst.msk [vmem:[%s5702_s15 + $0x60] sm:$0xff] %vm3015_vm3, %v2995_v60  ;;  %v2998_v1 = vmax.f32 %v2966_v17, 0.0  ;;  %v2965_v57 = vadd.f32 %v5688_v31, %v2926_v42  ;;  %v2929_v24 = vadd.f32 %v4136_v33, %v2661_v10  ;;  %v2660_v12 = vadd.f32 %v2565_v50, %v2391_v55  ;;  %v4139_v0 = vpop.f32.mrf.mxu0  ;;  %v6155_v17 = vld [vmem:[#allocation16_spill] sm:$0xff]  ;;  %v6157_v50 = vld [vmem:[#allocation29_spill] sm:$0xff] }
 0x1db   : > { %v4089_v5 = vpop.f32.mrf.mxu1  ;;  %v2397_v60 = vadd.f32 %v6154_v47, %v2132_v51  ;;  %v6156_v42 = vld [vmem:[#allocation8_spill] sm:$0xff] }
 0x1dc   : > { %3031 = vst.msk [vmem:[%s5702_s15 + $0x78] sm:$0xff] %vm3015_vm3, %v2998_v1  ;;  %v2997_v2 = vmax.f32 %v2965_v57, 0.0  ;;  %v2968_v45 = vadd.f32 %v5688_v31, %v2929_v24  ;;  %v2928_v36 = vadd.f32 %v2833_v41, %v2660_v12  ;;  %v2663_v6 = vadd.f32 %v4089_v5, %v2394_v29  ;;  %v2843_v8 = vpop.f32.mrf.mxu0  ;;  %v6158_v57 = vld [vmem:[#allocation21_spill] sm:$0xff]  ;;  %v6160_v5 = vld [vmem:[#allocation31_spill] sm:$0xff] }
 0x1dd   : > { %v2575_v3 = vpop.f32.mrf.mxu1  ;;  %v2134_v10 = vadd.f32 %v6156_v42, %v6155_v17  ;;  %v2400_v1 = vadd.f32 %v6157_v50, %v2135_v40  ;;  %v6159_v24 = vld [vmem:[#allocation33_spill] sm:$0xff] }
 0x1de   : > { %3030 = vst.msk [vmem:[%s5702_s15 + $0x70] sm:$0xff] %vm3015_vm3, %v2997_v2  ;;  %v3000_v16 = vmax.f32 %v2968_v45, 0.0  ;;  %v2967_v61 = vadd.f32 %v5688_v31, %v2928_v36  ;;  %v2931_v30 = vadd.f32 %v4139_v0, %v2663_v6  ;;  %v2662_v43 = vadd.f32 %v2575_v3, %v2393_v52  ;;  %v4142_v14 = vpop.f32.mrf.mxu0  ;;  %v6161_v45 = vld [vmem:[#allocation24_spill] sm:$0xff]  ;;  %v6162_v36 = vld [vmem:[#allocation10_spill] sm:$0xff] }
 0x1df   : > { %v4092_v27 = vpop.f32.mrf.mxu1  ;;  %v2137_v12 = vadd.f32 %v6159_v24, %v6158_v57  ;;  %v2399_v2 = vadd.f32 %v6160_v5, %v2134_v10  ;;  %v2136_v6 = vadd.f32 %v6162_v36, %v6161_v45  ;;  %v6163_v3 = vld [vmem:[#allocation18_spill] sm:$0xff]  ;;  %v6173_v57 = vld [vmem:[#allocation19_spill] sm:$0xff] }
 0x1e0   : > { %3033 = vst.msk [vmem:[%s5702_s15 + $0x88] sm:$0xff] %vm3015_vm3, %v3000_v16  ;;  %v2999_v18 = vmax.f32 %v2967_v61, 0.0  ;;  %v2970_v13 = vadd.f32 %v5688_v31, %v2931_v30  ;;  %v2930_v15 = vadd.f32 %v2843_v8, %v2662_v43  ;;  %v2665_v63 = vadd.f32 %v4092_v27, %v2396_v48  ;;  %v2853_v39 = vpop.f32.mrf.mxu0  ;;  %v6164_v61 = vld [vmem:[#allocation26_spill] sm:$0xff]  ;;  %v6165_v30 = vld [vmem:[#allocation12_spill] sm:$0xff] }
 0x1e1   : > { %v2585_v33 = vpop.f32.mrf.mxu1  ;;  %v2402_v16 = vadd.f32 %v6163_v3, %v2137_v12  ;;  %v2139_v43 = vadd.f32 %v6165_v30, %v6164_v61  ;;  %v6166_v27 = vld [vmem:[#allocation14_spill] sm:$0xff] }
 0x1e2   : > { %3032 = vst.msk [vmem:[%s5702_s15 + $0x80] sm:$0xff] %vm3015_vm3, %v2999_v18  ;;  %v3002_v46 = vmax.f32 %v2970_v13, 0.0  ;;  %v2969_v55 = vadd.f32 %v5688_v31, %v2930_v15  ;;  %v2933_v53 = vadd.f32 %v4142_v14, %v2665_v63  ;;  %v2664_v62 = vadd.f32 %v2585_v33, %v2395_v32  ;;  %v4145_v20 = vpop.f32.mrf.mxu0  ;;  %v6167_v13 = vld [vmem:[#allocation28_spill] sm:$0xff]  ;;  %v6169_v33 = vld [vmem:[#allocation23_spill] sm:$0xff]  ;;  %v6171_v10 = vld [vmem:[#allocation34_spill] sm:$0xff] }
 0x1e3   : > { %v4095_v41 = vpop.f32.mrf.mxu1  ;;  %v2401_v18 = vadd.f32 %v6166_v27, %v2136_v6  ;;  %v6168_v15 = vld [vmem:[#allocation4_spill] sm:$0xff] }
 0x1e4   : > { %3035 = vst.msk [vmem:[%s5702_s15 + $0x98] sm:$0xff] %vm3015_vm3, %v3002_v46  ;;  %v3001_v59 = vmax.f32 %v2969_v55, 0.0  ;;  %v2972_v29 = vadd.f32 %v5688_v31, %v2933_v53  ;;  %v2932_v54 = vadd.f32 %v2853_v39, %v2664_v62  ;;  %v2667_v9 = vadd.f32 %v4095_v41, %v2398_v58  ;;  %v2863_v23 = vpop.f32.mrf.mxu0  ;;  %v6170_v55 = vld [vmem:[#allocation30_spill] sm:$0xff] }
 0x1e5   : > { %v2595_v0 = vpop.f32.mrf.mxu1  ;;  %v2138_v63 = vadd.f32 %v6168_v15, %v6167_v13  ;;  %v2404_v46 = vadd.f32 %v6169_v33, %v2139_v43  ;;  %v2141_v53 = vadd.f32 %v5671_v19, %v6170_v55 }
 0x1e6   : > { %3034 = vst.msk [vmem:[%s5702_s15 + $0x90] sm:$0xff] %vm3015_vm3, %v3001_v59  ;;  %v3004_v28 = vmax.f32 %v2972_v29, 0.0  ;;  %v2971_v52 = vadd.f32 %v5688_v31, %v2932_v54  ;;  %v2935_v22 = vadd.f32 %v4145_v20, %v2667_v9  ;;  %v2666_v44 = vadd.f32 %v2595_v0, %v2397_v60  ;;  %v4148_v7 = vpop.f32.mrf.mxu0  ;;  %v6172_v59 = vld [vmem:[#allocation32_spill] sm:$0xff] }
 0x1e7   : > { %v4098_v8 = vpop.f32.mrf.mxu1  ;;  %v2403_v41 = vadd.f32 %v6171_v10, %v2138_v63  ;;  %v2140_v29 = vadd.f32 %v5676_v21, %v6172_v59  ;;  %v2406_v24 = vadd.f32 %v6173_v57, %v2141_v53 }
 0x1e8   : > { %3037 = vst.msk [vmem:[%s5702_s15 + $0xa8] sm:$0xff] %vm3015_vm3, %v3004_v28  ;;  %v3003_v38 = vmax.f32 %v2971_v52, 0.0  ;;  %v2974_v48 = vadd.f32 %v5688_v31, %v2935_v22  ;;  %v2934_v26 = vadd.f32 %v2863_v23, %v2666_v44  ;;  %v2669_v56 = vadd.f32 %v4098_v8, %v2400_v1  ;;  %v2873_v4 = vpop.f32.mrf.mxu0  ;;  %v6174_v22 = vld [vmem:[#allocation35_spill] sm:$0xff] }
 0x1e9   : > { %v2605_v14 = vpop.f32.mrf.mxu1  ;;  %v2405_v44 = vadd.f32 %v6174_v22, %v2140_v29 }
 0x1ea   : > { %3036 = vst.msk [vmem:[%s5702_s15 + $0xa0] sm:$0xff] %vm3015_vm3, %v3003_v38  ;;  %v3006_v34 = vmax.f32 %v2974_v48, 0.0  ;;  %v2973_v32 = vadd.f32 %v5688_v31, %v2934_v26  ;;  %v2937_v37 = vadd.f32 %v4148_v7, %v2669_v56  ;;  %v2668_v25 = vadd.f32 %v2605_v14, %v2399_v2  ;;  %v4151_v51 = vpop.f32.mrf.mxu0 }
 0x1eb   : > { %v4101_v39 = vpop.f32.mrf.mxu1 }
 0x1ec   : > { %3039 = vst.msk [vmem:[%s5702_s15 + $0xb8] sm:$0xff] %vm3015_vm3, %v3006_v34  ;;  %v3005_v49 = vmax.f32 %v2973_v32, 0.0  ;;  %v2976_v58 = vadd.f32 %v5688_v31, %v2937_v37  ;;  %v2936_v11 = vadd.f32 %v2873_v4, %v2668_v25  ;;  %v2671_v35 = vadd.f32 %v4101_v39, %v2402_v16  ;;  %v2883_v40 = vpop.f32.mrf.mxu0 }
 0x1ed   : > { %v2615_v62 = vpop.f32.mrf.mxu1 }
 0x1ee   : > { %3038 = vst.msk [vmem:[%s5702_s15 + $0xb0] sm:$0xff] %vm3015_vm3, %v3005_v49  ;;  %v3008_v20 = vmax.f32 %v2976_v58, 0.0  ;;  %v2975_v47 = vadd.f32 %v5688_v31, %v2936_v11  ;;  %v2939_v60 = vadd.f32 %v4151_v51, %v2671_v35  ;;  %v2670_v17 = vadd.f32 %v2615_v62, %v2401_v18  ;;  %v4154_v42 = vpop.f32.mrf.mxu0 }
 0x1ef   : > { %v4104_v54 = vpop.f32.mrf.mxu1 }
 0x1f0   : > { %3041 = vst.msk [vmem:[%s5702_s15 + $0xc8] sm:$0xff] %vm3015_vm3, %v3008_v20  ;;  %v3007_v19 = vmax.f32 %v2975_v47, 0.0  ;;  %v2978_v9 = vadd.f32 %v5688_v31, %v2939_v60  ;;  %v2938_v23 = vadd.f32 %v2883_v40, %v2670_v17  ;;  %v2673_v50 = vadd.f32 %v4104_v54, %v2404_v46  ;;  %v2893_v1 = vpop.f32.mrf.mxu0 }
 0x1f1   : > { %v2625_v12 = vpop.f32.mrf.mxu1 }
 0x1f2   : > { %3040 = vst.msk [vmem:[%s5702_s15 + $0xc0] sm:$0xff] %vm3015_vm3, %v3007_v19  ;;  %v3010_v0 = vmax.f32 %v2978_v9, 0.0  ;;  %v2977_v28 = vadd.f32 %v5688_v31, %v2938_v23  ;;  %v2941_v21 = vadd.f32 %v4154_v42, %v2673_v50  ;;  %v2672_v52 = vadd.f32 %v2625_v12, %v2403_v41  ;;  %v4157_v5 = vpop.f32.mrf.mxu0 }
 0x1f3   : > { %v4107_v7 = vpop.f32.mrf.mxu1 }
 0x1f4   : > { %3043 = vst.msk [vmem:[%s5702_s15 + $0xd8] sm:$0xff] %vm3015_vm3, %v3010_v0  ;;  %v3009_v2 = vmax.f32 %v2977_v28, 0.0  ;;  %v2980_v45 = vadd.f32 %v5688_v31, %v2941_v21  ;;  %v2940_v36 = vadd.f32 %v2893_v1, %v2672_v52  ;;  %v2675_v6 = vadd.f32 %v4107_v7, %v2406_v24  ;;  %v2903_v4 = vpop.f32.mrf.mxu0 }
 0x1f5   : > { %v2635_v8 = vpop.f32.mrf.mxu1 }
 0x1f6   : > { %3042 = vst.msk [vmem:[%s5702_s15 + $0xd0] sm:$0xff] %vm3015_vm3, %v3009_v2  ;;  %v3012_v38 = vmax.f32 %v2980_v45, 0.0  ;;  %v2979_v48 = vadd.f32 %v5688_v31, %v2940_v36  ;;  %v2943_v26 = vadd.f32 %v4157_v5, %v2675_v6  ;;  %v2674_v56 = vadd.f32 %v2635_v8, %v2405_v44 }
 0x1f8   : > { %3045 = vst.msk [vmem:[%s5702_s15 + $0xe8] sm:$0xff] %vm3015_vm3, %v3012_v38  ;;  %v3011_v3 = vmax.f32 %v2979_v48, 0.0  ;;  %v2982_v16 = vadd.f32 %v5688_v31, %v2943_v26  ;;  %v2942_v61 = vadd.f32 %v2903_v4, %v2674_v56 }
 0x1fa   : > { %3044 = vst.msk [vmem:[%s5702_s15 + $0xe0] sm:$0xff] %vm3015_vm3, %v3011_v3  ;;  %v3014_v30 = vmax.f32 %v2982_v16, 0.0  ;;  %v2981_v43 = vadd.f32 %v5688_v31, %v2942_v61 }
 0x1fc   : > { %3047 = vst.msk [vmem:[%s5702_s15 + $0xf8] sm:$0xff] %vm3015_vm3, %v3014_v30  ;;  %v3013_v14 = vmax.f32 %v2981_v43, 0.0 }
 0x1fe   : > { %3046 = vst.msk [vmem:[%s5702_s15 + $0xf0] sm:$0xff] %vm3015_vm3, %v3013_v14 }
 0x1ff PF: > { %s13_s12 = sadd.s32 1, %s4175_s12  }
 0x200   : > { %p10_p4 = scmp.ge.s32.totalorder %s13_s12, 4  }
 0x202   :  { %12 = sbr.rel (!%p10_p4) target bundleno = 1 (0x1), region = 70 }

// kernel: _lambda_.8
= control target key start
LH: loop header
LB: loop body
LE: loop exit
PB: predicated region body
PF: predicated region fallthrough
CT: control target
= control target key end

     0   :  { %s4242_s12 = smov 0   ;;  %s5951_s0 = inlined_call_operand.vmem [shape: f32[2,18,18,16], index: 0, kind: input, shape index: {}]   ;;  %s5952_s1 = inlined_call_operand.vmem [shape: f32[9,16,16], index: 1, kind: input, shape index: {}]   ;;  %s5953_s2 = inlined_call_operand.vmem [shape: f32[1,16], index: 2, kind: input, shape index: {}]   ;;  %s5954_s3 = inlined_call_operand.vmem [shape: f32[2,16,16,16], index: 3, kind: output, shape index: {}]  }
   0x1 LB: > { %s3111_s13 = sadd.s32 4294967295, %s4220_s12   ;;  %p3115_p0 = scmp.ge.s32.totalorder %s4220_s12, 1  ;;  %s4220_s12 = sphi %s4242_s12, %s13_s12  }
   0x2   : > { %p137_p1 = scmp.lt.s32.totalorder %s4220_s12, 3 }
   0x4   : > { %p138_p2 = pnand %p3115_p0, %p137_p1 }
   0x6   : > { %141 = sbr.rel (%p138_p2) target bundleno = 511 (0x1ff), region = 32 }
   0xb   : > { %v3120_v0 = vld [vmem:[%s5952_s1 + $0x18] sm:$0xff]  ;;  %v3119_v1 = vld [vmem:[%s5952_s1 + $0x10] sm:$0xff]  ;;  %p161_p3 = scmp.lt.s32.totalorder %s3111_s13, 1  ;;  %v226_v2 = vld [vmem:[%s5952_s1 + $0x8] sm:$0xff]  ;;  %vm275_vm0 = vcmask 1046528   ;;  %vm359_vm1 = vcmask 130048  }
   0xc   : > { %4201 = vmatprep.subr.mxu1 %v3120_v0  ;;  %3733 = vmatprep.subr.mxu0 %v3120_v0  ;;  %v3186_v3 = vld [vmem:[%s5952_s1 + $0x28] sm:$0xff]  ;;  %v225_v22 = vld [vmem:[%s5952_s1] sm:$0xff]  ;;  %v4383_v50 = vld [vmem:[%s5952_s1 + $0x38] sm:$0xff]  ;;  %vm938_vm2 = vcmask 1045504  }
   0xd   : > { %4203 = vmatpush3.msra.mxu1 %v3120_v0  ;;  %3734 = vmatpush3.msra.mxu0 %v3120_v0  ;;  %s6248_s13 = smov (!%p161_p3, %s3111_s13), 1  ;;  %v3185_v42 = vld [vmem:[%s5952_s1 + $0x20] sm:$0xff]  ;;  %v4405_v58 = vld [vmem:[%s5952_s1 + $0x48] sm:$0xff] }
   0xe   : > { %4202 = vmatprep.subr.mxu1 %v3119_v1  ;;  %3735 = vmatprep.subr.mxu0 %v3119_v1  ;;  %s4205_s22 = smul.u32 432, %s6248_s13  ;;  %s3426_s4 = sshll.u32 %s6248_s13, 8 }
   0xf   : > { %4204 = vmatpush3.msra.mxu1 %v3119_v1  ;;  %3736 = vmatpush3.msra.mxu0 %v3119_v1  ;;  %s5774_s6 = scalar_lea.vmem %s5954_s3, %s3426_s4 }
  0x10   : > { %3785 = vmatprep.subr.mxu1 %v226_v2  ;;  %3837 = vmatprep.subr.mxu0 %v3186_v3  ;;  %s4268_s25 = scalar_lea.vmem %s5951_s0, %s4205_s22 }
  0x11   : > { %v4271_v4 = vld [vmem:[%s4268_s25] sm:$0xff]  ;;  %v4274_v5 = vld [vmem:[%s4268_s25 + $0x8] sm:$0xff]  ;;  %v4286_v11 = vld [vmem:[%s4268_s25 + $0x10] sm:$0x3] }
  0x12   : > { %v4277_v6 = vld [vmem:[%s4268_s25 + $0xc0] sm:$0xff]  ;;  %v276_v7 = vrot.slane %v4271_v4, 1  ;;  %v277_v8 = vrot.slane %v4274_v5, 1  ;;  %v4282_v9 = vld [vmem:[%s4268_s25 + $0xc8] sm:$0xff]  ;;  %v279_v13 = vrot.slane %v4286_v11, 1  ;;  %v4294_v15 = vld [vmem:[%s4268_s25 + $0x18] sm:$0xff] }
  0x13   : > { %v316_v10 = vrot.slane %v4277_v6, 1  ;;  %v317_v12 = vrot.slane %v4282_v9, 1  ;;  %v4291_v14 = vld [vmem:[%s4268_s25 + $0xd0] sm:$0x3]  ;;  %v4299_v18 = vld [vmem:[%s4268_s25 + $0x20] sm:$0xff]  ;;  %v281_v19 = vrot.slane %v4294_v15, 1 }
  0x14   : > { %v278_v16 = vsel %vm275_vm0, %v276_v7, %v277_v8  ;;  %v319_v17 = vrot.slane %v4291_v14, 1  ;;  %v4303_v20 = vld [vmem:[%s4268_s25 + $0xd8] sm:$0xff]  ;;  %v4306_v21 = vld [vmem:[%s4268_s25 + $0xe0] sm:$0xff]  ;;  %v280_v24 = vsel %vm275_vm0, %v277_v8, %v279_v13  ;;  %v282_v25 = vrot.slane %v4299_v18, 1  ;;  %v4319_v27 = vld [vmem:[%s4268_s25 + $0x28] sm:$0x3] }
  0x15   : > { %3737 = vmatprep.mubr.msk.f32.mxu0 %vm359_vm1, %v278_v16  ;;  %v4313_v23 = vsel %vm275_vm0, %v316_v10, %v317_v12  ;;  %v321_v26 = vrot.slane %v4303_v20, 1  ;;  %v4322_v28 = vld [vmem:[%s4268_s25 + $0xe8] sm:$0x3]  ;;  %v322_v30 = vrot.slane %v4306_v21, 1  ;;  %v284_v31 = vrot.slane %v4319_v27, 1  ;;  %v4334_v33 = vld [vmem:[%s4268_s25 + $0x30] sm:$0xff] }
  0x16   : > { %6037 = vst [vmem:[#allocation2_spill] sm:$0xff] %v4313_v23  ;;  %3761 = vmatprep.mubr.msk.f32.mxu1 %vm359_vm1, %v4313_v23  ;;  %3738 = vmatmul.mubr.msk.f32.vlgmr.msra.gmra.mxu0 %vm359_vm1, %v280_v24  ;;  %v4328_v29 = vsel %vm275_vm0, %v317_v12, %v319_v17  ;;  %v324_v32 = vrot.slane %v4322_v28, 1  ;;  %v4337_v34 = vld [vmem:[%s4268_s25 + $0x38] sm:$0xff]  ;;  %v4340_v35 = vld [vmem:[%s4268_s25 + $0xf0] sm:$0xff]  ;;  %v4345_v36 = vsel %vm275_vm0, %v281_v19, %v282_v25  ;;  %v286_v37 = vrot.slane %v4334_v33, 1  ;;  %v4375_v48 = vld [vmem:[%s4268_s25 + $0x48] sm:$0xff] }
  0x17   : > { %6038 = vst [vmem:[#allocation3_spill] sm:$0xff] %v4328_v29  ;;  %3762 = vmatmul.mubr.msk.f32.vlgmr.msra.gmra.mxu1 %vm359_vm1, %v4328_v29  ;;  %3838 = vmatpush3.msra.mxu0 %v3186_v3  ;;  %6039 = vst [vmem:[#allocation4_spill] sm:$0xff] %v4345_v36  ;;  %v287_v38 = vrot.slane %v4337_v34, 1  ;;  %v4350_v39 = vld [vmem:[%s4268_s25 + $0xf8] sm:$0xff]  ;;  %v326_v40 = vrot.slane %v4340_v35, 1  ;;  %v4362_v43 = vsel %vm275_vm0, %v321_v26, %v322_v30  ;;  %v4378_v49 = vld [vmem:[%s4268_s25 + $0x50] sm:$0xff] }
  0x18   : > { %v4354_v41 = vld [vmem:[%s4268_s25 + $0x40] sm:$0x3]  ;;  %3786 = vmatpush3.msra.mxu1 %v226_v2  ;;  %3740 = vmatprep.mubr.msk.f32.mxu0 %vm359_vm1, %v4345_v36  ;;  %6040 = vst [vmem:[#allocation5_spill] sm:$0xff] %v4362_v43  ;;  %v4365_v44 = vsel %vm275_vm0, %v282_v25, %v284_v31  ;;  %v4368_v45 = vsel %vm275_vm0, %v322_v30, %v324_v32  ;;  %v327_v46 = vrot.slane %v4350_v39, 1  ;;  %v291_v54 = vrot.slane %v4375_v48, 1  ;;  %v4394_v55 = vld [vmem:[%s4268_s25 + $0x108] sm:$0xff] }
  0x19   : > { %6041 = vst [vmem:[#allocation6_spill] sm:$0xff] %v4365_v44  ;;  %6042 = vst [vmem:[#allocation7_spill] sm:$0xff] %v4368_v45  ;;  %v4372_v47 = vld [vmem:[%s4268_s25 + $0x100] sm:$0x3]  ;;  %3764 = vmatprep.mubr.msk.f32.mxu1 %vm359_vm1, %v4362_v43  ;;  %v4388_v51 = vsel %vm275_vm0, %v286_v37, %v287_v38  ;;  %v289_v52 = vrot.slane %v4354_v41, 1  ;;  %v4397_v56 = vld [vmem:[%s4268_s25 + $0x110] sm:$0xff]  ;;  %3787 = vmatprep.subr.mxu1 %v225_v22 }
  0x1a   : > { %6043 = vst [vmem:[#allocation8_spill] sm:$0xff] %v4388_v51  ;;  %v329_v53 = vrot.slane %v4372_v47, 1  ;;  %v4400_v57 = vld [vmem:[%s4268_s25 + $0x60] sm:$0xff]  ;;  %3741 = vmatmul.mubr.msk.f32.gmra.mxu0 %vm359_vm1, %v4365_v44  ;;  %v4410_v59 = vsel %vm275_vm0, %v326_v40, %v327_v46  ;;  %v292_v60 = vrot.slane %v4378_v49, 1  ;;  %v331_v61 = vrot.slane %v4394_v55, 1  ;;  %v4419_v0 = vld [vmem:[%s4268_s25 + $0x68] sm:$0xff]  ;;  %3788 = vmatpush3.msra.mxu1 %v225_v22 }
  0x1b   : > { %6044 = vst [vmem:[#allocation9_spill] sm:$0xff] %v4410_v59  ;;  %v332_v62 = vrot.slane %v4397_v56, 1  ;;  %v4416_v63 = vld [vmem:[%s4268_s25 + $0x58] sm:$0x3]  ;;  %3765 = vmatmul.mubr.msk.f32.gmra.mxu1 %vm359_vm1, %v4368_v45  ;;  %3743 = vmatprep.mubr.msk.f32.mxu0 %vm359_vm1, %v4388_v51  ;;  %v4426_v1 = vsel %vm275_vm0, %v287_v38, %v289_v52  ;;  %v296_v7 = vrot.slane %v4400_v57, 1  ;;  %v4434_v8 = vld [vmem:[%s4268_s25 + $0x120] sm:$0xff] }
  0x1c   : > { %6045 = vst [vmem:[#allocation10_spill] sm:$0xff] %v4426_v1  ;;  %v294_v2 = vrot.slane %v4416_v63, 1  ;;  %v4430_v3 = vld [vmem:[%s4268_s25 + $0x118] sm:$0x3]  ;;  %v4437_v10 = vld [vmem:[%s4268_s25 + $0x128] sm:$0xff]  ;;  %3767 = vmatprep.mubr.msk.f32.mxu1 %vm359_vm1, %v4410_v59  ;;  %v4442_v12 = vsel %vm275_vm0, %v327_v46, %v329_v53  ;;  %v4445_v13 = vsel %vm275_vm0, %v291_v54, %v292_v60  ;;  %v297_v17 = vrot.slane %v4419_v0, 1  ;;  %3839 = vmatprep.subr.mxu0 %v3185_v42 }
  0x1d   : > { %6046 = vst [vmem:[#allocation11_spill] sm:$0xff] %v4442_v12  ;;  %6047 = vst [vmem:[#allocation12_spill] sm:$0xff] %v4445_v13  ;;  %v334_v16 = vrot.slane %v4430_v3, 1  ;;  %v4450_v19 = vld [vmem:[%s4268_s25 + $0x70] sm:$0x3]  ;;  %v4456_v24 = vsel %vm275_vm0, %v331_v61, %v332_v62  ;;  %v336_v25 = vrot.slane %v4434_v8, 1  ;;  %3840 = vmatpush3.msra.mxu0 %v3185_v42  ;;  %3889 = vmatprep.subr.mxu1 %v4383_v50 }
  0x1e   : > { %v4453_v22 = vld [vmem:[%s4268_s25 + $0x130] sm:$0x3]  ;;  %6048 = vst [vmem:[#allocation13_spill] sm:$0xff] %v4456_v24  ;;  %v337_v26 = vrot.slane %v4437_v10, 1  ;;  %v4461_v30 = vld [vmem:[%s4268_s25 + $0x78] sm:$0xff]  ;;  %v4464_v31 = vld [vmem:[%s4268_s25 + $0x80] sm:$0xff]  ;;  %3744 = vmatmul.mubr.msk.f32.gmra.mxu0 %vm359_vm1, %v4426_v1  ;;  %3941 = vmatprep.subr.mxu0 %v4405_v58  ;;  %v4481_v38 = vsel %vm275_vm0, %v292_v60, %v294_v2  ;;  %v4491_v52 = vsel %vm275_vm0, %v296_v7, %v297_v17 }
  0x1f   : > { %v4470_v32 = vld [vmem:[%s4268_s25 + $0x138] sm:$0xff]  ;;  %v4473_v37 = vld [vmem:[%s4268_s25 + $0x140] sm:$0xff]  ;;  %3768 = vmatmul.mubr.msk.f32.gmra.mxu1 %vm359_vm1, %v4442_v12  ;;  %3746 = vmatprep.mubr.msk.f32.mxu0 %vm359_vm1, %v4445_v13  ;;  %6049 = vst [vmem:[#allocation14_spill] sm:$0xff] %v4481_v38  ;;  %v299_v40 = vrot.slane %v4450_v19, 1  ;;  %v339_v42 = vrot.slane %v4453_v22, 1  ;;  %v4488_v46 = vsel %vm275_vm0, %v332_v62, %v334_v16  ;;  %6051 = vst [vmem:[#allocation16_spill] sm:$0xff] %v4491_v52 }
  0x20   : > { %3770 = vmatprep.mubr.msk.f32.mxu1 %vm359_vm1, %v4456_v24  ;;  %6050 = vst [vmem:[#allocation15_spill] sm:$0xff] %v4488_v46  ;;  %v301_v53 = vrot.slane %v4461_v30, 1  ;;  %v302_v54 = vrot.slane %v4464_v31, 1  ;;  %v4496_v60 = vld [vmem:[%s4268_s25 + $0x88] sm:$0x3]  ;;  %v4502_v2 = vsel %vm275_vm0, %v336_v25, %v337_v26  ;;  %v341_v12 = vrot.slane %v4470_v32, 1 }
  0x21   : > { %v4499_v61 = vld [vmem:[%s4268_s25 + $0x148] sm:$0x3]  ;;  %6052 = vst [vmem:[#allocation17_spill] sm:$0xff] %v4502_v2  ;;  %v342_v24 = vrot.slane %v4473_v37, 1  ;;  %v4507_v62 = vld [vmem:[%s4268_s25 + $0x90] sm:$0xff]  ;;  %v4510_v7 = vld [vmem:[%s4268_s25 + $0x98] sm:$0xff]  ;;  %v4525_v25 = vsel %vm275_vm0, %v297_v17, %v299_v40  ;;  %v4532_v29 = vsel %vm275_vm0, %v337_v26, %v339_v42 }
  0x22   : > { %3747 = vmatmul.mubr.msk.f32.gmra.mxu0 %vm359_vm1, %v4481_v38  ;;  %v4515_v16 = vld [vmem:[%s4268_s25 + $0x150] sm:$0xff]  ;;  %v4518_v59 = vld [vmem:[%s4268_s25 + $0x158] sm:$0xff]  ;;  %6054 = vst [vmem:[#allocation19_spill] sm:$0xff] %v4525_v25  ;;  %v304_v45 = vrot.slane %v4496_v60, 1  ;;  %v344_v43 = vrot.slane %v4499_v61, 1  ;;  %6055 = vst [vmem:[#allocation20_spill] sm:$0xff] %v4532_v29 }
  0x23   : > { %6053 = vst [vmem:[#allocation18_spill] sm:$0xff] %v4518_v59  ;;  %3771 = vmatmul.mubr.msk.f32.gmra.mxu1 %vm359_vm1, %v4488_v46  ;;  %3749 = vmatprep.mubr.msk.f32.mxu0 %vm359_vm1, %v4491_v52  ;;  %v4535_v46 = vsel %vm275_vm0, %v301_v53, %v302_v54  ;;  %v306_v23 = vrot.slane %v4507_v62, 1  ;;  %v307_v17 = vrot.slane %v4510_v7, 1  ;;  %v4540_v40 = vld [vmem:[%s4268_s25 + $0xa0] sm:$0x3]  ;;  %v4543_v52 = vsel %vm275_vm0, %v341_v12, %v342_v24  ;;  %v4551_v26 = vld [vmem:[%s4268_s25 + $0xa8] sm:$0xff] }
  0x24   : > { %3773 = vmatprep.mubr.msk.f32.mxu1 %vm359_vm1, %v4502_v2  ;;  %6056 = vst [vmem:[#allocation21_spill] sm:$0xff] %v4535_v46  ;;  %6057 = vst [vmem:[#allocation22_spill] sm:$0xff] %v4543_v52  ;;  %v346_v38 = vrot.slane %v4515_v16, 1  ;;  %v347_v13 = vrot.slane %v4518_v59, 1  ;;  %v4548_v2 = vld [vmem:[%s4268_s25 + $0x160] sm:$0x3]  ;;  %v4569_v12 = vsel %vm275_vm0, %v302_v54, %v304_v45  ;;  %v4572_v51 = vsel %vm275_vm0, %v342_v24, %v344_v43 }
  0x25   : > { %v4554_v42 = vld [vmem:[%s4268_s25 + $0xb0] sm:$0xff]  ;;  %v4559_v53 = vld [vmem:[%s4268_s25 + $0x168] sm:$0xff]  ;;  %6059 = vst [vmem:[#allocation24_spill] sm:$0xff] %v4569_v12  ;;  %6060 = vst [vmem:[#allocation25_spill] sm:$0xff] %v4572_v51  ;;  %v309_v44 = vrot.slane %v4540_v40, 1  ;;  %v349_v36 = vrot.slane %v4548_v2, 1 }
  0x26   : > { %3750 = vmatmul.mubr.msk.f32.gmra.mxu0 %vm359_vm1, %v4525_v25  ;;  %v4562_v1 = vld [vmem:[%s4268_s25 + $0x170] sm:$0xff]  ;;  %v4578_v25 = vsel %vm275_vm0, %v306_v23, %v307_v17  ;;  %v4584_v59 = vld [vmem:[%s4268_s25 + $0xb8] sm:$0x3]  ;;  %v4587_v45 = vsel %vm275_vm0, %v346_v38, %v347_v13  ;;  %v351_v43 = vrot.slane %v4559_v53, 1 }
  0x27   : > { %6058 = vst [vmem:[#allocation23_spill] sm:$0xff] %v4562_v1  ;;  %3774 = vmatmul.mubr.msk.f32.gmra.mxu1 %vm359_vm1, %v4532_v29  ;;  %3752 = vmatprep.mubr.msk.f32.mxu0 %vm359_vm1, %v4535_v46  ;;  %6061 = vst [vmem:[#allocation26_spill] sm:$0xff] %v4578_v25  ;;  %v311_v29 = vrot.slane %v4551_v26, 1  ;;  %v312_v46 = vrot.slane %v4554_v42, 1  ;;  %v352_v24 = vrot.slane %v4562_v1, 1  ;;  %v4601_v23 = vsel %vm275_vm0, %v307_v17, %v309_v44 }
  0x28   : > { %3776 = vmatprep.mubr.msk.f32.mxu1 %vm359_vm1, %v4543_v52  ;;  %6062 = vst [vmem:[#allocation27_spill] sm:$0xff] %v4587_v45  ;;  %v4592_v54 = vld [vmem:[%s4268_s25 + $0x178] sm:$0x3]  ;;  %6063 = vst [vmem:[#allocation28_spill] sm:$0xff] %v4601_v23  ;;  %v314_v38 = vrot.slane %v4584_v59, 1  ;;  %v939_v52 = vrot.slane %v4271_v4, 2  ;;  %v4608_v1 = vsel %vm275_vm0, %v347_v13, %v349_v36 }
  0x29   : > { %6064 = vst [vmem:[#allocation29_spill] sm:$0xff] %v4608_v1  ;;  %v4616_v44 = vsel %vm275_vm0, %v351_v43, %v352_v24  ;;  %v942_v17 = vrot.slane %v4286_v11, 2  ;;  %v944_v11 = vrot.slane %v4294_v15, 2  ;;  %v945_v43 = vrot.slane %v4299_v18, 2 }
  0x2a   : > { %3753 = vmatmul.mubr.msk.f32.gmra.mxu0 %vm359_vm1, %v4569_v12  ;;  %v4611_v12 = vsel %vm275_vm0, %v311_v29, %v312_v46  ;;  %6066 = vst [vmem:[#allocation31_spill] sm:$0xff] %v4616_v44  ;;  %v4626_v29 = vsel %vm275_vm0, %v312_v46, %v314_v38  ;;  %v947_v38 = vrot.slane %v4319_v27, 2  ;;  %v952_v27 = vrot.slane %v4354_v41, 2  ;;  %v4679_v41 = vld [vmem:[%s5952_s1 + $0x58] sm:$0xff] }
  0x2b   : > { %3777 = vmatmul.mubr.msk.f32.gmra.mxu1 %vm359_vm1, %v4572_v51  ;;  %3755 = vmatprep.mubr.msk.f32.mxu0 %vm359_vm1, %v4578_v25  ;;  %6065 = vst [vmem:[#allocation30_spill] sm:$0xff] %v4611_v12  ;;  %v354_v51 = vrot.slane %v4592_v54, 1  ;;  %v940_v25 = vrot.slane %v4274_v5, 2  ;;  %6067 = vst [vmem:[#allocation32_spill] sm:$0xff] %v4626_v29 }
  0x2c   : > { %3779 = vmatprep.mubr.msk.f32.mxu1 %vm359_vm1, %v4587_v45 }
  0x2d   : > { %v4631_v36 = vsel %vm275_vm0, %v352_v24, %v354_v51  ;;  %v941_v13 = vsel %vm938_vm2, %v939_v52, %v940_v25  ;;  %v943_v46 = vsel %vm938_vm2, %v940_v25, %v942_v17  ;;  %v949_v51 = vrot.slane %v4334_v33, 2 }
  0x2e   : > { %3756 = vmatmul.mubr.msk.f32.gmra.mxu0 %vm359_vm1, %v4601_v23  ;;  %6068 = vst [vmem:[#allocation33_spill] sm:$0xff] %v4631_v36  ;;  %v950_v52 = vrot.slane %v4337_v34, 2  ;;  %v4649_v24 = vsel %vm938_vm2, %v944_v11, %v945_v43  ;;  %v954_v17 = vrot.slane %v4375_v48, 2  ;;  %v955_v11 = vrot.slane %v4378_v49, 2 }
  0x2f   : > { %3780 = vmatmul.mubr.msk.f32.gmra.mxu1 %vm359_vm1, %v4608_v1  ;;  %3758 = vmatprep.mubr.msk.f32.mxu0 %vm359_vm1, %v4611_v12 }
  0x30   : > { %3782 = vmatprep.mubr.msk.f32.mxu1 %vm359_vm1, %v4616_v44  ;;  %v4665_v25 = vsel %vm938_vm2, %v949_v51, %v950_v52  ;;  %v960_v51 = vrot.slane %v4419_v0, 2 }
  0x32   : > { %3759 = vmatmul.mubr.msk.f32.gmra.mxu0 %vm359_vm1, %v4626_v29 }
  0x33   : > { %3783 = vmatmul.mubr.msk.f32.gmra.mxu1 %vm359_vm1, %v4631_v36  ;;  %3841 = vmatprep.mubr.msk.f32.mxu0 %vm359_vm1, %v941_v13  ;;  %v3219_v13 = vld [vmem:[%s5952_s1 + $0x30] sm:$0xff] }
  0x34   : > { %3789 = vmatprep.mubr.msk.f32.mxu1 %vm359_vm1, %v4271_v4  ;;  %v4658_v4 = vsel %vm938_vm2, %v945_v43, %v947_v38  ;;  %v4692_v43 = vld [vmem:[%s5952_s1 + $0x68] sm:$0xff]  ;;  %v959_v38 = vrot.slane %v4400_v57, 2 }
  0x36   : > { %3842 = vmatmul.mubr.msk.f32.vlgmr.msra.gmra.mxu0 %vm359_vm1, %v943_v46  ;;  %v4697_v46 = vsel %vm938_vm2, %v954_v17, %v955_v11  ;;  %v965_v17 = vrot.slane %v4464_v31, 2 }
  0x37   : > { %3790 = vmatmul.mubr.msk.f32.vlgmr.msra.gmra.mxu1 %vm359_vm1, %v4274_v5  ;;  %3942 = vmatpush3.msra.mxu0 %v4405_v58  ;;  %v3253_v5 = vld [vmem:[%s5952_s1 + $0x40] sm:$0xff]  ;;  %v957_v58 = vrot.slane %v4416_v63, 2 }
  0x38   : > { %3890 = vmatpush3.msra.mxu1 %v4383_v50  ;;  %3792 = vmatprep.mubr.msk.f32.mxu1 %vm359_vm1, %v4294_v15  ;;  %v4686_v50 = vsel %vm938_vm2, %v950_v52, %v952_v27  ;;  %v962_v52 = vrot.slane %v4450_v19, 2  ;;  %v964_v27 = vrot.slane %v4461_v30, 2 }
  0x39   : > { %3844 = vmatprep.mubr.msk.f32.mxu0 %vm359_vm1, %v4649_v24  ;;  %3891 = vmatprep.subr.mxu1 %v3219_v13  ;;  %v4710_v63 = vsel %vm938_vm2, %v955_v11, %v957_v58  ;;  %v967_v11 = vrot.slane %v4496_v60, 2  ;;  %v969_v58 = vrot.slane %v4507_v62, 2 }
  0x3a   : > { %3845 = vmatmul.mubr.msk.f32.gmra.mxu0 %vm359_vm1, %v4658_v4  ;;  %3892 = vmatpush3.msra.mxu1 %v3219_v13  ;;  %v4716_v13 = vsel %vm938_vm2, %v959_v38, %v960_v51  ;;  %v4727_v19 = vsel %vm938_vm2, %v960_v51, %v962_v52  ;;  %v970_v38 = vrot.slane %v4510_v7, 2  ;;  %v972_v51 = vrot.slane %v4540_v40, 2 }
  0x3b   : > { %3793 = vmatmul.mubr.msk.f32.gmra.mxu1 %vm359_vm1, %v4299_v18  ;;  %3847 = vmatprep.mubr.msk.f32.mxu0 %vm359_vm1, %v4665_v25  ;;  %6069 = vst [vmem:[#allocation34_spill] sm:$0xff] %v4727_v19  ;;  %v4744_v60 = vsel %vm938_vm2, %v965_v17, %v967_v11 }
  0x3c   : > { %3795 = vmatprep.mubr.msk.f32.mxu1 %vm359_vm1, %v4334_v33  ;;  %3943 = vmatprep.subr.mxu0 %v3253_v5  ;;  %6070 = vst [vmem:[#allocation35_spill] sm:$0xff] %v4744_v60  ;;  %v4750_v52 = vsel %vm938_vm2, %v969_v58, %v970_v38  ;;  %v4761_v40 = vsel %vm938_vm2, %v970_v38, %v972_v51  ;;  %v979_v58 = vrot.slane %v4277_v6, 2  ;;  %v982_v38 = vrot.slane %v4291_v14, 2 }
  0x3d   : > { %3944 = vmatpush3.msra.mxu0 %v3253_v5  ;;  %3993 = vmatprep.subr.mxu1 %v4679_v41  ;;  %v4733_v5 = vsel %vm938_vm2, %v964_v27, %v965_v17  ;;  %v974_v27 = vrot.slane %v4551_v26, 2  ;;  %6071 = vst [vmem:[#allocation36_spill] sm:$0xff] %v4761_v40  ;;  %v977_v17 = vrot.slane %v4584_v59, 2 }
  0x3e   : > { %3848 = vmatmul.mubr.msk.f32.gmra.mxu0 %vm359_vm1, %v4686_v50  ;;  %4045 = vmatprep.subr.mxu0 %v4692_v43 }
  0x3f   : > { %3796 = vmatmul.mubr.msk.f32.gmra.mxu1 %vm359_vm1, %v4337_v34  ;;  %3850 = vmatprep.mubr.msk.f32.mxu0 %vm359_vm1, %v4697_v46 }
  0x40   : > { %3798 = vmatprep.mubr.msk.f32.mxu1 %vm359_vm1, %v4375_v48 }
  0x42   : > { %3851 = vmatmul.mubr.msk.f32.gmra.mxu0 %vm359_vm1, %v4710_v63 }
  0x43   : > { %3799 = vmatmul.mubr.msk.f32.gmra.mxu1 %vm359_vm1, %v4378_v49  ;;  %3853 = vmatprep.mubr.msk.f32.mxu0 %vm359_vm1, %v4716_v13 }
  0x44   : > { %3801 = vmatprep.mubr.msk.f32.mxu1 %vm359_vm1, %v4400_v57 }
  0x46   : > { %3854 = vmatmul.mubr.msk.f32.gmra.mxu0 %vm359_vm1, %v4727_v19  ;;  %v975_v19 = vrot.slane %v4554_v42, 2 }
  0x47   : > { %3802 = vmatmul.mubr.msk.f32.gmra.mxu1 %vm359_vm1, %v4419_v0  ;;  %3856 = vmatprep.mubr.msk.f32.mxu0 %vm359_vm1, %v4733_v5 }
  0x48   : > { %3804 = vmatprep.mubr.msk.f32.mxu1 %vm359_vm1, %v4461_v30  ;;  %v4767_v11 = vsel %vm938_vm2, %v974_v27, %v975_v19  ;;  %v4778_v59 = vsel %vm938_vm2, %v975_v19, %v977_v17  ;;  %v984_v27 = vrot.slane %v4303_v20, 2  ;;  %v987_v19 = vrot.slane %v4322_v28, 2 }
  0x49   : > { %6072 = vst [vmem:[#allocation37_spill] sm:$0xff] %v4778_v59 }
  0x4a   : > { %3857 = vmatmul.mubr.msk.f32.gmra.mxu0 %vm359_vm1, %v4744_v60  ;;  %v980_v60 = vrot.slane %v4282_v9, 2 }
  0x4b   : > { %3805 = vmatmul.mubr.msk.f32.gmra.mxu1 %vm359_vm1, %v4464_v31  ;;  %3859 = vmatprep.mubr.msk.f32.mxu0 %vm359_vm1, %v4750_v52 }
  0x4c   : > { %3807 = vmatprep.mubr.msk.f32.mxu1 %vm359_vm1, %v4507_v62  ;;  %v4784_v51 = vsel %vm938_vm2, %v979_v58, %v980_v60  ;;  %v4795_v14 = vsel %vm938_vm2, %v980_v60, %v982_v38  ;;  %v989_v58 = vrot.slane %v4340_v35, 2  ;;  %v992_v60 = vrot.slane %v4372_v47, 2 }
  0x4d   : > { %6073 = vst [vmem:[#allocation38_spill] sm:$0xff] %v4795_v14 }
  0x4e   : > { %3860 = vmatmul.mubr.msk.f32.gmra.mxu0 %vm359_vm1, %v4761_v40  ;;  %v985_v40 = vrot.slane %v4306_v21, 2 }
  0x4f   : > { %3808 = vmatmul.mubr.msk.f32.gmra.mxu1 %vm359_vm1, %v4510_v7  ;;  %3862 = vmatprep.mubr.msk.f32.mxu0 %vm359_vm1, %v4767_v11 }
  0x50   : > { %3810 = vmatprep.mubr.msk.f32.mxu1 %vm359_vm1, %v4551_v26  ;;  %v4801_v17 = vsel %vm938_vm2, %v984_v27, %v985_v40  ;;  %v4812_v28 = vsel %vm938_vm2, %v985_v40, %v987_v19  ;;  %v994_v27 = vrot.slane %v4394_v55, 2  ;;  %v997_v40 = vrot.slane %v4430_v3, 2 }
  0x51   : > { %6074 = vst [vmem:[#allocation39_spill] sm:$0xff] %v4812_v28 }
  0x52   : > { %3863 = vmatmul.mubr.msk.f32.gmra.mxu0 %vm359_vm1, %v4778_v59  ;;  %v990_v59 = vrot.slane %v4350_v39, 2 }
  0x53   : > { %3811 = vmatmul.mubr.msk.f32.gmra.mxu1 %vm359_vm1, %v4554_v42  ;;  %3865 = vmatprep.mubr.msk.f32.mxu0 %vm359_vm1, %v4784_v51 }
  0x54   : > { %3813 = vmatprep.mubr.msk.f32.mxu1 %vm359_vm1, %v4277_v6  ;;  %v4818_v38 = vsel %vm938_vm2, %v989_v58, %v990_v59  ;;  %v4829_v47 = vsel %vm938_vm2, %v990_v59, %v992_v60  ;;  %v999_v58 = vrot.slane %v4434_v8, 2  ;;  %v1002_v59 = vrot.slane %v4453_v22, 2 }
  0x55   : > { %6075 = vst [vmem:[#allocation40_spill] sm:$0xff] %v4829_v47 }
  0x56   : > { %3866 = vmatmul.mubr.msk.f32.gmra.mxu0 %vm359_vm1, %v4795_v14  ;;  %v995_v14 = vrot.slane %v4397_v56, 2 }
  0x57   : > { %3814 = vmatmul.mubr.msk.f32.gmra.mxu1 %vm359_vm1, %v4282_v9  ;;  %3868 = vmatprep.mubr.msk.f32.mxu0 %vm359_vm1, %v4801_v17 }
  0x58   : > { %3816 = vmatprep.mubr.msk.f32.mxu1 %vm359_vm1, %v4303_v20  ;;  %v4835_v19 = vsel %vm938_vm2, %v994_v27, %v995_v14  ;;  %v4846_v3 = vsel %vm938_vm2, %v995_v14, %v997_v40  ;;  %v1004_v27 = vrot.slane %v4470_v32, 2  ;;  %v1007_v14 = vrot.slane %v4499_v61, 2 }
  0x59   : > { %6076 = vst [vmem:[#allocation41_spill] sm:$0xff] %v4835_v19  ;;  %6077 = vst [vmem:[#allocation42_spill] sm:$0xff] %v4846_v3 }
  0x5a   : > { %3869 = vmatmul.mubr.msk.f32.gmra.mxu0 %vm359_vm1, %v4812_v28  ;;  %v1000_v28 = vrot.slane %v4437_v10, 2 }
  0x5b   : > { %3817 = vmatmul.mubr.msk.f32.gmra.mxu1 %vm359_vm1, %v4306_v21  ;;  %3871 = vmatprep.mubr.msk.f32.mxu0 %vm359_vm1, %v4818_v38 }
  0x5c   : > { %3819 = vmatprep.mubr.msk.f32.mxu1 %vm359_vm1, %v4340_v35  ;;  %v4852_v60 = vsel %vm938_vm2, %v999_v58, %v1000_v28  ;;  %v4863_v22 = vsel %vm938_vm2, %v1000_v28, %v1002_v59  ;;  %v1009_v58 = vrot.slane %v4515_v16, 2  ;;  %v1012_v28 = vrot.slane %v4548_v2, 2 }
  0x5d   : > { %6078 = vst [vmem:[#allocation43_spill] sm:$0xff] %v4852_v60  ;;  %6079 = vst [vmem:[#allocation44_spill] sm:$0xff] %v4863_v22 }
  0x5e   : > { %3872 = vmatmul.mubr.msk.f32.gmra.mxu0 %vm359_vm1, %v4829_v47  ;;  %v1005_v47 = vrot.slane %v4473_v37, 2 }
  0x5f   : > { %3820 = vmatmul.mubr.msk.f32.gmra.mxu1 %vm359_vm1, %v4350_v39  ;;  %3874 = vmatprep.mubr.msk.f32.mxu0 %vm359_vm1, %v4835_v19 }
  0x60   : > { %3822 = vmatprep.mubr.msk.f32.mxu1 %vm359_vm1, %v4394_v55  ;;  %v4869_v40 = vsel %vm938_vm2, %v1004_v27, %v1005_v47  ;;  %v4880_v61 = vsel %vm938_vm2, %v1005_v47, %v1007_v14  ;;  %v1014_v27 = vrot.slane %v4559_v53, 2  ;;  %v1017_v47 = vrot.slane %v4592_v54, 2  ;;  %v6083_v54 = vld [vmem:[#allocation4_spill] sm:$0xff] }
  0x62   : > { %3875 = vmatmul.mubr.msk.f32.gmra.mxu0 %vm359_vm1, %v4846_v3  ;;  %v6080_v3 = vld [vmem:[#allocation18_spill] sm:$0xff] }
  0x63   : > { %3823 = vmatmul.mubr.msk.f32.gmra.mxu1 %vm359_vm1, %v4397_v56  ;;  %3877 = vmatprep.mubr.msk.f32.mxu0 %vm359_vm1, %v4852_v60  ;;  %v1010_v19 = vrot.slane %v6080_v3, 2 }
  0x64   : > { %3825 = vmatprep.mubr.msk.f32.mxu1 %vm359_vm1, %v4434_v8 }
  0x65   : > { %v4886_v59 = vsel %vm938_vm2, %v1009_v58, %v1010_v19  ;;  %v4897_v2 = vsel %vm938_vm2, %v1010_v19, %v1012_v28  ;;  %v6084_v58 = vld [vmem:[#allocation6_spill] sm:$0xff]  ;;  %v6085_v28 = vld [vmem:[#allocation8_spill] sm:$0xff] }
  0x66   : > { %3878 = vmatmul.mubr.msk.f32.gmra.mxu0 %vm359_vm1, %v4863_v22  ;;  %v6081_v22 = vld [vmem:[#allocation23_spill] sm:$0xff] }
  0x67   : > { %3826 = vmatmul.mubr.msk.f32.gmra.mxu1 %vm359_vm1, %v4437_v10  ;;  %3880 = vmatprep.mubr.msk.f32.mxu0 %vm359_vm1, %v4869_v40  ;;  %v1015_v60 = vrot.slane %v6081_v22, 2 }
  0x68   : > { %3828 = vmatprep.mubr.msk.f32.mxu1 %vm359_vm1, %v4470_v32 }
  0x69   : > { %v4903_v14 = vsel %vm938_vm2, %v1014_v27, %v1015_v60  ;;  %v4912_v19 = vsel %vm938_vm2, %v1015_v60, %v1017_v47  ;;  %v3287_v60 = vld [vmem:[%s5952_s1 + $0x50] sm:$0xff]  ;;  %v6086_v27 = vld [vmem:[#allocation10_spill] sm:$0xff] }
  0x6a   : > { %3881 = vmatmul.mubr.msk.f32.gmra.mxu0 %vm359_vm1, %v4880_v61  ;;  %6082 = vst [vmem:[#allocation18_spill] sm:$0xff] %v4912_v19  ;;  %v6088_v47 = vld [vmem:[#allocation14_spill] sm:$0xff] }
  0x6b   : > { %3829 = vmatmul.mubr.msk.f32.gmra.mxu1 %vm359_vm1, %v4473_v37  ;;  %3883 = vmatprep.mubr.msk.f32.mxu0 %vm359_vm1, %v4886_v59 }
  0x6c   : > { %3831 = vmatprep.mubr.msk.f32.mxu1 %vm359_vm1, %v4515_v16 }
  0x6e   : > { %3884 = vmatmul.mubr.msk.f32.gmra.mxu0 %vm359_vm1, %v4897_v2 }
  0x6f   : > { %3832 = vmatmul.mubr.msk.f32.gmra.mxu1 %vm359_vm1, %v6080_v3  ;;  %3886 = vmatprep.mubr.msk.f32.mxu0 %vm359_vm1, %v4903_v14 }
  0x70   : > { %3834 = vmatprep.mubr.msk.f32.mxu1 %vm359_vm1, %v4559_v53 }
  0x72   : > { %3887 = vmatmul.mubr.msk.f32.gmra.mxu0 %vm359_vm1, %v4912_v19 }
  0x73   : > { %3835 = vmatmul.mubr.msk.f32.gmra.mxu1 %vm359_vm1, %v6081_v22  ;;  %3945 = vmatprep.mubr.msk.f32.mxu0 %vm359_vm1, %v6083_v54  ;;  %v6089_v54 = vld [vmem:[#allocation16_spill] sm:$0xff] }
  0x74   : > { %3893 = vmatprep.mubr.msk.f32.mxu1 %vm359_vm1, %v4294_v15  ;;  %v3321_v15 = vld [vmem:[%s5952_s1 + $0x60] sm:$0xff] }
  0x76   : > { %3946 = vmatmul.mubr.msk.f32.vlgmr.msra.gmra.mxu0 %vm359_vm1, %v6084_v58  ;;  %v6090_v58 = vld [vmem:[#allocation19_spill] sm:$0xff] }
  0x77   : > { %3894 = vmatmul.mubr.msk.f32.vlgmr.msra.gmra.mxu1 %vm359_vm1, %v4299_v18  ;;  %4046 = vmatpush3.msra.mxu0 %v4692_v43  ;;  %v4945_v18 = vld [vmem:[%s5952_s1 + $0x78] sm:$0xff]  ;;  %v4954_v43 = vld [vmem:[%s5952_s1 + $0x88] sm:$0xff] }
  0x78   : > { %3994 = vmatpush3.msra.mxu1 %v4679_v41  ;;  %3896 = vmatprep.mubr.msk.f32.mxu1 %vm359_vm1, %v4334_v33  ;;  %v6087_v41 = vld [vmem:[#allocation12_spill] sm:$0xff] }
  0x79   : > { %3948 = vmatprep.mubr.msk.f32.mxu0 %vm359_vm1, %v6085_v28  ;;  %3995 = vmatprep.subr.mxu1 %v3287_v60 }
  0x7a   : > { %3949 = vmatmul.mubr.msk.f32.gmra.mxu0 %vm359_vm1, %v6086_v27  ;;  %3996 = vmatpush3.msra.mxu1 %v3287_v60  ;;  %v6091_v60 = vld [vmem:[#allocation21_spill] sm:$0xff] }
  0x7b   : > { %3897 = vmatmul.mubr.msk.f32.gmra.mxu1 %vm359_vm1, %v4337_v34  ;;  %3951 = vmatprep.mubr.msk.f32.mxu0 %vm359_vm1, %v6087_v41 }
  0x7c   : > { %3899 = vmatprep.mubr.msk.f32.mxu1 %vm359_vm1, %v4375_v48  ;;  %4047 = vmatprep.subr.mxu0 %v3321_v15 }
  0x7d   : > { %4048 = vmatpush3.msra.mxu0 %v3321_v15  ;;  %4097 = vmatprep.subr.mxu1 %v4945_v18  ;;  %v6092_v15 = vld [vmem:[#allocation24_spill] sm:$0xff] }
  0x7e   : > { %3952 = vmatmul.mubr.msk.f32.gmra.mxu0 %vm359_vm1, %v6088_v47  ;;  %4149 = vmatprep.subr.mxu0 %v4954_v43 }
  0x7f   : > { %3900 = vmatmul.mubr.msk.f32.gmra.mxu1 %vm359_vm1, %v4378_v49  ;;  %3954 = vmatprep.mubr.msk.f32.mxu0 %vm359_vm1, %v6089_v54  ;;  %v6093_v54 = vld [vmem:[#allocation26_spill] sm:$0xff] }
  0x80   : > { %3902 = vmatprep.mubr.msk.f32.mxu1 %vm359_vm1, %v4400_v57 }
  0x82   : > { %3955 = vmatmul.mubr.msk.f32.gmra.mxu0 %vm359_vm1, %v6090_v58 }
  0x83   : > { %3903 = vmatmul.mubr.msk.f32.gmra.mxu1 %vm359_vm1, %v4419_v0  ;;  %3957 = vmatprep.mubr.msk.f32.mxu0 %vm359_vm1, %v6091_v60  ;;  %v5057_v60 = vld [vmem:[%s4268_s25 + $0x190] sm:$0x3] }
  0x84   : > { %3905 = vmatprep.mubr.msk.f32.mxu1 %vm359_vm1, %v4461_v30 }
  0x86   : > { %3958 = vmatmul.mubr.msk.f32.gmra.mxu0 %vm359_vm1, %v6092_v15  ;;  %v5044_v15 = vld [vmem:[%s4268_s25 + $0x188] sm:$0xff] }
  0x87   : > { %3906 = vmatmul.mubr.msk.f32.gmra.mxu1 %vm359_vm1, %v4464_v31  ;;  %3960 = vmatprep.mubr.msk.f32.mxu0 %vm359_vm1, %v6093_v54  ;;  %v6094_v54 = vld [vmem:[#allocation2_spill] sm:$0xff] }
  0x88   : > { %3908 = vmatprep.mubr.msk.f32.mxu1 %vm359_vm1, %v4507_v62 }
  0x8a   : > { %3961 = vmatmul.mubr.msk.f32.gmra.mxu0 %vm359_vm1, %v4601_v23  ;;  %v6095_v23 = vld [vmem:[#allocation3_spill] sm:$0xff] }
  0x8b   : > { %3909 = vmatmul.mubr.msk.f32.gmra.mxu1 %vm359_vm1, %v4510_v7  ;;  %3963 = vmatprep.mubr.msk.f32.mxu0 %vm359_vm1, %v4611_v12  ;;  %v6096_v12 = vld [vmem:[#allocation5_spill] sm:$0xff] }
  0x8c   : > { %3911 = vmatprep.mubr.msk.f32.mxu1 %vm359_vm1, %v4551_v26 }
  0x8e   : > { %3964 = vmatmul.mubr.msk.f32.gmra.mxu0 %vm359_vm1, %v4626_v29  ;;  %v6097_v29 = vld [vmem:[#allocation7_spill] sm:$0xff] }
  0x8f   : > { %3912 = vmatmul.mubr.msk.f32.gmra.mxu1 %vm359_vm1, %v4554_v42  ;;  %3966 = vmatprep.mubr.msk.f32.mxu0 %vm359_vm1, %v6094_v54  ;;  %v6098_v54 = vld [vmem:[#allocation9_spill] sm:$0xff] }
  0x90   : > { %3914 = vmatprep.mubr.msk.f32.mxu1 %vm359_vm1, %v4277_v6 }
  0x92   : > { %3967 = vmatmul.mubr.msk.f32.gmra.mxu0 %vm359_vm1, %v6095_v23  ;;  %v6099_v23 = vld [vmem:[#allocation11_spill] sm:$0xff] }
  0x93   : > { %3915 = vmatmul.mubr.msk.f32.gmra.mxu1 %vm359_vm1, %v4282_v9  ;;  %3969 = vmatprep.mubr.msk.f32.mxu0 %vm359_vm1, %v6096_v12  ;;  %v6100_v12 = vld [vmem:[#allocation13_spill] sm:$0xff] }
  0x94   : > { %3917 = vmatprep.mubr.msk.f32.mxu1 %vm359_vm1, %v4303_v20 }
  0x96   : > { %3970 = vmatmul.mubr.msk.f32.gmra.mxu0 %vm359_vm1, %v6097_v29  ;;  %v6101_v29 = vld [vmem:[#allocation15_spill] sm:$0xff] }
  0x97   : > { %3918 = vmatmul.mubr.msk.f32.gmra.mxu1 %vm359_vm1, %v4306_v21  ;;  %3972 = vmatprep.mubr.msk.f32.mxu0 %vm359_vm1, %v6098_v54  ;;  %v6102_v54 = vld [vmem:[#allocation17_spill] sm:$0xff] }
  0x98   : > { %3920 = vmatprep.mubr.msk.f32.mxu1 %vm359_vm1, %v4340_v35 }
  0x9a   : > { %3973 = vmatmul.mubr.msk.f32.gmra.mxu0 %vm359_vm1, %v6099_v23  ;;  %v6103_v23 = vld [vmem:[#allocation20_spill] sm:$0xff] }
  0x9b   : > { %3921 = vmatmul.mubr.msk.f32.gmra.mxu1 %vm359_vm1, %v4350_v39  ;;  %3975 = vmatprep.mubr.msk.f32.mxu0 %vm359_vm1, %v6100_v12  ;;  %v6104_v12 = vld [vmem:[#allocation22_spill] sm:$0xff] }
  0x9c   : > { %3923 = vmatprep.mubr.msk.f32.mxu1 %vm359_vm1, %v4394_v55 }
  0x9e   : > { %3976 = vmatmul.mubr.msk.f32.gmra.mxu0 %vm359_vm1, %v6101_v29  ;;  %v5041_v29 = vld [vmem:[%s4268_s25 + $0x180] sm:$0xff] }
  0x9f   : > { %3924 = vmatmul.mubr.msk.f32.gmra.mxu1 %vm359_vm1, %v4397_v56  ;;  %3978 = vmatprep.mubr.msk.f32.mxu0 %vm359_vm1, %v6102_v54  ;;  %v6105_v54 = vld [vmem:[#allocation25_spill] sm:$0xff] }
  0xa0   : > { %3926 = vmatprep.mubr.msk.f32.mxu1 %vm359_vm1, %v4434_v8 }
  0xa2   : > { %3979 = vmatmul.mubr.msk.f32.gmra.mxu0 %vm359_vm1, %v6103_v23  ;;  %v1611_v23 = vrot.slane %v5044_v15, 1 }
  0xa3   : > { %3927 = vmatmul.mubr.msk.f32.gmra.mxu1 %vm359_vm1, %v4437_v10  ;;  %3981 = vmatprep.mubr.msk.f32.mxu0 %vm359_vm1, %v6104_v12  ;;  %v1610_v12 = vrot.slane %v5041_v29, 1 }
  0xa4   : > { %3929 = vmatprep.mubr.msk.f32.mxu1 %vm359_vm1, %v4470_v32 }
  0xa6   : > { %3982 = vmatmul.mubr.msk.f32.gmra.mxu0 %vm359_vm1, %v6105_v54  ;;  %v5069_v54 = vsel %vm275_vm0, %v1610_v12, %v1611_v23  ;;  %v3355_v12 = vld [vmem:[%s5952_s1 + $0x70] sm:$0xff] }
  0xa7   : > { %3930 = vmatmul.mubr.msk.f32.gmra.mxu1 %vm359_vm1, %v4473_v37  ;;  %3984 = vmatprep.mubr.msk.f32.mxu0 %vm359_vm1, %v4587_v45  ;;  %v1613_v45 = vrot.slane %v5057_v60, 1  ;;  %6106 = vst [vmem:[#allocation23_spill] sm:$0xff] %v5069_v54 }
  0xa8   : > { %3932 = vmatprep.mubr.msk.f32.mxu1 %vm359_vm1, %v4515_v16 }
  0xaa   : > { %3985 = vmatmul.mubr.msk.f32.gmra.mxu0 %vm359_vm1, %v4608_v1  ;;  %v5078_v1 = vsel %vm275_vm0, %v1611_v23, %v1613_v45  ;;  %v6117_v45 = vld [vmem:[#allocation43_spill] sm:$0xff] }
  0xab   : > { %3933 = vmatmul.mubr.msk.f32.gmra.mxu1 %vm359_vm1, %v6080_v3  ;;  %3987 = vmatprep.mubr.msk.f32.mxu0 %vm359_vm1, %v4616_v44  ;;  %6107 = vst [vmem:[#allocation4_spill] sm:$0xff] %v5078_v1 }
  0xac   : > { %3935 = vmatprep.mubr.msk.f32.mxu1 %vm359_vm1, %v4559_v53 }
  0xae   : > { %3988 = vmatmul.mubr.msk.f32.gmra.mxu0 %vm359_vm1, %v4631_v36  ;;  %v5259_v36 = vld [vmem:[%s4268_s25 + $0x198] sm:$0xff] }
  0xaf   : > { %3936 = vmatmul.mubr.msk.f32.gmra.mxu1 %vm359_vm1, %v6081_v22  ;;  %3990 = vmatprep.mubr.msk.f32.mxu0 %vm359_vm1, %v5069_v54 }
  0xb0   : > { %3938 = vmatprep.mubr.msk.f32.mxu1 %vm359_vm1, %v5041_v29 }
  0xb2   : > { %3991 = vmatmul.mubr.msk.f32.gmra.mxu0 %vm359_vm1, %v5078_v1 }
  0xb3   : > { %3939 = vmatmul.mubr.msk.f32.gmra.mxu1 %vm359_vm1, %v5044_v15  ;;  %4049 = vmatprep.mubr.msk.f32.mxu0 %vm359_vm1, %v4334_v33  ;;  %v3389_v33 = vld [vmem:[%s5952_s1 + $0x80] sm:$0xff] }
  0xb4   : > { %3997 = vmatprep.mubr.msk.f32.mxu1 %vm359_vm1, %v4649_v24 }
  0xb6   : > { %4050 = vmatmul.mubr.msk.f32.vlgmr.msra.gmra.mxu0 %vm359_vm1, %v4337_v34  ;;  %v6108_v34 = vld [vmem:[#allocation34_spill] sm:$0xff] }
  0xb7   : > { %3998 = vmatmul.mubr.msk.f32.vlgmr.msra.gmra.mxu1 %vm359_vm1, %v4658_v4  ;;  %4150 = vmatpush3.msra.mxu0 %v4954_v43  ;;  %v6118_v4 = vld [vmem:[#allocation44_spill] sm:$0xff] }
  0xb8   : > { %4098 = vmatpush3.msra.mxu1 %v4945_v18  ;;  %4000 = vmatprep.mubr.msk.f32.mxu1 %vm359_vm1, %v4665_v25 }
  0xb9   : > { %4052 = vmatprep.mubr.msk.f32.mxu0 %vm359_vm1, %v4375_v48  ;;  %4099 = vmatprep.subr.mxu1 %v3355_v12  ;;  %v6109_v48 = vld [vmem:[#allocation35_spill] sm:$0xff] }
  0xba   : > { %4053 = vmatmul.mubr.msk.f32.gmra.mxu0 %vm359_vm1, %v4378_v49  ;;  %4100 = vmatpush3.msra.mxu1 %v3355_v12  ;;  %v6110_v49 = vld [vmem:[#allocation36_spill] sm:$0xff]  ;;  %v1879_v12 = vrot.slane %v5041_v29, 2 }
  0xbb   : > { %4001 = vmatmul.mubr.msk.f32.gmra.mxu1 %vm359_vm1, %v4686_v50  ;;  %4055 = vmatprep.mubr.msk.f32.mxu0 %vm359_vm1, %v4400_v57  ;;  %v6111_v57 = vld [vmem:[#allocation37_spill] sm:$0xff] }
  0xbc   : > { %4003 = vmatprep.mubr.msk.f32.mxu1 %vm359_vm1, %v4697_v46  ;;  %4151 = vmatprep.subr.mxu0 %v3389_v33 }
  0xbd   : > { %4152 = vmatpush3.msra.mxu0 %v3389_v33 }
  0xbe   : > { %4056 = vmatmul.mubr.msk.f32.gmra.mxu0 %vm359_vm1, %v4419_v0  ;;  %v6112_v0 = vld [vmem:[#allocation38_spill] sm:$0xff] }
  0xbf   : > { %4004 = vmatmul.mubr.msk.f32.gmra.mxu1 %vm359_vm1, %v4710_v63  ;;  %4058 = vmatprep.mubr.msk.f32.mxu0 %vm359_vm1, %v4461_v30 }
  0xc0   : > { %4006 = vmatprep.mubr.msk.f32.mxu1 %vm359_vm1, %v4716_v13 }
  0xc2   : > { %4059 = vmatmul.mubr.msk.f32.gmra.mxu0 %vm359_vm1, %v4464_v31  ;;  %v6114_v31 = vld [vmem:[#allocation40_spill] sm:$0xff] }
  0xc3   : > { %4007 = vmatmul.mubr.msk.f32.gmra.mxu1 %vm359_vm1, %v6108_v34  ;;  %4061 = vmatprep.mubr.msk.f32.mxu0 %vm359_vm1, %v4507_v62  ;;  %v6115_v62 = vld [vmem:[#allocation41_spill] sm:$0xff] }
  0xc4   : > { %4009 = vmatprep.mubr.msk.f32.mxu1 %vm359_vm1, %v4733_v5 }
  0xc6   : > { %4062 = vmatmul.mubr.msk.f32.gmra.mxu0 %vm359_vm1, %v4510_v7 }
  0xc7   : > { %4010 = vmatmul.mubr.msk.f32.gmra.mxu1 %vm359_vm1, %v6109_v48  ;;  %4064 = vmatprep.mubr.msk.f32.mxu0 %vm359_vm1, %v4551_v26 }
  0xc8   : > { %4012 = vmatprep.mubr.msk.f32.mxu1 %vm359_vm1, %v4750_v52 }
  0xca   : > { %4065 = vmatmul.mubr.msk.f32.gmra.mxu0 %vm359_vm1, %v4554_v42  ;;  %v6116_v42 = vld [vmem:[#allocation42_spill] sm:$0xff] }
  0xcb   : > { %4013 = vmatmul.mubr.msk.f32.gmra.mxu1 %vm359_vm1, %v6110_v49  ;;  %4067 = vmatprep.mubr.msk.f32.mxu0 %vm359_vm1, %v4277_v6 }
  0xcc   : > { %4015 = vmatprep.mubr.msk.f32.mxu1 %vm359_vm1, %v4767_v11 }
  0xce   : > { %4068 = vmatmul.mubr.msk.f32.gmra.mxu0 %vm359_vm1, %v4282_v9 }
  0xcf   : > { %4016 = vmatmul.mubr.msk.f32.gmra.mxu1 %vm359_vm1, %v6111_v57  ;;  %4070 = vmatprep.mubr.msk.f32.mxu0 %vm359_vm1, %v4303_v20  ;;  %v6113_v20 = vld [vmem:[#allocation39_spill] sm:$0xff] }
  0xd0   : > { %4018 = vmatprep.mubr.msk.f32.mxu1 %vm359_vm1, %v4784_v51 }
  0xd2   : > { %4071 = vmatmul.mubr.msk.f32.gmra.mxu0 %vm359_vm1, %v4306_v21 }
  0xd3   : > { %4019 = vmatmul.mubr.msk.f32.gmra.mxu1 %vm359_vm1, %v6112_v0  ;;  %4073 = vmatprep.mubr.msk.f32.mxu0 %vm359_vm1, %v4340_v35 }
  0xd4   : > { %4021 = vmatprep.mubr.msk.f32.mxu1 %vm359_vm1, %v4801_v17 }
  0xd6   : > { %v5162_v6 = vpop.f32.mrf.mxu0  ;;  %4074 = vmatmul.mubr.msk.f32.gmra.mxu0 %vm359_vm1, %v4350_v39 }
  0xd7   : > { %v5166_v9 = vpop.f32.mrf.mxu1  ;;  %4022 = vmatmul.mubr.msk.f32.gmra.mxu1 %vm359_vm1, %v6113_v20  ;;  %4076 = vmatprep.mubr.msk.f32.mxu0 %vm359_vm1, %v4394_v55 }
  0xd8   : > { %v5172_v21 = vpop.f32.mrf.mxu0  ;;  %4024 = vmatprep.mubr.msk.f32.mxu1 %vm359_vm1, %v4818_v38 }
  0xd9   : > { %v5176_v35 = vpop.f32.mrf.mxu1 }
  0xda   : > { %v5178_v30 = vpop.f32.mrf.mxu0  ;;  %4077 = vmatmul.mubr.msk.f32.gmra.mxu0 %vm359_vm1, %v4397_v56 }
  0xdb   : > { %v5182_v39 = vpop.f32.mrf.mxu1  ;;  %4025 = vmatmul.mubr.msk.f32.gmra.mxu1 %vm359_vm1, %v6114_v31  ;;  %4079 = vmatprep.mubr.msk.f32.mxu0 %vm359_vm1, %v4434_v8 }
  0xdc   : > { %v5188_v55 = vpop.f32.mrf.mxu0  ;;  %4027 = vmatprep.mubr.msk.f32.mxu1 %vm359_vm1, %v6115_v62 }
  0xdd   : > { %v5192_v7 = vpop.f32.mrf.mxu1 }
  0xde   : > { %v5194_v26 = vpop.f32.mrf.mxu0  ;;  %4080 = vmatmul.mubr.msk.f32.gmra.mxu0 %vm359_vm1, %v4437_v10 }
  0xdf   : > { %v5198_v56 = vpop.f32.mrf.mxu1  ;;  %4028 = vmatmul.mubr.msk.f32.gmra.mxu1 %vm359_vm1, %v6116_v42  ;;  %4082 = vmatprep.mubr.msk.f32.mxu0 %vm359_vm1, %v4470_v32 }
  0xe0   : > { %v5204_v8 = vpop.f32.mrf.mxu0  ;;  %4030 = vmatprep.mubr.msk.f32.mxu1 %vm359_vm1, %v6117_v45 }
  0xe1   : > { %v5208_v23 = vpop.f32.mrf.mxu1 }
  0xe2   : > { %v5210_v24 = vpop.f32.mrf.mxu0  ;;  %4083 = vmatmul.mubr.msk.f32.gmra.mxu0 %vm359_vm1, %v4473_v37 }
  0xe3   : > { %v5214_v10 = vpop.f32.mrf.mxu1  ;;  %4031 = vmatmul.mubr.msk.f32.gmra.mxu1 %vm359_vm1, %v6118_v4  ;;  %4085 = vmatprep.mubr.msk.f32.mxu0 %vm359_vm1, %v4515_v16 }
  0xe4   : > { %v5220_v32 = vpop.f32.mrf.mxu0  ;;  %4033 = vmatprep.mubr.msk.f32.mxu1 %vm359_vm1, %v4869_v40 }
  0xe5   : > { %v5224_v18 = vpop.f32.mrf.mxu1 }
  0xe6   : > { %v5226_v43 = vpop.f32.mrf.mxu0  ;;  %4086 = vmatmul.mubr.msk.f32.gmra.mxu0 %vm359_vm1, %v6080_v3  ;;  %v1880_v3 = vrot.slane %v5044_v15, 2 }
  0xe7   : > { %v5230_v37 = vpop.f32.mrf.mxu1  ;;  %4034 = vmatmul.mubr.msk.f32.gmra.mxu1 %vm359_vm1, %v4880_v61  ;;  %4088 = vmatprep.mubr.msk.f32.mxu0 %vm359_vm1, %v4559_v53 }
  0xe8   : > { %6119 = vst [vmem:[#allocation6_spill] sm:$0xff] %v5230_v37  ;;  %v5236_v16 = vpop.f32.mrf.mxu0  ;;  %4036 = vmatprep.mubr.msk.f32.mxu1 %vm359_vm1, %v4886_v59  ;;  %v5278_v37 = vld [vmem:[%s4268_s25 + $0x1a0] sm:$0xff] }
  0xe9   : > { %v5241_v33 = vpop.f32.mrf.mxu1 }
  0xea   : > { %6120 = vst [vmem:[#allocation8_spill] sm:$0xff] %v5241_v33  ;;  %v5244_v1 = vpop.f32.mrf.mxu0  ;;  %4089 = vmatmul.mubr.msk.f32.gmra.mxu0 %vm359_vm1, %v6081_v22  ;;  %v1882_v33 = vrot.slane %v5057_v60, 2  ;;  %v5265_v22 = vsel %vm938_vm2, %v1879_v12, %v1880_v3 }
  0xeb   : > { %v5248_v54 = vpop.f32.mrf.mxu1  ;;  %4037 = vmatmul.mubr.msk.f32.gmra.mxu1 %vm359_vm1, %v4897_v2  ;;  %4091 = vmatprep.mubr.msk.f32.mxu0 %vm359_vm1, %v5041_v29  ;;  %6123 = vst [vmem:[#allocation14_spill] sm:$0xff] %v5265_v22 }
  0xec   : > { %6121 = vst [vmem:[#allocation10_spill] sm:$0xff] %v5248_v54  ;;  %v5254_v53 = vpop.f32.mrf.mxu0  ;;  %4039 = vmatprep.mubr.msk.f32.mxu1 %vm359_vm1, %v4903_v14  ;;  %v5285_v12 = vsel %vm938_vm2, %v1880_v3, %v1882_v33 }
  0xed   : > { %v5262_v44 = vpop.f32.mrf.mxu1  ;;  %6125 = vst [vmem:[#allocation34_spill] sm:$0xff] %v5285_v12 }
  0xee   : > { %6122 = vst [vmem:[#allocation12_spill] sm:$0xff] %v5262_v44  ;;  %v5267_v54 = vpop.f32.mrf.mxu0  ;;  %4092 = vmatmul.mubr.msk.f32.gmra.mxu0 %vm359_vm1, %v5044_v15 }
  0xef   : > { %v5271_v29 = vpop.f32.mrf.mxu1  ;;  %4040 = vmatmul.mubr.msk.f32.gmra.mxu1 %vm359_vm1, %v4912_v19  ;;  %4094 = vmatprep.mubr.msk.f32.mxu0 %vm359_vm1, %v5259_v36 }
  0xf0   : > { %6124 = vst [vmem:[#allocation19_spill] sm:$0xff] %v5271_v29  ;;  %v5280_v60 = vpop.f32.mrf.mxu0  ;;  %4042 = vmatprep.mubr.msk.f32.mxu1 %vm359_vm1, %v5265_v22 }
  0xf1   : > { %v5287_v44 = vpop.f32.mrf.mxu1 }
  0xf2   : > { %6126 = vst [vmem:[#allocation35_spill] sm:$0xff] %v5287_v44  ;;  %v5289_v15 = vpop.f32.mrf.mxu0  ;;  %4095 = vmatmul.mubr.msk.f32.gmra.mxu0 %vm359_vm1, %v5278_v37 }
  0xf3   : > { %v5293_v29 = vpop.f32.mrf.mxu1  ;;  %4043 = vmatmul.mubr.msk.f32.gmra.mxu1 %vm359_vm1, %v5285_v12  ;;  %4153 = vmatprep.mubr.msk.f32.mxu0 %vm359_vm1, %v4665_v25 }
  0xf4   : > { %6127 = vst [vmem:[#allocation36_spill] sm:$0xff] %v5293_v29  ;;  %v5299_v19 = vpop.f32.mrf.mxu0  ;;  %4101 = vmatprep.mubr.msk.f32.mxu1 %vm359_vm1, %v6085_v28 }
  0xf5   : > { %v5303_v33 = vpop.f32.mrf.mxu1 }
  0xf6   : > { %6128 = vst [vmem:[#allocation37_spill] sm:$0xff] %v5303_v33  ;;  %v3843_v3 = vpop.f32.mrf.mxu0  ;;  %4154 = vmatmul.mubr.msk.f32.vlgmr.msra.gmra.mxu0 %vm359_vm1, %v4686_v50 }
  0xf7   : > { %v3791_v44 = vpop.f32.mrf.mxu1  ;;  %4102 = vmatmul.mubr.msk.f32.vlgmr.msra.gmra.mxu1 %vm359_vm1, %v6086_v27  ;;  %4156 = vmatprep.mubr.msk.f32.mxu0 %vm359_vm1, %v4697_v46 }
  0xf8   : > { %v785_v25 = vadd.f32 %v3791_v44, %v5162_v6  ;;  %v1152_v29 = vpop.f32.mrf.mxu0  ;;  %4104 = vmatprep.mubr.msk.f32.mxu1 %vm359_vm1, %v6087_v41  ;;  %v6129_v41 = vld [vmem:[#allocation16_spill] sm:$0xff] }
  0xf9   : > { %v779_v28 = vpop.f32.mrf.mxu1 }
  0xfa   : > { %v5314_v12 = vadd.f32 %v3843_v3, %v785_v25  ;;  %v780_v33 = vadd.f32 %v779_v28, %v5172_v21  ;;  %v3846_v22 = vpop.f32.mrf.mxu0  ;;  %4157 = vmatmul.mubr.msk.f32.gmra.mxu0 %vm359_vm1, %v4710_v63  ;;  %v6131_v28 = vld [vmem:[#allocation24_spill] sm:$0xff] }
  0xfb   : > { %v3794_v50 = vpop.f32.mrf.mxu1  ;;  %4105 = vmatmul.mubr.msk.f32.gmra.mxu1 %vm359_vm1, %v6088_v47  ;;  %4159 = vmatprep.mubr.msk.f32.mxu0 %vm359_vm1, %v4716_v13 }
  0xfc   : > { %v5323_v44 = vadd.f32 %v1152_v29, %v780_v33  ;;  %v795_v46 = vadd.f32 %v3794_v50, %v5178_v30  ;;  %v1162_v27 = vpop.f32.mrf.mxu0  ;;  %4107 = vmatprep.mubr.msk.f32.mxu1 %vm359_vm1, %v6129_v41 }
  0xfd   : > { %v789_v6 = vpop.f32.mrf.mxu1 }
  0xfe   : > { %v5328_v21 = vadd.f32 %v3846_v22, %v795_v46  ;;  %v790_v63 = vadd.f32 %v789_v6, %v5188_v55  ;;  %v3849_v3 = vpop.f32.mrf.mxu0  ;;  %4160 = vmatmul.mubr.msk.f32.gmra.mxu0 %vm359_vm1, %v6108_v34  ;;  %v6130_v22 = vld [vmem:[#allocation21_spill] sm:$0xff]  ;;  %v6132_v46 = vld [vmem:[#allocation26_spill] sm:$0xff] }
  0xff   : > { %v3797_v47 = vpop.f32.mrf.mxu1  ;;  %4108 = vmatmul.mubr.msk.f32.gmra.mxu1 %vm359_vm1, %v6090_v58  ;;  %4162 = vmatprep.mubr.msk.f32.mxu0 %vm359_vm1, %v4733_v5 }
 0x100   : > { %v5337_v13 = vadd.f32 %v1162_v27, %v790_v63  ;;  %v805_v30 = vadd.f32 %v3797_v47, %v5194_v26  ;;  %v1172_v29 = vpop.f32.mrf.mxu0  ;;  %4110 = vmatprep.mubr.msk.f32.mxu1 %vm359_vm1, %v6130_v22  ;;  %v6133_v63 = vld [vmem:[#allocation28_spill] sm:$0xff]  ;;  %v6134_v47 = vld [vmem:[#allocation30_spill] sm:$0xff] }
 0x101   : > { %v799_v55 = vpop.f32.mrf.mxu1 }
 0x102   : > { %v5342_v33 = vadd.f32 %v3849_v3, %v805_v30  ;;  %v800_v34 = vadd.f32 %v799_v55, %v5204_v8  ;;  %v3852_v25 = vpop.f32.mrf.mxu0  ;;  %4163 = vmatmul.mubr.msk.f32.gmra.mxu0 %vm359_vm1, %v6109_v48  ;;  %v6135_v55 = vld [vmem:[#allocation32_spill] sm:$0xff] }
 0x103   : > { %v3800_v58 = vpop.f32.mrf.mxu1  ;;  %4111 = vmatmul.mubr.msk.f32.gmra.mxu1 %vm359_vm1, %v6131_v28  ;;  %4165 = vmatprep.mubr.msk.f32.mxu0 %vm359_vm1, %v4750_v52 }
 0x104   : > { %v5351_v5 = vadd.f32 %v1172_v29, %v800_v34  ;;  %v815_v26 = vadd.f32 %v3800_v58, %v5210_v24  ;;  %v1182_v50 = vpop.f32.mrf.mxu0  ;;  %4113 = vmatprep.mubr.msk.f32.mxu1 %vm359_vm1, %v6132_v46 }
 0x105   : > { %v809_v8 = vpop.f32.mrf.mxu1 }
 0x106   : > { %v5356_v27 = vadd.f32 %v3852_v25, %v815_v26  ;;  %v810_v48 = vadd.f32 %v809_v8, %v5220_v32  ;;  %v3855_v41 = vpop.f32.mrf.mxu0  ;;  %4166 = vmatmul.mubr.msk.f32.gmra.mxu0 %vm359_vm1, %v6110_v49  ;;  %v6136_v25 = vld [vmem:[#allocation2_spill] sm:$0xff]  ;;  %v6138_v8 = vld [vmem:[#allocation5_spill] sm:$0xff] }
 0x107   : > { %v3803_v6 = vpop.f32.mrf.mxu1  ;;  %4114 = vmatmul.mubr.msk.f32.gmra.mxu1 %vm359_vm1, %v6133_v63  ;;  %4168 = vmatprep.mubr.msk.f32.mxu0 %vm359_vm1, %v4767_v11  ;;  %v6139_v63 = vld [vmem:[#allocation7_spill] sm:$0xff] }
 0x108   : > { %v5365_v52 = vadd.f32 %v1182_v50, %v810_v48  ;;  %v825_v24 = vadd.f32 %v3803_v6, %v5226_v43  ;;  %v1192_v3 = vpop.f32.mrf.mxu0  ;;  %4116 = vmatprep.mubr.msk.f32.mxu1 %vm359_vm1, %v6134_v47  ;;  %v6137_v50 = vld [vmem:[#allocation3_spill] sm:$0xff] }
 0x109   : > { %v819_v32 = vpop.f32.mrf.mxu1 }
 0x10a   : > { %v5370_v30 = vadd.f32 %v3855_v41, %v825_v24  ;;  %v820_v49 = vadd.f32 %v819_v32, %v5236_v16  ;;  %v3858_v29 = vpop.f32.mrf.mxu0  ;;  %4169 = vmatmul.mubr.msk.f32.gmra.mxu0 %vm359_vm1, %v6111_v57 }
 0x10b   : > { %v3806_v22 = vpop.f32.mrf.mxu1  ;;  %4117 = vmatmul.mubr.msk.f32.gmra.mxu1 %vm359_vm1, %v6135_v55  ;;  %4171 = vmatprep.mubr.msk.f32.mxu0 %vm359_vm1, %v4784_v51  ;;  %v6142_v55 = vld [vmem:[#allocation13_spill] sm:$0xff] }
 0x10c   : > { %v5379_v11 = vadd.f32 %v1192_v3, %v820_v49  ;;  %v835_v43 = vadd.f32 %v3806_v22, %v5244_v1  ;;  %v1202_v34 = vpop.f32.mrf.mxu0  ;;  %4119 = vmatprep.mubr.msk.f32.mxu1 %vm359_vm1, %v6136_v25  ;;  %v6140_v3 = vld [vmem:[#allocation9_spill] sm:$0xff] }
 0x10d   : > { %v829_v16 = vpop.f32.mrf.mxu1 }
 0x10e   : > { %v5384_v58 = vadd.f32 %v3858_v29, %v835_v43  ;;  %v830_v57 = vadd.f32 %v829_v16, %v5254_v53  ;;  %v3861_v28 = vpop.f32.mrf.mxu0  ;;  %4172 = vmatmul.mubr.msk.f32.gmra.mxu0 %vm359_vm1, %v6112_v0  ;;  %v6141_v29 = vld [vmem:[#allocation11_spill] sm:$0xff] }
 0x10f   : > { %v3809_v26 = vpop.f32.mrf.mxu1  ;;  %4120 = vmatmul.mubr.msk.f32.gmra.mxu1 %vm359_vm1, %v6137_v50  ;;  %4174 = vmatprep.mubr.msk.f32.mxu0 %vm359_vm1, %v4801_v17  ;;  %v6143_v16 = vld [vmem:[#allocation15_spill] sm:$0xff] }
 0x110   : > { %v5393_v1 = vadd.f32 %v1202_v34, %v830_v57  ;;  %v845_v51 = vadd.f32 %v3809_v26, %v5267_v54  ;;  %v1212_v46 = vpop.f32.mrf.mxu0  ;;  %4122 = vmatprep.mubr.msk.f32.mxu1 %vm359_vm1, %v6138_v8 }
 0x111   : > { %v839_v53 = vpop.f32.mrf.mxu1 }
 0x112   : > { %v5398_v48 = vadd.f32 %v3861_v28, %v845_v51  ;;  %v840_v0 = vadd.f32 %v839_v53, %v5280_v60  ;;  %v3864_v41 = vpop.f32.mrf.mxu0  ;;  %4175 = vmatmul.mubr.msk.f32.gmra.mxu0 %vm359_vm1, %v6113_v20  ;;  %v6144_v28 = vld [vmem:[#allocation17_spill] sm:$0xff]  ;;  %v6146_v53 = vld [vmem:[#allocation22_spill] sm:$0xff] }
 0x113   : > { %v3812_v6 = vpop.f32.mrf.mxu1  ;;  %4123 = vmatmul.mubr.msk.f32.gmra.mxu1 %vm359_vm1, %v6139_v63  ;;  %4177 = vmatprep.mubr.msk.f32.mxu0 %vm359_vm1, %v4818_v38  ;;  %v6147_v63 = vld [vmem:[#allocation25_spill] sm:$0xff] }
 0x114   : > { %v5407_v17 = vadd.f32 %v1212_v46, %v840_v0  ;;  %v855_v54 = vadd.f32 %v3812_v6, %v5289_v15  ;;  %v1222_v24 = vpop.f32.mrf.mxu0  ;;  %4125 = vmatprep.mubr.msk.f32.mxu1 %vm359_vm1, %v6140_v3  ;;  %v6145_v46 = vld [vmem:[#allocation20_spill] sm:$0xff] }
 0x115   : > { %v849_v60 = vpop.f32.mrf.mxu1 }
 0x116   : > { %v5412_v47 = vadd.f32 %v3864_v41, %v855_v54  ;;  %v850_v20 = vadd.f32 %v849_v60, %v5299_v19  ;;  %v3867_v32 = vpop.f32.mrf.mxu0  ;;  %4178 = vmatmul.mubr.msk.f32.gmra.mxu0 %vm359_vm1, %v6114_v31 }
 0x117   : > { %v3815_v49 = vpop.f32.mrf.mxu1  ;;  %4126 = vmatmul.mubr.msk.f32.gmra.mxu1 %vm359_vm1, %v6141_v29  ;;  %4180 = vmatprep.mubr.msk.f32.mxu0 %vm359_vm1, %v6115_v62  ;;  %v6150_v29 = vld [vmem:[#allocation6_spill] sm:$0xff] }
 0x118   : > { %v5421_v38 = vadd.f32 %v1222_v24, %v850_v20  ;;  %v865_v15 = vadd.f32 %v3815_v49, %v5166_v9  ;;  %v1232_v22 = vpop.f32.mrf.mxu0  ;;  %4128 = vmatprep.mubr.msk.f32.mxu1 %vm359_vm1, %v6142_v55  ;;  %v6148_v24 = vld [vmem:[#allocation27_spill] sm:$0xff]  ;;  %v2415_v55 = vrot.slane %v5259_v36, 1 }
 0x119   : > { %v859_v19 = vpop.f32.mrf.mxu1 }
 0x11a   : > { %v5426_v43 = vadd.f32 %v3867_v32, %v865_v15  ;;  %v860_v31 = vadd.f32 %v859_v19, %v5176_v35  ;;  %v3870_v34 = vpop.f32.mrf.mxu0  ;;  %4181 = vmatmul.mubr.msk.f32.gmra.mxu0 %vm359_vm1, %v6116_v42  ;;  %v2685_v32 = vrot.slane %v5278_v37, 2  ;;  %v2416_v19 = vrot.slane %v5278_v37, 1  ;;  %v6156_v37 = vld [vmem:[#allocation10_spill] sm:$0xff] }
 0x11b   : > { %v3818_v25 = vpop.f32.mrf.mxu1  ;;  %4129 = vmatmul.mubr.msk.f32.gmra.mxu1 %vm359_vm1, %v6143_v16  ;;  %4183 = vmatprep.mubr.msk.f32.mxu0 %vm359_vm1, %v6117_v45 }
 0x11c   : > { %v5435_v9 = vadd.f32 %v1232_v22, %v860_v31  ;;  %v875_v62 = vadd.f32 %v3818_v25, %v5182_v39  ;;  %v1242_v57 = vpop.f32.mrf.mxu0  ;;  %4131 = vmatprep.mubr.msk.f32.mxu1 %vm359_vm1, %v6144_v28  ;;  %v6151_v22 = vld [vmem:[#allocation31_spill] sm:$0xff]  ;;  %v6154_v28 = vld [vmem:[#allocation33_spill] sm:$0xff] }
 0x11d   : > { %v869_v35 = vpop.f32.mrf.mxu1 }
 0x11e   : > { %v5440_v26 = vadd.f32 %v3870_v34, %v875_v62  ;;  %v870_v42 = vadd.f32 %v869_v35, %v5192_v7  ;;  %v3873_v50 = vpop.f32.mrf.mxu0  ;;  %4184 = vmatmul.mubr.msk.f32.gmra.mxu0 %vm359_vm1, %v6118_v4  ;;  %v6153_v62 = vld [vmem:[#allocation18_spill] sm:$0xff] }
 0x11f   : > { %v3821_v51 = vpop.f32.mrf.mxu1  ;;  %4132 = vmatmul.mubr.msk.f32.gmra.mxu1 %vm359_vm1, %v6145_v46  ;;  %4186 = vmatprep.mubr.msk.f32.mxu0 %vm359_vm1, %v4869_v40  ;;  %v6155_v35 = vld [vmem:[#allocation14_spill] sm:$0xff]  ;;  %v6157_v46 = vld [vmem:[#allocation23_spill] sm:$0xff] }
 0x120   : > { %v5449_v39 = vadd.f32 %v1242_v57, %v870_v42  ;;  %v885_v45 = vadd.f32 %v3821_v51, %v5198_v56  ;;  %v1252_v8 = vpop.f32.mrf.mxu0  ;;  %4134 = vmatprep.mubr.msk.f32.mxu1 %vm359_vm1, %v6146_v53 }
 0x121   : > { %v879_v7 = vpop.f32.mrf.mxu1 }
 0x122   : > { %v5454_v0 = vadd.f32 %v3873_v50, %v885_v45  ;;  %v880_v4 = vadd.f32 %v879_v7, %v5208_v23  ;;  %v3876_v41 = vpop.f32.mrf.mxu0  ;;  %4187 = vmatmul.mubr.msk.f32.gmra.mxu0 %vm359_vm1, %v4880_v61  ;;  %v2417_v7 = vsel %vm275_vm0, %v2415_v55, %v2416_v19 }
 0x123   : > { %v3824_v6 = vpop.f32.mrf.mxu1  ;;  %4135 = vmatmul.mubr.msk.f32.gmra.mxu1 %vm359_vm1, %v6147_v63  ;;  %4189 = vmatprep.mubr.msk.f32.mxu0 %vm359_vm1, %v4886_v59  ;;  %v6149_v59 = vld [vmem:[#allocation29_spill] sm:$0xff] }
 0x124   : > { %v5463_v40 = vadd.f32 %v1252_v8, %v880_v4  ;;  %v895_v56 = vadd.f32 %v3824_v6, %v5214_v10  ;;  %v1262_v54 = vpop.f32.mrf.mxu0  ;;  %4137 = vmatprep.mubr.msk.f32.mxu1 %vm359_vm1, %v6148_v24  ;;  %v2684_v10 = vrot.slane %v5259_v36, 2  ;;  %v6160_v24 = vld [vmem:[#allocation4_spill] sm:$0xff] }
 0x125   : > { %v889_v23 = vpop.f32.mrf.mxu1 }
 0x126   : > { %v5468_v3 = vadd.f32 %v3876_v41, %v895_v56  ;;  %v890_v61 = vadd.f32 %v889_v23, %v5224_v18  ;;  %v3879_v60 = vpop.f32.mrf.mxu0  ;;  %4190 = vmatmul.mubr.msk.f32.gmra.mxu0 %vm359_vm1, %v4897_v2  ;;  %v224_v2 = vld [vmem:[%s4268_s25 + $0x1a8] sm:$0x3]  ;;  %v2686_v45 = vsel %vm938_vm2, %v2684_v10, %v2685_v32  ;;  %v6158_v41 = vld [vmem:[#allocation12_spill] sm:$0xff]  ;;  %v6159_v56 = vld [vmem:[#allocation34_spill] sm:$0xff] }
 0x127   : > { %v3827_v20 = vpop.f32.mrf.mxu1  ;;  %4138 = vmatmul.mubr.msk.f32.gmra.mxu1 %vm359_vm1, %v6149_v59  ;;  %4192 = vmatprep.mubr.msk.f32.mxu0 %vm359_vm1, %v4903_v14  ;;  %v6152_v14 = vld [vmem:[#allocation8_spill] sm:$0xff]  ;;  %v2687_v42 = vrot.slane %v224_v2, 2  ;;  %v2418_v8 = vrot.slane %v224_v2, 1 }
 0x128   : > { %v5479_v49 = vadd.f32 %v1262_v54, %v890_v61  ;;  %v905_v15 = vadd.f32 %v3827_v20, %v6150_v29  ;;  %v1272_v18 = vpop.f32.mrf.mxu0  ;;  %4140 = vmatprep.mubr.msk.f32.mxu1 %vm359_vm1, %v6151_v22 }
 0x129   : > { %v899_v31 = vpop.f32.mrf.mxu1  ;;  %v2688_v23 = vsel %vm938_vm2, %v2685_v32, %v2687_v42  ;;  %v2419_v10 = vsel %vm275_vm0, %v2416_v19, %v2418_v8  ;;  %v6164_v19 = vld [vmem:[#allocation37_spill] sm:$0xff] }
 0x12a   : > { %v5487_v34 = vadd.f32 %v3879_v60, %v905_v15  ;;  %v900_v25 = vadd.f32 %v899_v31, %v6152_v14  ;;  %v3882_v16 = vpop.f32.mrf.mxu0  ;;  %4193 = vmatmul.mubr.msk.f32.gmra.mxu0 %vm359_vm1, %v6153_v62  ;;  %v6161_v60 = vld [vmem:[#allocation19_spill] sm:$0xff]  ;;  %v6163_v31 = vld [vmem:[#allocation36_spill] sm:$0xff] }
 0x12b   : > { %v3830_v57 = vpop.f32.mrf.mxu1  ;;  %4141 = vmatmul.mubr.msk.f32.gmra.mxu1 %vm359_vm1, %v6154_v28  ;;  %4195 = vmatprep.mubr.msk.f32.mxu0 %vm359_vm1, %v6155_v35 }
 0x12c   : > { %v5496_v36 = vadd.f32 %v1272_v18, %v900_v25  ;;  %v915_v50 = vadd.f32 %v3830_v57, %v6156_v37  ;;  %v1282_v51 = vpop.f32.mrf.mxu0  ;;  %4143 = vmatprep.mubr.msk.f32.mxu1 %vm359_vm1, %v6157_v46  ;;  %v6162_v18 = vld [vmem:[#allocation35_spill] sm:$0xff] }
 0x12d   : > { %v909_v53 = vpop.f32.mrf.mxu1 }
 0x12e   : > { %v5503_v4 = vadd.f32 %v3882_v16, %v915_v50  ;;  %v910_v6 = vadd.f32 %v909_v53, %v6158_v41  ;;  %v3885_v63 = vpop.f32.mrf.mxu0  ;;  %4196 = vmatmul.mubr.msk.f32.gmra.mxu0 %vm359_vm1, %v6159_v56 }
 0x12f   : > { %v3833_v54 = vpop.f32.mrf.mxu1  ;;  %4144 = vmatmul.mubr.msk.f32.gmra.mxu1 %vm359_vm1, %v6160_v24  ;;  %4198 = vmatprep.mubr.msk.f32.mxu0 %vm359_vm1, %v2686_v45 }
 0x130   : > { %v5512_v61 = vadd.f32 %v1282_v51, %v910_v6  ;;  %v925_v20 = vadd.f32 %v3833_v54, %v6161_v60  ;;  %v1292_v59 = vpop.f32.mrf.mxu0  ;;  %4146 = vmatprep.mubr.msk.f32.mxu1 %vm359_vm1, %v2417_v7 }
 0x131   : > { %v919_v29 = vpop.f32.mrf.mxu1 }
 0x132   : > { %v5517_v15 = vadd.f32 %v3885_v63, %v925_v20  ;;  %v920_v22 = vadd.f32 %v919_v29, %v6162_v18  ;;  %v3888_v2 = vpop.f32.mrf.mxu0  ;;  %4199 = vmatmul.mubr.msk.f32.gmra.mxu0 %vm359_vm1, %v2688_v23 }
 0x133   : > { %v3836_v55 = vpop.f32.mrf.mxu1  ;;  %4147 = vmatmul.mubr.msk.f32.gmra.mxu1 %vm359_vm1, %v2419_v10 }
 0x134   : > { %v5522_v32 = vadd.f32 %v1292_v59, %v920_v22  ;;  %v935_v14 = vadd.f32 %v3836_v55, %v6163_v31  ;;  %v1302_v25 = vpop.f32.mrf.mxu0 }
 0x135   : > { %v929_v16 = vpop.f32.mrf.mxu1 }
 0x136   : > { %v5525_v62 = vadd.f32 %v3888_v2, %v935_v14  ;;  %v930_v57 = vadd.f32 %v929_v16, %v6164_v19  ;;  %v3947_v28 = vpop.f32.mrf.mxu0 }
 0x137   : > { %v3895_v35 = vpop.f32.mrf.mxu1 }
 0x138   : > { %v5528_v42 = vadd.f32 %v1302_v25, %v930_v57  ;;  %v1578_v37 = vadd.f32 %v3895_v35, %v5314_v12  ;;  %v1688_v50 = vpop.f32.mrf.mxu0 }
 0x139   : > { %v1418_v51 = vpop.f32.mrf.mxu1 }
 0x13a   : > { %v5531_v46 = vadd.f32 %v3947_v28, %v1578_v37  ;;  %v1577_v45 = vadd.f32 %v1418_v51, %v5323_v44  ;;  %v3950_v8 = vpop.f32.mrf.mxu0 }
 0x13b   : > { %v3898_v53 = vpop.f32.mrf.mxu1 }
 0x13c   : > { %v5534_v7 = vadd.f32 %v1688_v50, %v1577_v45  ;;  %v1580_v41 = vadd.f32 %v3898_v53, %v5328_v21  ;;  %v1698_v6 = vpop.f32.mrf.mxu0 }
 0x13d   : > { %v1428_v63 = vpop.f32.mrf.mxu1 }
 0x13e   : > { %v5537_v56 = vadd.f32 %v3950_v8, %v1580_v41  ;;  %v1579_v54 = vadd.f32 %v1428_v63, %v5337_v13  ;;  %v3953_v24 = vpop.f32.mrf.mxu0 }
 0x13f   : > { %v3901_v12 = vpop.f32.mrf.mxu1 }
 0x140   : > { %v5540_v23 = vadd.f32 %v1698_v6, %v1579_v54  ;;  %v1582_v60 = vadd.f32 %v3901_v12, %v5342_v33  ;;  %v1708_v20 = vpop.f32.mrf.mxu0 }
 0x141   : > { %v1438_v44 = vpop.f32.mrf.mxu1 }
 0x142   : > { %v5543_v59 = vadd.f32 %v3953_v24, %v1582_v60  ;;  %v1581_v10 = vadd.f32 %v1438_v44, %v5351_v5  ;;  %v3956_v29 = vpop.f32.mrf.mxu0 }
 0x143   : > { %v3904_v21 = vpop.f32.mrf.mxu1 }
 0x144   : > { %v5546_v18 = vadd.f32 %v1708_v20, %v1581_v10  ;;  %v1584_v22 = vadd.f32 %v3904_v21, %v5356_v27  ;;  %v1718_v2 = vpop.f32.mrf.mxu0 }
 0x145   : > { %v1448_v13 = vpop.f32.mrf.mxu1 }
 0x146   : > { %v5549_v55 = vadd.f32 %v3956_v29, %v1584_v22  ;;  %v1583_v31 = vadd.f32 %v1448_v13, %v5365_v52  ;;  %v3959_v14 = vpop.f32.mrf.mxu0 }
 0x147   : > { %v3907_v33 = vpop.f32.mrf.mxu1 }
 0x148   : > { %v5552_v25 = vadd.f32 %v1718_v2, %v1583_v31  ;;  %v1586_v16 = vadd.f32 %v3907_v33, %v5370_v30  ;;  %v1728_v19 = vpop.f32.mrf.mxu0 }
 0x149   : > { %v1458_v5 = vpop.f32.mrf.mxu1 }
 0x14a   : > { %v5555_v57 = vadd.f32 %v3959_v14, %v1586_v16  ;;  %v1585_v28 = vadd.f32 %v1458_v5, %v5379_v11  ;;  %v3962_v35 = vpop.f32.mrf.mxu0 }
 0x14b   : > { %v3910_v27 = vpop.f32.mrf.mxu1 }
 0x14c   : > { %v5558_v37 = vadd.f32 %v1728_v19, %v1585_v28  ;;  %v1588_v50 = vadd.f32 %v3910_v27, %v5384_v58  ;;  %v1738_v51 = vpop.f32.mrf.mxu0 }
 0x14d   : > { %v1468_v52 = vpop.f32.mrf.mxu1 }
 0x14e   : > { %v5561_v45 = vadd.f32 %v3962_v35, %v1588_v50  ;;  %v1587_v8 = vadd.f32 %v1468_v52, %v5393_v1  ;;  %v3965_v53 = vpop.f32.mrf.mxu0 }
 0x14f   : > { %v3913_v30 = vpop.f32.mrf.mxu1 }
 0x150   : > { %v5564_v41 = vadd.f32 %v1738_v51, %v1587_v8  ;;  %v1590_v6 = vadd.f32 %v3913_v30, %v5398_v48  ;;  %v1748_v63 = vpop.f32.mrf.mxu0 }
 0x151   : > { %v1478_v11 = vpop.f32.mrf.mxu1 }
 0x152   : > { %v5567_v54 = vadd.f32 %v3965_v53, %v1590_v6  ;;  %v1589_v24 = vadd.f32 %v1478_v11, %v5407_v17  ;;  %v3968_v12 = vpop.f32.mrf.mxu0 }
 0x153   : > { %v3916_v58 = vpop.f32.mrf.mxu1 }
 0x154   : > { %v5570_v60 = vadd.f32 %v1748_v63, %v1589_v24  ;;  %v1592_v20 = vadd.f32 %v3916_v58, %v5412_v47  ;;  %v1758_v44 = vpop.f32.mrf.mxu0 }
 0x155   : > { %v1488_v1 = vpop.f32.mrf.mxu1 }
 0x156   : > { %v5573_v10 = vadd.f32 %v3968_v12, %v1592_v20  ;;  %v1591_v29 = vadd.f32 %v1488_v1, %v5421_v38  ;;  %v3971_v21 = vpop.f32.mrf.mxu0 }
 0x157   : > { %v3919_v48 = vpop.f32.mrf.mxu1 }
 0x158   : > { %v5576_v22 = vadd.f32 %v1758_v44, %v1591_v29  ;;  %v1594_v2 = vadd.f32 %v3919_v48, %v5426_v43  ;;  %v1768_v13 = vpop.f32.mrf.mxu0 }
 0x159   : > { %v1498_v17 = vpop.f32.mrf.mxu1 }
 0x15a   : > { %v5579_v31 = vadd.f32 %v3971_v21, %v1594_v2  ;;  %v1593_v14 = vadd.f32 %v1498_v17, %v5435_v9  ;;  %v3974_v33 = vpop.f32.mrf.mxu0 }
 0x15b   : > { %v3922_v47 = vpop.f32.mrf.mxu1 }
 0x15c   : > { %v5582_v16 = vadd.f32 %v1768_v13, %v1593_v14  ;;  %v1596_v19 = vadd.f32 %v3922_v47, %v5440_v26  ;;  %v1778_v5 = vpop.f32.mrf.mxu0 }
 0x15d   : > { %v1508_v38 = vpop.f32.mrf.mxu1 }
 0x15e   : > { %v5585_v28 = vadd.f32 %v3974_v33, %v1596_v19  ;;  %v1595_v35 = vadd.f32 %v1508_v38, %v5449_v39  ;;  %v3977_v27 = vpop.f32.mrf.mxu0 }
 0x15f   : > { %v3925_v43 = vpop.f32.mrf.mxu1 }
 0x160   : > { %6165 = vst [vmem:[#allocation38_spill] sm:$0xff] %v5585_v28  ;;  %v5588_v50 = vadd.f32 %v1778_v5, %v1595_v35  ;;  %v1598_v51 = vadd.f32 %v3925_v43, %v5454_v0  ;;  %v1788_v52 = vpop.f32.mrf.mxu0 }
 0x161   : > { %v1518_v9 = vpop.f32.mrf.mxu1 }
 0x162   : > { %6166 = vst [vmem:[#allocation39_spill] sm:$0xff] %v5588_v50  ;;  %v5591_v8 = vadd.f32 %v3977_v27, %v1598_v51  ;;  %v1597_v53 = vadd.f32 %v1518_v9, %v5463_v40  ;;  %v3980_v30 = vpop.f32.mrf.mxu0 }
 0x163   : > { %v3928_v26 = vpop.f32.mrf.mxu1 }
 0x164   : > { %6167 = vst [vmem:[#allocation40_spill] sm:$0xff] %v5591_v8  ;;  %v5594_v6 = vadd.f32 %v1788_v52, %v1597_v53  ;;  %v1600_v63 = vadd.f32 %v3928_v26, %v5468_v3  ;;  %v1798_v11 = vpop.f32.mrf.mxu0 }
 0x165   : > { %v1528_v39 = vpop.f32.mrf.mxu1 }
 0x166   : > { %6168 = vst [vmem:[#allocation41_spill] sm:$0xff] %v5594_v6  ;;  %v5597_v24 = vadd.f32 %v3980_v30, %v1600_v63  ;;  %v1599_v12 = vadd.f32 %v1528_v39, %v5479_v49  ;;  %v3983_v58 = vpop.f32.mrf.mxu0 }
 0x167   : > { %v3931_v0 = vpop.f32.mrf.mxu1 }
 0x168   : > { %6169 = vst [vmem:[#allocation42_spill] sm:$0xff] %v5597_v24  ;;  %v5600_v20 = vadd.f32 %v1798_v11, %v1599_v12  ;;  %v1602_v44 = vadd.f32 %v3931_v0, %v5487_v34  ;;  %v1808_v1 = vpop.f32.mrf.mxu0 }
 0x169   : > { %v1538_v40 = vpop.f32.mrf.mxu1 }
 0x16a   : > { %6170 = vst [vmem:[#allocation43_spill] sm:$0xff] %v5600_v20  ;;  %v5603_v29 = vadd.f32 %v3983_v58, %v1602_v44  ;;  %v1601_v21 = vadd.f32 %v1538_v40, %v5496_v36  ;;  %v3986_v48 = vpop.f32.mrf.mxu0 }
 0x16b   : > { %v3934_v3 = vpop.f32.mrf.mxu1 }
 0x16c   : > { %6171 = vst [vmem:[#allocation44_spill] sm:$0xff] %v5603_v29  ;;  %v5606_v2 = vadd.f32 %v1808_v1, %v1601_v21  ;;  %v1604_v13 = vadd.f32 %v3934_v3, %v5503_v4  ;;  %v1818_v17 = vpop.f32.mrf.mxu0 }
 0x16d   : > { %v1548_v49 = vpop.f32.mrf.mxu1 }
 0x16e   : > { %6172 = vst [vmem:[#allocation16_spill] sm:$0xff] %v5606_v2  ;;  %v5609_v14 = vadd.f32 %v3986_v48, %v1604_v13  ;;  %v1603_v33 = vadd.f32 %v1548_v49, %v5512_v61  ;;  %v3989_v47 = vpop.f32.mrf.mxu0 }
 0x16f   : > { %v3937_v34 = vpop.f32.mrf.mxu1 }
 0x170   : > { %6173 = vst [vmem:[#allocation21_spill] sm:$0xff] %v5609_v14  ;;  %v5612_v19 = vadd.f32 %v1818_v17, %v1603_v33  ;;  %v1606_v5 = vadd.f32 %v3937_v34, %v5517_v15  ;;  %v1828_v38 = vpop.f32.mrf.mxu0 }
 0x171   : > { %v1558_v36 = vpop.f32.mrf.mxu1 }
 0x172   : > { %6174 = vst [vmem:[#allocation24_spill] sm:$0xff] %v5612_v19  ;;  %v5615_v35 = vadd.f32 %v3989_v47, %v1606_v5  ;;  %v1605_v27 = vadd.f32 %v1558_v36, %v5522_v32  ;;  %v3992_v43 = vpop.f32.mrf.mxu0 }
 0x173   : > { %v3940_v4 = vpop.f32.mrf.mxu1 }
 0x174   : > { %6175 = vst [vmem:[#allocation26_spill] sm:$0xff] %v5615_v35  ;;  %v5618_v51 = vadd.f32 %v1828_v38, %v1605_v27  ;;  %v1608_v52 = vadd.f32 %v3940_v4, %v5525_v62  ;;  %v1838_v9 = vpop.f32.mrf.mxu0 }
 0x175   : > { %v1568_v61 = vpop.f32.mrf.mxu1 }
 0x176   : > { %6176 = vst [vmem:[#allocation28_spill] sm:$0xff] %v5618_v51  ;;  %v5621_v53 = vadd.f32 %v3992_v43, %v1608_v52  ;;  %v1607_v30 = vadd.f32 %v1568_v61, %v5528_v42  ;;  %v5624_v26 = vpop.f32.mrf.mxu0 }
 0x177   : > { %v3999_v15 = vpop.f32.mrf.mxu1 }
 0x178   : > { %6177 = vst [vmem:[#allocation30_spill] sm:$0xff] %v5621_v53  ;;  %v5626_v63 = vadd.f32 %v1838_v9, %v1607_v30  ;;  %v5628_v11 = vpop.f32.mrf.mxu0 }
 0x179   : > { %v1957_v32 = vpop.f32.mrf.mxu1 }
 0x17a   : > { %6178 = vst [vmem:[#allocation32_spill] sm:$0xff] %v5626_v63  ;;  %v5630_v39 = vpop.f32.mrf.mxu0 }
 0x17b   : > { %v4002_v12 = vpop.f32.mrf.mxu1 }
 0x17c   : > { %v5632_v58 = vpop.f32.mrf.mxu0 }
 0x17d   : > { %v5634_v62 = vpop.f32.mrf.mxu1 }
 0x17e   : > { %v5636_v0 = vpop.f32.mrf.mxu0 }
 0x17f   : > { %v5638_v44 = vpop.f32.mrf.mxu1 }
 0x180   : > { %v5640_v42 = vpop.f32.mrf.mxu0 }
 0x181   : > { %v5642_v1 = vpop.f32.mrf.mxu1 }
 0x182   : > { %v5644_v40 = vpop.f32.mrf.mxu0 }
 0x183   : > { %v5646_v21 = vpop.f32.mrf.mxu1 }
 0x184   : > { %v5648_v48 = vpop.f32.mrf.mxu0 }
 0x185   : > { %v5650_v3 = vpop.f32.mrf.mxu1 }
 0x186   : > { %v5652_v13 = vpop.f32.mrf.mxu0 }
 0x187   : > { %v5654_v17 = vpop.f32.mrf.mxu1 }
 0x188   : > { %v5656_v49 = vpop.f32.mrf.mxu0 }
 0x189   : > { %v5658_v33 = vpop.f32.mrf.mxu1 }
 0x18a   : > { %v5660_v47 = vpop.f32.mrf.mxu0 }
 0x18b   : > { %v5662_v34 = vpop.f32.mrf.mxu1 }
 0x18c   : > { %v5664_v5 = vpop.f32.mrf.mxu0 }
 0x18d   : > { %v5666_v38 = vpop.f32.mrf.mxu1 }
 0x18e   : > { %v5668_v36 = vpop.f32.mrf.mxu0 }
 0x18f   : > { %v5670_v27 = vpop.f32.mrf.mxu1 }
 0x190   : > { %v5672_v43 = vpop.f32.mrf.mxu0 }
 0x191   : > { %v5674_v4 = vpop.f32.mrf.mxu1 }
 0x192   : > { %v5676_v52 = vpop.f32.mrf.mxu0 }
 0x193   : > { %v5678_v9 = vpop.f32.mrf.mxu1 }
 0x194   : > { %v5680_v61 = vpop.f32.mrf.mxu0 }
 0x195   : > { %v5682_v30 = vpop.f32.mrf.mxu1 }
 0x196   : > { %v5684_v63 = vpop.f32.mrf.mxu0 }
 0x197   : > { %v5686_v53 = vpop.f32.mrf.mxu1 }
 0x198   : > { %v5688_v51 = vpop.f32.mrf.mxu0 }
 0x199   : > { %6179 = vst [vmem:[#allocation2_spill] sm:$0xff] %v5688_v51  ;;  %v5690_v35 = vpop.f32.mrf.mxu1 }
 0x19a   : > { %v5692_v19 = vpop.f32.mrf.mxu0 }
 0x19b   : > { %6180 = vst [vmem:[#allocation3_spill] sm:$0xff] %v5692_v19  ;;  %v5694_v14 = vpop.f32.mrf.mxu1 }
 0x19c   : > { %6181 = vst [vmem:[#allocation5_spill] sm:$0xff] %v5694_v14  ;;  %v5696_v2 = vpop.f32.mrf.mxu0 }
 0x19d   : > { %6182 = vst [vmem:[#allocation7_spill] sm:$0xff] %v5696_v2  ;;  %v5698_v29 = vpop.f32.mrf.mxu1 }
 0x19e   : > { %6183 = vst [vmem:[#allocation9_spill] sm:$0xff] %v5698_v29  ;;  %v5700_v20 = vpop.f32.mrf.mxu0 }
 0x19f   : > { %6184 = vst [vmem:[#allocation11_spill] sm:$0xff] %v5700_v20  ;;  %v5702_v24 = vpop.f32.mrf.mxu1 }
 0x1a0   : > { %6185 = vst [vmem:[#allocation13_spill] sm:$0xff] %v5702_v24  ;;  %v5704_v6 = vpop.f32.mrf.mxu0 }
 0x1a1   : > { %6186 = vst [vmem:[#allocation15_spill] sm:$0xff] %v5704_v6  ;;  %v5706_v8 = vpop.f32.mrf.mxu1 }
 0x1a2   : > { %6187 = vst [vmem:[#allocation17_spill] sm:$0xff] %v5706_v8  ;;  %v5708_v50 = vpop.f32.mrf.mxu0 }
 0x1a3   : > { %6188 = vst [vmem:[#allocation20_spill] sm:$0xff] %v5708_v50  ;;  %v5710_v51 = vpop.f32.mrf.mxu1 }
 0x1a4   : > { %6189 = vst [vmem:[#allocation22_spill] sm:$0xff] %v5710_v51  ;;  %v5712_v28 = vpop.f32.mrf.mxu0 }
 0x1a5   : > { %6190 = vst [vmem:[#allocation25_spill] sm:$0xff] %v5712_v28  ;;  %v5714_v19 = vpop.f32.mrf.mxu1 }
 0x1a6   : > { %6191 = vst [vmem:[#allocation27_spill] sm:$0xff] %v5714_v19  ;;  %v5716_v14 = vpop.f32.mrf.mxu0 }
 0x1a7   : > { %6192 = vst [vmem:[#allocation29_spill] sm:$0xff] %v5716_v14  ;;  %v5718_v2 = vpop.f32.mrf.mxu1 }
 0x1a8   : > { %6193 = vst [vmem:[#allocation6_spill] sm:$0xff] %v5718_v2  ;;  %v5720_v29 = vpop.f32.mrf.mxu0 }
 0x1a9   : > { %6194 = vst [vmem:[#allocation31_spill] sm:$0xff] %v5720_v29  ;;  %v5722_v20 = vpop.f32.mrf.mxu1  ;;  %v2117_v29 = vadd.f32 %v3999_v15, %v5531_v46  ;;  %v2118_v46 = vadd.f32 %v5634_v62, %v5540_v23  ;;  %v2120_v23 = vadd.f32 %v5642_v1, %v5546_v18 }
 0x1aa   : > { %6195 = vst [vmem:[#allocation8_spill] sm:$0xff] %v5722_v20  ;;  %v5724_v24 = vpop.f32.mrf.mxu0 }
 0x1ab   : > { %6196 = vst [vmem:[#allocation18_spill] sm:$0xff] %v5724_v24  ;;  %v5726_v6 = vpop.f32.mrf.mxu1  ;;  %v2116_v24 = vadd.f32 %v1957_v32, %v5534_v7  ;;  %v2121_v7 = vadd.f32 %v5638_v44, %v5543_v59  ;;  %v5760_v32 = vld [vmem:[%s5953_s2] ss:$0 sm:$0xff]  ;;  %v2386_v1 = vadd.f32 %v5640_v42, %v2120_v23 }
 0x1ac   : > { %6197 = vst [vmem:[#allocation33_spill] sm:$0xff] %v5726_v6  ;;  %v5728_v8 = vpop.f32.mrf.mxu0 }
 0x1ad   : > { %6198 = vst [vmem:[#allocation14_spill] sm:$0xff] %v5728_v8  ;;  %v5730_v50 = vpop.f32.mrf.mxu1 }
 0x1ae   : > { %6199 = vst [vmem:[#allocation10_spill] sm:$0xff] %v5730_v50  ;;  %v5732_v51 = vpop.f32.mrf.mxu0 }
 0x1af   : > { %6200 = vst [vmem:[#allocation23_spill] sm:$0xff] %v5732_v51  ;;  %v5734_v28 = vpop.f32.mrf.mxu1  ;;  %v2383_v51 = vadd.f32 %v5624_v26, %v2117_v29 }
 0x1b0   : > { %6201 = vst [vmem:[#allocation12_spill] sm:$0xff] %v5734_v28  ;;  %v5736_v19 = vpop.f32.mrf.mxu0  ;;  %v2119_v28 = vadd.f32 %v4002_v12, %v5537_v56 }
 0x1b1   : > { %6202 = vst [vmem:[#allocation34_spill] sm:$0xff] %v5736_v19  ;;  %v5738_v14 = vpop.f32.mrf.mxu1 }
 0x1b2   : > { %6203 = vst [vmem:[#allocation4_spill] sm:$0xff] %v5738_v14  ;;  %v5741_v2 = vpop.f32.mrf.mxu0  ;;  %v2382_v14 = vadd.f32 %v5628_v11, %v2116_v24  ;;  %v2385_v56 = vadd.f32 %v5630_v39, %v2119_v28  ;;  %v2123_v28 = vadd.f32 %v5646_v21, %v5549_v55 }
 0x1b3   : > { %6204 = vst [vmem:[#allocation19_spill] sm:$0xff] %v5741_v2  ;;  %v5743_v20 = vpop.f32.mrf.mxu1 }
 0x1b4   : > { %v5746_v8 = vpop.f32.mrf.mxu0 }
 0x1b5   : > { %6205 = vst [vmem:[#allocation35_spill] sm:$0xff] %v5746_v8  ;;  %v5748_v50 = vpop.f32.mrf.mxu1  ;;  %v2387_v8 = vadd.f32 %v5636_v0, %v2121_v7  ;;  %v2122_v0 = vadd.f32 %v5650_v3, %v5552_v25 }
 0x1b6   : > { %v4155_v19 = vpop.f32.mrf.mxu0 }
 0x1b7   : > { %v4103_v6 = vpop.f32.mrf.mxu1 }
 0x1b8   : > { %v2653_v15 = vadd.f32 %v4103_v6, %v2383_v51  ;;  %v2762_v2 = vpop.f32.mrf.mxu0  ;;  %v2384_v51 = vadd.f32 %v5632_v58, %v2118_v46 }
 0x1b9   : > { %v2493_v29 = vpop.f32.mrf.mxu1 }
 0x1ba   : > { %v2922_v26 = vadd.f32 %v4155_v19, %v2653_v15  ;;  %v2652_v12 = vadd.f32 %v2493_v29, %v2382_v14  ;;  %v4158_v24 = vpop.f32.mrf.mxu0 }
 0x1bb   : > { %v4106_v6 = vpop.f32.mrf.mxu1 }
 0x1bc   : > { %v2961_v59 = vadd.f32 %v5760_v32, %v2922_v26  ;;  %v2921_v11 = vadd.f32 %v2762_v2, %v2652_v12  ;;  %v2655_v62 = vadd.f32 %v4106_v6, %v2385_v56  ;;  %v2772_v44 = vpop.f32.mrf.mxu0  ;;  %v2389_v56 = vadd.f32 %v5644_v40, %v2123_v28 }
 0x1bd   : > { %v2503_v18 = vpop.f32.mrf.mxu1  ;;  %v2125_v26 = vadd.f32 %v5654_v17, %v5555_v57  ;;  %v2388_v6 = vadd.f32 %v5648_v48, %v2122_v0 }
 0x1be   : > { %v2993_v14 = vmax.f32 %v2961_v59, 0.0  ;;  %v2960_v19 = vadd.f32 %v5760_v32, %v2921_v11  ;;  %v2924_v39 = vadd.f32 %v4158_v24, %v2655_v62  ;;  %v2654_v2 = vadd.f32 %v2503_v18, %v2384_v51  ;;  %v4161_v58 = vpop.f32.mrf.mxu0 }
 0x1bf   : > { %v4109_v55 = vpop.f32.mrf.mxu1  ;;  %v2391_v62 = vadd.f32 %v5652_v13, %v2125_v26 }
 0x1c0   : > { %3025 = vst.msk [vmem:[%s5774_s6 + $0x8] sm:$0xff] %vm359_vm1, %v2993_v14  ;;  %v2992_v21 = vmax.f32 %v2960_v19, 0.0  ;;  %v2963_v46 = vadd.f32 %v5760_v32, %v2924_v39  ;;  %v2923_v15 = vadd.f32 %v2772_v44, %v2654_v2  ;;  %v2657_v7 = vadd.f32 %v4109_v55, %v2387_v8  ;;  %v2782_v29 = vpop.f32.mrf.mxu0 }
 0x1c1   : > { %v2513_v12 = vpop.f32.mrf.mxu1  ;;  %v2124_v8 = vadd.f32 %v5658_v33, %v5558_v37  ;;  %v2127_v44 = vadd.f32 %v5662_v34, %v5561_v45  ;;  %v2126_v39 = vadd.f32 %v5666_v38, %v5564_v41  ;;  %v2129_v55 = vadd.f32 %v5670_v27, %v5567_v54 }
 0x1c2   : > { %3024 = vst.msk [vmem:[%s5774_s6] sm:$0xff] %vm359_vm1, %v2992_v21  ;;  %v2995_v42 = vmax.f32 %v2963_v46, 0.0  ;;  %v2962_v25 = vadd.f32 %v5760_v32, %v2923_v15  ;;  %v2926_v3 = vadd.f32 %v4161_v58, %v2657_v7  ;;  %v2656_v24 = vadd.f32 %v2513_v12, %v2386_v1  ;;  %v4164_v23 = vpop.f32.mrf.mxu0 }
 0x1c3   : > { %v4112_v51 = vpop.f32.mrf.mxu1  ;;  %v2390_v19 = vadd.f32 %v5656_v49, %v2124_v8  ;;  %v2393_v0 = vadd.f32 %v5660_v47, %v2127_v44  ;;  %v2392_v7 = vadd.f32 %v5664_v5, %v2126_v39  ;;  %v2130_v8 = vadd.f32 %v5682_v30, %v5576_v22  ;;  %v6207_v39 = vld [vmem:[#allocation5_spill] sm:$0xff] }
 0x1c4   : > { %3027 = vst.msk [vmem:[%s5774_s6 + $0x18] sm:$0xff] %vm359_vm1, %v2995_v42  ;;  %v2994_v40 = vmax.f32 %v2962_v25, 0.0  ;;  %v2965_v57 = vadd.f32 %v5760_v32, %v2926_v3  ;;  %v2925_v17 = vadd.f32 %v2782_v29, %v2656_v24  ;;  %v2659_v59 = vadd.f32 %v4112_v51, %v2389_v56  ;;  %v2792_v11 = vpop.f32.mrf.mxu0 }
 0x1c5   : > { %v2523_v28 = vpop.f32.mrf.mxu1  ;;  %v2128_v29 = vadd.f32 %v5674_v4, %v5570_v60  ;;  %v2395_v42 = vadd.f32 %v5668_v36, %v2129_v55  ;;  %v2131_v25 = vadd.f32 %v5678_v9, %v5573_v10  ;;  %v6210_v55 = vld [vmem:[#allocation9_spill] sm:$0xff] }
 0x1c6   : > { %3026 = vst.msk [vmem:[%s5774_s6 + $0x10] sm:$0xff] %vm359_vm1, %v2994_v40  ;;  %v2997_v48 = vmax.f32 %v2965_v57, 0.0  ;;  %v2964_v37 = vadd.f32 %v5760_v32, %v2925_v17  ;;  %v2928_v33 = vadd.f32 %v4164_v23, %v2659_v59  ;;  %v2658_v18 = vadd.f32 %v2523_v28, %v2388_v6  ;;  %v4167_v14 = vpop.f32.mrf.mxu0 }
 0x1c7   : > { %v4115_v2 = vpop.f32.mrf.mxu1  ;;  %v2394_v6 = vadd.f32 %v5672_v43, %v2128_v29  ;;  %v2397_v17 = vadd.f32 %v5676_v52, %v2131_v25  ;;  %v2133_v59 = vadd.f32 %v5686_v53, %v5579_v31  ;;  %v2396_v28 = vadd.f32 %v5680_v61, %v2130_v8 }
 0x1c8   : > { %3029 = vst.msk [vmem:[%s5774_s6 + $0x28] sm:$0xff] %vm359_vm1, %v2997_v48  ;;  %v2996_v13 = vmax.f32 %v2964_v37, 0.0  ;;  %v2967_v45 = vadd.f32 %v5760_v32, %v2928_v33  ;;  %v2927_v34 = vadd.f32 %v2792_v11, %v2658_v18  ;;  %v2661_v58 = vadd.f32 %v4115_v2, %v2391_v62  ;;  %v2802_v1 = vpop.f32.mrf.mxu0 }
 0x1c9   : > { %v2533_v21 = vpop.f32.mrf.mxu1  ;;  %v2132_v48 = vadd.f32 %v5690_v35, %v5582_v16 }
 0x1ca   : > { %3028 = vst.msk [vmem:[%s5774_s6 + $0x20] sm:$0xff] %vm359_vm1, %v2996_v13  ;;  %v2999_v49 = vmax.f32 %v2967_v45, 0.0  ;;  %v2966_v41 = vadd.f32 %v5760_v32, %v2927_v34  ;;  %v2930_v38 = vadd.f32 %v4167_v14, %v2661_v58  ;;  %v2660_v46 = vadd.f32 %v2533_v21, %v2390_v19  ;;  %v4170_v15 = vpop.f32.mrf.mxu0  ;;  %v6206_v19 = vld [vmem:[#allocation38_spill] sm:$0xff] }
 0x1cb   : > { %v4118_v56 = vpop.f32.mrf.mxu1  ;;  %v2399_v14 = vadd.f32 %v5684_v63, %v2133_v59  ;;  %v2135_v2 = vadd.f32 %v6207_v39, %v6206_v19  ;;  %v6208_v58 = vld [vmem:[#allocation2_spill] sm:$0xff] }
 0x1cc   : > { %3031 = vst.msk [vmem:[%s5774_s6 + $0x38] sm:$0xff] %vm359_vm1, %v2999_v49  ;;  %v2998_v47 = vmax.f32 %v2966_v41, 0.0  ;;  %v2969_v54 = vadd.f32 %v5760_v32, %v2930_v38  ;;  %v2929_v27 = vadd.f32 %v2802_v1, %v2660_v46  ;;  %v2663_v26 = vadd.f32 %v4118_v56, %v2393_v0  ;;  %v2812_v12 = vpop.f32.mrf.mxu0  ;;  %v6209_v0 = vld [vmem:[#allocation39_spill] sm:$0xff]  ;;  %v6212_v56 = vld [vmem:[#allocation40_spill] sm:$0xff]  ;;  %v6219_v59 = vld [vmem:[#allocation22_spill] sm:$0xff] }
 0x1cd   : > { %v2543_v3 = vpop.f32.mrf.mxu1  ;;  %v2398_v1 = vadd.f32 %v6208_v58, %v2132_v48  ;;  %v2134_v21 = vadd.f32 %v6210_v55, %v6209_v0  ;;  %v6220_v48 = vld [vmem:[#allocation15_spill] sm:$0xff] }
 0x1ce   : > { %3030 = vst.msk [vmem:[%s5774_s6 + $0x30] sm:$0xff] %vm359_vm1, %v2998_v47  ;;  %v3001_v5 = vmax.f32 %v2969_v54, 0.0  ;;  %v2968_v60 = vadd.f32 %v5760_v32, %v2929_v27  ;;  %v2932_v4 = vadd.f32 %v4170_v15, %v2663_v26  ;;  %v2662_v24 = vadd.f32 %v2543_v3, %v2392_v7  ;;  %v4173_v23 = vpop.f32.mrf.mxu0  ;;  %v6211_v7 = vld [vmem:[#allocation3_spill] sm:$0xff]  ;;  %v6213_v47 = vld [vmem:[#allocation13_spill] sm:$0xff] }
 0x1cf   : > { %v4121_v51 = vpop.f32.mrf.mxu1  ;;  %v2401_v29 = vadd.f32 %v6211_v7, %v2135_v2  ;;  %v2137_v54 = vadd.f32 %v6213_v47, %v6212_v56 }
 0x1d0   : > { %3033 = vst.msk [vmem:[%s5774_s6 + $0x48] sm:$0xff] %vm359_vm1, %v3001_v5  ;;  %v3000_v36 = vmax.f32 %v2968_v60, 0.0  ;;  %v2971_v10 = vadd.f32 %v5760_v32, %v2932_v4  ;;  %v2931_v9 = vadd.f32 %v2812_v12, %v2662_v24  ;;  %v2665_v40 = vadd.f32 %v4121_v51, %v2395_v42  ;;  %v2822_v57 = vpop.f32.mrf.mxu0  ;;  %v6214_v5 = vld [vmem:[#allocation7_spill] sm:$0xff]  ;;  %v6215_v4 = vld [vmem:[#allocation41_spill] sm:$0xff] }
 0x1d1   : > { %v2553_v11 = vpop.f32.mrf.mxu1  ;;  %v2400_v60 = vadd.f32 %v6214_v5, %v2134_v21  ;;  %v6216_v24 = vld [vmem:[#allocation17_spill] sm:$0xff] }
 0x1d2   : > { %3032 = vst.msk [vmem:[%s5774_s6 + $0x40] sm:$0xff] %vm359_vm1, %v3000_v36  ;;  %v3003_v43 = vmax.f32 %v2971_v10, 0.0  ;;  %v2970_v22 = vadd.f32 %v5760_v32, %v2931_v9  ;;  %v2934_v30 = vadd.f32 %v4173_v23, %v2665_v40  ;;  %v2664_v62 = vadd.f32 %v2553_v11, %v2394_v6  ;;  %v4176_v44 = vpop.f32.mrf.mxu0  ;;  %v6217_v40 = vld [vmem:[#allocation11_spill] sm:$0xff] }
 0x1d3   : > { %v4124_v37 = vpop.f32.mrf.mxu1  ;;  %v2136_v23 = vadd.f32 %v6216_v24, %v6215_v4 }
 0x1d4   : > { %3035 = vst.msk [vmem:[%s5774_s6 + $0x58] sm:$0xff] %vm359_vm1, %v3003_v43  ;;  %v3002_v52 = vmax.f32 %v2970_v22, 0.0  ;;  %v2973_v31 = vadd.f32 %v5760_v32, %v2934_v30  ;;  %v2933_v53 = vadd.f32 %v2822_v57, %v2664_v62  ;;  %v2667_v33 = vadd.f32 %v4124_v37, %v2397_v17  ;;  %v2832_v18 = vpop.f32.mrf.mxu0  ;;  %v6218_v17 = vld [vmem:[#allocation42_spill] sm:$0xff] }
 0x1d5   : > { %v2563_v13 = vpop.f32.mrf.mxu1  ;;  %v2403_v57 = vadd.f32 %v6217_v40, %v2137_v54  ;;  %v2139_v11 = vadd.f32 %v6219_v59, %v6218_v17  ;;  %v2402_v37 = vadd.f32 %v6220_v48, %v2136_v23 }
 0x1d6   : > { %3034 = vst.msk [vmem:[%s5774_s6 + $0x50] sm:$0xff] %vm359_vm1, %v3002_v52  ;;  %v3005_v61 = vmax.f32 %v2973_v31, 0.0  ;;  %v2972_v16 = vadd.f32 %v5760_v32, %v2933_v53  ;;  %v2936_v35 = vadd.f32 %v4176_v44, %v2667_v33  ;;  %v2666_v45 = vadd.f32 %v2563_v13, %v2396_v28  ;;  %v4179_v34 = vpop.f32.mrf.mxu0  ;;  %v6221_v52 = vld [vmem:[#allocation43_spill] sm:$0xff]  ;;  %v6223_v13 = vld [vmem:[#allocation20_spill] sm:$0xff] }
 0x1d7   : > { %v4127_v49 = vpop.f32.mrf.mxu1  ;;  %v6222_v31 = vld [vmem:[#allocation27_spill] sm:$0xff] }
 0x1d8   : > { %3037 = vst.msk [vmem:[%s5774_s6 + $0x68] sm:$0xff] %vm359_vm1, %v3005_v61  ;;  %v3004_v63 = vmax.f32 %v2972_v16, 0.0  ;;  %v2975_v41 = vadd.f32 %v5760_v32, %v2936_v35  ;;  %v2935_v38 = vadd.f32 %v2832_v18, %v2666_v45  ;;  %v2669_v46 = vadd.f32 %v4127_v49, %v2399_v14  ;;  %v2842_v15 = vpop.f32.mrf.mxu0  ;;  %v6224_v16 = vld [vmem:[#allocation44_spill] sm:$0xff]  ;;  %v6225_v35 = vld [vmem:[#allocation6_spill] sm:$0xff]  ;;  %v6226_v49 = vld [vmem:[#allocation25_spill] sm:$0xff] }
 0x1d9   : > { %v2573_v27 = vpop.f32.mrf.mxu1  ;;  %v2138_v53 = vadd.f32 %v6222_v31, %v6221_v52  ;;  %v2405_v61 = vadd.f32 %v6223_v13, %v2139_v11  ;;  %v2141_v45 = vadd.f32 %v6225_v35, %v6224_v16 }
 0x1da   : > { %3036 = vst.msk [vmem:[%s5774_s6 + $0x60] sm:$0xff] %vm359_vm1, %v3004_v63  ;;  %v3007_v26 = vmax.f32 %v2975_v41, 0.0  ;;  %v2974_v12 = vadd.f32 %v5760_v32, %v2935_v38  ;;  %v2938_v42 = vadd.f32 %v4179_v34, %v2669_v46  ;;  %v2668_v25 = vadd.f32 %v2573_v27, %v2398_v1  ;;  %v4182_v3 = vpop.f32.mrf.mxu0  ;;  %v6227_v41 = vld [vmem:[#allocation16_spill] sm:$0xff]  ;;  %v6229_v27 = vld [vmem:[#allocation29_spill] sm:$0xff] }
 0x1db   : > { %v4130_v6 = vpop.f32.mrf.mxu1  ;;  %v2404_v63 = vadd.f32 %v6226_v49, %v2138_v53  ;;  %v6228_v38 = vld [vmem:[#allocation8_spill] sm:$0xff] }
 0x1dc   : > { %3039 = vst.msk [vmem:[%s5774_s6 + $0x78] sm:$0xff] %vm359_vm1, %v3007_v26  ;;  %v3006_v8 = vmax.f32 %v2974_v12, 0.0  ;;  %v2977_v51 = vadd.f32 %v5760_v32, %v2938_v42  ;;  %v2937_v36 = vadd.f32 %v2842_v15, %v2668_v25  ;;  %v2671_v10 = vadd.f32 %v4130_v6, %v2401_v29  ;;  %v2852_v9 = vpop.f32.mrf.mxu0  ;;  %v6230_v12 = vld [vmem:[#allocation21_spill] sm:$0xff]  ;;  %v6232_v6 = vld [vmem:[#allocation31_spill] sm:$0xff] }
 0x1dd   : > { %v2583_v43 = vpop.f32.mrf.mxu1  ;;  %v2140_v46 = vadd.f32 %v6228_v38, %v6227_v41  ;;  %v2407_v26 = vadd.f32 %v6229_v27, %v2141_v45  ;;  %v6231_v42 = vld [vmem:[#allocation33_spill] sm:$0xff] }
 0x1de   : > { %3038 = vst.msk [vmem:[%s5774_s6 + $0x70] sm:$0xff] %vm359_vm1, %v3006_v8  ;;  %v3009_v22 = vmax.f32 %v2977_v51, 0.0  ;;  %v2976_v30 = vadd.f32 %v5760_v32, %v2937_v36  ;;  %v2940_v62 = vadd.f32 %v4182_v3, %v2671_v10  ;;  %v2670_v44 = vadd.f32 %v2583_v43, %v2400_v60  ;;  %v4185_v28 = vpop.f32.mrf.mxu0  ;;  %v6233_v51 = vld [vmem:[#allocation24_spill] sm:$0xff]  ;;  %v6234_v36 = vld [vmem:[#allocation10_spill] sm:$0xff] }
 0x1df   : > { %v4133_v33 = vpop.f32.mrf.mxu1  ;;  %v2143_v25 = vadd.f32 %v6231_v42, %v6230_v12  ;;  %v2406_v8 = vadd.f32 %v6232_v6, %v2140_v46  ;;  %v2142_v10 = vadd.f32 %v6234_v36, %v6233_v51  ;;  %v6235_v43 = vld [vmem:[#allocation18_spill] sm:$0xff]  ;;  %v6245_v12 = vld [vmem:[#allocation19_spill] sm:$0xff] }
 0x1e0   : > { %3041 = vst.msk [vmem:[%s5774_s6 + $0x88] sm:$0xff] %vm359_vm1, %v3009_v22  ;;  %v3008_v18 = vmax.f32 %v2976_v30, 0.0  ;;  %v2979_v14 = vadd.f32 %v5760_v32, %v2940_v62  ;;  %v2939_v19 = vadd.f32 %v2852_v9, %v2670_v44  ;;  %v2673_v39 = vadd.f32 %v4133_v33, %v2403_v57  ;;  %v2862_v2 = vpop.f32.mrf.mxu0  ;;  %v6236_v30 = vld [vmem:[#allocation26_spill] sm:$0xff]  ;;  %v6237_v62 = vld [vmem:[#allocation12_spill] sm:$0xff] }
 0x1e1   : > { %v2593_v34 = vpop.f32.mrf.mxu1  ;;  %v2409_v22 = vadd.f32 %v6235_v43, %v2143_v25  ;;  %v2145_v44 = vadd.f32 %v6237_v62, %v6236_v30  ;;  %v6238_v33 = vld [vmem:[#allocation14_spill] sm:$0xff] }
 0x1e2   : > { %3040 = vst.msk [vmem:[%s5774_s6 + $0x80] sm:$0xff] %vm359_vm1, %v3008_v18  ;;  %v3011_v58 = vmax.f32 %v2979_v14, 0.0  ;;  %v2978_v1 = vadd.f32 %v5760_v32, %v2939_v19  ;;  %v2942_v0 = vadd.f32 %v4185_v28, %v2673_v39  ;;  %v2672_v55 = vadd.f32 %v2593_v34, %v2402_v37  ;;  %v4188_v21 = vpop.f32.mrf.mxu0  ;;  %v6239_v14 = vld [vmem:[#allocation28_spill] sm:$0xff]  ;;  %v6241_v34 = vld [vmem:[#allocation23_spill] sm:$0xff]  ;;  %v6243_v46 = vld [vmem:[#allocation34_spill] sm:$0xff] }
 0x1e3   : > { %v4136_v15 = vpop.f32.mrf.mxu1  ;;  %v2408_v18 = vadd.f32 %v6238_v33, %v2142_v10  ;;  %v6240_v19 = vld [vmem:[#allocation4_spill] sm:$0xff] }
 0x1e4   : > { %3043 = vst.msk [vmem:[%s5774_s6 + $0x98] sm:$0xff] %vm359_vm1, %v3011_v58  ;;  %v3010_v7 = vmax.f32 %v2978_v1, 0.0  ;;  %v2981_v29 = vadd.f32 %v5760_v32, %v2942_v0  ;;  %v2941_v56 = vadd.f32 %v2862_v2, %v2672_v55  ;;  %v2675_v47 = vadd.f32 %v4136_v15, %v2405_v61  ;;  %v2872_v54 = vpop.f32.mrf.mxu0  ;;  %v6242_v1 = vld [vmem:[#allocation30_spill] sm:$0xff] }
 0x1e5   : > { %v2603_v3 = vpop.f32.mrf.mxu1  ;;  %v2144_v39 = vadd.f32 %v6240_v19, %v6239_v14  ;;  %v2411_v58 = vadd.f32 %v6241_v34, %v2145_v44  ;;  %v2147_v0 = vadd.f32 %v5743_v20, %v6242_v1 }
 0x1e6   : > { %3042 = vst.msk [vmem:[%s5774_s6 + $0x90] sm:$0xff] %vm359_vm1, %v3010_v7  ;;  %v3013_v5 = vmax.f32 %v2981_v29, 0.0  ;;  %v2980_v60 = vadd.f32 %v5760_v32, %v2941_v56  ;;  %v2944_v4 = vadd.f32 %v4188_v21, %v2675_v47  ;;  %v2674_v24 = vadd.f32 %v2603_v3, %v2404_v63  ;;  %v4191_v23 = vpop.f32.mrf.mxu0  ;;  %v6244_v7 = vld [vmem:[#allocation32_spill] sm:$0xff] }
 0x1e7   : > { %v4139_v9 = vpop.f32.mrf.mxu1  ;;  %v2410_v15 = vadd.f32 %v6243_v46, %v2144_v39  ;;  %v2146_v29 = vadd.f32 %v5748_v50, %v6244_v7  ;;  %v2413_v42 = vadd.f32 %v6245_v12, %v2147_v0 }
 0x1e8   : > { %3045 = vst.msk [vmem:[%s5774_s6 + $0xa8] sm:$0xff] %vm359_vm1, %v3013_v5  ;;  %v3012_v40 = vmax.f32 %v2980_v60, 0.0  ;;  %v2983_v57 = vadd.f32 %v5760_v32, %v2944_v4  ;;  %v2943_v17 = vadd.f32 %v2872_v54, %v2674_v24  ;;  %v2677_v59 = vadd.f32 %v4139_v9, %v2407_v26  ;;  %v2882_v11 = vpop.f32.mrf.mxu0  ;;  %v6246_v4 = vld [vmem:[#allocation35_spill] sm:$0xff] }
 0x1e9   : > { %v2613_v28 = vpop.f32.mrf.mxu1  ;;  %v2412_v24 = vadd.f32 %v6246_v4, %v2146_v29 }
 0x1ea   : > { %3044 = vst.msk [vmem:[%s5774_s6 + $0xa0] sm:$0xff] %vm359_vm1, %v3012_v40  ;;  %v3015_v48 = vmax.f32 %v2983_v57, 0.0  ;;  %v2982_v37 = vadd.f32 %v5760_v32, %v2943_v17  ;;  %v2946_v52 = vadd.f32 %v4191_v23, %v2677_v59  ;;  %v2676_v31 = vadd.f32 %v2613_v28, %v2406_v8  ;;  %v4194_v53 = vpop.f32.mrf.mxu0 }
 0x1eb   : > { %v4142_v2 = vpop.f32.mrf.mxu1 }
 0x1ec   : > { %3047 = vst.msk [vmem:[%s5774_s6 + $0xb8] sm:$0xff] %vm359_vm1, %v3015_v48  ;;  %v3014_v13 = vmax.f32 %v2982_v37, 0.0  ;;  %v2985_v61 = vadd.f32 %v5760_v32, %v2946_v52  ;;  %v2945_v16 = vadd.f32 %v2882_v11, %v2676_v31  ;;  %v2679_v35 = vadd.f32 %v4142_v2, %v2409_v22  ;;  %v2892_v45 = vpop.f32.mrf.mxu0 }
 0x1ed   : > { %v2623_v55 = vpop.f32.mrf.mxu1 }
 0x1ee   : > { %3046 = vst.msk [vmem:[%s5774_s6 + $0xb0] sm:$0xff] %vm359_vm1, %v3014_v13  ;;  %v3017_v21 = vmax.f32 %v2985_v61, 0.0  ;;  %v2984_v49 = vadd.f32 %v5760_v32, %v2945_v16  ;;  %v2948_v63 = vadd.f32 %v4194_v53, %v2679_v35  ;;  %v2678_v41 = vadd.f32 %v2623_v55, %v2408_v18  ;;  %v4197_v38 = vpop.f32.mrf.mxu0 }
 0x1ef   : > { %v4145_v56 = vpop.f32.mrf.mxu1 }
 0x1f0   : > { %3049 = vst.msk [vmem:[%s5774_s6 + $0xc8] sm:$0xff] %vm359_vm1, %v3017_v21  ;;  %v3016_v20 = vmax.f32 %v2984_v49, 0.0  ;;  %v2987_v47 = vadd.f32 %v5760_v32, %v2948_v63  ;;  %v2947_v54 = vadd.f32 %v2892_v45, %v2678_v41  ;;  %v2681_v27 = vadd.f32 %v4145_v56, %v2411_v58  ;;  %v2902_v26 = vpop.f32.mrf.mxu0 }
 0x1f1   : > { %v2633_v25 = vpop.f32.mrf.mxu1 }
 0x1f2   : > { %3048 = vst.msk [vmem:[%s5774_s6 + $0xc0] sm:$0xff] %vm359_vm1, %v3016_v20  ;;  %v3019_v3 = vmax.f32 %v2987_v47, 0.0  ;;  %v2986_v5 = vadd.f32 %v5760_v32, %v2947_v54  ;;  %v2950_v50 = vadd.f32 %v4197_v38, %v2681_v27  ;;  %v2680_v60 = vadd.f32 %v2633_v25, %v2410_v15  ;;  %v4200_v6 = vpop.f32.mrf.mxu0 }
 0x1f3   : > { %v4148_v23 = vpop.f32.mrf.mxu1 }
 0x1f4   : > { %3051 = vst.msk [vmem:[%s5774_s6 + $0xd8] sm:$0xff] %vm359_vm1, %v3019_v3  ;;  %v3018_v8 = vmax.f32 %v2986_v5, 0.0  ;;  %v2989_v51 = vadd.f32 %v5760_v32, %v2950_v50  ;;  %v2949_v36 = vadd.f32 %v2902_v26, %v2680_v60  ;;  %v2683_v10 = vadd.f32 %v4148_v23, %v2413_v42  ;;  %v2912_v11 = vpop.f32.mrf.mxu0 }
 0x1f5   : > { %v2643_v9 = vpop.f32.mrf.mxu1 }
 0x1f6   : > { %3050 = vst.msk [vmem:[%s5774_s6 + $0xd0] sm:$0xff] %vm359_vm1, %v3018_v8  ;;  %v3021_v40 = vmax.f32 %v2989_v51, 0.0  ;;  %v2988_v57 = vadd.f32 %v5760_v32, %v2949_v36  ;;  %v2952_v17 = vadd.f32 %v4200_v6, %v2683_v10  ;;  %v2682_v59 = vadd.f32 %v2643_v9, %v2412_v24 }
 0x1f8   : > { %3053 = vst.msk [vmem:[%s5774_s6 + $0xe8] sm:$0xff] %vm359_vm1, %v3021_v40  ;;  %v3020_v43 = vmax.f32 %v2988_v57, 0.0  ;;  %v2991_v22 = vadd.f32 %v5760_v32, %v2952_v17  ;;  %v2951_v30 = vadd.f32 %v2912_v11, %v2682_v59 }
 0x1fa   : > { %3052 = vst.msk [vmem:[%s5774_s6 + $0xe0] sm:$0xff] %vm359_vm1, %v3020_v43  ;;  %v3023_v62 = vmax.f32 %v2991_v22, 0.0  ;;  %v2990_v44 = vadd.f32 %v5760_v32, %v2951_v30 }
 0x1fc   : > { %3055 = vst.msk [vmem:[%s5774_s6 + $0xf8] sm:$0xff] %vm359_vm1, %v3023_v62  ;;  %v3022_v28 = vmax.f32 %v2990_v44, 0.0 }
 0x1fe   : > { %3054 = vst.msk [vmem:[%s5774_s6 + $0xf0] sm:$0xff] %vm359_vm1, %v3022_v28 }
 0x1ff PF: > { %s13_s12 = sadd.s32 1, %s4220_s12  }
 0x200   : > { %p10_p4 = scmp.ge.s32.totalorder %s13_s12, 4  }
 0x202   :  { %12 = sbr.rel (!%p10_p4) target bundleno = 1 (0x1), region = 70 }

// kernel: _lambda_.9
= control target key start
LH: loop header
LB: loop body
LE: loop exit
PB: predicated region body
PF: predicated region fallthrough
CT: control target
= control target key end

     0   :  { %s4373_s15 = smov 0   ;;  %s6126_s0 = inlined_call_operand.vmem [shape: f32[2,18,18,16], index: 0, kind: input, shape index: {}]   ;;  %s6127_s1 = inlined_call_operand.vmem [shape: f32[9,16,16], index: 1, kind: input, shape index: {}]   ;;  %s6128_s2 = inlined_call_operand.vmem [shape: f32[1,16], index: 2, kind: input, shape index: {}]   ;;  %s6129_s3 = inlined_call_operand.vmem [shape: f32[2,16,16,16], index: 3, kind: input, shape index: {}]   ;;  %s6130_s4 = inlined_call_operand.vmem [shape: f32[2,16,16,16], index: 4, kind: output, shape index: {}]  }
   0x1 LB: > { %s3234_s16 = sadd.s32 4294967295, %s4346_s15   ;;  %p3238_p0 = scmp.ge.s32.totalorder %s4346_s15, 1  ;;  %s4346_s15 = sphi %s4373_s15, %s14_s15  }
   0x2   : > { %p172_p1 = scmp.lt.s32.totalorder %s4346_s15, 3 }
   0x4   : > { %p173_p2 = pnand %p3238_p0, %p172_p1 }
   0x6   : > { %176 = sbr.rel (%p173_p2) target bundleno = 513 (0x201), region = 36 }
   0xb   : > { %v3245_v0 = vld [vmem:[%s6127_s1 + $0x18] sm:$0xff]  ;;  %v3244_v1 = vld [vmem:[%s6127_s1 + $0x10] sm:$0xff]  ;;  %p203_p3 = scmp.lt.s32.totalorder %s3234_s16, 1  ;;  %v273_v2 = vld [vmem:[%s6127_s1 + $0x8] sm:$0xff]  ;;  %vm322_vm0 = vcmask 1046528   ;;  %vm406_vm1 = vcmask 130048  }
   0xc   : > { %4327 = vmatprep.subr.mxu1 %v3245_v0  ;;  %3859 = vmatprep.subr.mxu0 %v3245_v0  ;;  %v3311_v3 = vld [vmem:[%s6127_s1 + $0x28] sm:$0xff]  ;;  %v272_v22 = vld [vmem:[%s6127_s1] sm:$0xff]  ;;  %v4514_v50 = vld [vmem:[%s6127_s1 + $0x38] sm:$0xff]  ;;  %vm985_vm2 = vcmask 1045504  }
   0xd   : > { %4329 = vmatpush3.msra.mxu1 %v3245_v0  ;;  %3860 = vmatpush3.msra.mxu0 %v3245_v0  ;;  %s6426_s16 = smov (!%p203_p3, %s3234_s16), 1  ;;  %v3310_v42 = vld [vmem:[%s6127_s1 + $0x20] sm:$0xff]  ;;  %v4536_v58 = vld [vmem:[%s6127_s1 + $0x48] sm:$0xff] }
   0xe   : > { %4328 = vmatprep.subr.mxu1 %v3244_v1  ;;  %3861 = vmatprep.subr.mxu0 %v3244_v1  ;;  %s4331_s25 = smul.u32 432, %s6426_s16 }
   0xf   : > { %4330 = vmatpush3.msra.mxu1 %v3244_v1  ;;  %3862 = vmatpush3.msra.mxu0 %v3244_v1 }
  0x10   : > { %3911 = vmatprep.subr.mxu1 %v273_v2  ;;  %3963 = vmatprep.subr.mxu0 %v3311_v3  ;;  %s4399_s28 = scalar_lea.vmem %s6126_s0, %s4331_s25 }
  0x11   : > { %v4402_v4 = vld [vmem:[%s4399_s28] sm:$0xff]  ;;  %v4405_v5 = vld [vmem:[%s4399_s28 + $0x8] sm:$0xff]  ;;  %v4417_v11 = vld [vmem:[%s4399_s28 + $0x10] sm:$0x3] }
  0x12   : > { %v4408_v6 = vld [vmem:[%s4399_s28 + $0xc0] sm:$0xff]  ;;  %v323_v7 = vrot.slane %v4402_v4, 1  ;;  %v324_v8 = vrot.slane %v4405_v5, 1  ;;  %v4413_v9 = vld [vmem:[%s4399_s28 + $0xc8] sm:$0xff]  ;;  %v326_v13 = vrot.slane %v4417_v11, 1  ;;  %v4425_v15 = vld [vmem:[%s4399_s28 + $0x18] sm:$0xff] }
  0x13   : > { %v363_v10 = vrot.slane %v4408_v6, 1  ;;  %v364_v12 = vrot.slane %v4413_v9, 1  ;;  %v4422_v14 = vld [vmem:[%s4399_s28 + $0xd0] sm:$0x3]  ;;  %v4430_v18 = vld [vmem:[%s4399_s28 + $0x20] sm:$0xff]  ;;  %v328_v19 = vrot.slane %v4425_v15, 1 }
  0x14   : > { %v325_v16 = vsel %vm322_vm0, %v323_v7, %v324_v8  ;;  %v366_v17 = vrot.slane %v4422_v14, 1  ;;  %v4434_v20 = vld [vmem:[%s4399_s28 + $0xd8] sm:$0xff]  ;;  %v4437_v21 = vld [vmem:[%s4399_s28 + $0xe0] sm:$0xff]  ;;  %v327_v24 = vsel %vm322_vm0, %v324_v8, %v326_v13  ;;  %v329_v25 = vrot.slane %v4430_v18, 1  ;;  %v4450_v27 = vld [vmem:[%s4399_s28 + $0x28] sm:$0x3] }
  0x15   : > { %3863 = vmatprep.mubr.msk.f32.mxu0 %vm406_vm1, %v325_v16  ;;  %v4444_v23 = vsel %vm322_vm0, %v363_v10, %v364_v12  ;;  %v368_v26 = vrot.slane %v4434_v20, 1  ;;  %v4453_v28 = vld [vmem:[%s4399_s28 + $0xe8] sm:$0x3]  ;;  %v369_v30 = vrot.slane %v4437_v21, 1  ;;  %v331_v31 = vrot.slane %v4450_v27, 1  ;;  %v4465_v33 = vld [vmem:[%s4399_s28 + $0x30] sm:$0xff] }
  0x16   : > { %6213 = vst [vmem:[#allocation2_spill] sm:$0xff] %v4444_v23  ;;  %3887 = vmatprep.mubr.msk.f32.mxu1 %vm406_vm1, %v4444_v23  ;;  %3864 = vmatmul.mubr.msk.f32.vlgmr.msra.gmra.mxu0 %vm406_vm1, %v327_v24  ;;  %v4459_v29 = vsel %vm322_vm0, %v364_v12, %v366_v17  ;;  %v371_v32 = vrot.slane %v4453_v28, 1  ;;  %v4468_v34 = vld [vmem:[%s4399_s28 + $0x38] sm:$0xff]  ;;  %v4471_v35 = vld [vmem:[%s4399_s28 + $0xf0] sm:$0xff]  ;;  %v4476_v36 = vsel %vm322_vm0, %v328_v19, %v329_v25  ;;  %v333_v37 = vrot.slane %v4465_v33, 1  ;;  %v4506_v48 = vld [vmem:[%s4399_s28 + $0x48] sm:$0xff] }
  0x17   : > { %6214 = vst [vmem:[#allocation3_spill] sm:$0xff] %v4459_v29  ;;  %3888 = vmatmul.mubr.msk.f32.vlgmr.msra.gmra.mxu1 %vm406_vm1, %v4459_v29  ;;  %3964 = vmatpush3.msra.mxu0 %v3311_v3  ;;  %6215 = vst [vmem:[#allocation4_spill] sm:$0xff] %v4476_v36  ;;  %v334_v38 = vrot.slane %v4468_v34, 1  ;;  %v4481_v39 = vld [vmem:[%s4399_s28 + $0xf8] sm:$0xff]  ;;  %v373_v40 = vrot.slane %v4471_v35, 1  ;;  %v4493_v43 = vsel %vm322_vm0, %v368_v26, %v369_v30  ;;  %v4509_v49 = vld [vmem:[%s4399_s28 + $0x50] sm:$0xff] }
  0x18   : > { %v4485_v41 = vld [vmem:[%s4399_s28 + $0x40] sm:$0x3]  ;;  %3912 = vmatpush3.msra.mxu1 %v273_v2  ;;  %3866 = vmatprep.mubr.msk.f32.mxu0 %vm406_vm1, %v4476_v36  ;;  %6216 = vst [vmem:[#allocation5_spill] sm:$0xff] %v4493_v43  ;;  %v4496_v44 = vsel %vm322_vm0, %v329_v25, %v331_v31  ;;  %v4499_v45 = vsel %vm322_vm0, %v369_v30, %v371_v32  ;;  %v374_v46 = vrot.slane %v4481_v39, 1  ;;  %v338_v54 = vrot.slane %v4506_v48, 1  ;;  %v4525_v55 = vld [vmem:[%s4399_s28 + $0x108] sm:$0xff] }
  0x19   : > { %6217 = vst [vmem:[#allocation6_spill] sm:$0xff] %v4496_v44  ;;  %6218 = vst [vmem:[#allocation7_spill] sm:$0xff] %v4499_v45  ;;  %v4503_v47 = vld [vmem:[%s4399_s28 + $0x100] sm:$0x3]  ;;  %3890 = vmatprep.mubr.msk.f32.mxu1 %vm406_vm1, %v4493_v43  ;;  %v4519_v51 = vsel %vm322_vm0, %v333_v37, %v334_v38  ;;  %v336_v52 = vrot.slane %v4485_v41, 1  ;;  %v4528_v56 = vld [vmem:[%s4399_s28 + $0x110] sm:$0xff]  ;;  %3913 = vmatprep.subr.mxu1 %v272_v22 }
  0x1a   : > { %6219 = vst [vmem:[#allocation8_spill] sm:$0xff] %v4519_v51  ;;  %v376_v53 = vrot.slane %v4503_v47, 1  ;;  %v4531_v57 = vld [vmem:[%s4399_s28 + $0x60] sm:$0xff]  ;;  %3867 = vmatmul.mubr.msk.f32.gmra.mxu0 %vm406_vm1, %v4496_v44  ;;  %v4541_v59 = vsel %vm322_vm0, %v373_v40, %v374_v46  ;;  %v339_v60 = vrot.slane %v4509_v49, 1  ;;  %v378_v61 = vrot.slane %v4525_v55, 1  ;;  %v4550_v0 = vld [vmem:[%s4399_s28 + $0x68] sm:$0xff]  ;;  %3914 = vmatpush3.msra.mxu1 %v272_v22 }
  0x1b   : > { %6220 = vst [vmem:[#allocation9_spill] sm:$0xff] %v4541_v59  ;;  %v379_v62 = vrot.slane %v4528_v56, 1  ;;  %v4547_v63 = vld [vmem:[%s4399_s28 + $0x58] sm:$0x3]  ;;  %3891 = vmatmul.mubr.msk.f32.gmra.mxu1 %vm406_vm1, %v4499_v45  ;;  %3869 = vmatprep.mubr.msk.f32.mxu0 %vm406_vm1, %v4519_v51  ;;  %v4557_v1 = vsel %vm322_vm0, %v334_v38, %v336_v52  ;;  %v343_v7 = vrot.slane %v4531_v57, 1  ;;  %v4565_v8 = vld [vmem:[%s4399_s28 + $0x120] sm:$0xff] }
  0x1c   : > { %6221 = vst [vmem:[#allocation10_spill] sm:$0xff] %v4557_v1  ;;  %v341_v2 = vrot.slane %v4547_v63, 1  ;;  %v4561_v3 = vld [vmem:[%s4399_s28 + $0x118] sm:$0x3]  ;;  %v4568_v10 = vld [vmem:[%s4399_s28 + $0x128] sm:$0xff]  ;;  %3893 = vmatprep.mubr.msk.f32.mxu1 %vm406_vm1, %v4541_v59  ;;  %v4573_v12 = vsel %vm322_vm0, %v374_v46, %v376_v53  ;;  %v4576_v13 = vsel %vm322_vm0, %v338_v54, %v339_v60  ;;  %v344_v17 = vrot.slane %v4550_v0, 1  ;;  %3965 = vmatprep.subr.mxu0 %v3310_v42 }
  0x1d   : > { %6222 = vst [vmem:[#allocation11_spill] sm:$0xff] %v4573_v12  ;;  %6223 = vst [vmem:[#allocation12_spill] sm:$0xff] %v4576_v13  ;;  %v381_v16 = vrot.slane %v4561_v3, 1  ;;  %v4581_v19 = vld [vmem:[%s4399_s28 + $0x70] sm:$0x3]  ;;  %v4587_v24 = vsel %vm322_vm0, %v378_v61, %v379_v62  ;;  %v383_v25 = vrot.slane %v4565_v8, 1  ;;  %3966 = vmatpush3.msra.mxu0 %v3310_v42  ;;  %4015 = vmatprep.subr.mxu1 %v4514_v50 }
  0x1e   : > { %v4584_v22 = vld [vmem:[%s4399_s28 + $0x130] sm:$0x3]  ;;  %6224 = vst [vmem:[#allocation13_spill] sm:$0xff] %v4587_v24  ;;  %v384_v26 = vrot.slane %v4568_v10, 1  ;;  %v4592_v30 = vld [vmem:[%s4399_s28 + $0x78] sm:$0xff]  ;;  %v4595_v31 = vld [vmem:[%s4399_s28 + $0x80] sm:$0xff]  ;;  %3870 = vmatmul.mubr.msk.f32.gmra.mxu0 %vm406_vm1, %v4557_v1  ;;  %4067 = vmatprep.subr.mxu0 %v4536_v58  ;;  %v4612_v38 = vsel %vm322_vm0, %v339_v60, %v341_v2  ;;  %v4622_v52 = vsel %vm322_vm0, %v343_v7, %v344_v17 }
  0x1f   : > { %v4601_v32 = vld [vmem:[%s4399_s28 + $0x138] sm:$0xff]  ;;  %v4604_v37 = vld [vmem:[%s4399_s28 + $0x140] sm:$0xff]  ;;  %3894 = vmatmul.mubr.msk.f32.gmra.mxu1 %vm406_vm1, %v4573_v12  ;;  %3872 = vmatprep.mubr.msk.f32.mxu0 %vm406_vm1, %v4576_v13  ;;  %6225 = vst [vmem:[#allocation14_spill] sm:$0xff] %v4612_v38  ;;  %v346_v40 = vrot.slane %v4581_v19, 1  ;;  %v386_v42 = vrot.slane %v4584_v22, 1  ;;  %v4619_v46 = vsel %vm322_vm0, %v379_v62, %v381_v16  ;;  %6227 = vst [vmem:[#allocation16_spill] sm:$0xff] %v4622_v52 }
  0x20   : > { %3896 = vmatprep.mubr.msk.f32.mxu1 %vm406_vm1, %v4587_v24  ;;  %6226 = vst [vmem:[#allocation15_spill] sm:$0xff] %v4619_v46  ;;  %v348_v53 = vrot.slane %v4592_v30, 1  ;;  %v349_v54 = vrot.slane %v4595_v31, 1  ;;  %v4627_v60 = vld [vmem:[%s4399_s28 + $0x88] sm:$0x3]  ;;  %v4633_v2 = vsel %vm322_vm0, %v383_v25, %v384_v26  ;;  %v388_v12 = vrot.slane %v4601_v32, 1 }
  0x21   : > { %v4630_v61 = vld [vmem:[%s4399_s28 + $0x148] sm:$0x3]  ;;  %6228 = vst [vmem:[#allocation17_spill] sm:$0xff] %v4633_v2  ;;  %v389_v24 = vrot.slane %v4604_v37, 1  ;;  %v4638_v62 = vld [vmem:[%s4399_s28 + $0x90] sm:$0xff]  ;;  %v4641_v7 = vld [vmem:[%s4399_s28 + $0x98] sm:$0xff]  ;;  %v4656_v25 = vsel %vm322_vm0, %v344_v17, %v346_v40  ;;  %v4663_v29 = vsel %vm322_vm0, %v384_v26, %v386_v42 }
  0x22   : > { %3873 = vmatmul.mubr.msk.f32.gmra.mxu0 %vm406_vm1, %v4612_v38  ;;  %v4646_v16 = vld [vmem:[%s4399_s28 + $0x150] sm:$0xff]  ;;  %v4649_v59 = vld [vmem:[%s4399_s28 + $0x158] sm:$0xff]  ;;  %6230 = vst [vmem:[#allocation19_spill] sm:$0xff] %v4656_v25  ;;  %v351_v45 = vrot.slane %v4627_v60, 1  ;;  %v391_v43 = vrot.slane %v4630_v61, 1  ;;  %6231 = vst [vmem:[#allocation20_spill] sm:$0xff] %v4663_v29 }
  0x23   : > { %6229 = vst [vmem:[#allocation18_spill] sm:$0xff] %v4649_v59  ;;  %3897 = vmatmul.mubr.msk.f32.gmra.mxu1 %vm406_vm1, %v4619_v46  ;;  %3875 = vmatprep.mubr.msk.f32.mxu0 %vm406_vm1, %v4622_v52  ;;  %v4666_v46 = vsel %vm322_vm0, %v348_v53, %v349_v54  ;;  %v353_v23 = vrot.slane %v4638_v62, 1  ;;  %v354_v17 = vrot.slane %v4641_v7, 1  ;;  %v4671_v40 = vld [vmem:[%s4399_s28 + $0xa0] sm:$0x3]  ;;  %v4674_v52 = vsel %vm322_vm0, %v388_v12, %v389_v24  ;;  %v4682_v26 = vld [vmem:[%s4399_s28 + $0xa8] sm:$0xff] }
  0x24   : > { %3899 = vmatprep.mubr.msk.f32.mxu1 %vm406_vm1, %v4633_v2  ;;  %6232 = vst [vmem:[#allocation21_spill] sm:$0xff] %v4666_v46  ;;  %6233 = vst [vmem:[#allocation22_spill] sm:$0xff] %v4674_v52  ;;  %v393_v38 = vrot.slane %v4646_v16, 1  ;;  %v394_v13 = vrot.slane %v4649_v59, 1  ;;  %v4679_v2 = vld [vmem:[%s4399_s28 + $0x160] sm:$0x3]  ;;  %v4700_v12 = vsel %vm322_vm0, %v349_v54, %v351_v45  ;;  %v4703_v51 = vsel %vm322_vm0, %v389_v24, %v391_v43 }
  0x25   : > { %v4685_v42 = vld [vmem:[%s4399_s28 + $0xb0] sm:$0xff]  ;;  %v4690_v53 = vld [vmem:[%s4399_s28 + $0x168] sm:$0xff]  ;;  %6235 = vst [vmem:[#allocation24_spill] sm:$0xff] %v4700_v12  ;;  %6236 = vst [vmem:[#allocation25_spill] sm:$0xff] %v4703_v51  ;;  %v356_v44 = vrot.slane %v4671_v40, 1  ;;  %v396_v36 = vrot.slane %v4679_v2, 1 }
  0x26   : > { %3876 = vmatmul.mubr.msk.f32.gmra.mxu0 %vm406_vm1, %v4656_v25  ;;  %v4693_v1 = vld [vmem:[%s4399_s28 + $0x170] sm:$0xff]  ;;  %v4709_v25 = vsel %vm322_vm0, %v353_v23, %v354_v17  ;;  %v4715_v59 = vld [vmem:[%s4399_s28 + $0xb8] sm:$0x3]  ;;  %v4718_v45 = vsel %vm322_vm0, %v393_v38, %v394_v13  ;;  %v398_v43 = vrot.slane %v4690_v53, 1 }
  0x27   : > { %6234 = vst [vmem:[#allocation23_spill] sm:$0xff] %v4693_v1  ;;  %3900 = vmatmul.mubr.msk.f32.gmra.mxu1 %vm406_vm1, %v4663_v29  ;;  %3878 = vmatprep.mubr.msk.f32.mxu0 %vm406_vm1, %v4666_v46  ;;  %6237 = vst [vmem:[#allocation26_spill] sm:$0xff] %v4709_v25  ;;  %v358_v29 = vrot.slane %v4682_v26, 1  ;;  %v359_v46 = vrot.slane %v4685_v42, 1  ;;  %v399_v24 = vrot.slane %v4693_v1, 1  ;;  %v4732_v23 = vsel %vm322_vm0, %v354_v17, %v356_v44 }
  0x28   : > { %3902 = vmatprep.mubr.msk.f32.mxu1 %vm406_vm1, %v4674_v52  ;;  %6238 = vst [vmem:[#allocation27_spill] sm:$0xff] %v4718_v45  ;;  %v4723_v54 = vld [vmem:[%s4399_s28 + $0x178] sm:$0x3]  ;;  %6239 = vst [vmem:[#allocation28_spill] sm:$0xff] %v4732_v23  ;;  %v361_v38 = vrot.slane %v4715_v59, 1  ;;  %v986_v52 = vrot.slane %v4402_v4, 2  ;;  %v4739_v1 = vsel %vm322_vm0, %v394_v13, %v396_v36 }
  0x29   : > { %6240 = vst [vmem:[#allocation29_spill] sm:$0xff] %v4739_v1  ;;  %v4747_v44 = vsel %vm322_vm0, %v398_v43, %v399_v24  ;;  %v989_v17 = vrot.slane %v4417_v11, 2  ;;  %v991_v11 = vrot.slane %v4425_v15, 2  ;;  %v992_v43 = vrot.slane %v4430_v18, 2 }
  0x2a   : > { %3879 = vmatmul.mubr.msk.f32.gmra.mxu0 %vm406_vm1, %v4700_v12  ;;  %v4742_v12 = vsel %vm322_vm0, %v358_v29, %v359_v46  ;;  %6242 = vst [vmem:[#allocation31_spill] sm:$0xff] %v4747_v44  ;;  %v4757_v29 = vsel %vm322_vm0, %v359_v46, %v361_v38  ;;  %v994_v38 = vrot.slane %v4450_v27, 2  ;;  %v999_v27 = vrot.slane %v4485_v41, 2  ;;  %v4810_v41 = vld [vmem:[%s6127_s1 + $0x58] sm:$0xff] }
  0x2b   : > { %3903 = vmatmul.mubr.msk.f32.gmra.mxu1 %vm406_vm1, %v4703_v51  ;;  %3881 = vmatprep.mubr.msk.f32.mxu0 %vm406_vm1, %v4709_v25  ;;  %6241 = vst [vmem:[#allocation30_spill] sm:$0xff] %v4742_v12  ;;  %v401_v51 = vrot.slane %v4723_v54, 1  ;;  %v987_v25 = vrot.slane %v4405_v5, 2  ;;  %6243 = vst [vmem:[#allocation32_spill] sm:$0xff] %v4757_v29 }
  0x2c   : > { %3905 = vmatprep.mubr.msk.f32.mxu1 %vm406_vm1, %v4718_v45 }
  0x2d   : > { %v4762_v36 = vsel %vm322_vm0, %v399_v24, %v401_v51  ;;  %v988_v13 = vsel %vm985_vm2, %v986_v52, %v987_v25  ;;  %v990_v46 = vsel %vm985_vm2, %v987_v25, %v989_v17  ;;  %v996_v51 = vrot.slane %v4465_v33, 2 }
  0x2e   : > { %3882 = vmatmul.mubr.msk.f32.gmra.mxu0 %vm406_vm1, %v4732_v23  ;;  %6244 = vst [vmem:[#allocation33_spill] sm:$0xff] %v4762_v36  ;;  %v997_v52 = vrot.slane %v4468_v34, 2  ;;  %v4780_v24 = vsel %vm985_vm2, %v991_v11, %v992_v43  ;;  %v1001_v17 = vrot.slane %v4506_v48, 2  ;;  %v1002_v11 = vrot.slane %v4509_v49, 2 }
  0x2f   : > { %3906 = vmatmul.mubr.msk.f32.gmra.mxu1 %vm406_vm1, %v4739_v1  ;;  %3884 = vmatprep.mubr.msk.f32.mxu0 %vm406_vm1, %v4742_v12 }
  0x30   : > { %3908 = vmatprep.mubr.msk.f32.mxu1 %vm406_vm1, %v4747_v44  ;;  %v4796_v25 = vsel %vm985_vm2, %v996_v51, %v997_v52  ;;  %v1007_v51 = vrot.slane %v4550_v0, 2 }
  0x32   : > { %3885 = vmatmul.mubr.msk.f32.gmra.mxu0 %vm406_vm1, %v4757_v29 }
  0x33   : > { %3909 = vmatmul.mubr.msk.f32.gmra.mxu1 %vm406_vm1, %v4762_v36  ;;  %3967 = vmatprep.mubr.msk.f32.mxu0 %vm406_vm1, %v988_v13  ;;  %v3344_v13 = vld [vmem:[%s6127_s1 + $0x30] sm:$0xff] }
  0x34   : > { %3915 = vmatprep.mubr.msk.f32.mxu1 %vm406_vm1, %v4402_v4  ;;  %v4789_v4 = vsel %vm985_vm2, %v992_v43, %v994_v38  ;;  %v4823_v43 = vld [vmem:[%s6127_s1 + $0x68] sm:$0xff]  ;;  %v1006_v38 = vrot.slane %v4531_v57, 2 }
  0x36   : > { %3968 = vmatmul.mubr.msk.f32.vlgmr.msra.gmra.mxu0 %vm406_vm1, %v990_v46  ;;  %v4828_v46 = vsel %vm985_vm2, %v1001_v17, %v1002_v11  ;;  %v1012_v17 = vrot.slane %v4595_v31, 2 }
  0x37   : > { %3916 = vmatmul.mubr.msk.f32.vlgmr.msra.gmra.mxu1 %vm406_vm1, %v4405_v5  ;;  %4068 = vmatpush3.msra.mxu0 %v4536_v58  ;;  %v3378_v5 = vld [vmem:[%s6127_s1 + $0x40] sm:$0xff]  ;;  %v1004_v58 = vrot.slane %v4547_v63, 2 }
  0x38   : > { %4016 = vmatpush3.msra.mxu1 %v4514_v50  ;;  %3918 = vmatprep.mubr.msk.f32.mxu1 %vm406_vm1, %v4425_v15  ;;  %v4817_v50 = vsel %vm985_vm2, %v997_v52, %v999_v27  ;;  %v1009_v52 = vrot.slane %v4581_v19, 2  ;;  %v1011_v27 = vrot.slane %v4592_v30, 2 }
  0x39   : > { %3970 = vmatprep.mubr.msk.f32.mxu0 %vm406_vm1, %v4780_v24  ;;  %4017 = vmatprep.subr.mxu1 %v3344_v13  ;;  %v4841_v63 = vsel %vm985_vm2, %v1002_v11, %v1004_v58  ;;  %v1014_v11 = vrot.slane %v4627_v60, 2  ;;  %v1016_v58 = vrot.slane %v4638_v62, 2 }
  0x3a   : > { %3971 = vmatmul.mubr.msk.f32.gmra.mxu0 %vm406_vm1, %v4789_v4  ;;  %4018 = vmatpush3.msra.mxu1 %v3344_v13  ;;  %v4847_v13 = vsel %vm985_vm2, %v1006_v38, %v1007_v51  ;;  %v4858_v19 = vsel %vm985_vm2, %v1007_v51, %v1009_v52  ;;  %v1017_v38 = vrot.slane %v4641_v7, 2  ;;  %v1019_v51 = vrot.slane %v4671_v40, 2 }
  0x3b   : > { %3919 = vmatmul.mubr.msk.f32.gmra.mxu1 %vm406_vm1, %v4430_v18  ;;  %3973 = vmatprep.mubr.msk.f32.mxu0 %vm406_vm1, %v4796_v25  ;;  %6245 = vst [vmem:[#allocation34_spill] sm:$0xff] %v4858_v19  ;;  %v4875_v60 = vsel %vm985_vm2, %v1012_v17, %v1014_v11 }
  0x3c   : > { %3921 = vmatprep.mubr.msk.f32.mxu1 %vm406_vm1, %v4465_v33  ;;  %4069 = vmatprep.subr.mxu0 %v3378_v5  ;;  %6246 = vst [vmem:[#allocation35_spill] sm:$0xff] %v4875_v60  ;;  %v4881_v52 = vsel %vm985_vm2, %v1016_v58, %v1017_v38  ;;  %v4892_v40 = vsel %vm985_vm2, %v1017_v38, %v1019_v51  ;;  %v1026_v58 = vrot.slane %v4408_v6, 2  ;;  %v1029_v38 = vrot.slane %v4422_v14, 2 }
  0x3d   : > { %4070 = vmatpush3.msra.mxu0 %v3378_v5  ;;  %4119 = vmatprep.subr.mxu1 %v4810_v41  ;;  %v4864_v5 = vsel %vm985_vm2, %v1011_v27, %v1012_v17  ;;  %v1021_v27 = vrot.slane %v4682_v26, 2  ;;  %6247 = vst [vmem:[#allocation36_spill] sm:$0xff] %v4892_v40  ;;  %v1024_v17 = vrot.slane %v4715_v59, 2 }
  0x3e   : > { %3974 = vmatmul.mubr.msk.f32.gmra.mxu0 %vm406_vm1, %v4817_v50  ;;  %4171 = vmatprep.subr.mxu0 %v4823_v43 }
  0x3f   : > { %3922 = vmatmul.mubr.msk.f32.gmra.mxu1 %vm406_vm1, %v4468_v34  ;;  %3976 = vmatprep.mubr.msk.f32.mxu0 %vm406_vm1, %v4828_v46 }
  0x40   : > { %3924 = vmatprep.mubr.msk.f32.mxu1 %vm406_vm1, %v4506_v48 }
  0x42   : > { %3977 = vmatmul.mubr.msk.f32.gmra.mxu0 %vm406_vm1, %v4841_v63 }
  0x43   : > { %3925 = vmatmul.mubr.msk.f32.gmra.mxu1 %vm406_vm1, %v4509_v49  ;;  %3979 = vmatprep.mubr.msk.f32.mxu0 %vm406_vm1, %v4847_v13 }
  0x44   : > { %3927 = vmatprep.mubr.msk.f32.mxu1 %vm406_vm1, %v4531_v57 }
  0x46   : > { %3980 = vmatmul.mubr.msk.f32.gmra.mxu0 %vm406_vm1, %v4858_v19  ;;  %v1022_v19 = vrot.slane %v4685_v42, 2 }
  0x47   : > { %3928 = vmatmul.mubr.msk.f32.gmra.mxu1 %vm406_vm1, %v4550_v0  ;;  %3982 = vmatprep.mubr.msk.f32.mxu0 %vm406_vm1, %v4864_v5 }
  0x48   : > { %3930 = vmatprep.mubr.msk.f32.mxu1 %vm406_vm1, %v4592_v30  ;;  %v4898_v11 = vsel %vm985_vm2, %v1021_v27, %v1022_v19  ;;  %v4909_v59 = vsel %vm985_vm2, %v1022_v19, %v1024_v17  ;;  %v1031_v27 = vrot.slane %v4434_v20, 2  ;;  %v1034_v19 = vrot.slane %v4453_v28, 2 }
  0x49   : > { %6248 = vst [vmem:[#allocation37_spill] sm:$0xff] %v4909_v59 }
  0x4a   : > { %3983 = vmatmul.mubr.msk.f32.gmra.mxu0 %vm406_vm1, %v4875_v60  ;;  %v1027_v60 = vrot.slane %v4413_v9, 2 }
  0x4b   : > { %3931 = vmatmul.mubr.msk.f32.gmra.mxu1 %vm406_vm1, %v4595_v31  ;;  %3985 = vmatprep.mubr.msk.f32.mxu0 %vm406_vm1, %v4881_v52 }
  0x4c   : > { %3933 = vmatprep.mubr.msk.f32.mxu1 %vm406_vm1, %v4638_v62  ;;  %v4915_v51 = vsel %vm985_vm2, %v1026_v58, %v1027_v60  ;;  %v4926_v14 = vsel %vm985_vm2, %v1027_v60, %v1029_v38  ;;  %v1036_v58 = vrot.slane %v4471_v35, 2  ;;  %v1039_v60 = vrot.slane %v4503_v47, 2 }
  0x4d   : > { %6249 = vst [vmem:[#allocation38_spill] sm:$0xff] %v4926_v14 }
  0x4e   : > { %3986 = vmatmul.mubr.msk.f32.gmra.mxu0 %vm406_vm1, %v4892_v40  ;;  %v1032_v40 = vrot.slane %v4437_v21, 2 }
  0x4f   : > { %3934 = vmatmul.mubr.msk.f32.gmra.mxu1 %vm406_vm1, %v4641_v7  ;;  %3988 = vmatprep.mubr.msk.f32.mxu0 %vm406_vm1, %v4898_v11 }
  0x50   : > { %3936 = vmatprep.mubr.msk.f32.mxu1 %vm406_vm1, %v4682_v26  ;;  %v4932_v17 = vsel %vm985_vm2, %v1031_v27, %v1032_v40  ;;  %v4943_v28 = vsel %vm985_vm2, %v1032_v40, %v1034_v19  ;;  %v1041_v27 = vrot.slane %v4525_v55, 2  ;;  %v1044_v40 = vrot.slane %v4561_v3, 2 }
  0x51   : > { %6250 = vst [vmem:[#allocation39_spill] sm:$0xff] %v4943_v28 }
  0x52   : > { %3989 = vmatmul.mubr.msk.f32.gmra.mxu0 %vm406_vm1, %v4909_v59  ;;  %v1037_v59 = vrot.slane %v4481_v39, 2 }
  0x53   : > { %3937 = vmatmul.mubr.msk.f32.gmra.mxu1 %vm406_vm1, %v4685_v42  ;;  %3991 = vmatprep.mubr.msk.f32.mxu0 %vm406_vm1, %v4915_v51 }
  0x54   : > { %3939 = vmatprep.mubr.msk.f32.mxu1 %vm406_vm1, %v4408_v6  ;;  %v4949_v38 = vsel %vm985_vm2, %v1036_v58, %v1037_v59  ;;  %v4960_v47 = vsel %vm985_vm2, %v1037_v59, %v1039_v60  ;;  %v1046_v58 = vrot.slane %v4565_v8, 2  ;;  %v1049_v59 = vrot.slane %v4584_v22, 2 }
  0x55   : > { %6251 = vst [vmem:[#allocation40_spill] sm:$0xff] %v4960_v47 }
  0x56   : > { %3992 = vmatmul.mubr.msk.f32.gmra.mxu0 %vm406_vm1, %v4926_v14  ;;  %v1042_v14 = vrot.slane %v4528_v56, 2 }
  0x57   : > { %3940 = vmatmul.mubr.msk.f32.gmra.mxu1 %vm406_vm1, %v4413_v9  ;;  %3994 = vmatprep.mubr.msk.f32.mxu0 %vm406_vm1, %v4932_v17 }
  0x58   : > { %3942 = vmatprep.mubr.msk.f32.mxu1 %vm406_vm1, %v4434_v20  ;;  %v4966_v19 = vsel %vm985_vm2, %v1041_v27, %v1042_v14  ;;  %v4977_v3 = vsel %vm985_vm2, %v1042_v14, %v1044_v40  ;;  %v1051_v27 = vrot.slane %v4601_v32, 2  ;;  %v1054_v14 = vrot.slane %v4630_v61, 2 }
  0x59   : > { %6252 = vst [vmem:[#allocation41_spill] sm:$0xff] %v4966_v19  ;;  %6253 = vst [vmem:[#allocation42_spill] sm:$0xff] %v4977_v3 }
  0x5a   : > { %3995 = vmatmul.mubr.msk.f32.gmra.mxu0 %vm406_vm1, %v4943_v28  ;;  %v1047_v28 = vrot.slane %v4568_v10, 2 }
  0x5b   : > { %3943 = vmatmul.mubr.msk.f32.gmra.mxu1 %vm406_vm1, %v4437_v21  ;;  %3997 = vmatprep.mubr.msk.f32.mxu0 %vm406_vm1, %v4949_v38 }
  0x5c   : > { %3945 = vmatprep.mubr.msk.f32.mxu1 %vm406_vm1, %v4471_v35  ;;  %v4983_v60 = vsel %vm985_vm2, %v1046_v58, %v1047_v28  ;;  %v4994_v22 = vsel %vm985_vm2, %v1047_v28, %v1049_v59  ;;  %v1056_v58 = vrot.slane %v4646_v16, 2  ;;  %v1059_v28 = vrot.slane %v4679_v2, 2 }
  0x5d   : > { %6254 = vst [vmem:[#allocation43_spill] sm:$0xff] %v4983_v60  ;;  %6255 = vst [vmem:[#allocation44_spill] sm:$0xff] %v4994_v22 }
  0x5e   : > { %3998 = vmatmul.mubr.msk.f32.gmra.mxu0 %vm406_vm1, %v4960_v47  ;;  %v1052_v47 = vrot.slane %v4604_v37, 2 }
  0x5f   : > { %3946 = vmatmul.mubr.msk.f32.gmra.mxu1 %vm406_vm1, %v4481_v39  ;;  %4000 = vmatprep.mubr.msk.f32.mxu0 %vm406_vm1, %v4966_v19 }
  0x60   : > { %3948 = vmatprep.mubr.msk.f32.mxu1 %vm406_vm1, %v4525_v55  ;;  %v5000_v40 = vsel %vm985_vm2, %v1051_v27, %v1052_v47  ;;  %v5011_v61 = vsel %vm985_vm2, %v1052_v47, %v1054_v14  ;;  %v1061_v27 = vrot.slane %v4690_v53, 2  ;;  %v1064_v47 = vrot.slane %v4723_v54, 2  ;;  %v6259_v54 = vld [vmem:[#allocation4_spill] sm:$0xff] }
  0x62   : > { %4001 = vmatmul.mubr.msk.f32.gmra.mxu0 %vm406_vm1, %v4977_v3  ;;  %v6256_v3 = vld [vmem:[#allocation18_spill] sm:$0xff] }
  0x63   : > { %3949 = vmatmul.mubr.msk.f32.gmra.mxu1 %vm406_vm1, %v4528_v56  ;;  %4003 = vmatprep.mubr.msk.f32.mxu0 %vm406_vm1, %v4983_v60  ;;  %v1057_v19 = vrot.slane %v6256_v3, 2 }
  0x64   : > { %3951 = vmatprep.mubr.msk.f32.mxu1 %vm406_vm1, %v4565_v8 }
  0x65   : > { %v5017_v59 = vsel %vm985_vm2, %v1056_v58, %v1057_v19  ;;  %v5028_v2 = vsel %vm985_vm2, %v1057_v19, %v1059_v28  ;;  %v6260_v58 = vld [vmem:[#allocation6_spill] sm:$0xff]  ;;  %v6261_v28 = vld [vmem:[#allocation8_spill] sm:$0xff] }
  0x66   : > { %4004 = vmatmul.mubr.msk.f32.gmra.mxu0 %vm406_vm1, %v4994_v22  ;;  %v6257_v22 = vld [vmem:[#allocation23_spill] sm:$0xff] }
  0x67   : > { %3952 = vmatmul.mubr.msk.f32.gmra.mxu1 %vm406_vm1, %v4568_v10  ;;  %4006 = vmatprep.mubr.msk.f32.mxu0 %vm406_vm1, %v5000_v40  ;;  %v1062_v60 = vrot.slane %v6257_v22, 2 }
  0x68   : > { %3954 = vmatprep.mubr.msk.f32.mxu1 %vm406_vm1, %v4601_v32 }
  0x69   : > { %v5034_v14 = vsel %vm985_vm2, %v1061_v27, %v1062_v60  ;;  %v5043_v19 = vsel %vm985_vm2, %v1062_v60, %v1064_v47  ;;  %v3412_v60 = vld [vmem:[%s6127_s1 + $0x50] sm:$0xff]  ;;  %v6262_v27 = vld [vmem:[#allocation10_spill] sm:$0xff] }
  0x6a   : > { %4007 = vmatmul.mubr.msk.f32.gmra.mxu0 %vm406_vm1, %v5011_v61  ;;  %6258 = vst [vmem:[#allocation18_spill] sm:$0xff] %v5043_v19  ;;  %v6264_v47 = vld [vmem:[#allocation14_spill] sm:$0xff] }
  0x6b   : > { %3955 = vmatmul.mubr.msk.f32.gmra.mxu1 %vm406_vm1, %v4604_v37  ;;  %4009 = vmatprep.mubr.msk.f32.mxu0 %vm406_vm1, %v5017_v59 }
  0x6c   : > { %3957 = vmatprep.mubr.msk.f32.mxu1 %vm406_vm1, %v4646_v16 }
  0x6e   : > { %4010 = vmatmul.mubr.msk.f32.gmra.mxu0 %vm406_vm1, %v5028_v2 }
  0x6f   : > { %3958 = vmatmul.mubr.msk.f32.gmra.mxu1 %vm406_vm1, %v6256_v3  ;;  %4012 = vmatprep.mubr.msk.f32.mxu0 %vm406_vm1, %v5034_v14 }
  0x70   : > { %3960 = vmatprep.mubr.msk.f32.mxu1 %vm406_vm1, %v4690_v53 }
  0x72   : > { %4013 = vmatmul.mubr.msk.f32.gmra.mxu0 %vm406_vm1, %v5043_v19 }
  0x73   : > { %3961 = vmatmul.mubr.msk.f32.gmra.mxu1 %vm406_vm1, %v6257_v22  ;;  %4071 = vmatprep.mubr.msk.f32.mxu0 %vm406_vm1, %v6259_v54  ;;  %v6265_v54 = vld [vmem:[#allocation16_spill] sm:$0xff] }
  0x74   : > { %4019 = vmatprep.mubr.msk.f32.mxu1 %vm406_vm1, %v4425_v15  ;;  %v3446_v15 = vld [vmem:[%s6127_s1 + $0x60] sm:$0xff] }
  0x76   : > { %4072 = vmatmul.mubr.msk.f32.vlgmr.msra.gmra.mxu0 %vm406_vm1, %v6260_v58  ;;  %v6266_v58 = vld [vmem:[#allocation19_spill] sm:$0xff] }
  0x77   : > { %4020 = vmatmul.mubr.msk.f32.vlgmr.msra.gmra.mxu1 %vm406_vm1, %v4430_v18  ;;  %4172 = vmatpush3.msra.mxu0 %v4823_v43  ;;  %v5076_v18 = vld [vmem:[%s6127_s1 + $0x78] sm:$0xff]  ;;  %v5085_v43 = vld [vmem:[%s6127_s1 + $0x88] sm:$0xff] }
  0x78   : > { %4120 = vmatpush3.msra.mxu1 %v4810_v41  ;;  %4022 = vmatprep.mubr.msk.f32.mxu1 %vm406_vm1, %v4465_v33  ;;  %v6263_v41 = vld [vmem:[#allocation12_spill] sm:$0xff] }
  0x79   : > { %4074 = vmatprep.mubr.msk.f32.mxu0 %vm406_vm1, %v6261_v28  ;;  %4121 = vmatprep.subr.mxu1 %v3412_v60 }
  0x7a   : > { %4075 = vmatmul.mubr.msk.f32.gmra.mxu0 %vm406_vm1, %v6262_v27  ;;  %4122 = vmatpush3.msra.mxu1 %v3412_v60  ;;  %v6267_v60 = vld [vmem:[#allocation21_spill] sm:$0xff] }
  0x7b   : > { %4023 = vmatmul.mubr.msk.f32.gmra.mxu1 %vm406_vm1, %v4468_v34  ;;  %4077 = vmatprep.mubr.msk.f32.mxu0 %vm406_vm1, %v6263_v41 }
  0x7c   : > { %4025 = vmatprep.mubr.msk.f32.mxu1 %vm406_vm1, %v4506_v48  ;;  %4173 = vmatprep.subr.mxu0 %v3446_v15 }
  0x7d   : > { %4174 = vmatpush3.msra.mxu0 %v3446_v15  ;;  %4223 = vmatprep.subr.mxu1 %v5076_v18  ;;  %v6268_v15 = vld [vmem:[#allocation24_spill] sm:$0xff] }
  0x7e   : > { %4078 = vmatmul.mubr.msk.f32.gmra.mxu0 %vm406_vm1, %v6264_v47  ;;  %4275 = vmatprep.subr.mxu0 %v5085_v43 }
  0x7f   : > { %4026 = vmatmul.mubr.msk.f32.gmra.mxu1 %vm406_vm1, %v4509_v49  ;;  %4080 = vmatprep.mubr.msk.f32.mxu0 %vm406_vm1, %v6265_v54  ;;  %v6269_v54 = vld [vmem:[#allocation26_spill] sm:$0xff] }
  0x80   : > { %4028 = vmatprep.mubr.msk.f32.mxu1 %vm406_vm1, %v4531_v57 }
  0x82   : > { %4081 = vmatmul.mubr.msk.f32.gmra.mxu0 %vm406_vm1, %v6266_v58 }
  0x83   : > { %4029 = vmatmul.mubr.msk.f32.gmra.mxu1 %vm406_vm1, %v4550_v0  ;;  %4083 = vmatprep.mubr.msk.f32.mxu0 %vm406_vm1, %v6267_v60  ;;  %v5188_v60 = vld [vmem:[%s4399_s28 + $0x190] sm:$0x3] }
  0x84   : > { %4031 = vmatprep.mubr.msk.f32.mxu1 %vm406_vm1, %v4592_v30 }
  0x86   : > { %4084 = vmatmul.mubr.msk.f32.gmra.mxu0 %vm406_vm1, %v6268_v15  ;;  %v5175_v15 = vld [vmem:[%s4399_s28 + $0x188] sm:$0xff] }
  0x87   : > { %4032 = vmatmul.mubr.msk.f32.gmra.mxu1 %vm406_vm1, %v4595_v31  ;;  %4086 = vmatprep.mubr.msk.f32.mxu0 %vm406_vm1, %v6269_v54  ;;  %v6270_v54 = vld [vmem:[#allocation2_spill] sm:$0xff] }
  0x88   : > { %4034 = vmatprep.mubr.msk.f32.mxu1 %vm406_vm1, %v4638_v62 }
  0x8a   : > { %4087 = vmatmul.mubr.msk.f32.gmra.mxu0 %vm406_vm1, %v4732_v23  ;;  %v6271_v23 = vld [vmem:[#allocation3_spill] sm:$0xff] }
  0x8b   : > { %4035 = vmatmul.mubr.msk.f32.gmra.mxu1 %vm406_vm1, %v4641_v7  ;;  %4089 = vmatprep.mubr.msk.f32.mxu0 %vm406_vm1, %v4742_v12  ;;  %v6272_v12 = vld [vmem:[#allocation5_spill] sm:$0xff] }
  0x8c   : > { %4037 = vmatprep.mubr.msk.f32.mxu1 %vm406_vm1, %v4682_v26 }
  0x8e   : > { %4090 = vmatmul.mubr.msk.f32.gmra.mxu0 %vm406_vm1, %v4757_v29  ;;  %v6273_v29 = vld [vmem:[#allocation7_spill] sm:$0xff] }
  0x8f   : > { %4038 = vmatmul.mubr.msk.f32.gmra.mxu1 %vm406_vm1, %v4685_v42  ;;  %4092 = vmatprep.mubr.msk.f32.mxu0 %vm406_vm1, %v6270_v54  ;;  %v6274_v54 = vld [vmem:[#allocation9_spill] sm:$0xff] }
  0x90   : > { %4040 = vmatprep.mubr.msk.f32.mxu1 %vm406_vm1, %v4408_v6 }
  0x92   : > { %4093 = vmatmul.mubr.msk.f32.gmra.mxu0 %vm406_vm1, %v6271_v23  ;;  %v6275_v23 = vld [vmem:[#allocation11_spill] sm:$0xff] }
  0x93   : > { %4041 = vmatmul.mubr.msk.f32.gmra.mxu1 %vm406_vm1, %v4413_v9  ;;  %4095 = vmatprep.mubr.msk.f32.mxu0 %vm406_vm1, %v6272_v12  ;;  %v6276_v12 = vld [vmem:[#allocation13_spill] sm:$0xff] }
  0x94   : > { %4043 = vmatprep.mubr.msk.f32.mxu1 %vm406_vm1, %v4434_v20 }
  0x96   : > { %4096 = vmatmul.mubr.msk.f32.gmra.mxu0 %vm406_vm1, %v6273_v29  ;;  %v6277_v29 = vld [vmem:[#allocation15_spill] sm:$0xff] }
  0x97   : > { %4044 = vmatmul.mubr.msk.f32.gmra.mxu1 %vm406_vm1, %v4437_v21  ;;  %4098 = vmatprep.mubr.msk.f32.mxu0 %vm406_vm1, %v6274_v54  ;;  %v6278_v54 = vld [vmem:[#allocation17_spill] sm:$0xff] }
  0x98   : > { %4046 = vmatprep.mubr.msk.f32.mxu1 %vm406_vm1, %v4471_v35 }
  0x9a   : > { %4099 = vmatmul.mubr.msk.f32.gmra.mxu0 %vm406_vm1, %v6275_v23  ;;  %v6279_v23 = vld [vmem:[#allocation20_spill] sm:$0xff] }
  0x9b   : > { %4047 = vmatmul.mubr.msk.f32.gmra.mxu1 %vm406_vm1, %v4481_v39  ;;  %4101 = vmatprep.mubr.msk.f32.mxu0 %vm406_vm1, %v6276_v12  ;;  %v6280_v12 = vld [vmem:[#allocation22_spill] sm:$0xff] }
  0x9c   : > { %4049 = vmatprep.mubr.msk.f32.mxu1 %vm406_vm1, %v4525_v55 }
  0x9e   : > { %4102 = vmatmul.mubr.msk.f32.gmra.mxu0 %vm406_vm1, %v6277_v29  ;;  %v5172_v29 = vld [vmem:[%s4399_s28 + $0x180] sm:$0xff] }
  0x9f   : > { %4050 = vmatmul.mubr.msk.f32.gmra.mxu1 %vm406_vm1, %v4528_v56  ;;  %4104 = vmatprep.mubr.msk.f32.mxu0 %vm406_vm1, %v6278_v54  ;;  %v6281_v54 = vld [vmem:[#allocation25_spill] sm:$0xff] }
  0xa0   : > { %4052 = vmatprep.mubr.msk.f32.mxu1 %vm406_vm1, %v4565_v8 }
  0xa2   : > { %4105 = vmatmul.mubr.msk.f32.gmra.mxu0 %vm406_vm1, %v6279_v23  ;;  %v1658_v23 = vrot.slane %v5175_v15, 1 }
  0xa3   : > { %4053 = vmatmul.mubr.msk.f32.gmra.mxu1 %vm406_vm1, %v4568_v10  ;;  %4107 = vmatprep.mubr.msk.f32.mxu0 %vm406_vm1, %v6280_v12  ;;  %v1657_v12 = vrot.slane %v5172_v29, 1 }
  0xa4   : > { %4055 = vmatprep.mubr.msk.f32.mxu1 %vm406_vm1, %v4601_v32 }
  0xa6   : > { %4108 = vmatmul.mubr.msk.f32.gmra.mxu0 %vm406_vm1, %v6281_v54  ;;  %v5200_v54 = vsel %vm322_vm0, %v1657_v12, %v1658_v23  ;;  %v3480_v12 = vld [vmem:[%s6127_s1 + $0x70] sm:$0xff] }
  0xa7   : > { %4056 = vmatmul.mubr.msk.f32.gmra.mxu1 %vm406_vm1, %v4604_v37  ;;  %4110 = vmatprep.mubr.msk.f32.mxu0 %vm406_vm1, %v4718_v45  ;;  %v1660_v45 = vrot.slane %v5188_v60, 1  ;;  %6282 = vst [vmem:[#allocation23_spill] sm:$0xff] %v5200_v54 }
  0xa8   : > { %4058 = vmatprep.mubr.msk.f32.mxu1 %vm406_vm1, %v4646_v16 }
  0xaa   : > { %4111 = vmatmul.mubr.msk.f32.gmra.mxu0 %vm406_vm1, %v4739_v1  ;;  %v5209_v1 = vsel %vm322_vm0, %v1658_v23, %v1660_v45  ;;  %v6293_v45 = vld [vmem:[#allocation43_spill] sm:$0xff] }
  0xab   : > { %4059 = vmatmul.mubr.msk.f32.gmra.mxu1 %vm406_vm1, %v6256_v3  ;;  %4113 = vmatprep.mubr.msk.f32.mxu0 %vm406_vm1, %v4747_v44  ;;  %6283 = vst [vmem:[#allocation4_spill] sm:$0xff] %v5209_v1 }
  0xac   : > { %4061 = vmatprep.mubr.msk.f32.mxu1 %vm406_vm1, %v4690_v53 }
  0xae   : > { %4114 = vmatmul.mubr.msk.f32.gmra.mxu0 %vm406_vm1, %v4762_v36  ;;  %v5390_v36 = vld [vmem:[%s4399_s28 + $0x198] sm:$0xff] }
  0xaf   : > { %4062 = vmatmul.mubr.msk.f32.gmra.mxu1 %vm406_vm1, %v6257_v22  ;;  %4116 = vmatprep.mubr.msk.f32.mxu0 %vm406_vm1, %v5200_v54 }
  0xb0   : > { %4064 = vmatprep.mubr.msk.f32.mxu1 %vm406_vm1, %v5172_v29 }
  0xb2   : > { %4117 = vmatmul.mubr.msk.f32.gmra.mxu0 %vm406_vm1, %v5209_v1 }
  0xb3   : > { %4065 = vmatmul.mubr.msk.f32.gmra.mxu1 %vm406_vm1, %v5175_v15  ;;  %4175 = vmatprep.mubr.msk.f32.mxu0 %vm406_vm1, %v4465_v33  ;;  %v3514_v33 = vld [vmem:[%s6127_s1 + $0x80] sm:$0xff] }
  0xb4   : > { %4123 = vmatprep.mubr.msk.f32.mxu1 %vm406_vm1, %v4780_v24 }
  0xb6   : > { %4176 = vmatmul.mubr.msk.f32.vlgmr.msra.gmra.mxu0 %vm406_vm1, %v4468_v34  ;;  %v6284_v34 = vld [vmem:[#allocation34_spill] sm:$0xff] }
  0xb7   : > { %4124 = vmatmul.mubr.msk.f32.vlgmr.msra.gmra.mxu1 %vm406_vm1, %v4789_v4  ;;  %4276 = vmatpush3.msra.mxu0 %v5085_v43  ;;  %v6294_v4 = vld [vmem:[#allocation44_spill] sm:$0xff] }
  0xb8   : > { %4224 = vmatpush3.msra.mxu1 %v5076_v18  ;;  %4126 = vmatprep.mubr.msk.f32.mxu1 %vm406_vm1, %v4796_v25 }
  0xb9   : > { %4178 = vmatprep.mubr.msk.f32.mxu0 %vm406_vm1, %v4506_v48  ;;  %4225 = vmatprep.subr.mxu1 %v3480_v12  ;;  %v6285_v48 = vld [vmem:[#allocation35_spill] sm:$0xff] }
  0xba   : > { %4179 = vmatmul.mubr.msk.f32.gmra.mxu0 %vm406_vm1, %v4509_v49  ;;  %4226 = vmatpush3.msra.mxu1 %v3480_v12  ;;  %v6286_v49 = vld [vmem:[#allocation36_spill] sm:$0xff]  ;;  %v1926_v12 = vrot.slane %v5172_v29, 2 }
  0xbb   : > { %4127 = vmatmul.mubr.msk.f32.gmra.mxu1 %vm406_vm1, %v4817_v50  ;;  %4181 = vmatprep.mubr.msk.f32.mxu0 %vm406_vm1, %v4531_v57  ;;  %v6287_v57 = vld [vmem:[#allocation37_spill] sm:$0xff] }
  0xbc   : > { %4129 = vmatprep.mubr.msk.f32.mxu1 %vm406_vm1, %v4828_v46  ;;  %4277 = vmatprep.subr.mxu0 %v3514_v33 }
  0xbd   : > { %4278 = vmatpush3.msra.mxu0 %v3514_v33 }
  0xbe   : > { %4182 = vmatmul.mubr.msk.f32.gmra.mxu0 %vm406_vm1, %v4550_v0  ;;  %v6288_v0 = vld [vmem:[#allocation38_spill] sm:$0xff] }
  0xbf   : > { %4130 = vmatmul.mubr.msk.f32.gmra.mxu1 %vm406_vm1, %v4841_v63  ;;  %4184 = vmatprep.mubr.msk.f32.mxu0 %vm406_vm1, %v4592_v30 }
  0xc0   : > { %4132 = vmatprep.mubr.msk.f32.mxu1 %vm406_vm1, %v4847_v13 }
  0xc2   : > { %4185 = vmatmul.mubr.msk.f32.gmra.mxu0 %vm406_vm1, %v4595_v31  ;;  %v6290_v31 = vld [vmem:[#allocation40_spill] sm:$0xff] }
  0xc3   : > { %4133 = vmatmul.mubr.msk.f32.gmra.mxu1 %vm406_vm1, %v6284_v34  ;;  %4187 = vmatprep.mubr.msk.f32.mxu0 %vm406_vm1, %v4638_v62  ;;  %v6291_v62 = vld [vmem:[#allocation41_spill] sm:$0xff] }
  0xc4   : > { %4135 = vmatprep.mubr.msk.f32.mxu1 %vm406_vm1, %v4864_v5 }
  0xc6   : > { %4188 = vmatmul.mubr.msk.f32.gmra.mxu0 %vm406_vm1, %v4641_v7 }
  0xc7   : > { %4136 = vmatmul.mubr.msk.f32.gmra.mxu1 %vm406_vm1, %v6285_v48  ;;  %4190 = vmatprep.mubr.msk.f32.mxu0 %vm406_vm1, %v4682_v26 }
  0xc8   : > { %4138 = vmatprep.mubr.msk.f32.mxu1 %vm406_vm1, %v4881_v52 }
  0xca   : > { %4191 = vmatmul.mubr.msk.f32.gmra.mxu0 %vm406_vm1, %v4685_v42  ;;  %v6292_v42 = vld [vmem:[#allocation42_spill] sm:$0xff] }
  0xcb   : > { %4139 = vmatmul.mubr.msk.f32.gmra.mxu1 %vm406_vm1, %v6286_v49  ;;  %4193 = vmatprep.mubr.msk.f32.mxu0 %vm406_vm1, %v4408_v6 }
  0xcc   : > { %4141 = vmatprep.mubr.msk.f32.mxu1 %vm406_vm1, %v4898_v11 }
  0xce   : > { %4194 = vmatmul.mubr.msk.f32.gmra.mxu0 %vm406_vm1, %v4413_v9 }
  0xcf   : > { %4142 = vmatmul.mubr.msk.f32.gmra.mxu1 %vm406_vm1, %v6287_v57  ;;  %4196 = vmatprep.mubr.msk.f32.mxu0 %vm406_vm1, %v4434_v20  ;;  %v6289_v20 = vld [vmem:[#allocation39_spill] sm:$0xff] }
  0xd0   : > { %4144 = vmatprep.mubr.msk.f32.mxu1 %vm406_vm1, %v4915_v51 }
  0xd2   : > { %4197 = vmatmul.mubr.msk.f32.gmra.mxu0 %vm406_vm1, %v4437_v21 }
  0xd3   : > { %4145 = vmatmul.mubr.msk.f32.gmra.mxu1 %vm406_vm1, %v6288_v0  ;;  %4199 = vmatprep.mubr.msk.f32.mxu0 %vm406_vm1, %v4471_v35 }
  0xd4   : > { %4147 = vmatprep.mubr.msk.f32.mxu1 %vm406_vm1, %v4932_v17 }
  0xd6   : > { %v5293_v6 = vpop.f32.mrf.mxu0  ;;  %4200 = vmatmul.mubr.msk.f32.gmra.mxu0 %vm406_vm1, %v4481_v39 }
  0xd7   : > { %v5297_v9 = vpop.f32.mrf.mxu1  ;;  %4148 = vmatmul.mubr.msk.f32.gmra.mxu1 %vm406_vm1, %v6289_v20  ;;  %4202 = vmatprep.mubr.msk.f32.mxu0 %vm406_vm1, %v4525_v55 }
  0xd8   : > { %v5303_v21 = vpop.f32.mrf.mxu0  ;;  %4150 = vmatprep.mubr.msk.f32.mxu1 %vm406_vm1, %v4949_v38 }
  0xd9   : > { %v5307_v35 = vpop.f32.mrf.mxu1 }
  0xda   : > { %v5309_v30 = vpop.f32.mrf.mxu0  ;;  %4203 = vmatmul.mubr.msk.f32.gmra.mxu0 %vm406_vm1, %v4528_v56 }
  0xdb   : > { %v5313_v39 = vpop.f32.mrf.mxu1  ;;  %4151 = vmatmul.mubr.msk.f32.gmra.mxu1 %vm406_vm1, %v6290_v31  ;;  %4205 = vmatprep.mubr.msk.f32.mxu0 %vm406_vm1, %v4565_v8 }
  0xdc   : > { %v5319_v55 = vpop.f32.mrf.mxu0  ;;  %4153 = vmatprep.mubr.msk.f32.mxu1 %vm406_vm1, %v6291_v62 }
  0xdd   : > { %v5323_v7 = vpop.f32.mrf.mxu1 }
  0xde   : > { %v5325_v26 = vpop.f32.mrf.mxu0  ;;  %4206 = vmatmul.mubr.msk.f32.gmra.mxu0 %vm406_vm1, %v4568_v10 }
  0xdf   : > { %v5329_v56 = vpop.f32.mrf.mxu1  ;;  %4154 = vmatmul.mubr.msk.f32.gmra.mxu1 %vm406_vm1, %v6292_v42  ;;  %4208 = vmatprep.mubr.msk.f32.mxu0 %vm406_vm1, %v4601_v32 }
  0xe0   : > { %v5335_v8 = vpop.f32.mrf.mxu0  ;;  %4156 = vmatprep.mubr.msk.f32.mxu1 %vm406_vm1, %v6293_v45 }
  0xe1   : > { %v5339_v23 = vpop.f32.mrf.mxu1 }
  0xe2   : > { %v5341_v24 = vpop.f32.mrf.mxu0  ;;  %4209 = vmatmul.mubr.msk.f32.gmra.mxu0 %vm406_vm1, %v4604_v37 }
  0xe3   : > { %v5345_v10 = vpop.f32.mrf.mxu1  ;;  %4157 = vmatmul.mubr.msk.f32.gmra.mxu1 %vm406_vm1, %v6294_v4  ;;  %4211 = vmatprep.mubr.msk.f32.mxu0 %vm406_vm1, %v4646_v16 }
  0xe4   : > { %v5351_v32 = vpop.f32.mrf.mxu0  ;;  %4159 = vmatprep.mubr.msk.f32.mxu1 %vm406_vm1, %v5000_v40 }
  0xe5   : > { %v5355_v18 = vpop.f32.mrf.mxu1 }
  0xe6   : > { %v5357_v43 = vpop.f32.mrf.mxu0  ;;  %4212 = vmatmul.mubr.msk.f32.gmra.mxu0 %vm406_vm1, %v6256_v3  ;;  %v1927_v3 = vrot.slane %v5175_v15, 2 }
  0xe7   : > { %v5361_v37 = vpop.f32.mrf.mxu1  ;;  %4160 = vmatmul.mubr.msk.f32.gmra.mxu1 %vm406_vm1, %v5011_v61  ;;  %4214 = vmatprep.mubr.msk.f32.mxu0 %vm406_vm1, %v4690_v53 }
  0xe8   : > { %6295 = vst [vmem:[#allocation6_spill] sm:$0xff] %v5361_v37  ;;  %v5367_v16 = vpop.f32.mrf.mxu0  ;;  %4162 = vmatprep.mubr.msk.f32.mxu1 %vm406_vm1, %v5017_v59  ;;  %v5409_v37 = vld [vmem:[%s4399_s28 + $0x1a0] sm:$0xff] }
  0xe9   : > { %v5372_v33 = vpop.f32.mrf.mxu1 }
  0xea   : > { %6296 = vst [vmem:[#allocation8_spill] sm:$0xff] %v5372_v33  ;;  %v5375_v1 = vpop.f32.mrf.mxu0  ;;  %4215 = vmatmul.mubr.msk.f32.gmra.mxu0 %vm406_vm1, %v6257_v22  ;;  %v1929_v33 = vrot.slane %v5188_v60, 2  ;;  %v5396_v22 = vsel %vm985_vm2, %v1926_v12, %v1927_v3 }
  0xeb   : > { %v5379_v54 = vpop.f32.mrf.mxu1  ;;  %4163 = vmatmul.mubr.msk.f32.gmra.mxu1 %vm406_vm1, %v5028_v2  ;;  %4217 = vmatprep.mubr.msk.f32.mxu0 %vm406_vm1, %v5172_v29  ;;  %6299 = vst [vmem:[#allocation14_spill] sm:$0xff] %v5396_v22 }
  0xec   : > { %6297 = vst [vmem:[#allocation10_spill] sm:$0xff] %v5379_v54  ;;  %v5385_v53 = vpop.f32.mrf.mxu0  ;;  %4165 = vmatprep.mubr.msk.f32.mxu1 %vm406_vm1, %v5034_v14  ;;  %v5416_v12 = vsel %vm985_vm2, %v1927_v3, %v1929_v33 }
  0xed   : > { %v5393_v44 = vpop.f32.mrf.mxu1  ;;  %6301 = vst [vmem:[#allocation34_spill] sm:$0xff] %v5416_v12 }
  0xee   : > { %6298 = vst [vmem:[#allocation12_spill] sm:$0xff] %v5393_v44  ;;  %v5398_v54 = vpop.f32.mrf.mxu0  ;;  %4218 = vmatmul.mubr.msk.f32.gmra.mxu0 %vm406_vm1, %v5175_v15 }
  0xef   : > { %v5402_v29 = vpop.f32.mrf.mxu1  ;;  %4166 = vmatmul.mubr.msk.f32.gmra.mxu1 %vm406_vm1, %v5043_v19  ;;  %4220 = vmatprep.mubr.msk.f32.mxu0 %vm406_vm1, %v5390_v36 }
  0xf0   : > { %6300 = vst [vmem:[#allocation19_spill] sm:$0xff] %v5402_v29  ;;  %v5411_v60 = vpop.f32.mrf.mxu0  ;;  %4168 = vmatprep.mubr.msk.f32.mxu1 %vm406_vm1, %v5396_v22 }
  0xf1   : > { %v5418_v44 = vpop.f32.mrf.mxu1 }
  0xf2   : > { %6302 = vst [vmem:[#allocation35_spill] sm:$0xff] %v5418_v44  ;;  %v5420_v15 = vpop.f32.mrf.mxu0  ;;  %4221 = vmatmul.mubr.msk.f32.gmra.mxu0 %vm406_vm1, %v5409_v37 }
  0xf3   : > { %v5424_v29 = vpop.f32.mrf.mxu1  ;;  %4169 = vmatmul.mubr.msk.f32.gmra.mxu1 %vm406_vm1, %v5416_v12  ;;  %4279 = vmatprep.mubr.msk.f32.mxu0 %vm406_vm1, %v4796_v25 }
  0xf4   : > { %6303 = vst [vmem:[#allocation36_spill] sm:$0xff] %v5424_v29  ;;  %v5430_v19 = vpop.f32.mrf.mxu0  ;;  %4227 = vmatprep.mubr.msk.f32.mxu1 %vm406_vm1, %v6261_v28 }
  0xf5   : > { %v5434_v33 = vpop.f32.mrf.mxu1 }
  0xf6   : > { %6304 = vst [vmem:[#allocation37_spill] sm:$0xff] %v5434_v33  ;;  %v3969_v3 = vpop.f32.mrf.mxu0  ;;  %4280 = vmatmul.mubr.msk.f32.vlgmr.msra.gmra.mxu0 %vm406_vm1, %v4817_v50 }
  0xf7   : > { %v3917_v44 = vpop.f32.mrf.mxu1  ;;  %4228 = vmatmul.mubr.msk.f32.vlgmr.msra.gmra.mxu1 %vm406_vm1, %v6262_v27  ;;  %4282 = vmatprep.mubr.msk.f32.mxu0 %vm406_vm1, %v4828_v46 }
  0xf8   : > { %v832_v25 = vadd.f32 %v3917_v44, %v5293_v6  ;;  %v1199_v29 = vpop.f32.mrf.mxu0  ;;  %4230 = vmatprep.mubr.msk.f32.mxu1 %vm406_vm1, %v6263_v41  ;;  %v6305_v41 = vld [vmem:[#allocation16_spill] sm:$0xff] }
  0xf9   : > { %v826_v28 = vpop.f32.mrf.mxu1 }
  0xfa   : > { %v5445_v12 = vadd.f32 %v3969_v3, %v832_v25  ;;  %v827_v33 = vadd.f32 %v826_v28, %v5303_v21  ;;  %v3972_v22 = vpop.f32.mrf.mxu0  ;;  %4283 = vmatmul.mubr.msk.f32.gmra.mxu0 %vm406_vm1, %v4841_v63  ;;  %v6307_v28 = vld [vmem:[#allocation24_spill] sm:$0xff] }
  0xfb   : > { %v3920_v50 = vpop.f32.mrf.mxu1  ;;  %4231 = vmatmul.mubr.msk.f32.gmra.mxu1 %vm406_vm1, %v6264_v47  ;;  %4285 = vmatprep.mubr.msk.f32.mxu0 %vm406_vm1, %v4847_v13 }
  0xfc   : > { %v5454_v44 = vadd.f32 %v1199_v29, %v827_v33  ;;  %v842_v46 = vadd.f32 %v3920_v50, %v5309_v30  ;;  %v1209_v27 = vpop.f32.mrf.mxu0  ;;  %4233 = vmatprep.mubr.msk.f32.mxu1 %vm406_vm1, %v6305_v41 }
  0xfd   : > { %v836_v6 = vpop.f32.mrf.mxu1 }
  0xfe   : > { %v5459_v21 = vadd.f32 %v3972_v22, %v842_v46  ;;  %v837_v63 = vadd.f32 %v836_v6, %v5319_v55  ;;  %v3975_v3 = vpop.f32.mrf.mxu0  ;;  %4286 = vmatmul.mubr.msk.f32.gmra.mxu0 %vm406_vm1, %v6284_v34  ;;  %v6306_v22 = vld [vmem:[#allocation21_spill] sm:$0xff]  ;;  %v6308_v46 = vld [vmem:[#allocation26_spill] sm:$0xff] }
  0xff   : > { %v3923_v47 = vpop.f32.mrf.mxu1  ;;  %4234 = vmatmul.mubr.msk.f32.gmra.mxu1 %vm406_vm1, %v6266_v58  ;;  %4288 = vmatprep.mubr.msk.f32.mxu0 %vm406_vm1, %v4864_v5 }
 0x100   : > { %v5468_v13 = vadd.f32 %v1209_v27, %v837_v63  ;;  %v852_v30 = vadd.f32 %v3923_v47, %v5325_v26  ;;  %v1219_v29 = vpop.f32.mrf.mxu0  ;;  %4236 = vmatprep.mubr.msk.f32.mxu1 %vm406_vm1, %v6306_v22  ;;  %v6309_v63 = vld [vmem:[#allocation28_spill] sm:$0xff]  ;;  %v6310_v47 = vld [vmem:[#allocation30_spill] sm:$0xff] }
 0x101   : > { %v846_v55 = vpop.f32.mrf.mxu1 }
 0x102   : > { %v5473_v33 = vadd.f32 %v3975_v3, %v852_v30  ;;  %v847_v34 = vadd.f32 %v846_v55, %v5335_v8  ;;  %v3978_v25 = vpop.f32.mrf.mxu0  ;;  %4289 = vmatmul.mubr.msk.f32.gmra.mxu0 %vm406_vm1, %v6285_v48  ;;  %v6311_v55 = vld [vmem:[#allocation32_spill] sm:$0xff] }
 0x103   : > { %v3926_v58 = vpop.f32.mrf.mxu1  ;;  %4237 = vmatmul.mubr.msk.f32.gmra.mxu1 %vm406_vm1, %v6307_v28  ;;  %4291 = vmatprep.mubr.msk.f32.mxu0 %vm406_vm1, %v4881_v52 }
 0x104   : > { %v5482_v5 = vadd.f32 %v1219_v29, %v847_v34  ;;  %v862_v26 = vadd.f32 %v3926_v58, %v5341_v24  ;;  %v1229_v50 = vpop.f32.mrf.mxu0  ;;  %4239 = vmatprep.mubr.msk.f32.mxu1 %vm406_vm1, %v6308_v46 }
 0x105   : > { %v856_v8 = vpop.f32.mrf.mxu1 }
 0x106   : > { %v5487_v27 = vadd.f32 %v3978_v25, %v862_v26  ;;  %v857_v48 = vadd.f32 %v856_v8, %v5351_v32  ;;  %v3981_v41 = vpop.f32.mrf.mxu0  ;;  %4292 = vmatmul.mubr.msk.f32.gmra.mxu0 %vm406_vm1, %v6286_v49  ;;  %v6312_v25 = vld [vmem:[#allocation2_spill] sm:$0xff]  ;;  %v6314_v8 = vld [vmem:[#allocation5_spill] sm:$0xff] }
 0x107   : > { %v3929_v6 = vpop.f32.mrf.mxu1  ;;  %4240 = vmatmul.mubr.msk.f32.gmra.mxu1 %vm406_vm1, %v6309_v63  ;;  %4294 = vmatprep.mubr.msk.f32.mxu0 %vm406_vm1, %v4898_v11  ;;  %v6315_v63 = vld [vmem:[#allocation7_spill] sm:$0xff] }
 0x108   : > { %v5496_v52 = vadd.f32 %v1229_v50, %v857_v48  ;;  %v872_v24 = vadd.f32 %v3929_v6, %v5357_v43  ;;  %v1239_v3 = vpop.f32.mrf.mxu0  ;;  %4242 = vmatprep.mubr.msk.f32.mxu1 %vm406_vm1, %v6310_v47  ;;  %v6313_v50 = vld [vmem:[#allocation3_spill] sm:$0xff] }
 0x109   : > { %v866_v32 = vpop.f32.mrf.mxu1 }
 0x10a   : > { %v5501_v30 = vadd.f32 %v3981_v41, %v872_v24  ;;  %v867_v49 = vadd.f32 %v866_v32, %v5367_v16  ;;  %v3984_v29 = vpop.f32.mrf.mxu0  ;;  %4295 = vmatmul.mubr.msk.f32.gmra.mxu0 %vm406_vm1, %v6287_v57 }
 0x10b   : > { %v3932_v22 = vpop.f32.mrf.mxu1  ;;  %4243 = vmatmul.mubr.msk.f32.gmra.mxu1 %vm406_vm1, %v6311_v55  ;;  %4297 = vmatprep.mubr.msk.f32.mxu0 %vm406_vm1, %v4915_v51  ;;  %v6318_v55 = vld [vmem:[#allocation13_spill] sm:$0xff] }
 0x10c   : > { %v5510_v11 = vadd.f32 %v1239_v3, %v867_v49  ;;  %v882_v43 = vadd.f32 %v3932_v22, %v5375_v1  ;;  %v1249_v34 = vpop.f32.mrf.mxu0  ;;  %4245 = vmatprep.mubr.msk.f32.mxu1 %vm406_vm1, %v6312_v25  ;;  %v6316_v3 = vld [vmem:[#allocation9_spill] sm:$0xff] }
 0x10d   : > { %v876_v16 = vpop.f32.mrf.mxu1 }
 0x10e   : > { %v5515_v58 = vadd.f32 %v3984_v29, %v882_v43  ;;  %v877_v57 = vadd.f32 %v876_v16, %v5385_v53  ;;  %v3987_v28 = vpop.f32.mrf.mxu0  ;;  %4298 = vmatmul.mubr.msk.f32.gmra.mxu0 %vm406_vm1, %v6288_v0  ;;  %v6317_v29 = vld [vmem:[#allocation11_spill] sm:$0xff] }
 0x10f   : > { %v3935_v26 = vpop.f32.mrf.mxu1  ;;  %4246 = vmatmul.mubr.msk.f32.gmra.mxu1 %vm406_vm1, %v6313_v50  ;;  %4300 = vmatprep.mubr.msk.f32.mxu0 %vm406_vm1, %v4932_v17  ;;  %v6319_v16 = vld [vmem:[#allocation15_spill] sm:$0xff] }
 0x110   : > { %v5524_v1 = vadd.f32 %v1249_v34, %v877_v57  ;;  %v892_v51 = vadd.f32 %v3935_v26, %v5398_v54  ;;  %v1259_v46 = vpop.f32.mrf.mxu0  ;;  %4248 = vmatprep.mubr.msk.f32.mxu1 %vm406_vm1, %v6314_v8 }
 0x111   : > { %v886_v53 = vpop.f32.mrf.mxu1 }
 0x112   : > { %v5529_v48 = vadd.f32 %v3987_v28, %v892_v51  ;;  %v887_v0 = vadd.f32 %v886_v53, %v5411_v60  ;;  %v3990_v41 = vpop.f32.mrf.mxu0  ;;  %4301 = vmatmul.mubr.msk.f32.gmra.mxu0 %vm406_vm1, %v6289_v20  ;;  %v6320_v28 = vld [vmem:[#allocation17_spill] sm:$0xff]  ;;  %v6322_v53 = vld [vmem:[#allocation22_spill] sm:$0xff] }
 0x113   : > { %v3938_v6 = vpop.f32.mrf.mxu1  ;;  %4249 = vmatmul.mubr.msk.f32.gmra.mxu1 %vm406_vm1, %v6315_v63  ;;  %4303 = vmatprep.mubr.msk.f32.mxu0 %vm406_vm1, %v4949_v38  ;;  %v6323_v63 = vld [vmem:[#allocation25_spill] sm:$0xff] }
 0x114   : > { %v5538_v17 = vadd.f32 %v1259_v46, %v887_v0  ;;  %v902_v54 = vadd.f32 %v3938_v6, %v5420_v15  ;;  %v1269_v24 = vpop.f32.mrf.mxu0  ;;  %4251 = vmatprep.mubr.msk.f32.mxu1 %vm406_vm1, %v6316_v3  ;;  %v6321_v46 = vld [vmem:[#allocation20_spill] sm:$0xff] }
 0x115   : > { %v896_v60 = vpop.f32.mrf.mxu1 }
 0x116   : > { %v5543_v47 = vadd.f32 %v3990_v41, %v902_v54  ;;  %v897_v20 = vadd.f32 %v896_v60, %v5430_v19  ;;  %v3993_v32 = vpop.f32.mrf.mxu0  ;;  %4304 = vmatmul.mubr.msk.f32.gmra.mxu0 %vm406_vm1, %v6290_v31 }
 0x117   : > { %v3941_v49 = vpop.f32.mrf.mxu1  ;;  %4252 = vmatmul.mubr.msk.f32.gmra.mxu1 %vm406_vm1, %v6317_v29  ;;  %4306 = vmatprep.mubr.msk.f32.mxu0 %vm406_vm1, %v6291_v62  ;;  %v6326_v29 = vld [vmem:[#allocation6_spill] sm:$0xff] }
 0x118   : > { %v5552_v38 = vadd.f32 %v1269_v24, %v897_v20  ;;  %v912_v15 = vadd.f32 %v3941_v49, %v5297_v9  ;;  %v1279_v22 = vpop.f32.mrf.mxu0  ;;  %4254 = vmatprep.mubr.msk.f32.mxu1 %vm406_vm1, %v6318_v55  ;;  %v6324_v24 = vld [vmem:[#allocation27_spill] sm:$0xff]  ;;  %v2462_v55 = vrot.slane %v5390_v36, 1 }
 0x119   : > { %v906_v19 = vpop.f32.mrf.mxu1 }
 0x11a   : > { %v5557_v43 = vadd.f32 %v3993_v32, %v912_v15  ;;  %v907_v31 = vadd.f32 %v906_v19, %v5307_v35  ;;  %v3996_v34 = vpop.f32.mrf.mxu0  ;;  %4307 = vmatmul.mubr.msk.f32.gmra.mxu0 %vm406_vm1, %v6292_v42  ;;  %v2732_v32 = vrot.slane %v5409_v37, 2  ;;  %v2463_v19 = vrot.slane %v5409_v37, 1  ;;  %v6332_v37 = vld [vmem:[#allocation10_spill] sm:$0xff] }
 0x11b   : > { %v3944_v25 = vpop.f32.mrf.mxu1  ;;  %4255 = vmatmul.mubr.msk.f32.gmra.mxu1 %vm406_vm1, %v6319_v16  ;;  %4309 = vmatprep.mubr.msk.f32.mxu0 %vm406_vm1, %v6293_v45 }
 0x11c   : > { %v5566_v9 = vadd.f32 %v1279_v22, %v907_v31  ;;  %v922_v62 = vadd.f32 %v3944_v25, %v5313_v39  ;;  %v1289_v57 = vpop.f32.mrf.mxu0  ;;  %4257 = vmatprep.mubr.msk.f32.mxu1 %vm406_vm1, %v6320_v28  ;;  %v6327_v22 = vld [vmem:[#allocation31_spill] sm:$0xff]  ;;  %v6330_v28 = vld [vmem:[#allocation33_spill] sm:$0xff] }
 0x11d   : > { %v916_v35 = vpop.f32.mrf.mxu1 }
 0x11e   : > { %v5571_v26 = vadd.f32 %v3996_v34, %v922_v62  ;;  %v917_v42 = vadd.f32 %v916_v35, %v5323_v7  ;;  %v3999_v50 = vpop.f32.mrf.mxu0  ;;  %4310 = vmatmul.mubr.msk.f32.gmra.mxu0 %vm406_vm1, %v6294_v4  ;;  %v6329_v62 = vld [vmem:[#allocation18_spill] sm:$0xff] }
 0x11f   : > { %v3947_v51 = vpop.f32.mrf.mxu1  ;;  %4258 = vmatmul.mubr.msk.f32.gmra.mxu1 %vm406_vm1, %v6321_v46  ;;  %4312 = vmatprep.mubr.msk.f32.mxu0 %vm406_vm1, %v5000_v40  ;;  %v6331_v35 = vld [vmem:[#allocation14_spill] sm:$0xff]  ;;  %v6333_v46 = vld [vmem:[#allocation23_spill] sm:$0xff] }
 0x120   : > { %v5580_v39 = vadd.f32 %v1289_v57, %v917_v42  ;;  %v932_v45 = vadd.f32 %v3947_v51, %v5329_v56  ;;  %v1299_v8 = vpop.f32.mrf.mxu0  ;;  %4260 = vmatprep.mubr.msk.f32.mxu1 %vm406_vm1, %v6322_v53 }
 0x121   : > { %v926_v7 = vpop.f32.mrf.mxu1 }
 0x122   : > { %v5585_v0 = vadd.f32 %v3999_v50, %v932_v45  ;;  %v927_v4 = vadd.f32 %v926_v7, %v5339_v23  ;;  %v4002_v41 = vpop.f32.mrf.mxu0  ;;  %4313 = vmatmul.mubr.msk.f32.gmra.mxu0 %vm406_vm1, %v5011_v61  ;;  %v2464_v7 = vsel %vm322_vm0, %v2462_v55, %v2463_v19 }
 0x123   : > { %v3950_v6 = vpop.f32.mrf.mxu1  ;;  %4261 = vmatmul.mubr.msk.f32.gmra.mxu1 %vm406_vm1, %v6323_v63  ;;  %4315 = vmatprep.mubr.msk.f32.mxu0 %vm406_vm1, %v5017_v59  ;;  %v6325_v59 = vld [vmem:[#allocation29_spill] sm:$0xff] }
 0x124   : > { %v5594_v40 = vadd.f32 %v1299_v8, %v927_v4  ;;  %v942_v56 = vadd.f32 %v3950_v6, %v5345_v10  ;;  %v1309_v54 = vpop.f32.mrf.mxu0  ;;  %4263 = vmatprep.mubr.msk.f32.mxu1 %vm406_vm1, %v6324_v24  ;;  %v2731_v10 = vrot.slane %v5390_v36, 2  ;;  %v6336_v24 = vld [vmem:[#allocation4_spill] sm:$0xff] }
 0x125   : > { %v936_v23 = vpop.f32.mrf.mxu1 }
 0x126   : > { %v5599_v3 = vadd.f32 %v4002_v41, %v942_v56  ;;  %v937_v61 = vadd.f32 %v936_v23, %v5355_v18  ;;  %v4005_v60 = vpop.f32.mrf.mxu0  ;;  %4316 = vmatmul.mubr.msk.f32.gmra.mxu0 %vm406_vm1, %v5028_v2  ;;  %v271_v2 = vld [vmem:[%s4399_s28 + $0x1a8] sm:$0x3]  ;;  %v2733_v45 = vsel %vm985_vm2, %v2731_v10, %v2732_v32  ;;  %v6334_v41 = vld [vmem:[#allocation12_spill] sm:$0xff]  ;;  %v6335_v56 = vld [vmem:[#allocation34_spill] sm:$0xff]  ;;  %s3551_s28 = sshll.u32 %s6426_s16, 8 }
 0x127   : > { %v3953_v20 = vpop.f32.mrf.mxu1  ;;  %4264 = vmatmul.mubr.msk.f32.gmra.mxu1 %vm406_vm1, %v6325_v59  ;;  %4318 = vmatprep.mubr.msk.f32.mxu0 %vm406_vm1, %v5034_v14  ;;  %v6328_v14 = vld [vmem:[#allocation8_spill] sm:$0xff]  ;;  %v2734_v42 = vrot.slane %v271_v2, 2  ;;  %v2465_v8 = vrot.slane %v271_v2, 1  ;;  %s5895_s10 = scalar_lea.vmem %s6129_s3, %s3551_s28  ;;  %s5923_s17 = scalar_lea.vmem %s6130_s4, %s3551_s28 }
 0x128   : > { %v5610_v49 = vadd.f32 %v1309_v54, %v937_v61  ;;  %v952_v15 = vadd.f32 %v3953_v20, %v6326_v29  ;;  %v1319_v18 = vpop.f32.mrf.mxu0  ;;  %4266 = vmatprep.mubr.msk.f32.mxu1 %vm406_vm1, %v6327_v22 }
 0x129   : > { %v946_v31 = vpop.f32.mrf.mxu1  ;;  %v2735_v23 = vsel %vm985_vm2, %v2732_v32, %v2734_v42  ;;  %v2466_v10 = vsel %vm322_vm0, %v2463_v19, %v2465_v8  ;;  %v6340_v19 = vld [vmem:[#allocation37_spill] sm:$0xff] }
 0x12a   : > { %v5618_v34 = vadd.f32 %v4005_v60, %v952_v15  ;;  %v947_v25 = vadd.f32 %v946_v31, %v6328_v14  ;;  %v4008_v16 = vpop.f32.mrf.mxu0  ;;  %4319 = vmatmul.mubr.msk.f32.gmra.mxu0 %vm406_vm1, %v6329_v62  ;;  %v6337_v60 = vld [vmem:[#allocation19_spill] sm:$0xff]  ;;  %v6339_v31 = vld [vmem:[#allocation36_spill] sm:$0xff] }
 0x12b   : > { %v3956_v57 = vpop.f32.mrf.mxu1  ;;  %4267 = vmatmul.mubr.msk.f32.gmra.mxu1 %vm406_vm1, %v6330_v28  ;;  %4321 = vmatprep.mubr.msk.f32.mxu0 %vm406_vm1, %v6331_v35 }
 0x12c   : > { %v5627_v36 = vadd.f32 %v1319_v18, %v947_v25  ;;  %v962_v50 = vadd.f32 %v3956_v57, %v6332_v37  ;;  %v1329_v51 = vpop.f32.mrf.mxu0  ;;  %4269 = vmatprep.mubr.msk.f32.mxu1 %vm406_vm1, %v6333_v46  ;;  %v6338_v18 = vld [vmem:[#allocation35_spill] sm:$0xff] }
 0x12d   : > { %v956_v53 = vpop.f32.mrf.mxu1 }
 0x12e   : > { %v5634_v4 = vadd.f32 %v4008_v16, %v962_v50  ;;  %v957_v6 = vadd.f32 %v956_v53, %v6334_v41  ;;  %v4011_v63 = vpop.f32.mrf.mxu0  ;;  %4322 = vmatmul.mubr.msk.f32.gmra.mxu0 %vm406_vm1, %v6335_v56 }
 0x12f   : > { %v3959_v54 = vpop.f32.mrf.mxu1  ;;  %4270 = vmatmul.mubr.msk.f32.gmra.mxu1 %vm406_vm1, %v6336_v24  ;;  %4324 = vmatprep.mubr.msk.f32.mxu0 %vm406_vm1, %v2733_v45 }
 0x130   : > { %v5643_v61 = vadd.f32 %v1329_v51, %v957_v6  ;;  %v972_v20 = vadd.f32 %v3959_v54, %v6337_v60  ;;  %v1339_v59 = vpop.f32.mrf.mxu0  ;;  %4272 = vmatprep.mubr.msk.f32.mxu1 %vm406_vm1, %v2464_v7 }
 0x131   : > { %v966_v29 = vpop.f32.mrf.mxu1 }
 0x132   : > { %v5648_v15 = vadd.f32 %v4011_v63, %v972_v20  ;;  %v967_v22 = vadd.f32 %v966_v29, %v6338_v18  ;;  %v4014_v2 = vpop.f32.mrf.mxu0  ;;  %4325 = vmatmul.mubr.msk.f32.gmra.mxu0 %vm406_vm1, %v2735_v23 }
 0x133   : > { %v3962_v55 = vpop.f32.mrf.mxu1  ;;  %4273 = vmatmul.mubr.msk.f32.gmra.mxu1 %vm406_vm1, %v2466_v10 }
 0x134   : > { %v5653_v32 = vadd.f32 %v1339_v59, %v967_v22  ;;  %v982_v14 = vadd.f32 %v3962_v55, %v6339_v31  ;;  %v1349_v25 = vpop.f32.mrf.mxu0 }
 0x135   : > { %v976_v16 = vpop.f32.mrf.mxu1 }
 0x136   : > { %v5656_v62 = vadd.f32 %v4014_v2, %v982_v14  ;;  %v977_v57 = vadd.f32 %v976_v16, %v6340_v19  ;;  %v4073_v28 = vpop.f32.mrf.mxu0 }
 0x137   : > { %v4021_v35 = vpop.f32.mrf.mxu1 }
 0x138   : > { %v5659_v42 = vadd.f32 %v1349_v25, %v977_v57  ;;  %v1625_v37 = vadd.f32 %v4021_v35, %v5445_v12  ;;  %v1735_v50 = vpop.f32.mrf.mxu0 }
 0x139   : > { %v1465_v51 = vpop.f32.mrf.mxu1 }
 0x13a   : > { %v5662_v46 = vadd.f32 %v4073_v28, %v1625_v37  ;;  %v1624_v45 = vadd.f32 %v1465_v51, %v5454_v44  ;;  %v4076_v8 = vpop.f32.mrf.mxu0 }
 0x13b   : > { %v4024_v53 = vpop.f32.mrf.mxu1 }
 0x13c   : > { %v5665_v7 = vadd.f32 %v1735_v50, %v1624_v45  ;;  %v1627_v41 = vadd.f32 %v4024_v53, %v5459_v21  ;;  %v1745_v6 = vpop.f32.mrf.mxu0 }
 0x13d   : > { %v1475_v63 = vpop.f32.mrf.mxu1 }
 0x13e   : > { %v5668_v56 = vadd.f32 %v4076_v8, %v1627_v41  ;;  %v1626_v54 = vadd.f32 %v1475_v63, %v5468_v13  ;;  %v4079_v24 = vpop.f32.mrf.mxu0 }
 0x13f   : > { %v4027_v12 = vpop.f32.mrf.mxu1 }
 0x140   : > { %v5671_v23 = vadd.f32 %v1745_v6, %v1626_v54  ;;  %v1629_v60 = vadd.f32 %v4027_v12, %v5473_v33  ;;  %v1755_v20 = vpop.f32.mrf.mxu0 }
 0x141   : > { %v1485_v44 = vpop.f32.mrf.mxu1 }
 0x142   : > { %v5674_v59 = vadd.f32 %v4079_v24, %v1629_v60  ;;  %v1628_v10 = vadd.f32 %v1485_v44, %v5482_v5  ;;  %v4082_v29 = vpop.f32.mrf.mxu0 }
 0x143   : > { %v4030_v21 = vpop.f32.mrf.mxu1 }
 0x144   : > { %v5677_v18 = vadd.f32 %v1755_v20, %v1628_v10  ;;  %v1631_v22 = vadd.f32 %v4030_v21, %v5487_v27  ;;  %v1765_v2 = vpop.f32.mrf.mxu0 }
 0x145   : > { %v1495_v13 = vpop.f32.mrf.mxu1 }
 0x146   : > { %v5680_v55 = vadd.f32 %v4082_v29, %v1631_v22  ;;  %v1630_v31 = vadd.f32 %v1495_v13, %v5496_v52  ;;  %v4085_v14 = vpop.f32.mrf.mxu0 }
 0x147   : > { %v4033_v33 = vpop.f32.mrf.mxu1 }
 0x148   : > { %v5683_v25 = vadd.f32 %v1765_v2, %v1630_v31  ;;  %v1633_v16 = vadd.f32 %v4033_v33, %v5501_v30  ;;  %v1775_v19 = vpop.f32.mrf.mxu0 }
 0x149   : > { %v1505_v5 = vpop.f32.mrf.mxu1 }
 0x14a   : > { %v5686_v57 = vadd.f32 %v4085_v14, %v1633_v16  ;;  %v1632_v28 = vadd.f32 %v1505_v5, %v5510_v11  ;;  %v4088_v35 = vpop.f32.mrf.mxu0 }
 0x14b   : > { %v4036_v27 = vpop.f32.mrf.mxu1 }
 0x14c   : > { %v5689_v37 = vadd.f32 %v1775_v19, %v1632_v28  ;;  %v1635_v50 = vadd.f32 %v4036_v27, %v5515_v58  ;;  %v1785_v51 = vpop.f32.mrf.mxu0 }
 0x14d   : > { %v1515_v52 = vpop.f32.mrf.mxu1 }
 0x14e   : > { %v5692_v45 = vadd.f32 %v4088_v35, %v1635_v50  ;;  %v1634_v8 = vadd.f32 %v1515_v52, %v5524_v1  ;;  %v4091_v53 = vpop.f32.mrf.mxu0 }
 0x14f   : > { %v4039_v30 = vpop.f32.mrf.mxu1 }
 0x150   : > { %v5695_v41 = vadd.f32 %v1785_v51, %v1634_v8  ;;  %v1637_v6 = vadd.f32 %v4039_v30, %v5529_v48  ;;  %v1795_v63 = vpop.f32.mrf.mxu0 }
 0x151   : > { %v1525_v11 = vpop.f32.mrf.mxu1 }
 0x152   : > { %v5698_v54 = vadd.f32 %v4091_v53, %v1637_v6  ;;  %v1636_v24 = vadd.f32 %v1525_v11, %v5538_v17  ;;  %v4094_v12 = vpop.f32.mrf.mxu0 }
 0x153   : > { %v4042_v58 = vpop.f32.mrf.mxu1 }
 0x154   : > { %v5701_v60 = vadd.f32 %v1795_v63, %v1636_v24  ;;  %v1639_v20 = vadd.f32 %v4042_v58, %v5543_v47  ;;  %v1805_v44 = vpop.f32.mrf.mxu0 }
 0x155   : > { %v1535_v1 = vpop.f32.mrf.mxu1 }
 0x156   : > { %v5704_v10 = vadd.f32 %v4094_v12, %v1639_v20  ;;  %v1638_v29 = vadd.f32 %v1535_v1, %v5552_v38  ;;  %v4097_v21 = vpop.f32.mrf.mxu0 }
 0x157   : > { %v4045_v48 = vpop.f32.mrf.mxu1 }
 0x158   : > { %v5707_v22 = vadd.f32 %v1805_v44, %v1638_v29  ;;  %v1641_v2 = vadd.f32 %v4045_v48, %v5557_v43  ;;  %v1815_v13 = vpop.f32.mrf.mxu0 }
 0x159   : > { %v1545_v17 = vpop.f32.mrf.mxu1 }
 0x15a   : > { %v5710_v31 = vadd.f32 %v4097_v21, %v1641_v2  ;;  %v1640_v14 = vadd.f32 %v1545_v17, %v5566_v9  ;;  %v4100_v33 = vpop.f32.mrf.mxu0 }
 0x15b   : > { %v4048_v47 = vpop.f32.mrf.mxu1 }
 0x15c   : > { %v5713_v16 = vadd.f32 %v1815_v13, %v1640_v14  ;;  %v1643_v19 = vadd.f32 %v4048_v47, %v5571_v26  ;;  %v1825_v5 = vpop.f32.mrf.mxu0 }
 0x15d   : > { %v1555_v38 = vpop.f32.mrf.mxu1 }
 0x15e   : > { %v5716_v28 = vadd.f32 %v4100_v33, %v1643_v19  ;;  %v1642_v35 = vadd.f32 %v1555_v38, %v5580_v39  ;;  %v4103_v27 = vpop.f32.mrf.mxu0 }
 0x15f   : > { %v4051_v43 = vpop.f32.mrf.mxu1 }
 0x160   : > { %6341 = vst [vmem:[#allocation38_spill] sm:$0xff] %v5716_v28  ;;  %v5719_v50 = vadd.f32 %v1825_v5, %v1642_v35  ;;  %v1645_v51 = vadd.f32 %v4051_v43, %v5585_v0  ;;  %v1835_v52 = vpop.f32.mrf.mxu0 }
 0x161   : > { %v1565_v9 = vpop.f32.mrf.mxu1 }
 0x162   : > { %6342 = vst [vmem:[#allocation39_spill] sm:$0xff] %v5719_v50  ;;  %v5722_v8 = vadd.f32 %v4103_v27, %v1645_v51  ;;  %v1644_v53 = vadd.f32 %v1565_v9, %v5594_v40  ;;  %v4106_v30 = vpop.f32.mrf.mxu0 }
 0x163   : > { %v4054_v26 = vpop.f32.mrf.mxu1 }
 0x164   : > { %6343 = vst [vmem:[#allocation40_spill] sm:$0xff] %v5722_v8  ;;  %v5725_v6 = vadd.f32 %v1835_v52, %v1644_v53  ;;  %v1647_v63 = vadd.f32 %v4054_v26, %v5599_v3  ;;  %v1845_v11 = vpop.f32.mrf.mxu0 }
 0x165   : > { %v1575_v39 = vpop.f32.mrf.mxu1 }
 0x166   : > { %6344 = vst [vmem:[#allocation41_spill] sm:$0xff] %v5725_v6  ;;  %v5728_v24 = vadd.f32 %v4106_v30, %v1647_v63  ;;  %v1646_v12 = vadd.f32 %v1575_v39, %v5610_v49  ;;  %v4109_v58 = vpop.f32.mrf.mxu0 }
 0x167   : > { %v4057_v0 = vpop.f32.mrf.mxu1 }
 0x168   : > { %6345 = vst [vmem:[#allocation42_spill] sm:$0xff] %v5728_v24  ;;  %v5731_v20 = vadd.f32 %v1845_v11, %v1646_v12  ;;  %v1649_v44 = vadd.f32 %v4057_v0, %v5618_v34  ;;  %v1855_v1 = vpop.f32.mrf.mxu0 }
 0x169   : > { %v1585_v40 = vpop.f32.mrf.mxu1 }
 0x16a   : > { %6346 = vst [vmem:[#allocation43_spill] sm:$0xff] %v5731_v20  ;;  %v5734_v29 = vadd.f32 %v4109_v58, %v1649_v44  ;;  %v1648_v21 = vadd.f32 %v1585_v40, %v5627_v36  ;;  %v4112_v48 = vpop.f32.mrf.mxu0 }
 0x16b   : > { %v4060_v3 = vpop.f32.mrf.mxu1 }
 0x16c   : > { %6347 = vst [vmem:[#allocation44_spill] sm:$0xff] %v5734_v29  ;;  %v5737_v2 = vadd.f32 %v1855_v1, %v1648_v21  ;;  %v1651_v13 = vadd.f32 %v4060_v3, %v5634_v4  ;;  %v1865_v17 = vpop.f32.mrf.mxu0 }
 0x16d   : > { %v1595_v49 = vpop.f32.mrf.mxu1 }
 0x16e   : > { %6348 = vst [vmem:[#allocation16_spill] sm:$0xff] %v5737_v2  ;;  %v5740_v14 = vadd.f32 %v4112_v48, %v1651_v13  ;;  %v1650_v33 = vadd.f32 %v1595_v49, %v5643_v61  ;;  %v4115_v47 = vpop.f32.mrf.mxu0 }
 0x16f   : > { %v4063_v34 = vpop.f32.mrf.mxu1 }
 0x170   : > { %6349 = vst [vmem:[#allocation21_spill] sm:$0xff] %v5740_v14  ;;  %v5743_v19 = vadd.f32 %v1865_v17, %v1650_v33  ;;  %v1653_v5 = vadd.f32 %v4063_v34, %v5648_v15  ;;  %v1875_v38 = vpop.f32.mrf.mxu0 }
 0x171   : > { %v1605_v36 = vpop.f32.mrf.mxu1 }
 0x172   : > { %6350 = vst [vmem:[#allocation24_spill] sm:$0xff] %v5743_v19  ;;  %v5746_v35 = vadd.f32 %v4115_v47, %v1653_v5  ;;  %v1652_v27 = vadd.f32 %v1605_v36, %v5653_v32  ;;  %v4118_v43 = vpop.f32.mrf.mxu0 }
 0x173   : > { %v4066_v4 = vpop.f32.mrf.mxu1 }
 0x174   : > { %6351 = vst [vmem:[#allocation26_spill] sm:$0xff] %v5746_v35  ;;  %v5749_v51 = vadd.f32 %v1875_v38, %v1652_v27  ;;  %v1655_v52 = vadd.f32 %v4066_v4, %v5656_v62  ;;  %v1885_v9 = vpop.f32.mrf.mxu0 }
 0x175   : > { %v1615_v61 = vpop.f32.mrf.mxu1 }
 0x176   : > { %6352 = vst [vmem:[#allocation28_spill] sm:$0xff] %v5749_v51  ;;  %v5752_v53 = vadd.f32 %v4118_v43, %v1655_v52  ;;  %v1654_v30 = vadd.f32 %v1615_v61, %v5659_v42  ;;  %v5755_v26 = vpop.f32.mrf.mxu0 }
 0x177   : > { %v4125_v15 = vpop.f32.mrf.mxu1 }
 0x178   : > { %6353 = vst [vmem:[#allocation30_spill] sm:$0xff] %v5752_v53  ;;  %v5757_v63 = vadd.f32 %v1885_v9, %v1654_v30  ;;  %v5759_v11 = vpop.f32.mrf.mxu0 }
 0x179   : > { %v2004_v32 = vpop.f32.mrf.mxu1 }
 0x17a   : > { %6354 = vst [vmem:[#allocation32_spill] sm:$0xff] %v5757_v63  ;;  %v5761_v39 = vpop.f32.mrf.mxu0 }
 0x17b   : > { %v5763_v12 = vpop.f32.mrf.mxu1 }
 0x17c   : > { %v5765_v58 = vpop.f32.mrf.mxu0 }
 0x17d   : > { %v5767_v62 = vpop.f32.mrf.mxu1 }
 0x17e   : > { %v5769_v0 = vpop.f32.mrf.mxu0 }
 0x17f   : > { %v5771_v44 = vpop.f32.mrf.mxu1 }
 0x180   : > { %v5773_v42 = vpop.f32.mrf.mxu0 }
 0x181   : > { %v5775_v1 = vpop.f32.mrf.mxu1 }
 0x182   : > { %v5777_v40 = vpop.f32.mrf.mxu0 }
 0x183   : > { %v5779_v21 = vpop.f32.mrf.mxu1 }
 0x184   : > { %v5781_v48 = vpop.f32.mrf.mxu0 }
 0x185   : > { %v5783_v3 = vpop.f32.mrf.mxu1 }
 0x186   : > { %v5785_v13 = vpop.f32.mrf.mxu0 }
 0x187   : > { %v5787_v17 = vpop.f32.mrf.mxu1 }
 0x188   : > { %v5789_v49 = vpop.f32.mrf.mxu0 }
 0x189   : > { %v5791_v33 = vpop.f32.mrf.mxu1 }
 0x18a   : > { %v5793_v47 = vpop.f32.mrf.mxu0 }
 0x18b   : > { %v5795_v34 = vpop.f32.mrf.mxu1 }
 0x18c   : > { %v5797_v5 = vpop.f32.mrf.mxu0 }
 0x18d   : > { %v5799_v38 = vpop.f32.mrf.mxu1 }
 0x18e   : > { %v5801_v36 = vpop.f32.mrf.mxu0 }
 0x18f   : > { %v5803_v27 = vpop.f32.mrf.mxu1 }
 0x190   : > { %v5805_v43 = vpop.f32.mrf.mxu0 }
 0x191   : > { %v5807_v4 = vpop.f32.mrf.mxu1 }
 0x192   : > { %v5809_v52 = vpop.f32.mrf.mxu0 }
 0x193   : > { %v5811_v9 = vpop.f32.mrf.mxu1 }
 0x194   : > { %v5813_v61 = vpop.f32.mrf.mxu0 }
 0x195   : > { %v5815_v30 = vpop.f32.mrf.mxu1 }
 0x196   : > { %v5817_v63 = vpop.f32.mrf.mxu0 }
 0x197   : > { %v5819_v53 = vpop.f32.mrf.mxu1 }
 0x198   : > { %v5821_v51 = vpop.f32.mrf.mxu0 }
 0x199   : > { %6355 = vst [vmem:[#allocation2_spill] sm:$0xff] %v5821_v51  ;;  %v5823_v35 = vpop.f32.mrf.mxu1 }
 0x19a   : > { %v5825_v19 = vpop.f32.mrf.mxu0 }
 0x19b   : > { %6356 = vst [vmem:[#allocation3_spill] sm:$0xff] %v5825_v19  ;;  %v5827_v14 = vpop.f32.mrf.mxu1 }
 0x19c   : > { %6357 = vst [vmem:[#allocation5_spill] sm:$0xff] %v5827_v14  ;;  %v5829_v2 = vpop.f32.mrf.mxu0 }
 0x19d   : > { %6358 = vst [vmem:[#allocation7_spill] sm:$0xff] %v5829_v2  ;;  %v5831_v29 = vpop.f32.mrf.mxu1 }
 0x19e   : > { %6359 = vst [vmem:[#allocation9_spill] sm:$0xff] %v5831_v29  ;;  %v5833_v20 = vpop.f32.mrf.mxu0 }
 0x19f   : > { %6360 = vst [vmem:[#allocation11_spill] sm:$0xff] %v5833_v20  ;;  %v5835_v24 = vpop.f32.mrf.mxu1 }
 0x1a0   : > { %v5837_v6 = vpop.f32.mrf.mxu0 }
 0x1a1   : > { %6361 = vst [vmem:[#allocation13_spill] sm:$0xff] %v5837_v6  ;;  %v5839_v8 = vpop.f32.mrf.mxu1 }
 0x1a2   : > { %6362 = vst [vmem:[#allocation15_spill] sm:$0xff] %v5839_v8  ;;  %v5841_v50 = vpop.f32.mrf.mxu0 }
 0x1a3   : > { %6363 = vst [vmem:[#allocation17_spill] sm:$0xff] %v5841_v50  ;;  %v5843_v51 = vpop.f32.mrf.mxu1 }
 0x1a4   : > { %6364 = vst [vmem:[#allocation20_spill] sm:$0xff] %v5843_v51  ;;  %v5845_v28 = vpop.f32.mrf.mxu0 }
 0x1a5   : > { %6365 = vst [vmem:[#allocation22_spill] sm:$0xff] %v5845_v28  ;;  %v5847_v19 = vpop.f32.mrf.mxu1 }
 0x1a6   : > { %6366 = vst [vmem:[#allocation25_spill] sm:$0xff] %v5847_v19  ;;  %v5849_v14 = vpop.f32.mrf.mxu0 }
 0x1a7   : > { %6367 = vst [vmem:[#allocation27_spill] sm:$0xff] %v5849_v14  ;;  %v5851_v2 = vpop.f32.mrf.mxu1 }
 0x1a8   : > { %6368 = vst [vmem:[#allocation29_spill] sm:$0xff] %v5851_v2  ;;  %v5853_v29 = vpop.f32.mrf.mxu0 }
 0x1a9   : > { %6369 = vst [vmem:[#allocation6_spill] sm:$0xff] %v5853_v29  ;;  %v5855_v20 = vpop.f32.mrf.mxu1  ;;  %v2164_v29 = vadd.f32 %v4125_v15, %v5662_v46  ;;  %v2165_v15 = vadd.f32 %v5767_v62, %v5671_v23 }
 0x1aa   : > { %6370 = vst [vmem:[#allocation31_spill] sm:$0xff] %v5855_v20  ;;  %v5857_v6 = vpop.f32.mrf.mxu0 }
 0x1ab   : > { %6371 = vst [vmem:[#allocation8_spill] sm:$0xff] %v5857_v6  ;;  %v5859_v8 = vpop.f32.mrf.mxu1  ;;  %v2431_v62 = vadd.f32 %v5765_v58, %v2165_v15 }
 0x1ac   : > { %6372 = vst [vmem:[#allocation18_spill] sm:$0xff] %v5859_v8  ;;  %v5861_v50 = vpop.f32.mrf.mxu0  ;;  %v2163_v8 = vadd.f32 %v2004_v32, %v5665_v7  ;;  %v3040_v32 = vld [vmem:[%s5895_s10 + $0x8] sm:$0xff] }
 0x1ad   : > { %6373 = vst [vmem:[#allocation33_spill] sm:$0xff] %v5861_v50  ;;  %v5863_v51 = vpop.f32.mrf.mxu1 }
 0x1ae   : > { %6374 = vst [vmem:[#allocation14_spill] sm:$0xff] %v5863_v51  ;;  %v5865_v28 = vpop.f32.mrf.mxu0  ;;  %v2429_v46 = vadd.f32 %v5759_v11, %v2163_v8  ;;  %v2167_v11 = vadd.f32 %v5775_v1, %v5677_v18 }
 0x1af   : > { %6375 = vst [vmem:[#allocation10_spill] sm:$0xff] %v5865_v28  ;;  %v5867_v19 = vpop.f32.mrf.mxu1  ;;  %v2430_v28 = vadd.f32 %v5755_v26, %v2164_v29 }
 0x1b0   : > { %6376 = vst [vmem:[#allocation23_spill] sm:$0xff] %v5867_v19  ;;  %v5869_v14 = vpop.f32.mrf.mxu0  ;;  %v2433_v15 = vadd.f32 %v5773_v42, %v2167_v11 }
 0x1b1   : > { %6377 = vst [vmem:[#allocation12_spill] sm:$0xff] %v5869_v14  ;;  %v5871_v2 = vpop.f32.mrf.mxu1  ;;  %v2166_v14 = vadd.f32 %v5763_v12, %v5668_v56  ;;  %v5900_v56 = vld [vmem:[%s6128_s2] ss:$0 sm:$0xff] }
 0x1b2   : > { %6378 = vst [vmem:[#allocation34_spill] sm:$0xff] %v5871_v2  ;;  %v5874_v20 = vpop.f32.mrf.mxu0 }
 0x1b3   : > { %6379 = vst [vmem:[#allocation4_spill] sm:$0xff] %v5874_v20  ;;  %v5876_v6 = vpop.f32.mrf.mxu1  ;;  %v2432_v8 = vadd.f32 %v5761_v39, %v2166_v14 }
 0x1b4   : > { %6380 = vst [vmem:[#allocation19_spill] sm:$0xff] %v5876_v6  ;;  %v5879_v50 = vpop.f32.mrf.mxu0 }
 0x1b5   : > { %6381 = vst [vmem:[#allocation35_spill] sm:$0xff] %v5879_v50  ;;  %v5881_v51 = vpop.f32.mrf.mxu1 }
 0x1b6   : > { %6382 = vst [vmem:[#allocation36_spill] sm:$0xff] %v5881_v51  ;;  %v4281_v19 = vpop.f32.mrf.mxu0 }
 0x1b7   : > { %v4229_v2 = vpop.f32.mrf.mxu1 }
 0x1b8   : > { %v2700_v20 = vadd.f32 %v4229_v2, %v2430_v28  ;;  %v2809_v7 = vpop.f32.mrf.mxu0  ;;  %v2168_v2 = vadd.f32 %v5771_v44, %v5674_v59 }
 0x1b9   : > { %v2540_v29 = vpop.f32.mrf.mxu1 }
 0x1ba   : > { %v2969_v26 = vadd.f32 %v4281_v19, %v2700_v20  ;;  %v2699_v23 = vadd.f32 %v2540_v29, %v2429_v46  ;;  %v4284_v28 = vpop.f32.mrf.mxu0  ;;  %v2170_v20 = vadd.f32 %v5779_v21, %v5680_v55  ;;  %v3039_v19 = vld [vmem:[%s5895_s10] sm:$0xff]  ;;  %v2434_v58 = vadd.f32 %v5769_v0, %v2168_v2  ;;  %v3042_v55 = vld [vmem:[%s5895_s10 + $0x18] sm:$0xff] }
 0x1bb   : > { %v4232_v12 = vpop.f32.mrf.mxu1 }
 0x1bc   : > { %v3008_v50 = vadd.f32 %v5900_v56, %v2969_v26  ;;  %v2968_v51 = vadd.f32 %v2809_v7, %v2699_v23  ;;  %v2702_v6 = vadd.f32 %v4232_v12, %v2432_v8  ;;  %v2819_v14 = vpop.f32.mrf.mxu0  ;;  %v2169_v7 = vadd.f32 %v5783_v3, %v5683_v25  ;;  %v3041_v3 = vld [vmem:[%s5895_s10 + $0x10] sm:$0xff] }
 0x1bd   : > { %v2550_v39 = vpop.f32.mrf.mxu1  ;;  %v2436_v42 = vadd.f32 %v5777_v40, %v2170_v20  ;;  %v2172_v25 = vadd.f32 %v5787_v17, %v5686_v57 }
 0x1be   : > { %v3072_v59 = vadd.f32 %v3040_v32, %v3008_v50  ;;  %v3007_v44 = vadd.f32 %v5900_v56, %v2968_v51  ;;  %v2971_v18 = vadd.f32 %v4284_v28, %v2702_v6  ;;  %v2701_v1 = vadd.f32 %v2550_v39, %v2431_v62  ;;  %v4287_v46 = vpop.f32.mrf.mxu0 }
 0x1bf   : > { %v4235_v50 = vpop.f32.mrf.mxu1  ;;  %v2435_v12 = vadd.f32 %v5781_v48, %v2169_v7  ;;  %v2174_v48 = vadd.f32 %v5795_v34, %v5692_v45 }
 0x1c0   : > { %v3104_v6 = vmax.f32 %v3072_v59, 0.0  ;;  %v3071_v51 = vadd.f32 %v3039_v19, %v3007_v44  ;;  %v3010_v21 = vadd.f32 %v5900_v56, %v2971_v18  ;;  %v2970_v29 = vadd.f32 %v2819_v14, %v2701_v1  ;;  %v2829_v0 = vpop.f32.mrf.mxu0  ;;  %v3044_v14 = vld [vmem:[%s5895_s10 + $0x28] sm:$0xff]  ;;  %v3043_v1 = vld [vmem:[%s5895_s10 + $0x20] sm:$0xff] }
 0x1c1   : > { %v2704_v8 = vadd.f32 %v4235_v50, %v2434_v58  ;;  %v2560_v26 = vpop.f32.mrf.mxu1  ;;  %v2438_v59 = vadd.f32 %v5785_v13, %v2172_v25  ;;  %v2171_v44 = vadd.f32 %v5791_v33, %v5689_v37  ;;  %v2173_v50 = vadd.f32 %v5799_v38, %v5695_v41  ;;  %v3046_v33 = vld [vmem:[%s5895_s10 + $0x38] sm:$0xff]  ;;  %v3045_v25 = vld [vmem:[%s5895_s10 + $0x30] sm:$0xff] }
 0x1c2   : > { %3136 = vst.msk [vmem:[%s5923_s17 + $0x8] sm:$0xff] %vm406_vm1, %v3104_v6  ;;  %v3103_v23 = vmax.f32 %v3071_v51, 0.0  ;;  %v3074_v28 = vadd.f32 %v3042_v55, %v3010_v21  ;;  %v3009_v2 = vadd.f32 %v5900_v56, %v2970_v29  ;;  %v2703_v11 = vadd.f32 %v2560_v26, %v2433_v15  ;;  %v4290_v32 = vpop.f32.mrf.mxu0 }
 0x1c3   : > { %v2973_v40 = vadd.f32 %v4287_v46, %v2704_v8  ;;  %v4238_v62 = vpop.f32.mrf.mxu1  ;;  %v2176_v41 = vadd.f32 %v5803_v27, %v5698_v54 }
 0x1c4   : > { %3135 = vst.msk [vmem:[%s5923_s17] sm:$0xff] %vm406_vm1, %v3103_v23  ;;  %v3106_v57 = vmax.f32 %v3074_v28, 0.0  ;;  %v3073_v17 = vadd.f32 %v3041_v3, %v3009_v2  ;;  %v2972_v20 = vadd.f32 %v2829_v0, %v2703_v11  ;;  %v2706_v19 = vadd.f32 %v4238_v62, %v2436_v42  ;;  %v2839_v39 = vpop.f32.mrf.mxu0 }
 0x1c5   : > { %v3012_v18 = vadd.f32 %v5900_v56, %v2973_v40  ;;  %v2570_v46 = vpop.f32.mrf.mxu1  ;;  %v2437_v0 = vadd.f32 %v5789_v49, %v2171_v44  ;;  %v2440_v42 = vadd.f32 %v5793_v47, %v2174_v48  ;;  %v2439_v11 = vadd.f32 %v5797_v5, %v2173_v50  ;;  %v3048_v47 = vld [vmem:[%s5895_s10 + $0x48] sm:$0xff] }
 0x1c6   : > { %3138 = vst.msk [vmem:[%s5923_s17 + $0x18] sm:$0xff] %vm406_vm1, %v3106_v57  ;;  %v3105_v58 = vmax.f32 %v3073_v17, 0.0  ;;  %v3011_v15 = vadd.f32 %v5900_v56, %v2972_v20  ;;  %v2975_v7 = vadd.f32 %v4290_v32, %v2706_v19  ;;  %v2705_v55 = vadd.f32 %v2570_v46, %v2435_v12  ;;  %v4293_v13 = vpop.f32.mrf.mxu0  ;;  %v3047_v20 = vld [vmem:[%s5895_s10 + $0x40] sm:$0xff] }
 0x1c7   : > { %v3076_v37 = vadd.f32 %v3044_v14, %v3012_v18  ;;  %v4241_v6 = vpop.f32.mrf.mxu1  ;;  %v2175_v49 = vadd.f32 %v5807_v4, %v5701_v60  ;;  %v2442_v5 = vadd.f32 %v5801_v36, %v2176_v41  ;;  %v2178_v48 = vadd.f32 %v5811_v9, %v5704_v10  ;;  %v3049_v9 = vld [vmem:[%s5895_s10 + $0x50] sm:$0xff] }
 0x1c8   : > { %3137 = vst.msk [vmem:[%s5923_s17 + $0x10] sm:$0xff] %vm406_vm1, %v3105_v58  ;;  %v3075_v45 = vadd.f32 %v3043_v1, %v3011_v15  ;;  %v3014_v34 = vadd.f32 %v5900_v56, %v2975_v7  ;;  %v2974_v51 = vadd.f32 %v2839_v39, %v2705_v55  ;;  %v2708_v21 = vadd.f32 %v4241_v6, %v2438_v59  ;;  %v2849_v29 = vpop.f32.mrf.mxu0  ;;  %v3050_v1 = vld [vmem:[%s5895_s10 + $0x58] sm:$0xff] }
 0x1c9   : > { %v3108_v38 = vmax.f32 %v3076_v37, 0.0  ;;  %v2580_v3 = vpop.f32.mrf.mxu1  ;;  %v2441_v44 = vadd.f32 %v5805_v43, %v2175_v49  ;;  %v2177_v36 = vadd.f32 %v5815_v30, %v5707_v22  ;;  %v6385_v49 = vld [vmem:[#allocation2_spill] sm:$0xff] }
 0x1ca   : > { %v3107_v8 = vmax.f32 %v3075_v45, 0.0  ;;  %v3078_v26 = vadd.f32 %v3046_v33, %v3014_v34  ;;  %v3013_v23 = vadd.f32 %v5900_v56, %v2974_v51  ;;  %v2977_v28 = vadd.f32 %v4293_v13, %v2708_v21  ;;  %v4296_v2 = vpop.f32.mrf.mxu0  ;;  %v3052_v51 = vld [vmem:[%s5895_s10 + $0x68] sm:$0xff] }
 0x1cb   : > { %3140 = vst.msk [vmem:[%s5923_s17 + $0x28] sm:$0xff] %vm406_vm1, %v3108_v38  ;;  %v2707_v54 = vadd.f32 %v2580_v3, %v2437_v0  ;;  %v4244_v27 = vpop.f32.mrf.mxu1  ;;  %v2180_v13 = vadd.f32 %v5819_v53, %v5710_v31  ;;  %v2444_v45 = vadd.f32 %v5809_v52, %v2178_v48  ;;  %v2443_v34 = vadd.f32 %v5813_v61, %v2177_v36  ;;  %v6383_v3 = vld [vmem:[#allocation38_spill] sm:$0xff]  ;;  %v6384_v52 = vld [vmem:[#allocation5_spill] sm:$0xff] }
 0x1cc   : > { %3139 = vst.msk [vmem:[%s5923_s17 + $0x20] sm:$0xff] %vm406_vm1, %v3107_v8  ;;  %v3110_v32 = vmax.f32 %v3078_v26, 0.0  ;;  %v3077_v12 = vadd.f32 %v3045_v25, %v3013_v23  ;;  %v3016_v40 = vadd.f32 %v5900_v56, %v2977_v28  ;;  %v2710_v62 = vadd.f32 %v4244_v27, %v2440_v42  ;;  %v2859_v57 = vpop.f32.mrf.mxu0  ;;  %v3051_v61 = vld [vmem:[%s5895_s10 + $0x60] sm:$0xff] }
 0x1cd   : > { %v2976_v17 = vadd.f32 %v2849_v29, %v2707_v54  ;;  %v2590_v60 = vpop.f32.mrf.mxu1  ;;  %v2179_v31 = vadd.f32 %v5823_v35, %v5713_v16  ;;  %v2446_v25 = vadd.f32 %v5817_v63, %v2180_v13  ;;  %v2182_v8 = vadd.f32 %v6384_v52, %v6383_v3  ;;  %v6397_v52 = vld [vmem:[#allocation43_spill] sm:$0xff] }
 0x1ce   : > { %3142 = vst.msk [vmem:[%s5923_s17 + $0x38] sm:$0xff] %vm406_vm1, %v3110_v32  ;;  %v3109_v4 = vmax.f32 %v3077_v12, 0.0  ;;  %v3080_v14 = vadd.f32 %v3048_v47, %v3016_v40  ;;  %v2979_v19 = vadd.f32 %v4296_v2, %v2710_v62  ;;  %v2709_v39 = vadd.f32 %v2590_v60, %v2439_v11  ;;  %v4299_v59 = vpop.f32.mrf.mxu0  ;;  %v3054_v12 = vld [vmem:[%s5895_s10 + $0x78] sm:$0xff]  ;;  %v6387_v60 = vld [vmem:[#allocation39_spill] sm:$0xff] }
 0x1cf   : > { %v3015_v18 = vadd.f32 %v5900_v56, %v2976_v17  ;;  %v4247_v46 = vpop.f32.mrf.mxu1  ;;  %v2445_v63 = vadd.f32 %v6385_v49, %v2179_v31 }
 0x1d0   : > { %3141 = vst.msk [vmem:[%s5923_s17 + $0x30] sm:$0xff] %vm406_vm1, %v3109_v4  ;;  %v3112_v58 = vmax.f32 %v3080_v14, 0.0  ;;  %v3018_v15 = vadd.f32 %v5900_v56, %v2979_v19  ;;  %v2978_v7 = vadd.f32 %v2859_v57, %v2709_v39  ;;  %v2712_v55 = vadd.f32 %v4247_v46, %v2442_v5  ;;  %v2869_v43 = vpop.f32.mrf.mxu0  ;;  %v6386_v5 = vld [vmem:[#allocation3_spill] sm:$0xff]  ;;  %v6388_v4 = vld [vmem:[#allocation9_spill] sm:$0xff] }
 0x1d1   : > { %v3079_v10 = vadd.f32 %v3047_v20, %v3015_v18  ;;  %v2600_v50 = vpop.f32.mrf.mxu1  ;;  %v2448_v17 = vadd.f32 %v6386_v5, %v2182_v8  ;;  %v2181_v14 = vadd.f32 %v6388_v4, %v6387_v60  ;;  %v6389_v20 = vld [vmem:[#allocation40_spill] sm:$0xff]  ;;  %v6398_v8 = vld [vmem:[#allocation25_spill] sm:$0xff] }
 0x1d2   : > { %3144 = vst.msk [vmem:[%s5923_s17 + $0x48] sm:$0xff] %vm406_vm1, %v3112_v58  ;;  %v3082_v22 = vadd.f32 %v3050_v1, %v3018_v15  ;;  %v3017_v30 = vadd.f32 %v5900_v56, %v2978_v7  ;;  %v2981_v37 = vadd.f32 %v4299_v59, %v2712_v55  ;;  %v2711_v33 = vadd.f32 %v2600_v50, %v2441_v44  ;;  %v4302_v6 = vpop.f32.mrf.mxu0  ;;  %v3053_v59 = vld [vmem:[%s5895_s10 + $0x70] sm:$0xff]  ;;  %v6390_v58 = vld [vmem:[#allocation41_spill] sm:$0xff]  ;;  %v6391_v15 = vld [vmem:[#allocation15_spill] sm:$0xff] }
 0x1d3   : > { %v3111_v53 = vmax.f32 %v3079_v10, 0.0  ;;  %v4250_v21 = vpop.f32.mrf.mxu1  ;;  %v2184_v19 = vadd.f32 %v5835_v24, %v6389_v20  ;;  %v2183_v7 = vadd.f32 %v6391_v15, %v6390_v58  ;;  %v6401_v4 = vld [vmem:[#allocation44_spill] sm:$0xff] }
 0x1d4   : > { %v3114_v29 = vmax.f32 %v3082_v22, 0.0  ;;  %v3081_v0 = vadd.f32 %v3049_v9, %v3017_v30  ;;  %v3020_v42 = vadd.f32 %v5900_v56, %v2981_v37  ;;  %v2980_v41 = vadd.f32 %v2869_v43, %v2711_v33  ;;  %v2879_v38 = vpop.f32.mrf.mxu0  ;;  %v3056_v43 = vld [vmem:[%s5895_s10 + $0x88] sm:$0xff] }
 0x1d5   : > { %3143 = vst.msk [vmem:[%s5923_s17 + $0x40] sm:$0xff] %vm406_vm1, %v3111_v53  ;;  %v2714_v16 = vadd.f32 %v4250_v21, %v2444_v45  ;;  %v2610_v35 = vpop.f32.mrf.mxu1  ;;  %v6392_v30 = vld [vmem:[#allocation7_spill] sm:$0xff]  ;;  %v6394_v45 = vld [vmem:[#allocation42_spill] sm:$0xff] }
 0x1d6   : > { %3146 = vst.msk [vmem:[%s5923_s17 + $0x58] sm:$0xff] %vm406_vm1, %v3114_v29  ;;  %v3113_v26 = vmax.f32 %v3081_v0, 0.0  ;;  %v3084_v23 = vadd.f32 %v3052_v51, %v3020_v42  ;;  %v3019_v28 = vadd.f32 %v5900_v56, %v2980_v41  ;;  %v2713_v2 = vadd.f32 %v2610_v35, %v2443_v34  ;;  %v4305_v11 = vpop.f32.mrf.mxu0  ;;  %v6393_v33 = vld [vmem:[#allocation11_spill] sm:$0xff]  ;;  %v6395_v34 = vld [vmem:[#allocation20_spill] sm:$0xff]  ;;  %v3055_v51 = vld [vmem:[%s5895_s10 + $0x80] sm:$0xff] }
 0x1d7   : > { %v2983_v47 = vadd.f32 %v4302_v6, %v2714_v16  ;;  %v4253_v54 = vpop.f32.mrf.mxu1  ;;  %v2447_v37 = vadd.f32 %v6392_v30, %v2181_v14  ;;  %v2450_v6 = vadd.f32 %v6393_v33, %v2184_v19  ;;  %v2186_v31 = vadd.f32 %v6395_v34, %v6394_v45  ;;  %v3058_v16 = vld [vmem:[%s5895_s10 + $0x98] sm:$0xff]  ;;  %v6403_v19 = vld [vmem:[#allocation16_spill] sm:$0xff]  ;;  %v6407_v33 = vld [vmem:[#allocation27_spill] sm:$0xff] }
 0x1d8   : > { %3145 = vst.msk [vmem:[%s5923_s17 + $0x50] sm:$0xff] %vm406_vm1, %v3113_v26  ;;  %v3116_v27 = vmax.f32 %v3084_v23, 0.0  ;;  %v3083_v32 = vadd.f32 %v3051_v61, %v3019_v28  ;;  %v2982_v40 = vadd.f32 %v2879_v38, %v2713_v2  ;;  %v2716_v62 = vadd.f32 %v4253_v54, %v2446_v25  ;;  %v2889_v57 = vpop.f32.mrf.mxu0  ;;  %v6396_v25 = vld [vmem:[#allocation13_spill] sm:$0xff]  ;;  %v6408_v45 = vld [vmem:[#allocation6_spill] sm:$0xff] }
 0x1d9   : > { %v3022_v39 = vadd.f32 %v5900_v56, %v2983_v47  ;;  %v2620_v44 = vpop.f32.mrf.mxu1  ;;  %v2449_v3 = vadd.f32 %v6396_v25, %v2183_v7  ;;  %v2185_v61 = vadd.f32 %v6398_v8, %v6397_v52  ;;  %v6402_v14 = vld [vmem:[#allocation29_spill] sm:$0xff]  ;;  %v6411_v52 = vld [vmem:[#allocation8_spill] sm:$0xff] }
 0x1da   : > { %3148 = vst.msk [vmem:[%s5923_s17 + $0x68] sm:$0xff] %vm406_vm1, %v3116_v27  ;;  %v3115_v48 = vmax.f32 %v3083_v32, 0.0  ;;  %v3021_v36 = vadd.f32 %v5900_v56, %v2982_v40  ;;  %v2985_v18 = vadd.f32 %v4305_v11, %v2716_v62  ;;  %v2715_v1 = vadd.f32 %v2620_v44, %v2445_v63  ;;  %v4308_v46 = vpop.f32.mrf.mxu0  ;;  %v6399_v63 = vld [vmem:[#allocation17_spill] sm:$0xff]  ;;  %v3057_v40 = vld [vmem:[%s5895_s10 + $0x90] sm:$0xff] }
 0x1db   : > { %v3086_v55 = vadd.f32 %v3054_v12, %v3022_v39  ;;  %v4256_v13 = vpop.f32.mrf.mxu1  ;;  %v2452_v47 = vadd.f32 %v6399_v63, %v2186_v31  ;;  %v2188_v20 = vadd.f32 %v6402_v14, %v6401_v4  ;;  %v6404_v39 = vld [vmem:[#allocation31_spill] sm:$0xff]  ;;  %v6405_v7 = vld [vmem:[#allocation21_spill] sm:$0xff]  ;;  %v6409_v31 = vld [vmem:[#allocation24_spill] sm:$0xff] }
 0x1dc   : > { %3147 = vst.msk [vmem:[%s5923_s17 + $0x60] sm:$0xff] %vm406_vm1, %v3115_v48  ;;  %v3085_v24 = vadd.f32 %v3053_v59, %v3021_v36  ;;  %v3024_v10 = vadd.f32 %v5900_v56, %v2985_v18  ;;  %v2984_v9 = vadd.f32 %v2889_v57, %v2715_v1  ;;  %v2718_v50 = vadd.f32 %v4256_v13, %v2448_v17  ;;  %v2899_v22 = vpop.f32.mrf.mxu0  ;;  %v6400_v17 = vld [vmem:[#allocation22_spill] sm:$0xff]  ;;  %v3060_v48 = vld [vmem:[%s5895_s10 + $0xa8] sm:$0xff] }
 0x1dd   : > { %v3118_v53 = vmax.f32 %v3086_v55, 0.0  ;;  %v2630_v21 = vpop.f32.mrf.mxu1  ;;  %v2451_v60 = vadd.f32 %v6400_v17, %v2185_v61  ;;  %v2187_v59 = vadd.f32 %v6404_v39, %v6403_v19  ;;  %v6406_v55 = vld [vmem:[#allocation18_spill] sm:$0xff] }
 0x1de   : > { %v3117_v29 = vmax.f32 %v3085_v24, 0.0  ;;  %v3088_v0 = vadd.f32 %v3056_v43, %v3024_v10  ;;  %v3023_v42 = vadd.f32 %v5900_v56, %v2984_v9  ;;  %v2987_v41 = vadd.f32 %v4308_v46, %v2718_v50  ;;  %v4311_v38 = vpop.f32.mrf.mxu0  ;;  %v3059_v24 = vld [vmem:[%s5895_s10 + $0xa0] sm:$0xff] }
 0x1df   : > { %3150 = vst.msk [vmem:[%s5923_s17 + $0x78] sm:$0xff] %vm406_vm1, %v3118_v53  ;;  %v2717_v35 = vadd.f32 %v2630_v21, %v2447_v37  ;;  %v4259_v26 = vpop.f32.mrf.mxu1  ;;  %v2190_v43 = vadd.f32 %v6406_v55, %v6405_v7  ;;  %v2453_v34 = vadd.f32 %v6408_v45, %v2187_v59  ;;  %v6410_v53 = vld [vmem:[#allocation14_spill] sm:$0xff]  ;;  %v6422_v45 = vld [vmem:[#allocation12_spill] sm:$0xff] }
 0x1e0   : > { %3149 = vst.msk [vmem:[%s5923_s17 + $0x70] sm:$0xff] %vm406_vm1, %v3117_v29  ;;  %v3120_v23 = vmax.f32 %v3088_v0, 0.0  ;;  %v3087_v28 = vadd.f32 %v3055_v51, %v3023_v42  ;;  %v3026_v2 = vadd.f32 %v5900_v56, %v2987_v41  ;;  %v2720_v11 = vadd.f32 %v4259_v26, %v2450_v6  ;;  %v2909_v49 = vpop.f32.mrf.mxu0  ;;  %v3062_v29 = vld [vmem:[%s5895_s10 + $0xb8] sm:$0xff]  ;;  %v6412_v61 = vld [vmem:[#allocation26_spill] sm:$0xff]  ;;  %v3061_v26 = vld [vmem:[%s5895_s10 + $0xb0] sm:$0xff] }
 0x1e1   : > { %v2986_v54 = vadd.f32 %v2899_v22, %v2717_v35  ;;  %v2640_v27 = vpop.f32.mrf.mxu1  ;;  %v2454_v6 = vadd.f32 %v6407_v33, %v2188_v20  ;;  %v2189_v51 = vadd.f32 %v6410_v53, %v6409_v31  ;;  %v2456_v8 = vadd.f32 %v6411_v52, %v2190_v43  ;;  %v6415_v4 = vld [vmem:[#allocation10_spill] sm:$0xff]  ;;  %v6416_v20 = vld [vmem:[#allocation28_spill] sm:$0xff]  ;;  %v3068_v52 = vld [vmem:[%s5895_s10 + $0xe8] sm:$0xff] }
 0x1e2   : > { %3152 = vst.msk [vmem:[%s5923_s17 + $0x88] sm:$0xff] %vm406_vm1, %v3120_v23  ;;  %v3119_v32 = vmax.f32 %v3087_v28, 0.0  ;;  %v3090_v12 = vadd.f32 %v3058_v16, %v3026_v2  ;;  %v2989_v62 = vadd.f32 %v4311_v38, %v2720_v11  ;;  %v2719_v57 = vadd.f32 %v2640_v27, %v2449_v3  ;;  %v4314_v5 = vpop.f32.mrf.mxu0  ;;  %v6413_v16 = vld [vmem:[#allocation23_spill] sm:$0xff]  ;;  %v6417_v19 = vld [vmem:[#allocation34_spill] sm:$0xff]  ;;  %v6420_v43 = vld [vmem:[#allocation32_spill] sm:$0xff] }
 0x1e3   : > { %v3025_v44 = vadd.f32 %v5900_v56, %v2986_v54  ;;  %v4262_v36 = vpop.f32.mrf.mxu1  ;;  %v2192_v35 = vadd.f32 %v6413_v16, %v6412_v61  ;;  %v6414_v54 = vld [vmem:[#allocation33_spill] sm:$0xff]  ;;  %v2191_v39 = vadd.f32 %v6417_v19, %v6416_v20  ;;  %v6418_v59 = vld [vmem:[#allocation30_spill] sm:$0xff]  ;;  %v6423_v31 = vld [vmem:[#allocation4_spill] sm:$0xff] }
 0x1e4   : > { %3151 = vst.msk [vmem:[%s5923_s17 + $0x80] sm:$0xff] %vm406_vm1, %v3119_v32  ;;  %v3122_v18 = vmax.f32 %v3090_v12, 0.0  ;;  %v3028_v1 = vadd.f32 %v5900_v56, %v2989_v62  ;;  %v2988_v46 = vadd.f32 %v2909_v49, %v2719_v57  ;;  %v2722_v58 = vadd.f32 %v4262_v36, %v2452_v47  ;;  %v2919_v15 = vpop.f32.mrf.mxu0  ;;  %v3064_v57 = vld [vmem:[%s5895_s10 + $0xc8] sm:$0xff] }
 0x1e5   : > { %v3089_v13 = vadd.f32 %v3057_v40, %v3025_v44  ;;  %v2650_v10 = vpop.f32.mrf.mxu1  ;;  %v2455_v27 = vadd.f32 %v6414_v54, %v2189_v51  ;;  %v2458_v14 = vadd.f32 %v6415_v4, %v2192_v35  ;;  %v6419_v44 = vld [vmem:[#allocation19_spill] sm:$0xff] }
 0x1e6   : > { %3154 = vst.msk [vmem:[%s5923_s17 + $0x98] sm:$0xff] %vm406_vm1, %v3122_v18  ;;  %v3092_v9 = vadd.f32 %v3060_v48, %v3028_v1  ;;  %v3027_v50 = vadd.f32 %v5900_v56, %v2988_v46  ;;  %v2991_v22 = vadd.f32 %v4314_v5, %v2722_v58  ;;  %v2721_v30 = vadd.f32 %v2650_v10, %v2451_v60  ;;  %v4317_v37 = vpop.f32.mrf.mxu0  ;;  %v3063_v18 = vld [vmem:[%s5895_s10 + $0xc0] sm:$0xff] }
 0x1e7   : > { %v3121_v21 = vmax.f32 %v3089_v13, 0.0  ;;  %v4265_v0 = vpop.f32.mrf.mxu1  ;;  %v2194_v48 = vadd.f32 %v6419_v44, %v6418_v59  ;;  %v6421_v13 = vld [vmem:[#allocation36_spill] sm:$0xff] }
 0x1e8   : > { %v3124_v42 = vmax.f32 %v3092_v9, 0.0  ;;  %v3091_v41 = vadd.f32 %v3059_v24, %v3027_v50  ;;  %v3030_v38 = vadd.f32 %v5900_v56, %v2991_v22  ;;  %v2990_v25 = vadd.f32 %v2919_v15, %v2721_v30  ;;  %v2929_v3 = vpop.f32.mrf.mxu0  ;;  %v3066_v9 = vld [vmem:[%s5895_s10 + $0xd8] sm:$0xff] }
 0x1e9   : > { %3153 = vst.msk [vmem:[%s5923_s17 + $0x90] sm:$0xff] %vm406_vm1, %v3121_v21  ;;  %v2724_v23 = vadd.f32 %v4265_v0, %v2454_v6  ;;  %v2660_v28 = vpop.f32.mrf.mxu1  ;;  %v2193_v24 = vadd.f32 %v6421_v13, %v6420_v43  ;;  %v2460_v53 = vadd.f32 %v6423_v31, %v2194_v48  ;;  %v3065_v21 = vld [vmem:[%s5895_s10 + $0xd0] sm:$0xff] }
 0x1ea   : > { %3156 = vst.msk [vmem:[%s5923_s17 + $0xa8] sm:$0xff] %vm406_vm1, %v3124_v42  ;;  %v3123_v2 = vmax.f32 %v3091_v41, 0.0  ;;  %v3094_v11 = vadd.f32 %v3062_v29, %v3030_v38  ;;  %v3029_v49 = vadd.f32 %v5900_v56, %v2990_v25  ;;  %v2723_v63 = vadd.f32 %v2660_v28, %v2453_v34  ;;  %v4320_v47 = vpop.f32.mrf.mxu0  ;;  %v6424_v25 = vld [vmem:[#allocation35_spill] sm:$0xff] }
 0x1eb   : > { %v2993_v32 = vadd.f32 %v4317_v37, %v2724_v23  ;;  %v4268_v12 = vpop.f32.mrf.mxu1  ;;  %v2457_v34 = vadd.f32 %v6422_v45, %v2191_v39 }
 0x1ec   : > { %3155 = vst.msk [vmem:[%s5923_s17 + $0xa0] sm:$0xff] %vm406_vm1, %v3123_v2  ;;  %v3126_v40 = vmax.f32 %v3094_v11, 0.0  ;;  %v3093_v62 = vadd.f32 %v3061_v26, %v3029_v49  ;;  %v2992_v5 = vadd.f32 %v2929_v3, %v2723_v63  ;;  %v2726_v17 = vadd.f32 %v4268_v12, %v2456_v8  ;;  %v2939_v60 = vpop.f32.mrf.mxu0  ;;  %v3070_v12 = vld [vmem:[%s5895_s10 + $0xf8] sm:$0xff] }
 0x1ed   : > { %v3032_v36 = vadd.f32 %v5900_v56, %v2993_v32  ;;  %v2670_v1 = vpop.f32.mrf.mxu1  ;;  %v2459_v3 = vadd.f32 %v6424_v25, %v2193_v24 }
 0x1ee   : > { %3158 = vst.msk [vmem:[%s5923_s17 + $0xb8] sm:$0xff] %vm406_vm1, %v3126_v40  ;;  %v3125_v46 = vmax.f32 %v3093_v62, 0.0  ;;  %v3031_v58 = vadd.f32 %v5900_v56, %v2992_v5  ;;  %v2995_v15 = vadd.f32 %v4320_v47, %v2726_v17  ;;  %v2725_v7 = vadd.f32 %v2670_v1, %v2455_v27  ;;  %v4323_v55 = vpop.f32.mrf.mxu0  ;;  %v3067_v47 = vld [vmem:[%s5895_s10 + $0xe0] sm:$0xff] }
 0x1ef   : > { %v3096_v10 = vadd.f32 %v3064_v57, %v3032_v36  ;;  %v4271_v50 = vpop.f32.mrf.mxu1 }
 0x1f0   : > { %3157 = vst.msk [vmem:[%s5923_s17 + $0xb0] sm:$0xff] %vm406_vm1, %v3125_v46  ;;  %v3095_v22 = vadd.f32 %v3063_v18, %v3031_v58  ;;  %v3034_v30 = vadd.f32 %v5900_v56, %v2995_v15  ;;  %v2994_v37 = vadd.f32 %v2939_v60, %v2725_v7  ;;  %v2728_v33 = vadd.f32 %v4271_v50, %v2458_v14  ;;  %v2949_v6 = vpop.f32.mrf.mxu0  ;;  %v3069_v60 = vld [vmem:[%s5895_s10 + $0xf0] sm:$0xff] }
 0x1f1   : > { %v3128_v51 = vmax.f32 %v3096_v10, 0.0  ;;  %v2680_v29 = vpop.f32.mrf.mxu1 }
 0x1f2   : > { %v3127_v0 = vmax.f32 %v3095_v22, 0.0  ;;  %v3098_v42 = vadd.f32 %v3066_v9, %v3034_v30  ;;  %v3033_v41 = vadd.f32 %v5900_v56, %v2994_v37  ;;  %v2997_v38 = vadd.f32 %v4323_v55, %v2728_v33  ;;  %v4326_v16 = vpop.f32.mrf.mxu0 }
 0x1f3   : > { %3160 = vst.msk [vmem:[%s5923_s17 + $0xc8] sm:$0xff] %vm406_vm1, %v3128_v51  ;;  %v2727_v8 = vadd.f32 %v2680_v29, %v2457_v34  ;;  %v4274_v61 = vpop.f32.mrf.mxu1 }
 0x1f4   : > { %3159 = vst.msk [vmem:[%s5923_s17 + $0xc0] sm:$0xff] %vm406_vm1, %v3127_v0  ;;  %v3130_v35 = vmax.f32 %v3098_v42, 0.0  ;;  %v3097_v26 = vadd.f32 %v3065_v21, %v3033_v41  ;;  %v3036_v23 = vadd.f32 %v5900_v56, %v2997_v38  ;;  %v2730_v28 = vadd.f32 %v4274_v61, %v2460_v53  ;;  %v2959_v40 = vpop.f32.mrf.mxu0 }
 0x1f5   : > { %v2996_v2 = vadd.f32 %v2949_v6, %v2727_v8  ;;  %v2690_v11 = vpop.f32.mrf.mxu1 }
 0x1f6   : > { %3162 = vst.msk [vmem:[%s5923_s17 + $0xd8] sm:$0xff] %vm406_vm1, %v3130_v35  ;;  %v3129_v49 = vmax.f32 %v3097_v26, 0.0  ;;  %v3100_v63 = vadd.f32 %v3068_v52, %v3036_v23  ;;  %v2999_v54 = vadd.f32 %v4326_v16, %v2730_v28  ;;  %v2729_v27 = vadd.f32 %v2690_v11, %v2459_v3 }
 0x1f7   : > { %v3035_v32 = vadd.f32 %v5900_v56, %v2996_v2 }
 0x1f8   : > { %3161 = vst.msk [vmem:[%s5923_s17 + $0xd0] sm:$0xff] %vm406_vm1, %v3129_v49  ;;  %v3132_v62 = vmax.f32 %v3100_v63, 0.0  ;;  %v3038_v57 = vadd.f32 %v5900_v56, %v2999_v54  ;;  %v2998_v5 = vadd.f32 %v2959_v40, %v2729_v27 }
 0x1f9   : > { %v3099_v17 = vadd.f32 %v3067_v47, %v3035_v32 }
 0x1fa   : > { %3164 = vst.msk [vmem:[%s5923_s17 + $0xe8] sm:$0xff] %vm406_vm1, %v3132_v62  ;;  %v3102_v4 = vadd.f32 %v3070_v12, %v3038_v57  ;;  %v3037_v14 = vadd.f32 %v5900_v56, %v2998_v5 }
 0x1fb   : > { %v3131_v20 = vmax.f32 %v3099_v17, 0.0 }
 0x1fc   : > { %v3134_v19 = vmax.f32 %v3102_v4, 0.0  ;;  %v3101_v39 = vadd.f32 %v3069_v60, %v3037_v14 }
 0x1fd   : > { %3163 = vst.msk [vmem:[%s5923_s17 + $0xe0] sm:$0xff] %vm406_vm1, %v3131_v20 }
 0x1fe   : > { %3166 = vst.msk [vmem:[%s5923_s17 + $0xf8] sm:$0xff] %vm406_vm1, %v3134_v19  ;;  %v3133_v59 = vmax.f32 %v3101_v39, 0.0 }
 0x200   : > { %3165 = vst.msk [vmem:[%s5923_s17 + $0xf0] sm:$0xff] %vm406_vm1, %v3133_v59 }
 0x201 PF: > { %s14_s15 = sadd.s32 1, %s4346_s15  }
 0x202   : > { %p11_p4 = scmp.ge.s32.totalorder %s14_s15, 4  }
 0x204   :  { %13 = sbr.rel (!%p11_p4) target bundleno = 1 (0x1), region = 77 }

// kernel: _lambda_.10
= control target key start
LH: loop header
LB: loop body
LE: loop exit
PB: predicated region body
PF: predicated region fallthrough
CT: control target
= control target key end

     0   :  { %s2112_s21 = smov 0   ;;  %s2481_s0 = inlined_call_operand.vmem [shape: f32[2,9,9,16], index: 0, kind: input, shape index: {}]   ;;  %s2482_s1 = inlined_call_operand.vmem [shape: f32[2,9,9,16], index: 1, kind: input, shape index: {}]   ;;  %s2483_s2 = inlined_call_operand.vmem [shape: f32[2,9,9,16], index: 2, kind: input, shape index: {}]   ;;  %s2484_s3 = inlined_call_operand.vmem [shape: f32[2,9,9,16], index: 3, kind: input, shape index: {}]   ;;  %s2485_s4 = inlined_call_operand.vmem [shape: f32[9,16,32], index: 4, kind: input, shape index: {}]   ;;  %s2486_s5 = inlined_call_operand.vmem [shape: f32[1,32], index: 5, kind: input, shape index: {}]   ;;  %s2487_s6 = inlined_call_operand.vmem [shape: f32[2,8,8,32], index: 6, kind: output, shape index: {}]  }
   0x1 LB: > { %s1719_s22 = sadd.s32 4294967295, %s2075_s21   ;;  %p1723_p0 = scmp.ge.s32.totalorder %s2075_s21, 1  ;;  %s2075_s21 = sphi %s2112_s21, %s16_s21  }
   0x2   : > { %p242_p1 = scmp.lt.s32.totalorder %s2075_s21, 3 }
   0x4   : > { %p243_p2 = pnand %p1723_p0, %p242_p1 }
   0x5   : > { %p287_p3 = scmp.lt.s32.totalorder (!%p243_p2), %s1719_s22, 1 }
   0x6   : > { %246 = sbr.rel (%p243_p2) target bundleno = 290 (0x122), region = 44 }
   0xb   : > { %v1731_v0 = vld [vmem:[%s2485_s4 + $0x18] sm:$0xff]  ;;  %v1730_v1 = vld [vmem:[%s2485_s4 + $0x10] sm:$0xff]  ;;  %s2489_s22 = smov (!%p287_p3, %s1719_s22), 1  ;;  %v364_v2 = vld [vmem:[%s2485_s4 + $0x8] sm:$0xff]  ;;  %vm368_vm0 = vcmask 130048   ;;  %vm635_vm1 = vcmask 1046528  }
   0xc   : > { %2056 = vmatprep.subr.mxu1 %v1731_v0  ;;  %1912 = vmatprep.subr.mxu0 %v1731_v0  ;;  %v1749_v3 = vld [vmem:[%s2485_s4 + $0x28] sm:$0xff]  ;;  %s2135_s7 = smul.u32 144, %s2489_s22  ;;  %v363_v7 = vld [vmem:[%s2485_s4] sm:$0xff]  ;;  %v1759_v30 = vld [vmem:[%s2485_s4 + $0x38] sm:$0xff]  ;;  %s1821_s30 = sshll.u32 %s2489_s22, 6  ;;  %vm1619_vm2 = vcmask 261120  }
   0xd   : > { %2058 = vmatpush3.msra.mxu1 %v1731_v0  ;;  %1913 = vmatpush3.msra.mxu0 %v1731_v0  ;;  %v1748_v8 = vld [vmem:[%s2485_s4 + $0x20] sm:$0xff]  ;;  %v1769_v31 = vld [vmem:[%s2485_s4 + $0x48] sm:$0xff]  ;;  %v1758_v43 = vld [vmem:[%s2485_s4 + $0x30] sm:$0xff]  ;;  %s2453_s22 = scalar_lea.vmem %s2487_s6, %s1821_s30 }
   0xe   : > { %2057 = vmatprep.subr.mxu1 %v1730_v1  ;;  %1914 = vmatprep.subr.mxu0 %v1730_v1  ;;  %s2141_s10 = scalar_lea.vmem %s2481_s0, %s2135_s7  ;;  %s2147_s13 = scalar_lea.vmem %s2482_s1, %s2135_s7  ;;  %v1768_v44 = vld [vmem:[%s2485_s4 + $0x40] sm:$0xff]  ;;  %v1779_v53 = vld [vmem:[%s2485_s4 + $0x58] sm:$0xff]  ;;  %v1789_v54 = vld [vmem:[%s2485_s4 + $0x68] sm:$0xff] }
   0xf   : > { %2059 = vmatpush3.msra.mxu1 %v1730_v1  ;;  %1915 = vmatpush3.msra.mxu0 %v1730_v1  ;;  %v330_v4 = vld [vmem:[%s2147_s13] sm:$0xff]  ;;  %v2154_v6 = vld [vmem:[%s2147_s13 + $0x10] sm:$0xff]  ;;  %v313_v16 = vld [vmem:[%s2141_s10 + $0x8] sm:$0x1]  ;;  %s2288_s12 = scalar_lea.vmem %s2483_s2, %s2135_s7  ;;  %s2294_s16 = scalar_lea.vmem %s2484_s3, %s2135_s7 }
  0x10   : > { %1928 = vmatprep.subr.mxu1 %v364_v2  ;;  %1944 = vmatprep.subr.mxu0 %v1749_v3  ;;  %v2151_v5 = vld [vmem:[%s2147_s13 + $0x40] sm:$0xff]  ;;  %v2166_v9 = vld [vmem:[%s2147_s13 + $0x50] sm:$0xff]  ;;  %v315_v18 = vld [vmem:[%s2141_s10 + $0x18] sm:$0x1]  ;;  %v637_v19 = vrot.slane %v313_v16, 1 }
  0x11   : > { %1916 = vmatprep.mubr.msk.f32.mxu0 %vm368_vm0, %v330_v4  ;;  %1922 = vmatprep.mubr.msk.f32.mxu1 %vm368_vm0, %v2151_v5  ;;  %v2169_v10 = vld [vmem:[%s2147_s13 + $0x20] sm:$0xff]  ;;  %v2179_v12 = vld [vmem:[%s2147_s13 + $0x30] sm:$0xff]  ;;  %v640_v21 = vrot.slane %v315_v18, 1  ;;  %v317_v23 = vld [vmem:[%s2141_s10 + $0x28] sm:$0x1] }
  0x12   : > { %v2172_v11 = vld [vmem:[%s2147_s13 + $0x60] sm:$0xff]  ;;  %1917 = vmatmul.mubr.msk.f32.vlgmr.msra.gmra.mxu0 %vm368_vm0, %v2154_v6  ;;  %1923 = vmatmul.mubr.msk.f32.vlgmr.msra.gmra.mxu1 %vm368_vm0, %v2166_v9  ;;  %v2182_v13 = vld [vmem:[%s2147_s13 + $0x70] sm:$0xff]  ;;  %v643_v25 = vrot.slane %v317_v23, 1  ;;  %v319_v27 = vld [vmem:[%s2141_s10 + $0x38] sm:$0x1] }
  0x13   : > { %v312_v14 = vld [vmem:[%s2141_s10] sm:$0xff]  ;;  %1929 = vmatpush3.msra.mxu1 %v364_v2  ;;  %1945 = vmatpush3.msra.mxu0 %v1749_v3  ;;  %v2187_v17 = vld [vmem:[%s2141_s10 + $0x10] sm:$0xff]  ;;  %v321_v32 = vld [vmem:[%s2141_s10 + $0x48] sm:$0x1]  ;;  %v646_v35 = vrot.slane %v319_v27, 1 }
  0x14   : > { %v636_v15 = vrot.slane %v312_v14, 1  ;;  %1919 = vmatprep.mubr.msk.f32.mxu0 %vm368_vm0, %v2169_v10  ;;  %1925 = vmatprep.mubr.msk.f32.mxu1 %vm368_vm0, %v2172_v11  ;;  %v639_v20 = vrot.slane %v2187_v17, 1  ;;  %v2196_v22 = vld [vmem:[%s2141_s10 + $0x20] sm:$0xff]  ;;  %v2201_v26 = vld [vmem:[%s2141_s10 + $0x30] sm:$0xff]  ;;  %v649_v37 = vrot.slane %v321_v32, 1  ;;  %v1799_v16 = vld [vmem:[%s2485_s4 + $0x78] sm:$0xff] }
  0x15   : > { %1930 = vmatprep.subr.mxu1 %v363_v7  ;;  %1946 = vmatprep.subr.mxu0 %v1748_v8  ;;  %v642_v24 = vrot.slane %v2196_v22, 1  ;;  %v2205_v28 = vld [vmem:[%s2141_s10 + $0x40] sm:$0xff]  ;;  %v645_v34 = vrot.slane %v2201_v26, 1  ;;  %v2227_v38 = vld [vmem:[%s2141_s10 + $0x50] sm:$0xff]  ;;  %v323_v39 = vld [vmem:[%s2141_s10 + $0x58] sm:$0x1] }
  0x16   : > { %1920 = vmatmul.mubr.msk.f32.gmra.mxu0 %vm368_vm0, %v2179_v12  ;;  %1926 = vmatmul.mubr.msk.f32.gmra.mxu1 %vm368_vm0, %v2182_v13  ;;  %v638_v29 = vsel %vm635_vm1, %v636_v15, %v637_v19  ;;  %v2220_v33 = vsel %vm635_vm1, %v639_v20, %v640_v21  ;;  %v648_v36 = vrot.slane %v2205_v28, 1  ;;  %v2234_v41 = vld [vmem:[%s2141_s10 + $0x60] sm:$0xff]  ;;  %v325_v42 = vld [vmem:[%s2141_s10 + $0x68] sm:$0x1]  ;;  %v651_v46 = vrot.slane %v2227_v38, 1  ;;  %v2260_v51 = vld [vmem:[%s2141_s10 + $0x70] sm:$0xff] }
  0x17   : > { %1931 = vmatpush3.msra.mxu1 %v363_v7  ;;  %1947 = vmatpush3.msra.mxu0 %v1748_v8  ;;  %v2231_v40 = vsel %vm635_vm1, %v642_v24, %v643_v25  ;;  %v2248_v45 = vsel %vm635_vm1, %v645_v34, %v646_v35  ;;  %v652_v47 = vrot.slane %v323_v39, 1  ;;  %v654_v49 = vrot.slane %v2234_v41, 1  ;;  %v327_v52 = vld [vmem:[%s2141_s10 + $0x78] sm:$0x1]  ;;  %v339_v60 = vld [vmem:[%s2288_s12] sm:$0xff]  ;;  %v341_v62 = vld [vmem:[%s2288_s12 + $0x10] sm:$0xff] }
  0x18   : > { %1932 = vmatprep.mubr.msk.f32.mxu1 %vm368_vm0, %v312_v14  ;;  %1948 = vmatprep.mubr.msk.f32.mxu0 %vm368_vm0, %v638_v29  ;;  %v2256_v48 = vsel %vm635_vm1, %v648_v36, %v649_v37  ;;  %v655_v50 = vrot.slane %v325_v42, 1  ;;  %v657_v56 = vrot.slane %v2260_v51, 1  ;;  %v658_v57 = vrot.slane %v327_v52, 1  ;;  %v355_v61 = vld [vmem:[%s2294_s16] sm:$0xff]  ;;  %v356_v63 = vld [vmem:[%s2294_s16 + $0x10] sm:$0xff]  ;;  %v1809_v18 = vld [vmem:[%s2485_s4 + $0x88] sm:$0xff] }
  0x19   : > { %1960 = vmatprep.subr.mxu1 %v1759_v30  ;;  %1976 = vmatprep.subr.mxu0 %v1769_v31  ;;  %v2278_v55 = vsel %vm635_vm1, %v651_v46, %v652_v47  ;;  %v343_v0 = vld [vmem:[%s2288_s12 + $0x20] sm:$0xff]  ;;  %v1778_v2 = vld [vmem:[%s2485_s4 + $0x50] sm:$0xff]  ;;  %v340_v15 = vld [vmem:[%s2288_s12 + $0x8] sm:$0x1]  ;;  %v1080_v21 = vrot.slane %v339_v60, 1 }
  0x1a   : > { %1933 = vmatmul.mubr.msk.f32.vlgmr.msra.gmra.mxu1 %vm368_vm0, %v2187_v17  ;;  %1949 = vmatmul.mubr.msk.f32.vlgmr.msra.gmra.mxu0 %vm368_vm0, %v2220_v33  ;;  %v2282_v58 = vsel %vm635_vm1, %v654_v49, %v655_v50  ;;  %v2305_v59 = vsel %vm635_vm1, %v657_v56, %v658_v57  ;;  %v357_v1 = vld [vmem:[%s2294_s16 + $0x20] sm:$0xff]  ;;  %v345_v4 = vld [vmem:[%s2288_s12 + $0x30] sm:$0xff]  ;;  %v1081_v25 = vrot.slane %v340_v15, 1  ;;  %v342_v27 = vld [vmem:[%s2288_s12 + $0x18] sm:$0x1]  ;;  %v1086_v37 = vrot.slane %v343_v0, 1 }
  0x1b   : > { %1961 = vmatpush3.msra.mxu1 %v1759_v30  ;;  %1977 = vmatpush3.msra.mxu0 %v1769_v31  ;;  %v1788_v3 = vld [vmem:[%s2485_s4 + $0x60] sm:$0xff]  ;;  %v358_v7 = vld [vmem:[%s2294_s16 + $0x30] sm:$0xff]  ;;  %v344_v29 = vld [vmem:[%s2288_s12 + $0x28] sm:$0x1]  ;;  %v1083_v30 = vrot.slane %v341_v62, 1  ;;  %v1084_v34 = vrot.slane %v342_v27, 1 }
  0x1c   : > { %1935 = vmatprep.mubr.msk.f32.mxu1 %vm368_vm0, %v2196_v22  ;;  %1951 = vmatprep.mubr.msk.f32.mxu0 %vm368_vm0, %v2231_v40  ;;  %v347_v8 = vld [vmem:[%s2288_s12 + $0x40] sm:$0xff]  ;;  %v349_v19 = vld [vmem:[%s2288_s12 + $0x50] sm:$0xff]  ;;  %v1082_v35 = vsel %vm635_vm1, %v1080_v21, %v1081_v25  ;;  %v346_v36 = vld [vmem:[%s2288_s12 + $0x38] sm:$0x1]  ;;  %v1087_v39 = vrot.slane %v344_v29, 1 }
  0x1d   : > { %1962 = vmatprep.subr.mxu1 %v1758_v43  ;;  %1978 = vmatprep.subr.mxu0 %v1768_v44  ;;  %v359_v14 = vld [vmem:[%s2294_s16 + $0x40] sm:$0xff]  ;;  %v360_v20 = vld [vmem:[%s2294_s16 + $0x50] sm:$0xff]  ;;  %v348_v42 = vld [vmem:[%s2288_s12 + $0x48] sm:$0x1]  ;;  %v1090_v46 = vrot.slane %v346_v36, 1  ;;  %v1092_v47 = vrot.slane %v347_v8, 1 }
  0x1e   : > { %1936 = vmatmul.mubr.msk.f32.gmra.mxu1 %vm368_vm0, %v2201_v26  ;;  %1952 = vmatmul.mubr.msk.f32.gmra.mxu0 %vm368_vm0, %v2248_v45  ;;  %v351_v23 = vld [vmem:[%s2288_s12 + $0x60] sm:$0xff]  ;;  %v353_v31 = vld [vmem:[%s2288_s12 + $0x70] sm:$0xff]  ;;  %v1093_v49 = vrot.slane %v348_v42, 1  ;;  %v350_v50 = vld [vmem:[%s2288_s12 + $0x58] sm:$0x1]  ;;  %v1088_v52 = vsel %vm635_vm1, %v1086_v37, %v1087_v39  ;;  %v1095_v56 = vrot.slane %v349_v19, 1 }
  0x1f   : > { %1938 = vmatprep.mubr.msk.f32.mxu1 %vm368_vm0, %v2205_v28  ;;  %1954 = vmatprep.mubr.msk.f32.mxu0 %vm368_vm0, %v2256_v48  ;;  %v361_v24 = vld [vmem:[%s2294_s16 + $0x60] sm:$0xff]  ;;  %v362_v32 = vld [vmem:[%s2294_s16 + $0x70] sm:$0xff] }
  0x20   : > { %1963 = vmatpush3.msra.mxu1 %v1758_v43  ;;  %1979 = vmatpush3.msra.mxu0 %v1768_v44  ;;  %v1089_v43 = vrot.slane %v345_v4, 1  ;;  %v1085_v44 = vsel %vm635_vm1, %v1083_v30, %v1084_v34 }
  0x21   : > { %1992 = vmatprep.subr.mxu1 %v1779_v53  ;;  %2008 = vmatprep.subr.mxu0 %v1789_v54 }
  0x22   : > { %1939 = vmatmul.mubr.msk.f32.gmra.mxu1 %vm368_vm0, %v2227_v38  ;;  %1955 = vmatmul.mubr.msk.f32.gmra.mxu0 %vm368_vm0, %v2278_v55  ;;  %v1091_v57 = vsel %vm635_vm1, %v1089_v43, %v1090_v46 }
  0x23   : > { %1941 = vmatprep.mubr.msk.f32.mxu1 %vm368_vm0, %v2234_v41  ;;  %1957 = vmatprep.mubr.msk.f32.mxu0 %vm368_vm0, %v2282_v58 }
  0x26   : > { %1942 = vmatmul.mubr.msk.f32.gmra.mxu1 %vm368_vm0, %v2260_v51  ;;  %1958 = vmatmul.mubr.msk.f32.gmra.mxu0 %vm368_vm0, %v2305_v59 }
  0x27   : > { %1964 = vmatprep.mubr.msk.f32.mxu1 %vm368_vm0, %v339_v60  ;;  %1980 = vmatprep.mubr.msk.f32.mxu0 %vm368_vm0, %v355_v61  ;;  %v1096_v60 = vrot.slane %v350_v50, 1  ;;  %v1098_v61 = vrot.slane %v351_v23, 1 }
  0x2a   : > { %1965 = vmatmul.mubr.msk.f32.vlgmr.msra.gmra.mxu1 %vm368_vm0, %v341_v62  ;;  %1981 = vmatmul.mubr.msk.f32.vlgmr.msra.gmra.mxu0 %vm368_vm0, %v356_v63  ;;  %v354_v63 = vld [vmem:[%s2288_s12 + $0x78] sm:$0x1] }
  0x2b   : > { %1993 = vmatpush3.msra.mxu1 %v1779_v53  ;;  %2009 = vmatpush3.msra.mxu0 %v1789_v54  ;;  %v352_v53 = vld [vmem:[%s2288_s12 + $0x68] sm:$0x1]  ;;  %v1798_v54 = vld [vmem:[%s2485_s4 + $0x70] sm:$0xff] }
  0x2c   : > { %1967 = vmatprep.mubr.msk.f32.mxu1 %vm368_vm0, %v343_v0  ;;  %1983 = vmatprep.mubr.msk.f32.mxu0 %vm368_vm0, %v357_v1  ;;  %v1099_v62 = vrot.slane %v352_v53, 1  ;;  %v1101_v0 = vrot.slane %v353_v31, 1  ;;  %v1102_v1 = vrot.slane %v354_v63, 1 }
  0x2d   : > { %1994 = vmatprep.subr.mxu1 %v1778_v2  ;;  %2010 = vmatprep.subr.mxu0 %v1788_v3 }
  0x2e   : > { %1968 = vmatmul.mubr.msk.f32.gmra.mxu1 %vm368_vm0, %v345_v4  ;;  %1984 = vmatmul.mubr.msk.f32.gmra.mxu0 %vm368_vm0, %v358_v7 }
  0x2f   : > { %1970 = vmatprep.mubr.msk.f32.mxu1 %vm368_vm0, %v347_v8  ;;  %1986 = vmatprep.mubr.msk.f32.mxu0 %vm368_vm0, %v359_v14 }
  0x30   : > { %1995 = vmatpush3.msra.mxu1 %v1778_v2  ;;  %2011 = vmatpush3.msra.mxu0 %v1788_v3  ;;  %v1100_v2 = vsel %vm635_vm1, %v1098_v61, %v1099_v62 }
  0x31   : > { %2024 = vmatprep.subr.mxu1 %v1799_v16  ;;  %2040 = vmatprep.subr.mxu0 %v1809_v18 }
  0x32   : > { %1971 = vmatmul.mubr.msk.f32.gmra.mxu1 %vm368_vm0, %v349_v19  ;;  %1987 = vmatmul.mubr.msk.f32.gmra.mxu0 %vm368_vm0, %v360_v20 }
  0x33   : > { %1973 = vmatprep.mubr.msk.f32.mxu1 %vm368_vm0, %v351_v23  ;;  %1989 = vmatprep.mubr.msk.f32.mxu0 %vm368_vm0, %v361_v24 }
  0x36   : > { %1974 = vmatmul.mubr.msk.f32.gmra.mxu1 %vm368_vm0, %v353_v31  ;;  %1990 = vmatmul.mubr.msk.f32.gmra.mxu0 %vm368_vm0, %v362_v32 }
  0x37   : > { %1996 = vmatprep.mubr.msk.f32.mxu1 %vm368_vm0, %v1082_v35  ;;  %2012 = vmatprep.mubr.msk.f32.mxu0 %vm368_vm0, %v2187_v17  ;;  %v1808_v17 = vld [vmem:[%s2485_s4 + $0x80] sm:$0xff] }
  0x3a   : > { %1997 = vmatmul.mubr.msk.f32.vlgmr.msra.gmra.mxu1 %vm368_vm0, %v1085_v44  ;;  %2013 = vmatmul.mubr.msk.f32.vlgmr.msra.gmra.mxu0 %vm368_vm0, %v2196_v22  ;;  %v1094_v22 = vsel %vm635_vm1, %v1092_v47, %v1093_v49 }
  0x3b   : > { %2025 = vmatpush3.msra.mxu1 %v1799_v16  ;;  %2041 = vmatpush3.msra.mxu0 %v1809_v18 }
  0x3c   : > { %1999 = vmatprep.mubr.msk.f32.mxu1 %vm368_vm0, %v1088_v52  ;;  %2015 = vmatprep.mubr.msk.f32.mxu0 %vm368_vm0, %v2201_v26  ;;  %v1097_v26 = vsel %vm635_vm1, %v1095_v56, %v1096_v60 }
  0x3d   : > { %2026 = vmatprep.subr.mxu1 %v1798_v54  ;;  %2042 = vmatprep.subr.mxu0 %v1808_v17 }
  0x3e   : > { %2000 = vmatmul.mubr.msk.f32.gmra.mxu1 %vm368_vm0, %v1091_v57  ;;  %2016 = vmatmul.mubr.msk.f32.gmra.mxu0 %vm368_vm0, %v2205_v28  ;;  %v1103_v28 = vsel %vm635_vm1, %v1101_v0, %v1102_v1 }
  0x3f   : > { %2002 = vmatprep.mubr.msk.f32.mxu1 %vm368_vm0, %v1094_v22  ;;  %2018 = vmatprep.mubr.msk.f32.mxu0 %vm368_vm0, %v2227_v38  ;;  %v328_v38 = vld [vmem:[%s2141_s10 + $0x80] sm:$0xff] }
  0x40   : > { %2027 = vmatpush3.msra.mxu1 %v1798_v54  ;;  %2043 = vmatpush3.msra.mxu0 %v1808_v17 }
  0x42   : > { %2003 = vmatmul.mubr.msk.f32.gmra.mxu1 %vm368_vm0, %v1097_v26  ;;  %2019 = vmatmul.mubr.msk.f32.gmra.mxu0 %vm368_vm0, %v2234_v41  ;;  %v329_v41 = vld [vmem:[%s2141_s10 + $0x88] sm:$0x1] }
  0x43   : > { %2005 = vmatprep.mubr.msk.f32.mxu1 %vm368_vm0, %v1100_v2  ;;  %2021 = vmatprep.mubr.msk.f32.mxu0 %vm368_vm0, %v2260_v51 }
  0x46   : > { %2006 = vmatmul.mubr.msk.f32.gmra.mxu1 %vm368_vm0, %v1103_v28  ;;  %2022 = vmatmul.mubr.msk.f32.gmra.mxu0 %vm368_vm0, %v328_v38 }
  0x47   : > { %2028 = vmatprep.mubr.msk.f32.mxu1 %vm368_vm0, %v2154_v6  ;;  %2044 = vmatprep.mubr.msk.f32.mxu0 %vm368_vm0, %v2220_v33  ;;  %v1475_v6 = vrot.slane %v328_v38, 1 }
  0x4a   : > { %2029 = vmatmul.mubr.msk.f32.vlgmr.msra.gmra.mxu1 %vm368_vm0, %v2169_v10  ;;  %2045 = vmatmul.mubr.msk.f32.vlgmr.msra.gmra.mxu0 %vm368_vm0, %v2231_v40  ;;  %v1476_v10 = vrot.slane %v329_v41, 1 }
  0x4b   : > { %2031 = vmatprep.mubr.msk.f32.mxu1 %vm368_vm0, %v2179_v12  ;;  %2047 = vmatprep.mubr.msk.f32.mxu0 %vm368_vm0, %v2248_v45 }
  0x4c   : > { %v1477_v12 = vsel %vm635_vm1, %v1475_v6, %v1476_v10 }
  0x4e   : > { %2032 = vmatmul.mubr.msk.f32.gmra.mxu1 %vm368_vm0, %v2151_v5  ;;  %2048 = vmatmul.mubr.msk.f32.gmra.mxu0 %vm368_vm0, %v2256_v48  ;;  %v338_v5 = vld [vmem:[%s2147_s13 + $0x80] sm:$0xff] }
  0x4f   : > { %2034 = vmatprep.mubr.msk.f32.mxu1 %vm368_vm0, %v2166_v9  ;;  %2050 = vmatprep.mubr.msk.f32.mxu0 %vm368_vm0, %v2278_v55 }
  0x52   : > { %2035 = vmatmul.mubr.msk.f32.gmra.mxu1 %vm368_vm0, %v2172_v11  ;;  %2051 = vmatmul.mubr.msk.f32.gmra.mxu0 %vm368_vm0, %v2282_v58 }
  0x53   : > { %2037 = vmatprep.mubr.msk.f32.mxu1 %vm368_vm0, %v2182_v13  ;;  %2053 = vmatprep.mubr.msk.f32.mxu0 %vm368_vm0, %v2305_v59 }
  0x56   : > { %2038 = vmatmul.mubr.msk.f32.gmra.mxu1 %vm368_vm0, %v338_v5  ;;  %2054 = vmatmul.mubr.msk.f32.gmra.mxu0 %vm368_vm0, %v1477_v12 }
  0xd2   : > { %v1918_v9 = vpop.f32.mrf.mxu0  ;;  %v1924_v33 = vpop.f32.mrf.mxu1 }
  0xd4   : > { %v459_v40 = vpop.f32.mrf.mxu0  ;;  %v479_v11 = vpop.f32.mrf.mxu1 }
  0xd6   : > { %v1921_v45 = vpop.f32.mrf.mxu0  ;;  %v1927_v48 = vpop.f32.mrf.mxu1 }
  0xd8   : > { %v469_v51 = vpop.f32.mrf.mxu0  ;;  %v2434_v55 = vpop.f32.mrf.mxu1 }
  0xda   : > { %v1934_v13 = vpop.f32.mrf.mxu1  ;;  %v1950_v58 = vpop.f32.mrf.mxu0 }
  0xdb   : > { %v594_v49 = vadd.f32 %v1934_v13, %v1918_v9 }
  0xdc   : > { %v588_v3 = vpop.f32.mrf.mxu1  ;;  %v745_v59 = vpop.f32.mrf.mxu0 }
  0xdd   : > { %v589_v53 = vadd.f32 %v588_v3, %v459_v40  ;;  %v785_v56 = vadd.f32 %v1950_v58, %v594_v49 }
  0xde   : > { %v1937_v4 = vpop.f32.mrf.mxu1  ;;  %v1953_v7 = vpop.f32.mrf.mxu0 }
  0xdf   : > { %v604_v57 = vadd.f32 %v1937_v4, %v1921_v45  ;;  %v784_v22 = vadd.f32 %v745_v59, %v589_v53 }
  0xe0   : > { %v598_v8 = vpop.f32.mrf.mxu1  ;;  %v755_v14 = vpop.f32.mrf.mxu0 }
  0xe1   : > { %v599_v62 = vadd.f32 %v598_v8, %v469_v51  ;;  %v787_v2 = vadd.f32 %v1953_v7, %v604_v57 }
  0xe2   : > { %v1940_v15 = vpop.f32.mrf.mxu1  ;;  %v1956_v16 = vpop.f32.mrf.mxu0 }
  0xe3   : > { %v614_v0 = vadd.f32 %v1940_v15, %v1924_v33  ;;  %v786_v10 = vadd.f32 %v755_v14, %v599_v62 }
  0xe4   : > { %v608_v18 = vpop.f32.mrf.mxu1  ;;  %v765_v19 = vpop.f32.mrf.mxu0 }
  0xe5   : > { %v609_v38 = vadd.f32 %v608_v18, %v479_v11  ;;  %v789_v9 = vadd.f32 %v1956_v16, %v614_v0 }
  0xe6   : > { %v1943_v20 = vpop.f32.mrf.mxu1  ;;  %v1959_v21 = vpop.f32.mrf.mxu0 }
  0xe7   : > { %v624_v40 = vadd.f32 %v1943_v20, %v1927_v48  ;;  %v788_v51 = vadd.f32 %v765_v19, %v609_v38 }
  0xe8   : > { %v618_v23 = vpop.f32.mrf.mxu1  ;;  %v775_v24 = vpop.f32.mrf.mxu0 }
  0xe9   : > { %v619_v33 = vadd.f32 %v618_v23, %v2434_v55  ;;  %v791_v18 = vadd.f32 %v1959_v21, %v624_v40  ;;  %v2444_v21 = vld [vmem:[%s2486_s5] ss:$0 sm:$0xff] }
  0xea   : > { %v1966_v25 = vpop.f32.mrf.mxu1  ;;  %v1982_v27 = vpop.f32.mrf.mxu0 }
  0xeb   : > { %v925_v63 = vadd.f32 %v1966_v25, %v785_v56  ;;  %v790_v20 = vadd.f32 %v775_v24, %v619_v33 }
  0xec   : > { %v885_v29 = vpop.f32.mrf.mxu1  ;;  %v1025_v30 = vpop.f32.mrf.mxu0 }
  0xed   : > { %v924_v28 = vadd.f32 %v885_v29, %v784_v22  ;;  %v1065_v5 = vadd.f32 %v1982_v27, %v925_v63 }
  0xee   : > { %v1969_v31 = vpop.f32.mrf.mxu1  ;;  %v1985_v32 = vpop.f32.mrf.mxu0 }
  0xef   : > { %v927_v12 = vadd.f32 %v1969_v31, %v787_v2  ;;  %v1064_v58 = vadd.f32 %v1025_v30, %v924_v28 }
  0xf0   : > { %v895_v34 = vpop.f32.mrf.mxu1  ;;  %v1035_v35 = vpop.f32.mrf.mxu0 }
  0xf1   : > { %v926_v3 = vadd.f32 %v895_v34, %v786_v10  ;;  %v1067_v15 = vadd.f32 %v1985_v32, %v927_v12 }
  0xf2   : > { %v1972_v36 = vpop.f32.mrf.mxu1  ;;  %v1988_v37 = vpop.f32.mrf.mxu0 }
  0xf3   : > { %v929_v4 = vadd.f32 %v1972_v36, %v789_v9  ;;  %v1066_v29 = vadd.f32 %v1035_v35, %v926_v3 }
  0xf4   : > { %v905_v39 = vpop.f32.mrf.mxu1  ;;  %v1045_v42 = vpop.f32.mrf.mxu0 }
  0xf5   : > { %v928_v25 = vadd.f32 %v905_v39, %v788_v51  ;;  %v1069_v30 = vadd.f32 %v1988_v37, %v929_v4 }
  0xf6   : > { %v1975_v43 = vpop.f32.mrf.mxu1  ;;  %v2436_v44 = vpop.f32.mrf.mxu0 }
  0xf7   : > { %v931_v31 = vadd.f32 %v1975_v43, %v791_v18  ;;  %v1068_v36 = vadd.f32 %v1045_v42, %v928_v25 }
  0xf8   : > { %v915_v46 = vpop.f32.mrf.mxu1  ;;  %v2438_v47 = vpop.f32.mrf.mxu0 }
  0xf9   : > { %v1071_v43 = vadd.f32 %v2436_v44, %v931_v31 }
  0xfa   : > { %v1998_v50 = vpop.f32.mrf.mxu1  ;;  %v2014_v52 = vpop.f32.mrf.mxu0 }
  0xfb   : > { %v1229_v59 = vadd.f32 %v1998_v50, %v1065_v5  ;;  %v930_v50 = vadd.f32 %v915_v46, %v790_v20 }
  0xfc   : > { %v1189_v54 = vpop.f32.mrf.mxu1  ;;  %v1308_v17 = vpop.f32.mrf.mxu0 }
  0xfd   : > { %v1228_v11 = vadd.f32 %v1189_v54, %v1064_v58  ;;  %v1348_v16 = vadd.f32 %v2014_v52, %v1229_v59 }
  0xfe   : > { %v2001_v60 = vpop.f32.mrf.mxu1  ;;  %v2017_v61 = vpop.f32.mrf.mxu0 }
  0xff   : > { %v1231_v48 = vadd.f32 %v2001_v60, %v1067_v15  ;;  %v1347_v49 = vadd.f32 %v1308_v17, %v1228_v11  ;;  %v1070_v60 = vadd.f32 %v2438_v47, %v930_v50 }
 0x100   : > { %v1199_v26 = vpop.f32.mrf.mxu1  ;;  %v1318_v1 = vpop.f32.mrf.mxu0 }
 0x101   : > { %v1230_v55 = vadd.f32 %v1199_v26, %v1066_v29  ;;  %v1350_v52 = vadd.f32 %v2017_v61, %v1231_v48 }
 0x102   : > { %v2004_v41 = vpop.f32.mrf.mxu1  ;;  %v2020_v6 = vpop.f32.mrf.mxu0 }
 0x103   : > { %v1233_v32 = vadd.f32 %v2004_v41, %v1069_v30  ;;  %v1349_v56 = vadd.f32 %v1318_v1, %v1230_v55 }
 0x104   : > { %v1209_v13 = vpop.f32.mrf.mxu1  ;;  %v1328_v45 = vpop.f32.mrf.mxu0 }
 0x105   : > { %v1232_v53 = vadd.f32 %v1209_v13, %v1068_v36  ;;  %v1352_v22 = vadd.f32 %v2020_v6, %v1233_v32 }
 0x106   : > { %v2007_v8 = vpop.f32.mrf.mxu1  ;;  %v2023_v7 = vpop.f32.mrf.mxu0 }
 0x107   : > { %v1235_v62 = vadd.f32 %v2007_v8, %v1071_v43  ;;  %v1351_v2 = vadd.f32 %v1328_v45, %v1232_v53 }
 0x108   : > { %v1219_v14 = vpop.f32.mrf.mxu1  ;;  %v1338_v27 = vpop.f32.mrf.mxu0 }
 0x109   : > { %v1234_v28 = vadd.f32 %v1219_v14, %v1070_v60  ;;  %v1354_v12 = vadd.f32 %v2023_v7, %v1235_v62 }
 0x10a   : > { %v2030_v34 = vpop.f32.mrf.mxu1  ;;  %v2046_v19 = vpop.f32.mrf.mxu0 }
 0x10b   : > { %v1467_v23 = vadd.f32 %v2030_v34, %v1348_v16  ;;  %v1353_v59 = vadd.f32 %v1338_v27, %v1234_v28 }
 0x10c   : > { %v1427_v35 = vpop.f32.mrf.mxu1  ;;  %v1549_v39 = vpop.f32.mrf.mxu0 }
 0x10d   : > { %v1589_v24 = vadd.f32 %v2046_v19, %v1467_v23  ;;  %v1466_v37 = vadd.f32 %v1427_v35, %v1347_v49 }
 0x10e   : > { %v2033_v54 = vpop.f32.mrf.mxu1  ;;  %v2049_v17 = vpop.f32.mrf.mxu0 }
 0x10f   : > { %v1604_v42 = vadd.f32 %v2444_v21, %v1589_v24  ;;  %v1588_v46 = vadd.f32 %v1549_v39, %v1466_v37  ;;  %v1469_v57 = vadd.f32 %v2033_v54, %v1350_v52 }
 0x110   : > { %v1437_v44 = vpop.f32.mrf.mxu1  ;;  %v1559_v61 = vpop.f32.mrf.mxu0 }
 0x111   : > { %v1612_v63 = vmax.f32 %v1604_v42, 0.0  ;;  %v1603_v0 = vadd.f32 %v2444_v21, %v1588_v46  ;;  %v1591_v26 = vadd.f32 %v2049_v17, %v1469_v57  ;;  %v1468_v1 = vadd.f32 %v1437_v44, %v1349_v56 }
 0x112   : > { %v2036_v47 = vpop.f32.mrf.mxu1  ;;  %v2052_v38 = vpop.f32.mrf.mxu0 }
 0x113   : > { %1621 = vst.msk [vmem:[%s2453_s22 + $0x8] sm:$0xff] %vm1619_vm2, %v1612_v63  ;;  %v1611_v41 = vmax.f32 %v1603_v0, 0.0  ;;  %v1606_v6 = vadd.f32 %v2444_v21, %v1591_v26  ;;  %v1590_v10 = vadd.f32 %v1559_v61, %v1468_v1  ;;  %v1471_v5 = vadd.f32 %v2036_v47, %v1352_v22 }
 0x114   : > { %v1447_v9 = vpop.f32.mrf.mxu1  ;;  %v1569_v40 = vpop.f32.mrf.mxu0 }
 0x115   : > { %1620 = vst.msk [vmem:[%s2453_s22] sm:$0xff] %vm1619_vm2, %v1611_v41  ;;  %v1614_v13 = vmax.f32 %v1606_v6, 0.0  ;;  %v1605_v45 = vadd.f32 %v2444_v21, %v1590_v10  ;;  %v1593_v58 = vadd.f32 %v2052_v38, %v1471_v5  ;;  %v1470_v3 = vadd.f32 %v1447_v9, %v1351_v2 }
 0x116   : > { %v2039_v51 = vpop.f32.mrf.mxu1  ;;  %v2055_v33 = vpop.f32.mrf.mxu0 }
 0x117   : > { %1623 = vst.msk [vmem:[%s2453_s22 + $0x18] sm:$0xff] %vm1619_vm2, %v1614_v13  ;;  %v1613_v4 = vmax.f32 %v1605_v45, 0.0  ;;  %v1608_v8 = vadd.f32 %v2444_v21, %v1593_v58  ;;  %v1592_v7 = vadd.f32 %v1569_v40, %v1470_v3  ;;  %v1473_v15 = vadd.f32 %v2039_v51, %v1354_v12 }
 0x118   : > { %v1457_v11 = vpop.f32.mrf.mxu1  ;;  %v1579_v29 = vpop.f32.mrf.mxu0 }
 0x119   : > { %1622 = vst.msk [vmem:[%s2453_s22 + $0x10] sm:$0xff] %vm1619_vm2, %v1613_v4  ;;  %v1616_v18 = vmax.f32 %v1608_v8, 0.0  ;;  %v1607_v25 = vadd.f32 %v2444_v21, %v1592_v7  ;;  %v1595_v14 = vadd.f32 %v2055_v33, %v1473_v15  ;;  %v1472_v27 = vadd.f32 %v1457_v11, %v1353_v59 }
 0x11b   : > { %1625 = vst.msk [vmem:[%s2453_s22 + $0x28] sm:$0xff] %vm1619_vm2, %v1616_v18  ;;  %v1615_v16 = vmax.f32 %v1607_v25, 0.0  ;;  %v1610_v48 = vadd.f32 %v2444_v21, %v1595_v14  ;;  %v1594_v20 = vadd.f32 %v1579_v29, %v1472_v27 }
 0x11d   : > { %1624 = vst.msk [vmem:[%s2453_s22 + $0x20] sm:$0xff] %vm1619_vm2, %v1615_v16  ;;  %v1618_v30 = vmax.f32 %v1610_v48, 0.0  ;;  %v1609_v31 = vadd.f32 %v2444_v21, %v1594_v20 }
 0x11f   : > { %1627 = vst.msk [vmem:[%s2453_s22 + $0x38] sm:$0xff] %vm1619_vm2, %v1618_v30  ;;  %v1617_v34 = vmax.f32 %v1609_v31, 0.0 }
 0x121   : > { %1626 = vst.msk [vmem:[%s2453_s22 + $0x30] sm:$0xff] %vm1619_vm2, %v1617_v34 }
 0x122 PF: > { %s16_s21 = sadd.s32 1, %s2075_s21  }
 0x123   : > { %p13_p4 = scmp.ge.s32.totalorder %s16_s21, 4  }
 0x125   :  { %15 = sbr.rel (!%p13_p4) target bundleno = 1 (0x1), region = 91 }

// kernel: _lambda_.12
= control target key start
LH: loop header
LB: loop body
LE: loop exit
PB: predicated region body
PF: predicated region fallthrough
CT: control target
= control target key end

     0   :  { %s1597_s21 = smov 0   ;;  %s1849_s0 = inlined_call_operand.vmem [shape: f32[2,5,5,32], index: 0, kind: input, shape index: {}]   ;;  %s1850_s1 = inlined_call_operand.vmem [shape: f32[2,5,5,32], index: 1, kind: input, shape index: {}]   ;;  %s1851_s2 = inlined_call_operand.vmem [shape: f32[2,5,5,32], index: 2, kind: input, shape index: {}]   ;;  %s1852_s3 = inlined_call_operand.vmem [shape: f32[2,5,5,32], index: 3, kind: input, shape index: {}]   ;;  %s1853_s4 = inlined_call_operand.vmem [shape: f32[9,32,64], index: 4, kind: input, shape index: {}]   ;;  %s1854_s5 = inlined_call_operand.vmem [shape: f32[1,64], index: 5, kind: input, shape index: {}]   ;;  %s1855_s6 = inlined_call_operand.vmem [shape: f32[2,4,4,64], index: 6, kind: output, shape index: {}]  }
   0x1 LB: > { %s1297_s22 = sadd.s32 4294967295, %s1560_s21   ;;  %p1301_p0 = scmp.ge.s32.totalorder %s1560_s21, 1  ;;  %s1560_s21 = sphi %s1597_s21, %s16_s21  }
   0x2   : > { %p242_p1 = scmp.lt.s32.totalorder %s1560_s21, 3 }
   0x4   : > { %p243_p2 = pnand %p1301_p0, %p242_p1 }
   0x5   : > { %p287_p3 = scmp.lt.s32.totalorder (!%p243_p2), %s1297_s22, 1 }
   0x6   : > { %246 = sbr.rel (%p243_p2) target bundleno = 263 (0x107), region = 44 }
   0xb   : > { %v1311_v0 = vld [vmem:[%s1853_s4 + $0x38] sm:$0xff]  ;;  %v1310_v2 = vld [vmem:[%s1853_s4 + $0x30] sm:$0xff]  ;;  %v1309_v4 = vld [vmem:[%s1853_s4 + $0x28] sm:$0xff]  ;;  %s1859_s22 = smov (!%p287_p3, %s1297_s22), 1  ;;  %vm345_vm0 = vcmask 261120   ;;  %vm514_vm1 = vcmask 1042432  }
   0xc   : > { %v333_v1 = vld [vmem:[%s1853_s4 + $0x18] sm:$0xff]  ;;  %1425 = vmatprep.subr.mxu0 %v1311_v0  ;;  %v332_v3 = vld [vmem:[%s1853_s4 + $0x10] sm:$0xff]  ;;  %v331_v5 = vld [vmem:[%s1853_s4 + $0x8] sm:$0xff]  ;;  %s1632_s15 = smul.u32 40, %s1859_s22  ;;  %vm515_vm2 = vcmask 1046532   ;;  %s1370_s26 = sshll.u32 %s1859_s22, 4 }
   0xd   : > { %1436 = vmatprep.subr.mxu1 %v333_v1  ;;  %1426 = vmatpush3.msra.mxu0 %v1311_v0  ;;  %v1308_v6 = vld [vmem:[%s1853_s4 + $0x20] sm:$0xff]  ;;  %v1323_v8 = vld [vmem:[%s1853_s4 + $0x58] sm:$0xff]  ;;  %v1322_v26 = vld [vmem:[%s1853_s4 + $0x50] sm:$0xff]  ;;  %s311_s29 = scalar_lea.vmem %s1855_s6, %s1370_s26  ;;  %vm1201_vm4 = vcmask 519168  }
   0xe   : > { %1437 = vmatpush3.msra.mxu1 %v333_v1  ;;  %1427 = vmatprep.subr.mxu0 %v1310_v2  ;;  %v330_v7 = vld [vmem:[%s1853_s4] sm:$0xff]  ;;  %s1638_s18 = scalar_lea.vmem %s1850_s1, %s1632_s15  ;;  %s1644_s23 = scalar_lea.vmem %s1849_s0, %s1632_s15  ;;  %v1329_v9 = vld [vmem:[%s1853_s4 + $0x78] sm:$0xff]  ;;  %vm1687_vm3 = vmor %vm514_vm1, %vm515_vm2 }
   0xf   : > { %1438 = vmatprep.subr.mxu1 %v332_v3  ;;  %1428 = vmatpush3.msra.mxu0 %v1310_v2  ;;  %v317_v10 = vld [vmem:[%s1638_s18] sm:$0x1f]  ;;  %v1654_v11 = vld [vmem:[%s1638_s18 + $0x8] sm:$0x1f]  ;;  %v1657_v12 = vld [vmem:[%s1638_s18 + $0x10] sm:$0x1f]  ;;  %s301_s8 = scalar_lea.vmem %s1851_s2, %s1632_s15  ;;  %s1716_s19 = scalar_lea.vmem %s1852_s3, %s1632_s15 }
  0x10   : > { %1439 = vmatpush3.msra.mxu1 %v332_v3  ;;  %1429 = vmatprep.subr.mxu0 %v1309_v4  ;;  %v1660_v13 = vld [vmem:[%s1638_s18 + $0x18] sm:$0x1f]  ;;  %v343_v14 = vcombine.low %v317_v10, %v1654_v11  ;;  %v312_v15 = vld [vmem:[%s1644_s23] sm:$0x1f]  ;;  %v1667_v17 = vld [vmem:[%s1644_s23 + $0x8] sm:$0x1f] }
  0x11   : > { %1440 = vmatprep.subr.mxu1 %v331_v5  ;;  %1430 = vmatpush3.msra.mxu0 %v1309_v4  ;;  %v344_v16 = vcombine.low %v1657_v12, %v1660_v13  ;;  %v510_v18 = vcombine.high %v312_v15, %v312_v15  ;;  %v1316_v19 = vrot.slane %v312_v15, 9  ;;  %v1670_v20 = vld [vmem:[%s1644_s23 + $0x10] sm:$0x1f]  ;;  %v429_v21 = vcombine.low %v312_v15, %v1667_v17  ;;  %v1678_v24 = vld [vmem:[%s1644_s23 + $0x18] sm:$0x1f]  ;;  %v1321_v35 = vld [vmem:[%s1853_s4 + $0x48] sm:$0xff] }
  0x12   : > { %1441 = vmatpush3.msra.mxu1 %v331_v5  ;;  %1431 = vmatprep.subr.mxu0 %v1308_v6  ;;  %v511_v22 = vcombine.high %v1667_v17, %v1667_v17  ;;  %v1317_v23 = vrot.slane %v1667_v17, 9  ;;  %v512_v25 = vcombine.high %v1670_v20, %v1670_v20  ;;  %v430_v29 = vcombine.low %v1670_v20, %v1678_v24  ;;  %v1328_v36 = vld [vmem:[%s1853_s4 + $0x70] sm:$0xff]  ;;  %v1320_v37 = vld [vmem:[%s1853_s4 + $0x40] sm:$0xff]  ;;  %v1327_v39 = vld [vmem:[%s1853_s4 + $0x68] sm:$0xff] }
  0x13   : > { %1442 = vmatprep.subr.mxu1 %v330_v7  ;;  %1432 = vmatpush3.msra.mxu0 %v1308_v6  ;;  %v519_v28 = vrot.slane %v510_v18, 5  ;;  %v513_v30 = vcombine.high %v1678_v24, %v1678_v24  ;;  %v1318_v31 = vrot.slane %v1670_v20, 9  ;;  %v1319_v34 = vrot.slane %v1678_v24, 9  ;;  %v322_v43 = vld [vmem:[%s301_s8] sm:$0x1f]  ;;  %v1335_v53 = vld [vmem:[%s1853_s4 + $0x98] sm:$0xff] }
  0x14   : > { %1443 = vmatpush3.msra.mxu1 %v330_v7  ;;  %1447 = vmatprep.subr.mxu0 %v1323_v8  ;;  %v523_v32 = vrot.slane %v511_v22, 5  ;;  %v527_v33 = vrot.slane %v512_v25, 5  ;;  %v323_v44 = vld [vmem:[%s301_s8 + $0x8] sm:$0x1f]  ;;  %v324_v47 = vld [vmem:[%s301_s8 + $0x10] sm:$0x1f]  ;;  %v805_v50 = vcombine.high %v322_v43, %v322_v43 }
  0x15   : > { %1458 = vmatprep.subr.mxu1 %v1329_v9  ;;  %1433 = vmatprep.mubr.msk.f32.mxu0 %vm345_vm0, %v343_v14  ;;  %v531_v38 = vrot.slane %v513_v30, 5  ;;  %v520_v40 = vsel %vm1687_vm3, %v1316_v19, %v519_v28  ;;  %v325_v48 = vld [vmem:[%s301_s8 + $0x18] sm:$0x1f]  ;;  %v806_v51 = vcombine.high %v323_v44, %v323_v44  ;;  %v1326_v52 = vld [vmem:[%s1853_s4 + $0x60] sm:$0xff]  ;;  %v630_v54 = vcombine.low %v322_v43, %v323_v44  ;;  %v1334_v62 = vld [vmem:[%s1853_s4 + $0x90] sm:$0xff] }
  0x16   : > { %1434 = vmatmul.mubr.msk.f32.vlgmr.msra.gmra.mxu0 %vm345_vm0, %v344_v16  ;;  %1444 = vmatprep.mubr.msk.f32.mxu1 %vm345_vm0, %v429_v21  ;;  %v1726_v41 = vsel %vm1687_vm3, %v1317_v23, %v523_v32  ;;  %v1730_v42 = vsel %vm1687_vm3, %v1318_v31, %v527_v33  ;;  %v807_v55 = vcombine.high %v324_v47, %v324_v47  ;;  %v1338_v58 = vrot.slane %v322_v43, 9  ;;  %v1345_v63 = vld [vmem:[%s1853_s4 + $0xb8] sm:$0xff]  ;;  %v1333_v4 = vld [vmem:[%s1853_s4 + $0x88] sm:$0xff]  ;;  %v1344_v5 = vld [vmem:[%s1853_s4 + $0xb0] sm:$0xff] }
  0x17   : > { %1448 = vmatpush3.msra.mxu0 %v1323_v8  ;;  %1445 = vmatmul.mubr.msk.f32.vlgmr.msra.gmra.mxu1 %vm345_vm0, %v430_v29  ;;  %v538_v45 = vcombine.low %v520_v40, %v1726_v41  ;;  %v1735_v46 = vsel %vm1687_vm3, %v1319_v34, %v531_v38  ;;  %v808_v56 = vcombine.high %v325_v48, %v325_v48  ;;  %v811_v59 = vrot.slane %v805_v50, 5  ;;  %v1332_v6 = vld [vmem:[%s1853_s4 + $0x80] sm:$0xff]  ;;  %v1343_v7 = vld [vmem:[%s1853_s4 + $0xa8] sm:$0xff]  ;;  %v1550_v14 = vld [vmem:[%s1716_s19 + $0x10] ss:$8 sps:$4 sm:$0xff]  }
  0x18   : > { %1449 = vmatprep.subr.mxu0 %v1322_v26  ;;  %1459 = vmatpush3.msra.mxu1 %v1329_v9  ;;  %v539_v49 = vcombine.low %v1730_v42, %v1735_v46  ;;  %v631_v57 = vcombine.low %v324_v47, %v325_v48  ;;  %v1339_v60 = vrot.slane %v323_v44, 9  ;;  %v815_v61 = vrot.slane %v806_v51, 5  ;;  %v1549_v8 = vld [vmem:[%s1716_s19] ss:$8 sps:$4 sm:$0xff]   ;;  %v1351_v19 = vld [vmem:[%s1853_s4 + $0xd8] sm:$0xff]  ;;  %v1350_v23 = vld [vmem:[%s1853_s4 + $0xd0] sm:$0xff] }
  0x19   : > { %1450 = vmatpush3.msra.mxu0 %v1322_v26  ;;  %1460 = vmatprep.subr.mxu1 %v1328_v36  ;;  %v1340_v0 = vrot.slane %v324_v47, 9  ;;  %v819_v1 = vrot.slane %v807_v55, 5  ;;  %v1341_v2 = vrot.slane %v325_v48, 9  ;;  %v823_v3 = vrot.slane %v808_v56, 5  ;;  %v1342_v18 = vld [vmem:[%s1853_s4 + $0xa0] sm:$0xff]  ;;  %v1357_v25 = vld [vmem:[%s1853_s4 + $0xf8] sm:$0xff] }
  0x1a   : > { %1451 = vmatprep.subr.mxu0 %v1321_v35  ;;  %1461 = vmatpush3.msra.mxu1 %v1328_v36  ;;  %v812_v9 = vsel %vm1687_vm3, %v1338_v58, %v811_v59  ;;  %v816_v10 = vsel %vm1687_vm3, %v1339_v60, %v815_v61  ;;  %v1349_v26 = vld [vmem:[%s1853_s4 + $0xc8] sm:$0xff]  ;;  %v1356_v28 = vld [vmem:[%s1853_s4 + $0xf0] sm:$0xff]  ;;  %v316_v29 = vld [vmem:[%s1644_s23 + $0x20] sm:$0x1f]  ;;  %v919_v32 = vcombine.low %v1667_v17, %v1670_v20 }
  0x1b   : > { %1452 = vmatpush3.msra.mxu0 %v1321_v35  ;;  %1462 = vmatprep.subr.mxu1 %v1327_v39  ;;  %v820_v15 = vsel %vm1687_vm3, %v1340_v0, %v819_v1  ;;  %v824_v16 = vsel %vm1687_vm3, %v1341_v2, %v823_v3  ;;  %v830_v21 = vcombine.low %v812_v9, %v816_v10  ;;  %v1348_v30 = vld [vmem:[%s1853_s4 + $0xc0] sm:$0xff]  ;;  %v1355_v31 = vld [vmem:[%s1853_s4 + $0xe8] sm:$0xff]  ;;  %v1364_v17 = vld [vmem:[%s1853_s4 + $0x118] sm:$0xff] }
  0x1c   : > { %1453 = vmatprep.subr.mxu0 %v1320_v37  ;;  %1455 = vmatprep.mubr.msk.f32.mxu0 %vm345_vm0, %v538_v45  ;;  %v831_v22 = vcombine.low %v820_v15, %v824_v16  ;;  %v1091_v33 = vcombine.high %v316_v29, %v316_v29  ;;  %v321_v34 = vld [vmem:[%s1638_s18 + $0x20] sm:$0x1f]  ;;  %v920_v35 = vcombine.low %v1678_v24, %v316_v29  ;;  %v1360_v24 = vrot.slane %v316_v29, 9 }
  0x1d   : > { %1454 = vmatpush3.msra.mxu0 %v1320_v37  ;;  %1463 = vmatpush3.msra.mxu1 %v1327_v39  ;;  %v1008_v36 = vcombine.low %v1654_v11, %v1657_v12  ;;  %v1354_v37 = vld [vmem:[%s1853_s4 + $0xe0] sm:$0xff]  ;;  %v1009_v20 = vcombine.low %v1660_v13, %v321_v34  ;;  %v1101_v11 = vcombine.low %v1726_v41, %v1730_v42  ;;  %v1363_v12 = vld [vmem:[%s1853_s4 + $0x110] sm:$0xff]  ;;  %v1362_v13 = vld [vmem:[%s1853_s4 + $0x108] sm:$0xff] }
  0x1e   : > { %1456 = vmatmul.mubr.msk.f32.vlgmr.msra.gmra.mxu0 %vm345_vm0, %v539_v49  ;;  %1464 = vmatprep.subr.mxu1 %v1326_v52  ;;  %v1094_v38 = vrot.slane %v1091_v33, 5  ;;  %v1361_v40 = vld [vmem:[%s1853_s4 + $0x100] sm:$0xff] }
  0x1f   : > { %1469 = vmatprep.subr.mxu0 %v1335_v53  ;;  %1465 = vmatpush3.msra.mxu1 %v1326_v52 }
  0x20   : > { %1466 = vmatprep.mubr.msk.f32.mxu1 %vm345_vm0, %v630_v54  ;;  %1470 = vmatpush3.msra.mxu0 %v1335_v53  ;;  %v1095_v39 = vsel %vm1687_vm3, %v1360_v24, %v1094_v38 }
  0x21   : > { %1467 = vmatmul.mubr.msk.f32.vlgmr.msra.gmra.mxu1 %vm345_vm0, %v631_v57  ;;  %1471 = vmatprep.subr.mxu0 %v1334_v62  ;;  %v1102_v41 = vcombine.low %v1735_v46, %v1095_v39 }
  0x22   : > { %1480 = vmatprep.subr.mxu1 %v1345_v63  ;;  %1472 = vmatpush3.msra.mxu0 %v1334_v62 }
  0x23   : > { %1481 = vmatpush3.msra.mxu1 %v1345_v63  ;;  %1473 = vmatprep.subr.mxu0 %v1333_v4 }
  0x24   : > { %1482 = vmatprep.subr.mxu1 %v1344_v5  ;;  %1474 = vmatpush3.msra.mxu0 %v1333_v4 }
  0x25   : > { %1483 = vmatpush3.msra.mxu1 %v1344_v5  ;;  %1475 = vmatprep.subr.mxu0 %v1332_v6 }
  0x26   : > { %1484 = vmatprep.subr.mxu1 %v1343_v7  ;;  %1476 = vmatpush3.msra.mxu0 %v1332_v6 }
  0x27   : > { %1477 = vmatprep.mubr.msk.f32.mxu0 %vm345_vm0, %v1549_v8  ;;  %1485 = vmatpush3.msra.mxu1 %v1343_v7  ;;  %v1367_v7 = vld [vmem:[%s1854_s5] ss:$0 sm:$0xff] }
  0x28   : > { %1478 = vmatmul.mubr.msk.f32.vlgmr.msra.gmra.mxu0 %vm345_vm0, %v1550_v14  ;;  %1486 = vmatprep.subr.mxu1 %v1342_v18 }
  0x29   : > { %1491 = vmatprep.subr.mxu0 %v1351_v19  ;;  %1487 = vmatpush3.msra.mxu1 %v1342_v18 }
  0x2a   : > { %1488 = vmatprep.mubr.msk.f32.mxu1 %vm345_vm0, %v830_v21  ;;  %1492 = vmatpush3.msra.mxu0 %v1351_v19 }
  0x2b   : > { %1489 = vmatmul.mubr.msk.f32.vlgmr.msra.gmra.mxu1 %vm345_vm0, %v831_v22  ;;  %1493 = vmatprep.subr.mxu0 %v1350_v23 }
  0x2c   : > { %1502 = vmatprep.subr.mxu1 %v1357_v25  ;;  %1494 = vmatpush3.msra.mxu0 %v1350_v23 }
  0x2d   : > { %1503 = vmatpush3.msra.mxu1 %v1357_v25  ;;  %1495 = vmatprep.subr.mxu0 %v1349_v26 }
  0x2e   : > { %1504 = vmatprep.subr.mxu1 %v1356_v28  ;;  %1496 = vmatpush3.msra.mxu0 %v1349_v26 }
  0x2f   : > { %1505 = vmatpush3.msra.mxu1 %v1356_v28  ;;  %1497 = vmatprep.subr.mxu0 %v1348_v30 }
  0x30   : > { %1506 = vmatprep.subr.mxu1 %v1355_v31  ;;  %1498 = vmatpush3.msra.mxu0 %v1348_v30 }
  0x31   : > { %1499 = vmatprep.mubr.msk.f32.mxu0 %vm345_vm0, %v919_v32  ;;  %1507 = vmatpush3.msra.mxu1 %v1355_v31 }
  0x32   : > { %1500 = vmatmul.mubr.msk.f32.vlgmr.msra.gmra.mxu0 %vm345_vm0, %v920_v35  ;;  %1508 = vmatprep.subr.mxu1 %v1354_v37 }
  0x33   : > { %1513 = vmatprep.subr.mxu0 %v1364_v17  ;;  %1509 = vmatpush3.msra.mxu1 %v1354_v37 }
  0x34   : > { %1510 = vmatprep.mubr.msk.f32.mxu1 %vm345_vm0, %v1008_v36  ;;  %1514 = vmatpush3.msra.mxu0 %v1364_v17 }
  0x35   : > { %1511 = vmatmul.mubr.msk.f32.vlgmr.msra.gmra.mxu1 %vm345_vm0, %v1009_v20  ;;  %1515 = vmatprep.subr.mxu0 %v1363_v12 }
  0x36   : > { %1521 = vmatprep.mubr.msk.f32.mxu0 %vm345_vm0, %v1101_v11  ;;  %1516 = vmatpush3.msra.mxu0 %v1363_v12 }
  0x37   : > { %1517 = vmatprep.subr.mxu0 %v1362_v13 }
  0x38   : > { %1518 = vmatpush3.msra.mxu0 %v1362_v13 }
  0x39   : > { %1519 = vmatprep.subr.mxu0 %v1361_v40 }
  0x3a   : > { %1520 = vmatpush3.msra.mxu0 %v1361_v40 }
  0x3b   : > { %1522 = vmatmul.mubr.msk.f32.vlgmr.msra.gmra.mxu0 %vm345_vm0, %v1102_v41 }
  0xd6   : > { %v1435_v42 = vpop.f32.mrf.mxu0 }
  0xd7   : > { %v1446_v43 = vpop.f32.mrf.mxu1 }
  0xd8   : > { %v416_v27 = vpop.f32.mrf.mxu0  ;;  %v507_v47 = vadd.f32 %v1446_v43, %v1435_v42 }
  0xd9   : > { %v501_v45 = vpop.f32.mrf.mxu1 }
  0xda   : > { %v502_v50 = vadd.f32 %v501_v45, %v416_v27 }
  0xde   : > { %v1457_v44 = vpop.f32.mrf.mxu0 }
  0xdf   : > { %v620_v51 = vadd.f32 %v1457_v44, %v507_v47 }
  0xe0   : > { %v610_v48 = vpop.f32.mrf.mxu0 }
  0xe1   : > { %v1468_v49 = vpop.f32.mrf.mxu1  ;;  %v619_v53 = vadd.f32 %v610_v48, %v502_v50 }
  0xe2   : > { %v712_v55 = vadd.f32 %v1468_v49, %v620_v51 }
  0xe3   : > { %v702_v54 = vpop.f32.mrf.mxu1 }
  0xe4   : > { %v711_v57 = vadd.f32 %v702_v54, %v619_v53 }
  0xe8   : > { %v1479_v52 = vpop.f32.mrf.mxu0 }
  0xe9   : > { %v804_v58 = vadd.f32 %v1479_v52, %v712_v55 }
  0xea   : > { %v794_v46 = vpop.f32.mrf.mxu0 }
  0xeb   : > { %v1490_v56 = vpop.f32.mrf.mxu1  ;;  %v803_v60 = vadd.f32 %v794_v46, %v711_v57 }
  0xec   : > { %v912_v62 = vadd.f32 %v1490_v56, %v804_v58 }
  0xed   : > { %v902_v61 = vpop.f32.mrf.mxu1 }
  0xee   : > { %v911_v1 = vadd.f32 %v902_v61, %v803_v60 }
  0xf2   : > { %v1501_v59 = vpop.f32.mrf.mxu0 }
  0xf3   : > { %v1001_v2 = vadd.f32 %v1501_v59, %v912_v62 }
  0xf4   : > { %v991_v63 = vpop.f32.mrf.mxu0 }
  0xf5   : > { %v1512_v0 = vpop.f32.mrf.mxu1  ;;  %v1000_v3 = vadd.f32 %v991_v63, %v911_v1 }
  0xf6   : > { %v1090_v5 = vadd.f32 %v1512_v0, %v1001_v2 }
  0xf7   : > { %v1080_v4 = vpop.f32.mrf.mxu1 }
  0xf8   : > { %v1089_v8 = vadd.f32 %v1080_v4, %v1000_v3 }
  0xfb   : > { %v1523_v6 = vpop.f32.mrf.mxu0 }
  0xfc   : > { %v1183_v9 = vadd.f32 %v1523_v6, %v1090_v5 }
  0xfd   : > { %v1173_v10 = vpop.f32.mrf.mxu0 }
  0xfe   : > { %v1192_v14 = vadd.f32 %v1367_v7, %v1183_v9  ;;  %v1182_v15 = vadd.f32 %v1173_v10, %v1089_v8 }
 0x100   : > { %v1194_v16 = vmax.f32 %v1192_v14, 0.0  ;;  %v1191_v18 = vadd.f32 %v1367_v7, %v1182_v15 }
 0x102   : > { %v1198_v19 = vcombine.high %v1194_v16, %v1194_v16  ;;  %1204 = vst.msk [vmem:[%s311_s29 + $0x8] sm:$0xf] %vm1201_vm4, %v1194_v16  ;;  %v1193_v21 = vmax.f32 %v1191_v18, 0.0 }
 0x104   : > { %1205 = vst.msk [vmem:[%s311_s29 + $0xc] sm:$0xf] %vm1201_vm4, %v1198_v19  ;;  %v1197_v22 = vcombine.high %v1193_v21, %v1193_v21  ;;  %1202 = vst.msk [vmem:[%s311_s29] sm:$0xf] %vm1201_vm4, %v1193_v21 }
 0x106   : > { %1203 = vst.msk [vmem:[%s311_s29 + $0x4] sm:$0xf] %vm1201_vm4, %v1197_v22 }
 0x107 PF: > { %s16_s21 = sadd.s32 1, %s1560_s21  }
 0x108   : > { %p13_p4 = scmp.ge.s32.totalorder %s16_s21, 4  }
 0x10a   :  { %15 = sbr.rel (!%p13_p4) target bundleno = 1 (0x1), region = 91 }

// kernel: _lambda_.13
= control target key start
LH: loop header
LB: loop body
LE: loop exit
PB: predicated region body
PF: predicated region fallthrough
CT: control target
= control target key end

     0   :  { %9 = vsyncpa [#allocation3], 0  ;;  %s2218_s0 = inlined_call_operand.vmem [shape: f32[2,6,6,64], index: 0, kind: input, shape index: {}]   ;;  %s2219_s1 = inlined_call_operand.vmem [shape: f32[9,64,64], index: 1, kind: input, shape index: {}]   ;;  %s2220_s2 = inlined_call_operand.vmem [shape: f32[1,64], index: 2, kind: input, shape index: {}]   ;;  %s2221_s3 = inlined_call_operand.vmem [shape: f32[2,4,4,64], index: 3, kind: input, shape index: {}]   ;;  %s2222_s4 = inlined_call_operand.hbm [shape: f32[2,1,64], index: 4, kind: output, shape index: {}]  }
   0x1   :  { %11 = vsyncpa [#allocation3 + $0x1], 0  ;;  %s1727_s15 = smov 0   ;;  %s1729_s16 = smov 0  }
   0x2   :  { %s1731_s17 = smov 0   ;;  %s1733_s18 = smov 0  }
   0x3 LB: > { %s1748_s19 = sadd.s32 4294967295, %s1699_s18   ;;  %s1219_s20 = sadd.s32 4294967294, %s1699_s18   ;;  %s1699_s18 = sphi %s1733_s18, %s2232_s18   ;;  %s1695_s17 = sphi %s1731_s17, %s2231_s17   ;;  %s1691_s16 = sphi %s1729_s16, %s2230_s16   ;;  %s1687_s15 = sphi %s1727_s15, %s2229_s15  }
   0x4   : > { %s1752_s21 = sadd.s32 1, %s1699_s18   ;;  %s118_s22 = sadd.s32 1, %s1695_s17 }
   0x5   : > { %s115_s23 = ssub.s32 %s1699_s18, %s1752_s21  ;;  %p128_p0 = scmp.ne.s32.totalorder %s1695_s17, %s1691_s16 }
   0x6   : > { %p116_p1 = scmp.eq.s32.totalorder %s115_s23, 0  ;;  %p129_p2 = scmp.eq.s32.totalorder %s1748_s19, 1 }
   0x7   : > { %p134_p3 = scmp.ne.s32.totalorder %s1691_s16, %s1687_s15  ;;  %p135_p4 = scmp.eq.s32.totalorder %s1219_s20, 1 }
   0x8   : > { %s1763_s24 = scalar_select %p116_p1, %s1695_s17, %s118_s22  }
   0x9   : > { %p1765_p5 = por %p129_p2, %p128_p0  ;;  %p1769_p6 = por %p135_p4, %p134_p3 }
   0xa   : > { %p1222_p7 = scmp.ge.s32.totalorder %s1699_s18, 1  ;;  %p175_p8 = scmp.lt.s32.totalorder %s1699_s18, 3 }
   0xc   : > { %p176_p9 = pnand %p1222_p7, %p175_p8 }
   0xd   : > { %p205_p10 = scmp.lt.s32.totalorder (!%p176_p9), %s1748_s19, 1  ;;  %s203_s22 = sand.u32 (!%p176_p9), 1, %s1691_s16  }
   0xe   : > { %179 = sbr.rel (%p176_p9) target bundleno = 340 (0x154), region = 36  ;;  %s1321_s23 = sshll.u32 (!%p176_p9), %s1748_s19, 4 }
   0xf   : > { %s1150_s5 = scalar_lea.hbm (!%p176_p9), %s2222_s4, %s1321_s23  ;;  %s1701_s7 = smov (!%p176_p9), [#allocation2]  }
  0x10   : > { %s1643_s9 = sshll.u32 (!%p176_p9), %s1701_s7, 4  ;;  %s1644_s9 = int_to_ptr.vmem [resolvable:$false] %s1643_s9 }
  0x13   : > { %v1237_v0 = vld [vmem:[%s2219_s1 + $0x78] sm:$0xff]  ;;  %v1236_v2 = vld [vmem:[%s2219_s1 + $0x70] sm:$0xff]  ;;  %v1235_v4 = vld [vmem:[%s2219_s1 + $0x68] sm:$0xff]  ;;  %s1795_s13 = scalar_select %p205_p10, %s1748_s19, 1  ;;  %vm237_vm0 = vcmask 1042432   ;;  %vm238_vm1 = vcmask 1046532  }
  0x14   : > { %v228_v1 = vld [vmem:[%s2219_s1 + $0x38] sm:$0xff]  ;;  %1415 = vmatprep.subr.mxu0 %v1237_v0  ;;  %v227_v3 = vld [vmem:[%s2219_s1 + $0x30] sm:$0xff]  ;;  %v226_v5 = vld [vmem:[%s2219_s1 + $0x28] sm:$0xff]  ;;  %vm267_vm3 = vcmask 523264   ;;  %vm428_vm4 = vcmask 1041408   ;;  %vm429_vm5 = vcmask 1045508  }
  0x15   : > { %1434 = vmatprep.subr.mxu1 %v228_v1  ;;  %1416 = vmatpush3.msra.mxu0 %v1237_v0  ;;  %v1234_v6 = vld [vmem:[%s2219_s1 + $0x60] sm:$0xff]  ;;  %s1586_s27 = smul.u32 48, %s1795_s13  ;;  %v1233_v8 = vld [vmem:[%s2219_s1 + $0x58] sm:$0xff]  ;;  %v1232_v13 = vld [vmem:[%s2219_s1 + $0x50] sm:$0xff]  ;;  %s1324_s10 = sshll.u32 %s1795_s13, 4  ;;  %vm1137_vm7 = vcmask 516096  }
  0x16   : > { %1435 = vmatpush3.msra.mxu1 %v228_v1  ;;  %1417 = vmatprep.subr.mxu0 %v1236_v2  ;;  %v225_v7 = vld [vmem:[%s2219_s1 + $0x20] sm:$0xff]  ;;  %v224_v9 = vld [vmem:[%s2219_s1 + $0x18] sm:$0xff]  ;;  %v223_v14 = vld [vmem:[%s2219_s1 + $0x10] sm:$0xff]  ;;  %s2175_s14 = scalar_lea.vmem %s2221_s3, %s1324_s10  ;;  %s1645_s19 = scalar_lea.vmem %s1644_s9, 32 }
  0x17   : > { %1436 = vmatprep.subr.mxu1 %v227_v3  ;;  %1418 = vmatpush3.msra.mxu0 %v1236_v2  ;;  %s1813_s8 = scalar_lea.vmem %s2218_s0, %s1586_s27  ;;  %vm1851_vm2 = vmor %vm237_vm0, %vm238_vm1  ;;  %v1231_v24 = vld [vmem:[%s2219_s1 + $0x48] sm:$0xff]  ;;  %v1230_v31 = vld [vmem:[%s2219_s1 + $0x40] sm:$0xff]  ;;  %s204_s27 = scalar_lea.vmem [#allocation2], %s203_s22 }
  0x18   : > { %1437 = vmatpush3.msra.mxu1 %v227_v3  ;;  %1419 = vmatprep.subr.mxu0 %v1235_v4  ;;  %v1816_v10 = vld [vmem:[%s1813_s8] sm:$0x3f]  ;;  %v1819_v11 = vld [vmem:[%s1813_s8 + $0x8] sm:$0x3f]  ;;  %v1822_v12 = vld [vmem:[%s1813_s8 + $0x10] sm:$0x3f] }
  0x19   : > { %1438 = vmatprep.subr.mxu1 %v226_v5  ;;  %1420 = vmatpush3.msra.mxu0 %v1235_v4  ;;  %v1831_v15 = vld [vmem:[%s1813_s8 + $0x18] sm:$0x3f]  ;;  %v1835_v16 = vcombine.high %v1816_v10, %v1816_v10  ;;  %v1839_v17 = vcombine.high %v1819_v11, %v1819_v11  ;;  %v1843_v18 = vcombine.high %v1822_v12, %v1822_v12  ;;  %v1226_v21 = vrot.slane %v1816_v10, 9  ;;  %v222_v25 = vld [vmem:[%s2219_s1 + $0x8] sm:$0xff]  ;;  %v221_v32 = vld [vmem:[%s2219_s1] sm:$0xff]  ;;  %s1152_s28 = sshll.u32 %s204_s27, 4  ;;  %s1153_s28 = int_to_ptr.vmem [resolvable:$true] %s1152_s28 }
  0x1a   : > { %1439 = vmatpush3.msra.mxu1 %v226_v5  ;;  %1421 = vmatprep.subr.mxu0 %v1234_v6  ;;  %v1847_v19 = vcombine.high %v1831_v15, %v1831_v15  ;;  %v1227_v22 = vrot.slane %v1819_v11, 9  ;;  %v1228_v23 = vrot.slane %v1822_v12, 9  ;;  %v1229_v29 = vrot.slane %v1831_v15, 9  ;;  %v1253_v41 = vld [vmem:[%s2219_s1 + $0xb8] sm:$0xff]  ;;  %v1252_v43 = vld [vmem:[%s2219_s1 + $0xb0] sm:$0xff]  ;;  %v1251_v45 = vld [vmem:[%s2219_s1 + $0xa8] sm:$0xff]  ;;  %p1646_p0 = scmp.lt.s32.totalorder %s1153_s28, %s1644_s9 }
  0x1b   : > { %1440 = vmatprep.subr.mxu1 %v225_v7  ;;  %1422 = vmatpush3.msra.mxu0 %v1234_v6  ;;  %v242_v26 = vrot.slane %v1835_v16, 5  ;;  %v246_v27 = vrot.slane %v1839_v17, 5  ;;  %v250_v28 = vrot.slane %v1843_v18, 5  ;;  %v347_v39 = vcombine.low %v1816_v10, %v1819_v11  ;;  %v1263_v42 = vld [vmem:[%s2219_s1 + $0xf8] sm:$0xff]  ;;  %v1262_v44 = vld [vmem:[%s2219_s1 + $0xf0] sm:$0xff]  ;;  %v1261_v46 = vld [vmem:[%s2219_s1 + $0xe8] sm:$0xff] }
  0x1c   : > { %1441 = vmatpush3.msra.mxu1 %v225_v7  ;;  %1423 = vmatprep.subr.mxu0 %v1233_v8  ;;  %v254_v30 = vrot.slane %v1847_v19, 5  ;;  %v1898_v40 = vcombine.low %v1822_v12, %v1831_v15  ;;  %v433_v47 = vrot.slane %v1835_v16, 6  ;;  %v437_v48 = vrot.slane %v1839_v17, 6  ;;  %v1250_v51 = vld [vmem:[%s2219_s1 + $0xa0] sm:$0xff]  ;;  %vm1936_vm6 = vmor %vm428_vm4, %vm429_vm5  ;;  %v1249_v56 = vld [vmem:[%s2219_s1 + $0x98] sm:$0xff]  ;;  %s1639_s6 = scalar_lea.vmem %s1153_s28, 16 }
  0x1d   : > { %1442 = vmatprep.subr.mxu1 %v224_v9  ;;  %1424 = vmatpush3.msra.mxu0 %v1233_v8  ;;  %v243_v33 = vsel %vm1851_vm2, %v1226_v21, %v242_v26  ;;  %v1879_v34 = vsel %vm1851_vm2, %v1227_v22, %v246_v27  ;;  %v1883_v35 = vsel %vm1851_vm2, %v1228_v23, %v250_v28  ;;  %v1242_v49 = vrot.slane %v1816_v10, 10  ;;  %v1260_v52 = vld [vmem:[%s2219_s1 + $0xe0] sm:$0xff]  ;;  %v1259_v57 = vld [vmem:[%s2219_s1 + $0xd8] sm:$0xff]  ;;  %v1248_v62 = vld [vmem:[%s2219_s1 + $0x90] sm:$0xff]  ;;  %p1640_p11 = scmp.ne.s32.totalorder %s1153_s28, %s1639_s6  ;;  %p1647_p1 = scmp.lt.s32.totalorder %s1645_s19, %s1639_s6 }
  0x1e   : > { %1443 = vmatpush3.msra.mxu1 %v224_v9  ;;  %1425 = vmatprep.subr.mxu0 %v1232_v13  ;;  %v1887_v36 = vsel %vm1851_vm2, %v1229_v29, %v254_v30  ;;  %v265_v37 = vcombine.low %v243_v33, %v1879_v34  ;;  %v1243_v50 = vrot.slane %v1819_v11, 10  ;;  %v441_v54 = vrot.slane %v1843_v18, 6  ;;  %v1258_v63 = vld [vmem:[%s2219_s1 + $0xd0] sm:$0xff]  ;;  %v1247_v0 = vld [vmem:[%s2219_s1 + $0x88] sm:$0xff]  ;;  %v1978_v5 = vld [vmem:[%s1813_s8 + $0x20] sm:$0x3f] }
  0x1f   : > { %1444 = vmatprep.subr.mxu1 %v223_v14  ;;  %1426 = vmatpush3.msra.mxu0 %v1232_v13  ;;  %v1892_v38 = vcombine.low %v1883_v35, %v1887_v36  ;;  %v445_v55 = vrot.slane %v1847_v19, 6  ;;  %v1244_v58 = vrot.slane %v1822_v12, 10  ;;  %v1245_v59 = vrot.slane %v1831_v15, 10  ;;  %v1257_v1 = vld [vmem:[%s2219_s1 + $0xc8] sm:$0xff]  ;;  %v1246_v6 = vld [vmem:[%s2219_s1 + $0x80] sm:$0xff]  ;;  %v1274_v9 = vld [vmem:[%s2219_s1 + $0x138] sm:$0xff]  ;;  %p1641_p12 = pnand %p1640_p11, %p1765_p5  ;;  %p1648_p2 = por %p1647_p1, %p1646_p0 }
  0x20   : > { %1445 = vmatpush3.msra.mxu1 %v223_v14  ;;  %1427 = vmatprep.subr.mxu0 %v1231_v24  ;;  %v434_v60 = vsel %vm1936_vm6, %v1242_v49, %v433_v47  ;;  %v1954_v61 = vsel %vm1936_vm6, %v1243_v50, %v437_v48  ;;  %v1256_v8 = vld [vmem:[%s2219_s1 + $0xc0] sm:$0xff]  ;;  %v549_v10 = vcombine.low %v1819_v11, %v1822_v12  ;;  %v1273_v14 = vld [vmem:[%s2219_s1 + $0x130] sm:$0xff]  ;;  %v1285_v16 = vld [vmem:[%s2219_s1 + $0x178] sm:$0xff]  ;;  %v1266_v19 = vrot.slane %v1978_v5, 9 }
  0x21   : > { %1446 = vmatprep.subr.mxu1 %v222_v25  ;;  %1428 = vmatpush3.msra.mxu0 %v1231_v24  ;;  %v456_v2 = vcombine.low %v434_v60, %v1954_v61  ;;  %v1971_v3 = vsel %vm1936_vm6, %v1244_v58, %v441_v54  ;;  %v1975_v4 = vsel %vm1936_vm6, %v1245_v59, %v445_v55  ;;  %v1272_v12 = vld [vmem:[%s2219_s1 + $0x128] sm:$0xff]  ;;  %v1271_v17 = vld [vmem:[%s2219_s1 + $0x120] sm:$0xff]  ;;  %v1270_v22 = vld [vmem:[%s2219_s1 + $0x118] sm:$0xff]  ;;  %v1277_v27 = vrot.slane %v1978_v5, 10  ;;  %p1642_p13 = pneg %p1641_p12 }
  0x22   : > { %1447 = vmatpush3.msra.mxu1 %v222_v25  ;;  %1429 = vmatprep.subr.mxu0 %v1230_v31  ;;  %v1985_v7 = vcombine.low %v1971_v3, %v1975_v4  ;;  %v550_v13 = vcombine.low %v1831_v15, %v1978_v5  ;;  %v632_v11 = vcombine.high %v1978_v5, %v1978_v5  ;;  %v1284_v15 = vld [vmem:[%s2219_s1 + $0x170] sm:$0xff]  ;;  %v1283_v18 = vld [vmem:[%s2219_s1 + $0x168] sm:$0xff]  ;;  %v1282_v23 = vld [vmem:[%s2219_s1 + $0x160] sm:$0xff] }
  0x23   : > { %1448 = vmatprep.subr.mxu1 %v221_v32  ;;  %1430 = vmatpush3.msra.mxu0 %v1230_v31  ;;  %v1269_v24 = vld [vmem:[%s2219_s1 + $0x110] sm:$0xff]  ;;  %v1281_v25 = vld [vmem:[%s2219_s1 + $0x158] sm:$0xff]  ;;  %v1268_v29 = vld [vmem:[%s2219_s1 + $0x108] sm:$0xff]  ;;  %v646_v31 = vcombine.low %v1879_v34, %v1883_v35  ;;  %p1649_p3 = pnand %p1648_p2, %p1642_p13 }
  0x24   : > { %1431 = vmatprep.mubr.msk.f32.mxu0 %vm267_vm3, %v265_v37  ;;  %1449 = vmatpush3.msra.mxu1 %v221_v32  ;;  %v635_v21 = vrot.slane %v632_v11, 5  ;;  %v731_v26 = vrot.slane %v632_v11, 6  ;;  %v1280_v30 = vld [vmem:[%s2219_s1 + $0x150] sm:$0xff]  ;;  %v1267_v32 = vld [vmem:[%s2219_s1 + $0x100] sm:$0xff]  ;;  %v1279_v33 = vld [vmem:[%s2219_s1 + $0x148] sm:$0xff] }
  0x25   : > { %1450 = vmatprep.mubr.msk.f32.mxu1 %vm267_vm3, %v347_v39  ;;  %1432 = vmatmul.mubr.msk.f32.vlgmr.msra.gmra.mxu0 %vm267_vm3, %v1892_v38  ;;  %v1278_v34 = vld [vmem:[%s2219_s1 + $0x140] sm:$0xff]  ;;  %v1295_v35 = vld [vmem:[%s2219_s1 + $0x1b8] sm:$0xff]  ;;  %v1304_v48 = vld [vmem:[%s2219_s1 + $0x1e8] sm:$0xff] }
  0x26   : > { %1451 = vmatmul.mubr.msk.f32.vlgmr.msra.gmra.mxu1 %vm267_vm3, %v1898_v40  ;;  %1453 = vmatprep.subr.mxu0 %v1253_v41  ;;  %v2038_v28 = vsel %vm1851_vm2, %v1266_v19, %v635_v21  ;;  %v2058_v39 = vsel %vm1936_vm6, %v1277_v27, %v731_v26  ;;  %v1292_v47 = vld [vmem:[%s2219_s1 + $0x1a0] sm:$0xff]  ;;  %v1291_v50 = vld [vmem:[%s2219_s1 + $0x198] sm:$0xff]  ;;  %v1301_v58 = vld [vmem:[%s2219_s1 + $0x1d0] sm:$0xff] }
  0x27   : > { %1472 = vmatprep.subr.mxu1 %v1263_v42  ;;  %1454 = vmatpush3.msra.mxu0 %v1253_v41  ;;  %v647_v37 = vcombine.low %v1887_v36, %v2038_v28  ;;  %v742_v36 = vcombine.low %v1954_v61, %v1971_v3  ;;  %v743_v41 = vcombine.low %v1975_v4, %v2058_v39  ;;  %v1302_v54 = vld [vmem:[%s2219_s1 + $0x1d8] sm:$0xff]  ;;  %v1288_v59 = vld [vmem:[%s2219_s1 + $0x180] sm:$0xff]  ;;  %v1300_v60 = vld [vmem:[%s2219_s1 + $0x1c8] sm:$0xff] }
  0x28   : > { %1473 = vmatpush3.msra.mxu1 %v1263_v42  ;;  %1455 = vmatprep.subr.mxu0 %v1252_v43  ;;  %v1294_v42 = vld [vmem:[%s2219_s1 + $0x1b0] sm:$0xff] }
  0x29   : > { %1474 = vmatprep.subr.mxu1 %v1262_v44  ;;  %1456 = vmatpush3.msra.mxu0 %v1252_v43  ;;  %v1306_v43 = vld [vmem:[%s2219_s1 + $0x1f8] sm:$0xff] }
  0x2a   : > { %1475 = vmatpush3.msra.mxu1 %v1262_v44  ;;  %1457 = vmatprep.subr.mxu0 %v1251_v45  ;;  %v2080_v44 = vld [vmem:[%s1813_s8 + $0x28] sm:$0x3f]  ;;  %s1140_s8 = scalar_lea.sflag [#allocation3], %s203_s22 }
  0x2b   : > { %1476 = vmatprep.subr.mxu1 %v1261_v46  ;;  %1458 = vmatpush3.msra.mxu0 %v1251_v45  ;;  %v1293_v45 = vld [vmem:[%s2219_s1 + $0x1a8] sm:$0xff]  ;;  %v2097_v49 = vcombine.high %v2080_v44, %v2080_v44  ;;  %v1298_v55 = vrot.slane %v2080_v44, 9  ;;  %v1309_v3 = vrot.slane %v2080_v44, 10 }
  0x2c   : > { %1477 = vmatpush3.msra.mxu1 %v1261_v46  ;;  %1459 = vmatprep.subr.mxu0 %v1250_v51  ;;  %v1305_v46 = vld [vmem:[%s2219_s1 + $0x1f0] sm:$0xff] }
  0x2d   : > { %1478 = vmatprep.subr.mxu1 %v1260_v52  ;;  %1460 = vmatpush3.msra.mxu0 %v1250_v51  ;;  %v1303_v51 = vld [vmem:[%s2219_s1 + $0x1e0] sm:$0xff]  ;;  %v1011_v4 = vrot.slane %v2097_v49, 6 }
  0x2e   : > { %1479 = vmatpush3.msra.mxu1 %v1260_v52  ;;  %1461 = vmatprep.subr.mxu0 %v1249_v56  ;;  %v1290_v52 = vld [vmem:[%s2219_s1 + $0x190] sm:$0xff] }
  0x2f   : > { %1480 = vmatprep.subr.mxu1 %v1259_v57  ;;  %1462 = vmatpush3.msra.mxu0 %v1249_v56  ;;  %v918_v56 = vrot.slane %v2097_v49, 5  ;;  %v1638_v49 = vld [vmem:[%s2175_s14] sm:$0xff]  }
  0x30   : > { %1481 = vmatpush3.msra.mxu1 %v1259_v57  ;;  %1463 = vmatprep.subr.mxu0 %v1248_v62  ;;  %v1289_v57 = vld [vmem:[%s2219_s1 + $0x188] sm:$0xff] }
  0x31   : > { %1482 = vmatprep.subr.mxu1 %v1258_v63  ;;  %1464 = vmatpush3.msra.mxu0 %v1248_v62  ;;  %v919_v61 = vsel %vm1851_vm2, %v1298_v55, %v918_v56  ;;  %v835_v62 = vcombine.low %v1978_v5, %v2080_v44  ;;  %v1312_v5 = vld [vmem:[%s2219_s1 + $0x210] sm:$0xff] }
  0x32   : > { %1483 = vmatpush3.msra.mxu1 %v1258_v63  ;;  %1465 = vmatprep.subr.mxu0 %v1247_v0  ;;  %v1299_v63 = vld [vmem:[%s2219_s1 + $0x1c0] sm:$0xff]  ;;  %v929_v20 = vcombine.low %v2038_v28, %v919_v61 }
  0x33   : > { %1484 = vmatprep.subr.mxu1 %v1257_v1  ;;  %1466 = vmatpush3.msra.mxu0 %v1247_v0  ;;  %v1317_v0 = vld [vmem:[%s2219_s1 + $0x238] sm:$0xff] }
  0x34   : > { %1469 = vmatprep.mubr.msk.f32.mxu0 %vm267_vm3, %v456_v2  ;;  %1467 = vmatprep.subr.mxu0 %v1246_v6  ;;  %v1314_v2 = vld [vmem:[%s2219_s1 + $0x220] sm:$0xff] }
  0x35   : > { %1485 = vmatpush3.msra.mxu1 %v1257_v1  ;;  %1468 = vmatpush3.msra.mxu0 %v1246_v6  ;;  %v1316_v1 = vld [vmem:[%s2219_s1 + $0x230] sm:$0xff]  ;;  %v1311_v6 = vld [vmem:[%s2219_s1 + $0x208] sm:$0xff] }
  0x36   : > { %1486 = vmatprep.subr.mxu1 %v1256_v8  ;;  %1470 = vmatmul.mubr.msk.f32.vlgmr.msra.gmra.mxu0 %vm267_vm3, %v1985_v7 }
  0x37   : > { %1491 = vmatprep.subr.mxu0 %v1274_v9  ;;  %1487 = vmatpush3.msra.mxu1 %v1256_v8  ;;  %v1310_v8 = vld [vmem:[%s2219_s1 + $0x200] sm:$0xff] }
  0x38   : > { %1488 = vmatprep.mubr.msk.f32.mxu1 %vm267_vm3, %v549_v10  ;;  %1492 = vmatpush3.msra.mxu0 %v1274_v9 }
  0x39   : > { %1489 = vmatmul.mubr.msk.f32.vlgmr.msra.gmra.mxu1 %vm267_vm3, %v550_v13  ;;  %1493 = vmatprep.subr.mxu0 %v1273_v14 }
  0x3a   : > { %1510 = vmatprep.subr.mxu1 %v1285_v16  ;;  %1494 = vmatpush3.msra.mxu0 %v1273_v14 }
  0x3b   : > { %1511 = vmatpush3.msra.mxu1 %v1285_v16  ;;  %1495 = vmatprep.subr.mxu0 %v1272_v12 }
  0x3c   : > { %1512 = vmatprep.subr.mxu1 %v1284_v15  ;;  %1496 = vmatpush3.msra.mxu0 %v1272_v12 }
  0x3d   : > { %1513 = vmatpush3.msra.mxu1 %v1284_v15  ;;  %1497 = vmatprep.subr.mxu0 %v1271_v17 }
  0x3e   : > { %1514 = vmatprep.subr.mxu1 %v1283_v18  ;;  %1498 = vmatpush3.msra.mxu0 %v1271_v17 }
  0x3f   : > { %1515 = vmatpush3.msra.mxu1 %v1283_v18  ;;  %1499 = vmatprep.subr.mxu0 %v1270_v22 }
  0x40   : > { %1516 = vmatprep.subr.mxu1 %v1282_v23  ;;  %1500 = vmatpush3.msra.mxu0 %v1270_v22 }
  0x41   : > { %1517 = vmatpush3.msra.mxu1 %v1282_v23  ;;  %1501 = vmatprep.subr.mxu0 %v1269_v24 }
  0x42   : > { %1518 = vmatprep.subr.mxu1 %v1281_v25  ;;  %1502 = vmatpush3.msra.mxu0 %v1269_v24 }
  0x43   : > { %1519 = vmatpush3.msra.mxu1 %v1281_v25  ;;  %1503 = vmatprep.subr.mxu0 %v1268_v29 }
  0x44   : > { %1520 = vmatprep.subr.mxu1 %v1280_v30  ;;  %1504 = vmatpush3.msra.mxu0 %v1268_v29 }
  0x45   : > { %1521 = vmatpush3.msra.mxu1 %v1280_v30  ;;  %1505 = vmatprep.subr.mxu0 %v1267_v32 }
  0x46   : > { %1522 = vmatprep.subr.mxu1 %v1279_v33  ;;  %1506 = vmatpush3.msra.mxu0 %v1267_v32 }
  0x47   : > { %1507 = vmatprep.mubr.msk.f32.mxu0 %vm267_vm3, %v646_v31  ;;  %1523 = vmatpush3.msra.mxu1 %v1279_v33 }
  0x48   : > { %1508 = vmatmul.mubr.msk.f32.vlgmr.msra.gmra.mxu0 %vm267_vm3, %v647_v37  ;;  %1524 = vmatprep.subr.mxu1 %v1278_v34 }
  0x49   : > { %1529 = vmatprep.subr.mxu0 %v1295_v35  ;;  %1525 = vmatpush3.msra.mxu1 %v1278_v34 }
  0x4a   : > { %1526 = vmatprep.mubr.msk.f32.mxu1 %vm267_vm3, %v742_v36  ;;  %1530 = vmatpush3.msra.mxu0 %v1295_v35 }
  0x4b   : > { %1527 = vmatmul.mubr.msk.f32.vlgmr.msra.gmra.mxu1 %vm267_vm3, %v743_v41  ;;  %1531 = vmatprep.subr.mxu0 %v1294_v42 }
  0x4c   : > { %1548 = vmatprep.subr.mxu1 %v1306_v43  ;;  %1532 = vmatpush3.msra.mxu0 %v1294_v42  ;;  %v1320_v42 = vld [vmem:[%s2220_s2] ss:$0 sm:$0xff] }
  0x4d   : > { %1549 = vmatpush3.msra.mxu1 %v1306_v43  ;;  %1533 = vmatprep.subr.mxu0 %v1293_v45 }
  0x4e   : > { %1550 = vmatprep.subr.mxu1 %v1305_v46  ;;  %1534 = vmatpush3.msra.mxu0 %v1293_v45  ;;  %v1637_v45 = vld [vmem:[%s2175_s14 + $0x8] sm:$0xff]  }
  0x4f   : > { %1551 = vmatpush3.msra.mxu1 %v1305_v46  ;;  %1535 = vmatprep.subr.mxu0 %v1292_v47 }
  0x50   : > { %1552 = vmatprep.subr.mxu1 %v1304_v48  ;;  %1536 = vmatpush3.msra.mxu0 %v1292_v47 }
  0x51   : > { %1553 = vmatpush3.msra.mxu1 %v1304_v48  ;;  %1537 = vmatprep.subr.mxu0 %v1291_v50 }
  0x52   : > { %1554 = vmatprep.subr.mxu1 %v1303_v51  ;;  %1538 = vmatpush3.msra.mxu0 %v1291_v50 }
  0x53   : > { %1555 = vmatpush3.msra.mxu1 %v1303_v51  ;;  %1539 = vmatprep.subr.mxu0 %v1290_v52 }
  0x54   : > { %1556 = vmatprep.subr.mxu1 %v1302_v54  ;;  %1540 = vmatpush3.msra.mxu0 %v1290_v52 }
  0x55   : > { %1557 = vmatpush3.msra.mxu1 %v1302_v54  ;;  %1541 = vmatprep.subr.mxu0 %v1289_v57 }
  0x56   : > { %1558 = vmatprep.subr.mxu1 %v1301_v58  ;;  %1542 = vmatpush3.msra.mxu0 %v1289_v57 }
  0x57   : > { %1559 = vmatpush3.msra.mxu1 %v1301_v58  ;;  %1543 = vmatprep.subr.mxu0 %v1288_v59 }
  0x58   : > { %1560 = vmatprep.subr.mxu1 %v1300_v60  ;;  %1544 = vmatpush3.msra.mxu0 %v1288_v59 }
  0x59   : > { %1545 = vmatprep.mubr.msk.f32.mxu0 %vm267_vm3, %v1898_v40  ;;  %1561 = vmatpush3.msra.mxu1 %v1300_v60  ;;  %v1315_v40 = vld [vmem:[%s2219_s1 + $0x228] sm:$0xff] }
  0x5a   : > { %1546 = vmatmul.mubr.msk.f32.vlgmr.msra.gmra.mxu0 %vm267_vm3, %v835_v62  ;;  %1562 = vmatprep.subr.mxu1 %v1299_v63 }
  0x5b   : > { %1567 = vmatprep.subr.mxu0 %v1317_v0  ;;  %1563 = vmatpush3.msra.mxu1 %v1299_v63 }
  0x5c   : > { %1564 = vmatprep.mubr.msk.f32.mxu1 %vm267_vm3, %v1892_v38  ;;  %1568 = vmatpush3.msra.mxu0 %v1317_v0  ;;  %v1313_v38 = vld [vmem:[%s2219_s1 + $0x218] sm:$0xff] }
  0x5d   : > { %1565 = vmatmul.mubr.msk.f32.vlgmr.msra.gmra.mxu1 %vm267_vm3, %v929_v20  ;;  %1569 = vmatprep.subr.mxu0 %v1316_v1 }
  0x5e   : > { %1583 = vmatprep.mubr.msk.f32.mxu0 %vm267_vm3, %v1985_v7  ;;  %1570 = vmatpush3.msra.mxu0 %v1316_v1  ;;  %v1012_v7 = vsel %vm1936_vm6, %v1309_v3, %v1011_v4 }
  0x5f   : > { %1571 = vmatprep.subr.mxu0 %v1315_v40  ;;  %v1022_v9 = vcombine.low %v2058_v39, %v1012_v7 }
  0x60   : > { %1572 = vmatpush3.msra.mxu0 %v1315_v40 }
  0x61   : > { %1573 = vmatprep.subr.mxu0 %v1314_v2 }
  0x62   : > { %1574 = vmatpush3.msra.mxu0 %v1314_v2 }
  0x63   : > { %1575 = vmatprep.subr.mxu0 %v1313_v38 }
  0x64   : > { %1576 = vmatpush3.msra.mxu0 %v1313_v38 }
  0x65   : > { %1577 = vmatprep.subr.mxu0 %v1312_v5 }
  0x66   : > { %1578 = vmatpush3.msra.mxu0 %v1312_v5 }
  0x67   : > { %1579 = vmatprep.subr.mxu0 %v1311_v6 }
  0x68   : > { %1580 = vmatpush3.msra.mxu0 %v1311_v6 }
  0x69   : > { %1581 = vmatprep.subr.mxu0 %v1310_v8 }
  0x6a   : > { %1582 = vmatpush3.msra.mxu0 %v1310_v8 }
  0x6b   : > { %1584 = vmatmul.mubr.msk.f32.vlgmr.msra.gmra.mxu0 %vm267_vm3, %v1022_v9 }
  0xe5   : > { %v1433_v53 = vpop.f32.mrf.mxu0 }
  0xe6   : > { %v1452_v10 = vpop.f32.mrf.mxu1 }
  0xe7   : > { %v338_v13 = vpop.f32.mrf.mxu0  ;;  %v425_v11 = vadd.f32 %v1452_v10, %v1433_v53 }
  0xe8   : > { %v419_v16 = vpop.f32.mrf.mxu1 }
  0xe9   : > { %v420_v17 = vadd.f32 %v419_v16, %v338_v13 }
  0xf6   : > { %v1471_v14 = vpop.f32.mrf.mxu0 }
  0xf7   : > { %v538_v18 = vadd.f32 %v1471_v14, %v425_v11 }
  0xf8   : > { %v528_v12 = vpop.f32.mrf.mxu0 }
  0xf9   : > { %v1490_v15 = vpop.f32.mrf.mxu1  ;;  %v537_v21 = vadd.f32 %v528_v12, %v420_v17 }
  0xfa   : > { %v631_v23 = vadd.f32 %v1490_v15, %v538_v18 }
  0xfb   : > { %v621_v22 = vpop.f32.mrf.mxu1 }
  0xfc   : > { %v630_v26 = vadd.f32 %v621_v22, %v537_v21 }
 0x108   : > { %v1509_v19 = vpop.f32.mrf.mxu0 }
 0x109   : > { %v728_v27 = vadd.f32 %v1509_v19, %v631_v23 }
 0x10a   : > { %v718_v24 = vpop.f32.mrf.mxu0 }
 0x10b   : > { %v1528_v25 = vpop.f32.mrf.mxu1  ;;  %v727_v29 = vadd.f32 %v718_v24, %v630_v26 }
 0x10c   : > { %v824_v31 = vadd.f32 %v1528_v25, %v728_v27 }
 0x10d   : > { %v814_v30 = vpop.f32.mrf.mxu1 }
 0x10e   : > { %v823_v37 = vadd.f32 %v814_v30, %v727_v29 }
 0x11a   : > { %v1547_v28 = vpop.f32.mrf.mxu0 }
 0x11b   : > { %v914_v39 = vadd.f32 %v1547_v28, %v824_v31 }
 0x11c   : > { %v904_v32 = vpop.f32.mrf.mxu0 }
 0x11d   : > { %v1566_v33 = vpop.f32.mrf.mxu1  ;;  %v913_v34 = vadd.f32 %v904_v32, %v823_v37 }
 0x11e   : > { %v1008_v36 = vadd.f32 %v1566_v33, %v914_v39 }
 0x11f   : > { %v998_v35 = vpop.f32.mrf.mxu1 }
 0x120   : > { %v1007_v43 = vadd.f32 %v998_v35, %v913_v34 }
 0x12b   : > { %v1585_v41 = vpop.f32.mrf.mxu0 }
 0x12c   : > { %v1101_v44 = vadd.f32 %v1585_v41, %v1008_v36 }
 0x12d   : > { %v1091_v46 = vpop.f32.mrf.mxu0 }
 0x12e   : > { %v1110_v47 = vadd.f32 %v1320_v42, %v1101_v44  ;;  %v1100_v48 = vadd.f32 %v1091_v46, %v1007_v43 }
 0x130   : > { %v1124_v50 = vadd.f32 %v1637_v45, %v1110_v47  ;;  %v1109_v51 = vadd.f32 %v1320_v42, %v1100_v48 }
 0x132   : > { %v1126_v52 = vmax.f32 %v1124_v50, 0.0  ;;  %v1123_v54 = vadd.f32 %v1638_v49, %v1109_v51 }
 0x134   : > { %v1125_v55 = vmax.f32 %v1123_v54, 0.0  ;;  %v1128_v56 = vsel %vm267_vm3, %v1126_v52, 0.0 }
 0x136   : > { %v1127_v57 = vsel %vm267_vm3, %v1125_v55, 0.0 }
 0x137   : > { %v1129_v58 = vadd.f32 %v1128_v56, %v1127_v57 }
 0x139   : > { %v1130_v59 = vrot.slane %v1129_v58, 4 }
 0x13b   : > { %v1131_v60 = vadd.f32 %v1130_v59, %v1129_v58 }
 0x13d   : > { %v1132_v61 = vrot.slane %v1131_v60, 2 }
 0x13f   : > { %v1133_v62 = vadd.f32 %v1132_v61, %v1131_v60 }
 0x141   : > { %v1134_v63 = vrot.slane %v1133_v62, 1 }
 0x143   : > { %v1135_v0 = vadd.f32 %v1134_v63, %v1133_v62 }
 0x145   : > { %v1136_v20 = vmul.f32 0.0625, %v1135_v0 }
 0x147   : > { %1138 = vst.msk [vmem:[%s204_s27] sm:$0x1] %vm1137_vm7, %v1136_v20 }
 0x148   : > { %1652 = shalt.err (!%p1649_p3)
}
 0x149   : > { %s1653_s10 = scalar_lea.hbm %s1150_s5, 16  ;;  %s1657_s14 = scalar_lea.hbm %s2222_s4, 32 }
 0x14a   : > { %p1654_p4 = scmp.ne.s32.totalorder %s1150_s5, %s1653_s10  ;;  %p1658_p9 = scmp.lt.s32.totalorder %s1150_s5, %s2222_s4 }
 0x14b   : > { %p1659_p10 = scmp.lt.s32.totalorder %s1657_s14, %s1653_s10 }
 0x14c   : > { %p1655_p7 = pnand %p1654_p4, %p1765_p5 }
 0x14d   : > { %p1660_p11 = por %p1659_p10, %p1658_p9 }
 0x14e   : > { %p1656_p8 = pneg %p1655_p7 }
 0x150   : > { %p1661_p12 = pnand %p1660_p11, %p1656_p8 }
 0x152   : > { %1664 = shalt.err (!%p1661_p12)
}
 0x153   : > { %1587 = dma.vmem_to_hbm [thread:$0]  (%p1765_p5), %s1153_s28, 16, %s1150_s5, %s1140_s8  }
 0x154 PF: > { %p1593_p13 = scmp.ge.s32.totalorder %s1699_s18, 2  ;;  %s1164_s22 = sand.u32 1, %s1687_s15  }
 0x155   : > { %s1165_s23 = scalar_lea.sflag [#allocation3], %s1164_s22 }
 0x156   : > { %p1590_p0 = pnand %p1593_p13, %p1769_p6 }
 0x158   : > { %p1591_p1 = pneg %p1590_p0 }
 0x15a   : > { %1682 = dma.done.wait (%p1591_p1), %s1165_s23, 16  }
 0x15b   : > { %1684 = vsyncadd (%p1591_p1), %s1165_s23, 4294967280  ;;  %p14_p2 = scmp.ge.s32.totalorder %s1752_s21, 4   ;;  %s2229_s15 = smov %s1691_s16 }
 0x15c   : > { %s2230_s16 = smov %s1695_s17  ;;  %s2231_s17 = smov %s1763_s24 }
 0x15d   : > { %s2232_s18 = smov %s1752_s21  ;;  %16 = sbr.rel (!%p14_p2) target bundleno = 3 (0x3), region = 82 }
 0x162   :  { %1169 = vsyncpa [#allocation3], 1 }
 0x163   :  { %1171 = vsyncpa [#allocation3 + $0x1], 1 }

// kernel: _lambda_.11
= control target key start
LH: loop header
LB: loop body
LE: loop exit
PB: predicated region body
PF: predicated region fallthrough
CT: control target
= control target key end

     0   :  { %s1997_s15 = smov 0   ;;  %s2479_s0 = inlined_call_operand.vmem [shape: f32[2,10,10,32], index: 0, kind: input, shape index: {}]   ;;  %s2480_s1 = inlined_call_operand.vmem [shape: f32[9,32,32], index: 1, kind: input, shape index: {}]   ;;  %s2481_s2 = inlined_call_operand.vmem [shape: f32[1,32], index: 2, kind: input, shape index: {}]   ;;  %s2482_s3 = inlined_call_operand.vmem [shape: f32[2,8,8,32], index: 3, kind: input, shape index: {}]   ;;  %s2483_s4 = inlined_call_operand.vmem [shape: f32[2,8,8,32], index: 4, kind: output, shape index: {}]  }
   0x1 LB: > { %s1540_s16 = sadd.s32 4294967295, %s1970_s15   ;;  %p1544_p0 = scmp.ge.s32.totalorder %s1970_s15, 1  ;;  %s1970_s15 = sphi %s1997_s15, %s14_s15  }
   0x2   : > { %p172_p1 = scmp.lt.s32.totalorder %s1970_s15, 3 }
   0x4   : > { %p173_p2 = pnand %p1544_p0, %p172_p1 }
   0x5   : > { %p203_p3 = scmp.lt.s32.totalorder (!%p173_p2), %s1540_s16, 1 }
   0x6   : > { %176 = sbr.rel (%p173_p2) target bundleno = 299 (0x12b), region = 36 }
   0xb   : > { %v1553_v0 = vld [vmem:[%s2480_s1 + $0x38] sm:$0xff]  ;;  %v1552_v1 = vld [vmem:[%s2480_s1 + $0x30] sm:$0xff]  ;;  %v1551_v2 = vld [vmem:[%s2480_s1 + $0x28] sm:$0xff]  ;;  %s2485_s16 = smov (!%p203_p3, %s1540_s16), 1  ;;  %vm258_vm0 = vcmask 1046528   ;;  %vm288_vm1 = vcmask 261120  }
   0xc   : > { %1947 = vmatprep.subr.mxu1 %v1553_v0  ;;  %1767 = vmatprep.subr.mxu0 %v1553_v0  ;;  %v1550_v3 = vld [vmem:[%s2480_s1 + $0x20] sm:$0xff]  ;;  %s1955_s25 = smul.u32 160, %s2485_s16  ;;  %v241_v4 = vld [vmem:[%s2480_s1 + $0x18] sm:$0xff]  ;;  %v1572_v21 = vld [vmem:[%s2480_s1 + $0x50] sm:$0xff]  ;;  %vm531_vm2 = vcmask 1045504   ;;  %s1657_s22 = sshll.u32 %s2485_s16, 6 }
   0xd   : > { %1951 = vmatpush3.msra.mxu1 %v1553_v0  ;;  %1768 = vmatpush3.msra.mxu0 %v1553_v0  ;;  %v1573_v5 = vld [vmem:[%s2480_s1 + $0x58] sm:$0xff]  ;;  %v240_v26 = vld [vmem:[%s2480_s1 + $0x10] sm:$0xff]  ;;  %v239_v46 = vld [vmem:[%s2480_s1 + $0x8] sm:$0xff]  ;;  %s2428_s24 = scalar_lea.vmem %s2482_s3, %s1657_s22  ;;  %s2446_s30 = scalar_lea.vmem %s2483_s4, %s1657_s22 }
   0xe   : > { %1948 = vmatprep.subr.mxu1 %v1552_v1  ;;  %1769 = vmatprep.subr.mxu0 %v1552_v1  ;;  %s2023_s28 = scalar_lea.vmem %s2479_s0, %s1955_s25  ;;  %v1571_v50 = vld [vmem:[%s2480_s1 + $0x48] sm:$0xff]  ;;  %v238_v53 = vld [vmem:[%s2480_s1] sm:$0xff]  ;;  %v1585_v59 = vld [vmem:[%s2480_s1 + $0x78] sm:$0xff] }
   0xf   : > { %1952 = vmatpush3.msra.mxu1 %v1552_v1  ;;  %1770 = vmatpush3.msra.mxu0 %v1552_v1  ;;  %v2032_v6 = vld [vmem:[%s2023_s28] sm:$0xff]  ;;  %v2035_v7 = vld [vmem:[%s2023_s28 + $0x8] sm:$0x3]  ;;  %v2048_v14 = vld [vmem:[%s2023_s28 + $0x10] sm:$0xff] }
  0x10   : > { %1949 = vmatprep.subr.mxu1 %v1551_v2  ;;  %1771 = vmatprep.subr.mxu0 %v1551_v2  ;;  %v2038_v8 = vld [vmem:[%s2023_s28 + $0x40] sm:$0xff]  ;;  %v259_v9 = vrot.slane %v2032_v6, 1  ;;  %v260_v10 = vrot.slane %v2035_v7, 1  ;;  %v2043_v11 = vld [vmem:[%s2023_s28 + $0x48] sm:$0x3]  ;;  %v2054_v16 = vld [vmem:[%s2023_s28 + $0x50] sm:$0xff] }
  0x11   : > { %1953 = vmatpush3.msra.mxu1 %v1551_v2  ;;  %1772 = vmatpush3.msra.mxu0 %v1551_v2  ;;  %v271_v12 = vrot.slane %v2038_v8, 1  ;;  %v272_v13 = vrot.slane %v2043_v11, 1  ;;  %v2051_v15 = vld [vmem:[%s2023_s28 + $0x18] sm:$0x3]  ;;  %v262_v18 = vrot.slane %v2048_v14, 1  ;;  %v2066_v22 = vld [vmem:[%s2023_s28 + $0x20] sm:$0xff] }
  0x12   : > { %1950 = vmatprep.subr.mxu1 %v1550_v3  ;;  %1773 = vmatprep.subr.mxu0 %v1550_v3  ;;  %v261_v17 = vsel %vm258_vm0, %v259_v9, %v260_v10  ;;  %v263_v19 = vrot.slane %v2051_v15, 1  ;;  %v2060_v20 = vld [vmem:[%s2023_s28 + $0x58] sm:$0x3]  ;;  %v274_v24 = vrot.slane %v2054_v16, 1  ;;  %v2078_v27 = vld [vmem:[%s2023_s28 + $0x28] sm:$0x3] }
  0x13   : > { %1954 = vmatpush3.msra.mxu1 %v1550_v3  ;;  %1774 = vmatpush3.msra.mxu0 %v1550_v3  ;;  %v2070_v23 = vsel %vm258_vm0, %v271_v12, %v272_v13  ;;  %v275_v25 = vrot.slane %v2060_v20, 1  ;;  %v265_v28 = vrot.slane %v2066_v22, 1  ;;  %v2082_v29 = vld [vmem:[%s2023_s28 + $0x60] sm:$0xff]  ;;  %v266_v31 = vrot.slane %v2078_v27, 1  ;;  %v2091_v32 = vld [vmem:[%s2023_s28 + $0x68] sm:$0x3] }
  0x14   : > { %1787 = vmatprep.subr.mxu1 %v241_v4  ;;  %1807 = vmatprep.subr.mxu0 %v1573_v5  ;;  %v2087_v30 = vsel %vm258_vm0, %v262_v18, %v263_v19  ;;  %v277_v33 = vrot.slane %v2082_v29, 1  ;;  %v2095_v34 = vld [vmem:[%s2023_s28 + $0x30] sm:$0xff]  ;;  %v278_v37 = vrot.slane %v2091_v32, 1  ;;  %v2107_v38 = vld [vmem:[%s2023_s28 + $0x38] sm:$0x3]  ;;  %v533_v49 = vrot.slane %v2035_v7, 2 }
  0x15   : > { %1775 = vmatprep.mubr.msk.f32.mxu0 %vm288_vm1, %v261_v17  ;;  %1781 = vmatprep.mubr.msk.f32.mxu1 %vm288_vm1, %v2070_v23  ;;  %v2098_v35 = vld [vmem:[%s2023_s28 + $0x70] sm:$0xff]  ;;  %v2103_v36 = vsel %vm258_vm0, %v274_v24, %v275_v25  ;;  %v268_v39 = vrot.slane %v2095_v34, 1  ;;  %v2111_v40 = vld [vmem:[%s2023_s28 + $0x78] sm:$0x3]  ;;  %v2116_v41 = vsel %vm258_vm0, %v265_v28, %v266_v31  ;;  %v269_v42 = vrot.slane %v2107_v38, 1  ;;  %v1570_v55 = vld [vmem:[%s2480_s1 + $0x40] sm:$0xff] }
  0x16   : > { %1776 = vmatmul.mubr.msk.f32.vlgmr.msra.gmra.mxu0 %vm288_vm1, %v2087_v30  ;;  %1782 = vmatmul.mubr.msk.f32.vlgmr.msra.gmra.mxu1 %vm288_vm1, %v2103_v36  ;;  %v280_v43 = vrot.slane %v2098_v35, 1  ;;  %v281_v44 = vrot.slane %v2111_v40, 1  ;;  %v2122_v45 = vsel %vm258_vm0, %v277_v33, %v278_v37  ;;  %v532_v51 = vrot.slane %v2032_v6, 2  ;;  %v2155_v56 = vld [vmem:[%s2023_s28 + $0x90] sm:$0xff]  ;;  %v2158_v57 = vld [vmem:[%s2023_s28 + $0x98] sm:$0x3] }
  0x17   : > { %1808 = vmatpush3.msra.mxu0 %v1573_v5  ;;  %1788 = vmatpush3.msra.mxu1 %v241_v4  ;;  %v2130_v47 = vsel %vm258_vm0, %v268_v39, %v269_v42  ;;  %v536_v52 = vrot.slane %v2051_v15, 2  ;;  %v535_v54 = vrot.slane %v2048_v14, 2  ;;  %v538_v60 = vrot.slane %v2066_v22, 2  ;;  %v1597_v3 = vld [vmem:[%s2480_s1 + $0x98] sm:$0xff]  ;;  %v1596_v15 = vld [vmem:[%s2480_s1 + $0x90] sm:$0xff]  ;;  %v1583_v17 = vld [vmem:[%s2480_s1 + $0x68] sm:$0xff] }
  0x18   : > { %1809 = vmatprep.subr.mxu0 %v1572_v21  ;;  %1789 = vmatprep.subr.mxu1 %v240_v26  ;;  %v2133_v48 = vsel %vm258_vm0, %v280_v43, %v281_v44  ;;  %v534_v58 = vsel %vm531_vm2, %v532_v51, %v533_v49  ;;  %v539_v61 = vrot.slane %v2078_v27, 2  ;;  %v1180_v62 = vrot.slane %v2155_v56, 1  ;;  %v1595_v25 = vld [vmem:[%s2480_s1 + $0x88] sm:$0xff]  ;;  %v1582_v27 = vld [vmem:[%s2480_s1 + $0x60] sm:$0xff]  ;;  %v1621_v33 = vld [vmem:[%s2480_s1 + $0xd8] sm:$0xff] }
  0x19   : > { %1778 = vmatprep.mubr.msk.f32.mxu0 %vm288_vm1, %v2116_v41  ;;  %1790 = vmatpush3.msra.mxu1 %v240_v26  ;;  %v2168_v63 = vsel %vm531_vm2, %v535_v54, %v536_v52  ;;  %v541_v0 = vrot.slane %v2095_v34, 2  ;;  %v542_v1 = vrot.slane %v2107_v38, 2  ;;  %v1181_v2 = vrot.slane %v2158_v57, 1  ;;  %v1594_v31 = vld [vmem:[%s2480_s1 + $0x80] sm:$0xff]  ;;  %v1608_v37 = vld [vmem:[%s2480_s1 + $0xb0] sm:$0xff]  ;;  %v1607_v39 = vld [vmem:[%s2480_s1 + $0xa8] sm:$0xff] }
  0x1a   : > { %1784 = vmatprep.mubr.msk.f32.mxu1 %vm288_vm1, %v2122_v45  ;;  %1791 = vmatprep.subr.mxu1 %v239_v46  ;;  %v2187_v5 = vsel %vm531_vm2, %v538_v60, %v539_v61  ;;  %v544_v7 = vrot.slane %v2038_v8, 2  ;;  %v545_v9 = vrot.slane %v2043_v11, 2  ;;  %v547_v12 = vrot.slane %v2054_v16, 2  ;;  %v2280_v38 = vld [vmem:[%s2023_s28 + $0x88] sm:$0x3]  ;;  %v1606_v44 = vld [vmem:[%s2480_s1 + $0xa0] sm:$0xff] }
  0x1b   : > { %1810 = vmatpush3.msra.mxu0 %v1572_v21  ;;  %1785 = vmatmul.mubr.msk.f32.gmra.mxu1 %vm288_vm1, %v2133_v48  ;;  %v2180_v4 = vsel %vm258_vm0, %v1180_v62, %v1181_v2  ;;  %v2195_v10 = vsel %vm531_vm2, %v541_v0, %v542_v1  ;;  %v548_v13 = vrot.slane %v2060_v20, 2  ;;  %v550_v18 = vrot.slane %v2082_v29, 2  ;;  %v1619_v43 = vld [vmem:[%s2480_s1 + $0xc8] sm:$0xff]  ;;  %v1618_v49 = vld [vmem:[%s2480_s1 + $0xc0] sm:$0xff]  ;;  %v1645_v51 = vld [vmem:[%s2480_s1 + $0x118] sm:$0xff] }
  0x1c   : > { %1779 = vmatmul.mubr.msk.f32.gmra.mxu0 %vm288_vm1, %v2130_v47  ;;  %1792 = vmatpush3.msra.mxu1 %v239_v46  ;;  %v2211_v11 = vsel %vm531_vm2, %v544_v7, %v545_v9  ;;  %v551_v19 = vrot.slane %v2091_v32, 2  ;;  %v553_v21 = vrot.slane %v2098_v35, 2  ;;  %v554_v24 = vrot.slane %v2111_v40, 2  ;;  %v1609_v32 = vld [vmem:[%s2480_s1 + $0xb8] sm:$0xff]  ;;  %v1632_v52 = vld [vmem:[%s2480_s1 + $0xf0] sm:$0xff] }
  0x1d   : > { %1811 = vmatprep.subr.mxu0 %v1571_v50  ;;  %1793 = vmatprep.subr.mxu1 %v238_v53  ;;  %v2219_v20 = vsel %vm531_vm2, %v547_v12, %v548_v13  ;;  %v813_v42 = vrot.slane %v2280_v38, 1  ;;  %v936_v54 = vrot.slane %v2280_v38, 2 }
  0x1e   : > { %1812 = vmatpush3.msra.mxu0 %v1571_v50  ;;  %1794 = vmatpush3.msra.mxu1 %v238_v53  ;;  %v2235_v26 = vsel %vm531_vm2, %v550_v18, %v551_v19  ;;  %v2241_v28 = vsel %vm531_vm2, %v553_v21, %v554_v24  ;;  %v1633_v50 = vld [vmem:[%s2480_s1 + $0xf8] sm:$0xff] }
  0x1f   : > { %1813 = vmatprep.subr.mxu0 %v1570_v55  ;;  %1795 = vmatprep.mubr.msk.f32.mxu1 %vm288_vm1, %v2032_v6  ;;  %v1584_v6 = vld [vmem:[%s2480_s1 + $0x70] sm:$0xff] }
  0x20   : > { %1814 = vmatpush3.msra.mxu0 %v1570_v55  ;;  %1815 = vmatprep.mubr.msk.f32.mxu0 %vm288_vm1, %v534_v58 }
  0x21   : > { %1827 = vmatprep.subr.mxu1 %v1585_v59  ;;  %1796 = vmatmul.mubr.msk.f32.vlgmr.msra.gmra.mxu1 %vm288_vm1, %v2048_v14 }
  0x22   : > { %1816 = vmatmul.mubr.msk.f32.vlgmr.msra.gmra.mxu0 %vm288_vm1, %v2168_v63  ;;  %1828 = vmatpush3.msra.mxu1 %v1585_v59 }
  0x23   : > { %1847 = vmatprep.subr.mxu0 %v1597_v3  ;;  %1798 = vmatprep.mubr.msk.f32.mxu1 %vm288_vm1, %v2066_v22 }
  0x24   : > { %1848 = vmatpush3.msra.mxu0 %v1597_v3  ;;  %1818 = vmatprep.mubr.msk.f32.mxu0 %vm288_vm1, %v2187_v5 }
  0x25   : > { %1829 = vmatprep.subr.mxu1 %v1584_v6  ;;  %1799 = vmatmul.mubr.msk.f32.gmra.mxu1 %vm288_vm1, %v2095_v34 }
  0x26   : > { %1819 = vmatmul.mubr.msk.f32.gmra.mxu0 %vm288_vm1, %v2195_v10  ;;  %1830 = vmatpush3.msra.mxu1 %v1584_v6 }
  0x27   : > { %1849 = vmatprep.subr.mxu0 %v1596_v15  ;;  %1801 = vmatprep.mubr.msk.f32.mxu1 %vm288_vm1, %v2038_v8 }
  0x28   : > { %1850 = vmatpush3.msra.mxu0 %v1596_v15  ;;  %1821 = vmatprep.mubr.msk.f32.mxu0 %vm288_vm1, %v2211_v11 }
  0x29   : > { %1831 = vmatprep.subr.mxu1 %v1583_v17  ;;  %1802 = vmatmul.mubr.msk.f32.gmra.mxu1 %vm288_vm1, %v2054_v16 }
  0x2a   : > { %1822 = vmatmul.mubr.msk.f32.gmra.mxu0 %vm288_vm1, %v2219_v20  ;;  %1832 = vmatpush3.msra.mxu1 %v1583_v17 }
  0x2b   : > { %1851 = vmatprep.subr.mxu0 %v1595_v25  ;;  %1804 = vmatprep.mubr.msk.f32.mxu1 %vm288_vm1, %v2082_v29 }
  0x2c   : > { %1852 = vmatpush3.msra.mxu0 %v1595_v25  ;;  %1824 = vmatprep.mubr.msk.f32.mxu0 %vm288_vm1, %v2235_v26 }
  0x2d   : > { %1833 = vmatprep.subr.mxu1 %v1582_v27  ;;  %1805 = vmatmul.mubr.msk.f32.gmra.mxu1 %vm288_vm1, %v2098_v35 }
  0x2e   : > { %1825 = vmatmul.mubr.msk.f32.gmra.mxu0 %vm288_vm1, %v2241_v28  ;;  %1834 = vmatpush3.msra.mxu1 %v1582_v27 }
  0x2f   : > { %1853 = vmatprep.subr.mxu0 %v1594_v31  ;;  %1835 = vmatprep.mubr.msk.f32.mxu1 %vm288_vm1, %v2048_v14  ;;  %v1620_v14 = vld [vmem:[%s2480_s1 + $0xd0] sm:$0xff] }
  0x30   : > { %1854 = vmatpush3.msra.mxu0 %v1594_v31  ;;  %1855 = vmatprep.mubr.msk.f32.mxu0 %vm288_vm1, %v2087_v30  ;;  %v2277_v30 = vld [vmem:[%s2023_s28 + $0x80] sm:$0xff] }
  0x31   : > { %1867 = vmatprep.subr.mxu1 %v1609_v32  ;;  %1836 = vmatmul.mubr.msk.f32.vlgmr.msra.gmra.mxu1 %vm288_vm1, %v2066_v22  ;;  %v812_v40 = vrot.slane %v2277_v30, 1  ;;  %v935_v53 = vrot.slane %v2277_v30, 2 }
  0x32   : > { %1856 = vmatmul.mubr.msk.f32.vlgmr.msra.gmra.mxu0 %vm288_vm1, %v2116_v41  ;;  %1868 = vmatpush3.msra.mxu1 %v1609_v32 }
  0x33   : > { %1887 = vmatprep.subr.mxu0 %v1621_v33  ;;  %1838 = vmatprep.mubr.msk.f32.mxu1 %vm288_vm1, %v2095_v34  ;;  %v2308_v46 = vsel %vm258_vm0, %v812_v40, %v813_v42  ;;  %v937_v55 = vsel %vm531_vm2, %v935_v53, %v936_v54 }
  0x34   : > { %1888 = vmatpush3.msra.mxu0 %v1621_v33  ;;  %1858 = vmatprep.mubr.msk.f32.mxu0 %vm288_vm1, %v2130_v47 }
  0x35   : > { %1869 = vmatprep.subr.mxu1 %v1608_v37  ;;  %1839 = vmatmul.mubr.msk.f32.gmra.mxu1 %vm288_vm1, %v2038_v8 }
  0x36   : > { %1859 = vmatmul.mubr.msk.f32.gmra.mxu0 %vm288_vm1, %v2070_v23  ;;  %1870 = vmatpush3.msra.mxu1 %v1608_v37 }
  0x37   : > { %1889 = vmatprep.subr.mxu0 %v1620_v14  ;;  %1841 = vmatprep.mubr.msk.f32.mxu1 %vm288_vm1, %v2054_v16 }
  0x38   : > { %1890 = vmatpush3.msra.mxu0 %v1620_v14  ;;  %1861 = vmatprep.mubr.msk.f32.mxu0 %vm288_vm1, %v2103_v36 }
  0x39   : > { %1871 = vmatprep.subr.mxu1 %v1607_v39  ;;  %1842 = vmatmul.mubr.msk.f32.gmra.mxu1 %vm288_vm1, %v2082_v29 }
  0x3a   : > { %1862 = vmatmul.mubr.msk.f32.gmra.mxu0 %vm288_vm1, %v2122_v45  ;;  %1872 = vmatpush3.msra.mxu1 %v1607_v39 }
  0x3b   : > { %1891 = vmatprep.subr.mxu0 %v1619_v43  ;;  %1844 = vmatprep.mubr.msk.f32.mxu1 %vm288_vm1, %v2098_v35 }
  0x3c   : > { %1892 = vmatpush3.msra.mxu0 %v1619_v43  ;;  %1864 = vmatprep.mubr.msk.f32.mxu0 %vm288_vm1, %v2133_v48 }
  0x3d   : > { %1873 = vmatprep.subr.mxu1 %v1606_v44  ;;  %1845 = vmatmul.mubr.msk.f32.gmra.mxu1 %vm288_vm1, %v2277_v30 }
  0x3e   : > { %1865 = vmatmul.mubr.msk.f32.gmra.mxu0 %vm288_vm1, %v2308_v46  ;;  %1874 = vmatpush3.msra.mxu1 %v1606_v44 }
  0x3f   : > { %1893 = vmatprep.subr.mxu0 %v1618_v49  ;;  %1875 = vmatprep.mubr.msk.f32.mxu1 %vm288_vm1, %v2168_v63 }
  0x40   : > { %1894 = vmatpush3.msra.mxu0 %v1618_v49  ;;  %1895 = vmatprep.mubr.msk.f32.mxu0 %vm288_vm1, %v2066_v22  ;;  %v1644_v22 = vld [vmem:[%s2480_s1 + $0x110] sm:$0xff] }
  0x41   : > { %1907 = vmatprep.subr.mxu1 %v1633_v50  ;;  %1876 = vmatmul.mubr.msk.f32.vlgmr.msra.gmra.mxu1 %vm288_vm1, %v2187_v5 }
  0x42   : > { %1896 = vmatmul.mubr.msk.f32.vlgmr.msra.gmra.mxu0 %vm288_vm1, %v2095_v34  ;;  %1908 = vmatpush3.msra.mxu1 %v1633_v50  ;;  %v1631_v34 = vld [vmem:[%s2480_s1 + $0xe8] sm:$0xff] }
  0x43   : > { %1927 = vmatprep.subr.mxu0 %v1645_v51  ;;  %1878 = vmatprep.mubr.msk.f32.mxu1 %vm288_vm1, %v2195_v10 }
  0x44   : > { %1928 = vmatpush3.msra.mxu0 %v1645_v51  ;;  %1898 = vmatprep.mubr.msk.f32.mxu0 %vm288_vm1, %v2038_v8  ;;  %v1643_v8 = vld [vmem:[%s2480_s1 + $0x108] sm:$0xff] }
  0x45   : > { %1909 = vmatprep.subr.mxu1 %v1632_v52  ;;  %1879 = vmatmul.mubr.msk.f32.gmra.mxu1 %vm288_vm1, %v2211_v11 }
  0x46   : > { %1899 = vmatmul.mubr.msk.f32.gmra.mxu0 %vm288_vm1, %v2054_v16  ;;  %1910 = vmatpush3.msra.mxu1 %v1632_v52  ;;  %v1630_v16 = vld [vmem:[%s2480_s1 + $0xe0] sm:$0xff] }
  0x47   : > { %1929 = vmatprep.subr.mxu0 %v1644_v22  ;;  %1881 = vmatprep.mubr.msk.f32.mxu1 %vm288_vm1, %v2219_v20 }
  0x48   : > { %1930 = vmatpush3.msra.mxu0 %v1644_v22  ;;  %1901 = vmatprep.mubr.msk.f32.mxu0 %vm288_vm1, %v2082_v29  ;;  %v1642_v29 = vld [vmem:[%s2480_s1 + $0x100] sm:$0xff] }
  0x49   : > { %1911 = vmatprep.subr.mxu1 %v1631_v34  ;;  %1882 = vmatmul.mubr.msk.f32.gmra.mxu1 %vm288_vm1, %v2235_v26 }
  0x4a   : > { %1902 = vmatmul.mubr.msk.f32.gmra.mxu0 %vm288_vm1, %v2098_v35  ;;  %1912 = vmatpush3.msra.mxu1 %v1631_v34  ;;  %v1303_v35 = vrot.slane %v2155_v56, 2 }
  0x4b   : > { %1931 = vmatprep.subr.mxu0 %v1643_v8  ;;  %1884 = vmatprep.mubr.msk.f32.mxu1 %vm288_vm1, %v2241_v28 }
  0x4c   : > { %1932 = vmatpush3.msra.mxu0 %v1643_v8  ;;  %1904 = vmatprep.mubr.msk.f32.mxu0 %vm288_vm1, %v2277_v30 }
  0x4d   : > { %1913 = vmatprep.subr.mxu1 %v1630_v16  ;;  %1885 = vmatmul.mubr.msk.f32.gmra.mxu1 %vm288_vm1, %v937_v55 }
  0x4e   : > { %1905 = vmatmul.mubr.msk.f32.gmra.mxu0 %vm288_vm1, %v2155_v56  ;;  %1914 = vmatpush3.msra.mxu1 %v1630_v16 }
  0x4f   : > { %1933 = vmatprep.subr.mxu0 %v1642_v29  ;;  %1915 = vmatprep.mubr.msk.f32.mxu1 %vm288_vm1, %v2116_v41  ;;  %v1304_v41 = vrot.slane %v2158_v57, 2 }
  0x50   : > { %1934 = vmatpush3.msra.mxu0 %v1642_v29  ;;  %1935 = vmatprep.mubr.msk.f32.mxu0 %vm288_vm1, %v2187_v5 }
  0x51   : > { %1916 = vmatmul.mubr.msk.f32.vlgmr.msra.gmra.mxu1 %vm288_vm1, %v2130_v47 }
  0x52   : > { %1936 = vmatmul.mubr.msk.f32.vlgmr.msra.gmra.mxu0 %vm288_vm1, %v2195_v10  ;;  %1918 = vmatprep.mubr.msk.f32.mxu1 %vm288_vm1, %v2070_v23  ;;  %v1305_v23 = vsel %vm531_vm2, %v1303_v35, %v1304_v41 }
  0x53   : > { %1938 = vmatprep.mubr.msk.f32.mxu0 %vm288_vm1, %v2211_v11 }
  0x55   : > { %1919 = vmatmul.mubr.msk.f32.gmra.mxu1 %vm288_vm1, %v2103_v36 }
  0x56   : > { %1939 = vmatmul.mubr.msk.f32.gmra.mxu0 %vm288_vm1, %v2219_v20  ;;  %1921 = vmatprep.mubr.msk.f32.mxu1 %vm288_vm1, %v2122_v45 }
  0x57   : > { %1941 = vmatprep.mubr.msk.f32.mxu0 %vm288_vm1, %v2235_v26 }
  0x59   : > { %1922 = vmatmul.mubr.msk.f32.gmra.mxu1 %vm288_vm1, %v2133_v48 }
  0x5a   : > { %1942 = vmatmul.mubr.msk.f32.gmra.mxu0 %vm288_vm1, %v2241_v28  ;;  %1924 = vmatprep.mubr.msk.f32.mxu1 %vm288_vm1, %v2308_v46 }
  0x5b   : > { %1944 = vmatprep.mubr.msk.f32.mxu0 %vm288_vm1, %v937_v55 }
  0x5d   : > { %1925 = vmatmul.mubr.msk.f32.gmra.mxu1 %vm288_vm1, %v2180_v4 }
  0x5e   : > { %1945 = vmatmul.mubr.msk.f32.gmra.mxu0 %vm288_vm1, %v1305_v23 }
  0xd6   : > { %v1777_v36 = vpop.f32.mrf.mxu0  ;;  %v1783_v45 = vpop.f32.mrf.mxu1 }
  0xd8   : > { %v371_v47 = vpop.f32.mrf.mxu0  ;;  %v391_v56 = vpop.f32.mrf.mxu1 }
  0xdb   : > { %v1786_v57 = vpop.f32.mrf.mxu1 }
  0xdc   : > { %v1780_v48 = vpop.f32.mrf.mxu0 }
  0xdd   : > { %v2412_v59 = vpop.f32.mrf.mxu1 }
  0xde   : > { %v381_v58 = vpop.f32.mrf.mxu0 }
  0xe1   : > { %v1797_v60 = vpop.f32.mrf.mxu1 }
  0xe2   : > { %v1817_v61 = vpop.f32.mrf.mxu0  ;;  %v498_v14 = vadd.f32 %v1797_v60, %v1777_v36 }
  0xe3   : > { %v492_v62 = vpop.f32.mrf.mxu1 }
  0xe4   : > { %v643_v63 = vpop.f32.mrf.mxu0  ;;  %v493_v39 = vadd.f32 %v492_v62, %v371_v47  ;;  %v683_v43 = vadd.f32 %v1817_v61, %v498_v14 }
  0xe5   : > { %v1800_v0 = vpop.f32.mrf.mxu1 }
  0xe6   : > { %v1820_v1 = vpop.f32.mrf.mxu0  ;;  %v508_v44 = vadd.f32 %v1800_v0, %v1780_v48  ;;  %v682_v50 = vadd.f32 %v643_v63, %v493_v39 }
  0xe7   : > { %v502_v2 = vpop.f32.mrf.mxu1 }
  0xe8   : > { %v653_v3 = vpop.f32.mrf.mxu0  ;;  %v503_v51 = vadd.f32 %v502_v2, %v381_v58  ;;  %v685_v53 = vadd.f32 %v1820_v1, %v508_v44 }
  0xe9   : > { %v1803_v4 = vpop.f32.mrf.mxu1 }
  0xea   : > { %v1823_v5 = vpop.f32.mrf.mxu0  ;;  %v518_v8 = vadd.f32 %v1803_v4, %v1783_v45  ;;  %v684_v35 = vadd.f32 %v653_v3, %v503_v51 }
  0xeb   : > { %v512_v6 = vpop.f32.mrf.mxu1 }
  0xec   : > { %v663_v7 = vpop.f32.mrf.mxu0  ;;  %v513_v16 = vadd.f32 %v512_v6, %v391_v56  ;;  %v687_v58 = vadd.f32 %v1823_v5, %v518_v8 }
  0xed   : > { %v1806_v9 = vpop.f32.mrf.mxu1 }
  0xee   : > { %v1826_v10 = vpop.f32.mrf.mxu0  ;;  %v528_v36 = vadd.f32 %v1806_v9, %v1786_v57  ;;  %v686_v63 = vadd.f32 %v663_v7, %v513_v16 }
  0xef   : > { %v522_v12 = vpop.f32.mrf.mxu1 }
  0xf0   : > { %v2414_v13 = vpop.f32.mrf.mxu0  ;;  %v523_v0 = vadd.f32 %v522_v12, %v2412_v59  ;;  %v689_v4 = vadd.f32 %v1826_v10, %v528_v36 }
  0xf1   : > { %v1837_v15 = vpop.f32.mrf.mxu1 }
  0xf2   : > { %v1857_v11 = vpop.f32.mrf.mxu0  ;;  %v804_v52 = vadd.f32 %v1837_v15, %v683_v43 }
  0xf3   : > { %v764_v17 = vpop.f32.mrf.mxu1 }
  0xf4   : > { %v888_v18 = vpop.f32.mrf.mxu0  ;;  %v803_v54 = vadd.f32 %v764_v17, %v682_v50  ;;  %v928_v41 = vadd.f32 %v1857_v11, %v804_v52 }
  0xf5   : > { %v1840_v19 = vpop.f32.mrf.mxu1 }
  0xf6   : > { %v1860_v20 = vpop.f32.mrf.mxu0  ;;  %v806_v23 = vadd.f32 %v1840_v19, %v685_v53  ;;  %v927_v48 = vadd.f32 %v888_v18, %v803_v54  ;;  %v688_v18 = vadd.f32 %v2414_v13, %v523_v0  ;;  %v2433_v13 = vld [vmem:[%s2481_s2] ss:$0 sm:$0xff] }
  0xf7   : > { %v774_v21 = vpop.f32.mrf.mxu1 }
  0xf8   : > { %v898_v24 = vpop.f32.mrf.mxu0  ;;  %v805_v61 = vadd.f32 %v774_v21, %v684_v35  ;;  %v930_v45 = vadd.f32 %v1860_v20, %v806_v23 }
  0xf9   : > { %v1843_v25 = vpop.f32.mrf.mxu1 }
  0xfa   : > { %v1863_v26 = vpop.f32.mrf.mxu0  ;;  %v808_v3 = vadd.f32 %v1843_v25, %v687_v58  ;;  %v929_v9 = vadd.f32 %v898_v24, %v805_v61 }
  0xfb   : > { %v784_v27 = vpop.f32.mrf.mxu1 }
  0xfc   : > { %v908_v28 = vpop.f32.mrf.mxu0  ;;  %v807_v6 = vadd.f32 %v784_v27, %v686_v63  ;;  %v932_v10 = vadd.f32 %v1863_v26, %v808_v3 }
  0xfd   : > { %v1846_v31 = vpop.f32.mrf.mxu1 }
  0xfe   : > { %v2416_v32 = vpop.f32.mrf.mxu0  ;;  %v810_v5 = vadd.f32 %v1846_v31, %v689_v4  ;;  %v931_v20 = vadd.f32 %v908_v28, %v807_v6 }
  0xff   : > { %v794_v33 = vpop.f32.mrf.mxu1 }
 0x100   : > { %v2418_v37 = vpop.f32.mrf.mxu0  ;;  %v809_v24 = vadd.f32 %v794_v33, %v688_v18 }
 0x101   : > { %v1877_v30 = vpop.f32.mrf.mxu1 }
 0x102   : > { %v1897_v38 = vpop.f32.mrf.mxu0  ;;  %v1051_v62 = vadd.f32 %v1877_v30, %v928_v41  ;;  %v933_v50 = vadd.f32 %v2418_v37, %v809_v24  ;;  %v1444_v37 = vld [vmem:[%s2428_s24 + $0x18] sm:$0xff] }
 0x103   : > { %v1011_v40 = vpop.f32.mrf.mxu1 }
 0x104   : > { %v1132_v42 = vpop.f32.mrf.mxu0  ;;  %v1050_v56 = vadd.f32 %v1011_v40, %v927_v48  ;;  %v1172_v11 = vadd.f32 %v1897_v38, %v1051_v62  ;;  %v934_v38 = vadd.f32 %v2416_v32, %v810_v5  ;;  %v1445_v5 = vld [vmem:[%s2428_s24 + $0x20] sm:$0xff] }
 0x105   : > { %v1880_v46 = vpop.f32.mrf.mxu1 }
 0x106   : > { %v1900_v49 = vpop.f32.mrf.mxu0  ;;  %v1053_v17 = vadd.f32 %v1880_v46, %v930_v45  ;;  %v1171_v59 = vadd.f32 %v1132_v42, %v1050_v56  ;;  %v1442_v42 = vld [vmem:[%s2428_s24 + $0x8] sm:$0xff] }
 0x107   : > { %v1021_v22 = vpop.f32.mrf.mxu1 }
 0x108   : > { %v1142_v34 = vpop.f32.mrf.mxu0  ;;  %v1052_v12 = vadd.f32 %v1021_v22, %v929_v9  ;;  %v1174_v31 = vadd.f32 %v1900_v49, %v1053_v17  ;;  %v1441_v49 = vld [vmem:[%s2428_s24] sm:$0xff]  ;;  %v1446_v9 = vld [vmem:[%s2428_s24 + $0x28] sm:$0xff] }
 0x109   : > { %v1883_v55 = vpop.f32.mrf.mxu1 }
 0x10a   : > { %v1903_v29 = vpop.f32.mrf.mxu0  ;;  %v1055_v39 = vadd.f32 %v1883_v55, %v932_v10  ;;  %v1173_v28 = vadd.f32 %v1142_v34, %v1052_v12  ;;  %v1448_v10 = vld [vmem:[%s2428_s24 + $0x38] sm:$0xff] }
 0x10b   : > { %v1031_v47 = vpop.f32.mrf.mxu1 }
 0x10c   : > { %v1152_v60 = vpop.f32.mrf.mxu0  ;;  %v1054_v40 = vadd.f32 %v1031_v47, %v931_v20  ;;  %v1176_v16 = vadd.f32 %v1903_v29, %v1055_v39  ;;  %v1443_v29 = vld [vmem:[%s2428_s24 + $0x10] sm:$0xff] }
 0x10d   : > { %v1886_v1 = vpop.f32.mrf.mxu1 }
 0x10e   : > { %v1906_v2 = vpop.f32.mrf.mxu0  ;;  %v1057_v51 = vadd.f32 %v1886_v1, %v934_v38  ;;  %v1175_v34 = vadd.f32 %v1152_v60, %v1054_v40 }
 0x10f   : > { %v1041_v15 = vpop.f32.mrf.mxu1 }
 0x110   : > { %v1162_v57 = vpop.f32.mrf.mxu0  ;;  %v1056_v55 = vadd.f32 %v1041_v15, %v933_v50  ;;  %v1178_v61 = vadd.f32 %v1906_v2, %v1057_v51 }
 0x111   : > { %v1917_v7 = vpop.f32.mrf.mxu1 }
 0x112   : > { %v1937_v19 = vpop.f32.mrf.mxu0  ;;  %v1296_v21 = vadd.f32 %v1917_v7, %v1172_v11  ;;  %v1177_v56 = vadd.f32 %v1162_v57, %v1056_v55 }
 0x113   : > { %v1256_v25 = vpop.f32.mrf.mxu1 }
 0x114   : > { %v1379_v27 = vpop.f32.mrf.mxu0  ;;  %v1419_v14 = vadd.f32 %v1937_v19, %v1296_v21  ;;  %v1295_v30 = vadd.f32 %v1256_v25, %v1171_v59 }
 0x115   : > { %v1920_v43 = vpop.f32.mrf.mxu1 }
 0x116   : > { %v1940_v26 = vpop.f32.mrf.mxu0  ;;  %v1434_v33 = vadd.f32 %v2433_v13, %v1419_v14  ;;  %v1418_v44 = vadd.f32 %v1379_v27, %v1295_v30  ;;  %v1298_v46 = vadd.f32 %v1920_v43, %v1174_v31  ;;  %v1447_v14 = vld [vmem:[%s2428_s24 + $0x30] sm:$0xff] }
 0x117   : > { %v1266_v52 = vpop.f32.mrf.mxu1 }
 0x118   : > { %v1389_v22 = vpop.f32.mrf.mxu0  ;;  %v1450_v53 = vadd.f32 %v1442_v42, %v1434_v33  ;;  %v1433_v32 = vadd.f32 %v2433_v13, %v1418_v44  ;;  %v1421_v54 = vadd.f32 %v1940_v26, %v1298_v46  ;;  %v1297_v8 = vadd.f32 %v1266_v52, %v1173_v28 }
 0x119   : > { %v1923_v35 = vpop.f32.mrf.mxu1 }
 0x11a   : > { %v1943_v41 = vpop.f32.mrf.mxu0  ;;  %v1458_v23 = vmax.f32 %v1450_v53, 0.0  ;;  %v1449_v36 = vadd.f32 %v1441_v49, %v1433_v32  ;;  %v1436_v47 = vadd.f32 %v2433_v13, %v1421_v54  ;;  %v1420_v48 = vadd.f32 %v1389_v22, %v1297_v8 }
 0x11b   : > { %v1300_v60 = vadd.f32 %v1923_v35, %v1176_v16  ;;  %v1276_v62 = vpop.f32.mrf.mxu1 }
 0x11c   : > { %v1399_v58 = vpop.f32.mrf.mxu0  ;;  %1466 = vst.msk [vmem:[%s2446_s30 + $0x8] sm:$0xff] %vm288_vm1, %v1458_v23  ;;  %v1457_v63 = vmax.f32 %v1449_v36, 0.0  ;;  %v1452_v0 = vadd.f32 %v1444_v37, %v1436_v47  ;;  %v1435_v1 = vadd.f32 %v2433_v13, %v1420_v48  ;;  %v1299_v45 = vadd.f32 %v1276_v62, %v1175_v34 }
 0x11d   : > { %v1423_v4 = vadd.f32 %v1943_v41, %v1300_v60  ;;  %v1926_v3 = vpop.f32.mrf.mxu1 }
 0x11e   : > { %v1946_v6 = vpop.f32.mrf.mxu0  ;;  %1465 = vst.msk [vmem:[%s2446_s30] sm:$0xff] %vm288_vm1, %v1457_v63  ;;  %v1460_v2 = vmax.f32 %v1452_v0, 0.0  ;;  %v1451_v15 = vadd.f32 %v1443_v29, %v1435_v1  ;;  %v1422_v11 = vadd.f32 %v1399_v58, %v1299_v45  ;;  %v1302_v17 = vadd.f32 %v1926_v3, %v1178_v61 }
 0x11f   : > { %v1438_v18 = vadd.f32 %v2433_v13, %v1423_v4  ;;  %v1286_v7 = vpop.f32.mrf.mxu1 }
 0x120   : > { %1468 = vst.msk [vmem:[%s2446_s30 + $0x18] sm:$0xff] %vm288_vm1, %v1460_v2  ;;  %v1459_v57 = vmax.f32 %v1451_v15, 0.0  ;;  %v1437_v19 = vadd.f32 %v2433_v13, %v1422_v11  ;;  %v1425_v59 = vadd.f32 %v1946_v6, %v1302_v17  ;;  %v1301_v12 = vadd.f32 %v1286_v7, %v1177_v56  ;;  %v1409_v20 = vpop.f32.mrf.mxu0 }
 0x121   : > { %v1454_v21 = vadd.f32 %v1446_v9, %v1438_v18 }
 0x122   : > { %1467 = vst.msk [vmem:[%s2446_s30 + $0x10] sm:$0xff] %vm288_vm1, %v1459_v57  ;;  %v1453_v24 = vadd.f32 %v1445_v5, %v1437_v19  ;;  %v1440_v25 = vadd.f32 %v2433_v13, %v1425_v59  ;;  %v1424_v27 = vadd.f32 %v1409_v20, %v1301_v12 }
 0x123   : > { %v1462_v31 = vmax.f32 %v1454_v21, 0.0 }
 0x124   : > { %v1461_v30 = vmax.f32 %v1453_v24, 0.0  ;;  %v1456_v38 = vadd.f32 %v1448_v10, %v1440_v25  ;;  %v1439_v39 = vadd.f32 %v2433_v13, %v1424_v27 }
 0x125   : > { %1470 = vst.msk [vmem:[%s2446_s30 + $0x28] sm:$0xff] %vm288_vm1, %v1462_v31 }
 0x126   : > { %1469 = vst.msk [vmem:[%s2446_s30 + $0x20] sm:$0xff] %vm288_vm1, %v1461_v30  ;;  %v1464_v40 = vmax.f32 %v1456_v38, 0.0  ;;  %v1455_v42 = vadd.f32 %v1447_v14, %v1439_v39 }
 0x128   : > { %1472 = vst.msk [vmem:[%s2446_s30 + $0x38] sm:$0xff] %vm288_vm1, %v1464_v40  ;;  %v1463_v43 = vmax.f32 %v1455_v42, 0.0 }
 0x12a   : > { %1471 = vst.msk [vmem:[%s2446_s30 + $0x30] sm:$0xff] %vm288_vm1, %v1463_v43 }
 0x12b PF: > { %s14_s15 = sadd.s32 1, %s1970_s15  }
 0x12c   : > { %p11_p4 = scmp.ge.s32.totalorder %s14_s15, 4  }
 0x12e   :  { %13 = sbr.rel (!%p11_p4) target bundleno = 1 (0x1), region = 77 }

</bundles_post_ra>
